<compile_context>
chip_gen: v5e
topology: v5e:2x2
jax: 0.10.0
libtpu: 0.0.40
codegen_flags: <defaults>
</compile_context>

<pallas_src>
import functools

import jax
import jax.numpy as jnp
from jax.experimental import pallas as pl
from jax.experimental.pallas import tpu as pltpu


_BN_EPS = 1e-5
_PARALLEL1 = pltpu.CompilerParams(dimension_semantics=("parallel",))
# Conservative single-tile budget (well inside v7x's 32 MiB scoped-VMEM default).
_FUSED_VMEM_BUDGET = 6 * 1024 * 1024


def _pick_row_tile(m, target=512):
    """Largest row tile <= target that divides m (multiple of 8 when tiled).

    With target <= 512, any m > target yields g >= 2, so the "parallel" grid axis
    can be sharded across both v7x TensorCores at production sizes.
    """
    if m <= target:
        return m
    for t in range(target - target % 8, 0, -8):
        if m % t == 0:
            return t
    return m


# ----------------------------------------------------------------------------
# Fused Conv2d + BatchNorm(batch stats) + Swish [+ extra Swish | + residual]
# Single-invocation path: the whole (M, K) im2col slab, (K, C) weight and the
# (M, C) output live in VMEM at once, so each conv layer is exactly one
# pallas_call and the f32 activation never round-trips through HBM.
# ----------------------------------------------------------------------------
def _conv_bn_swish_kernel(x_ref, w_ref, b_ref, g_ref, be_ref, o_ref, *, extra_swish):
    y = jnp.dot(x_ref[...], w_ref[...], preferred_element_type=jnp.float32) + b_ref[...]
    inv_m = 1.0 / y.shape[0]
    mean = jnp.sum(y, axis=0, keepdims=True) * inv_m
    d = y - mean
    var = jnp.sum(d * d, axis=0, keepdims=True) * inv_m   # exact two-pass batch var
    y = d * (g_ref[...] * jax.lax.rsqrt(var + _BN_EPS)) + be_ref[...]
    y = y * jax.nn.sigmoid(y)
    if extra_swish:                                        # Encoder's module-level Swish
        y = y * jax.nn.sigmoid(y)
    o_ref[...] = y.astype(o_ref.dtype)


def _conv_bn_swish_res_kernel(x_ref, w_ref, b_ref, g_ref, be_ref, r_ref, o_ref):
    y = jnp.dot(x_ref[...], w_ref[...], preferred_element_type=jnp.float32) + b_ref[...]
    inv_m = 1.0 / y.shape[0]
    mean = jnp.sum(y, axis=0, keepdims=True) * inv_m
    d = y - mean
    var = jnp.sum(d * d, axis=0, keepdims=True) * inv_m
    y = d * (g_ref[...] * jax.lax.rsqrt(var + _BN_EPS)) + be_ref[...]
    # out = residual + swish(bn(conv(x)))   (matches ResBlock residual=True)
    o_ref[...] = (r_ref[...].astype(jnp.float32) + y * jax.nn.sigmoid(y)).astype(o_ref.dtype)


# ----------------------------------------------------------------------------
# Multi-tile fallback kernels (only used when a layer does not fit one VMEM tile)
# ----------------------------------------------------------------------------
def _mm_bias_stats_kernel(x_ref, w_ref, b_ref, y_ref, sum_ref, sq_ref):
    y = jnp.dot(x_ref[...], w_ref[...], preferred_element_type=jnp.float32) + b_ref[...]
    y_ref[...] = y.astype(y_ref.dtype)                     # bf16 store: half the HBM bytes
    sum_ref[0] = jnp.sum(y, axis=0, keepdims=True)
    sq_ref[0] = jnp.sum(y * y, axis=0, keepdims=True)


def matmul_bias_stats(x, w, b, target_tile=512):
    M, K = x.shape
    Nc = w.shape[1]
    tm = _pick_row_tile(M, target_tile)
    g = M // tm
    return pl.pallas_call(
        _mm_bias_stats_kernel,
        out_shape=(
            jax.ShapeDtypeStruct((M, Nc), jnp.bfloat16),
            jax.ShapeDtypeStruct((g, 1, Nc), jnp.float32),
            jax.ShapeDtypeStruct((g, 1, Nc), jnp.float32),
        ),
        grid=(g,),
        in_specs=[
            pl.BlockSpec((tm, K), lambda i: (i, 0)),
            pl.BlockSpec((K, Nc), lambda i: (0, 0)),
            pl.BlockSpec((1, Nc), lambda i: (0, 0)),
        ],
        out_specs=(
            pl.BlockSpec((tm, Nc), lambda i: (i, 0)),
            pl.BlockSpec((1, 1, Nc), lambda i: (i, 0, 0)),
            pl.BlockSpec((1, 1, Nc), lambda i: (i, 0, 0)),
        ),
        compiler_params=_PARALLEL1,
    )(x, w, b)


def _bn_act_kernel(y_ref, sc_ref, sh_ref, o_ref, *, extra_swish):
    # f32 epilogue math (v5e VPU/EUP have no bf16 path), bf16 storage.
    y = y_ref[...].astype(jnp.float32) * sc_ref[...] + sh_ref[...]
    y = y * jax.nn.sigmoid(y)
    if extra_swish:
        y = y * jax.nn.sigmoid(y)
    o_ref[...] = y.astype(o_ref.dtype)


def _bn_act_res_kernel(y_ref, sc_ref, sh_ref, r_ref, o_ref):
    y = y_ref[...].astype(jnp.float32) * sc_ref[...] + sh_ref[...]
    o_ref[...] = (r_ref[...].astype(jnp.float32) + y * jax.nn.sigmoid(y)).astype(o_ref.dtype)


def bn_act_apply(y2, scale2, shift2, residual2, extra_swish, target_tile=512):
    # y2 is the lane-dense (N*Ho, Wo*cout) slab so stores are not masked 1-lane vst.msk.
    R, L = y2.shape
    tr = _pick_row_tile(R, target_tile)
    g = R // tr
    row_spec = pl.BlockSpec((tr, L), lambda i: (i, 0))
    vec_spec = pl.BlockSpec((1, L), lambda i: (0, 0))
    if residual2 is None:
        kern = functools.partial(_bn_act_kernel, extra_swish=extra_swish)
        in_specs = [row_spec, vec_spec, vec_spec]
        args = (y2, scale2, shift2)
    else:
        kern = _bn_act_res_kernel
        in_specs = [row_spec, vec_spec, vec_spec, row_spec]
        args = (y2, scale2, shift2, residual2)
    return pl.pallas_call(
        kern,
        out_shape=jax.ShapeDtypeStruct((R, L), jnp.bfloat16),
        grid=(g,),
        in_specs=in_specs,
        out_specs=row_spec,
        compiler_params=_PARALLEL1,
    )(*args)


# ----------------------------------------------------------------------------
# Fused 1x1 quantize_conv + vector quantization
# ----------------------------------------------------------------------------
def _qconv_vq_kernel(x_ref, wq_ref, bq_ref, e_ref, e2_ref, q_ref, d_ref):
    #   z = x @ Wq + bq ; dist = ||z||^2 - 2 z@E + ||E||^2 ; nearest code (first
    #   index on ties, like torch's max on -dist); lookup via one-hot matmul;
    #   per-tile partial sum of (q - z)^2 for the commitment diff.
    z = jnp.dot(x_ref[...], wq_ref[...], preferred_element_type=jnp.float32) + bq_ref[...]
    e = e_ref[...]                                               # (D, NE) bf16
    z2 = jnp.sum(z * z, axis=1, keepdims=True)                   # (TM, 1) f32
    ze = jax.lax.dot_general(
        z.astype(jnp.bfloat16), e, (((1,), (0,)), ((), ())),
        preferred_element_type=jnp.float32)                      # (TM, NE) bf16 MXU
    dist = z2 - 2.0 * ze + e2_ref[...]                           # ||E||^2 hoisted out
    min_d = jnp.min(dist, axis=1, keepdims=True)
    ne = dist.shape[1]
    iota = jax.lax.broadcasted_iota(jnp.int32, dist.shape, 1)
    first_idx = jnp.min(jnp.where(dist == min_d, iota, ne), axis=1, keepdims=True)
    onehot = (iota == first_idx).astype(jnp.bfloat16)            # exact 0/1 in bf16
    q = jax.lax.dot_general(
        onehot, e, (((1,), (1,)), ((), ())),
        preferred_element_type=jnp.float32)                      # (TM, D) codebook lookup
    d2 = (q - z) * (q - z)
    d_ref[0] = jnp.sum(d2, axis=0, keepdims=True)                # (1, D) per-tile partial
    # straight-through estimator: forward value equals q
    q_ref[...] = q.astype(q_ref.dtype)


def quantize_conv_vq(x_nhwc, qp, target_tile=512):
    N, H, W, Cin = x_nhwc.shape
    D = qp["wq"].shape[1]
    NE = qp["embed"].shape[1]
    M = N * H * W
    x = x_nhwc.reshape(M, Cin)                                   # already bf16
    tm = _pick_row_tile(M, target_tile)
    g = M // tm
    q, dpart = pl.pallas_call(
        _qconv_vq_kernel,
        out_shape=(
            jax.ShapeDtypeStruct((M, D), jnp.bfloat16),
            jax.ShapeDtypeStruct((g, 1, D), jnp.float32),
        ),
        grid=(g,),
        in_specs=[
            pl.BlockSpec((tm, Cin), lambda i: (i, 0)),
            pl.BlockSpec((Cin, D), lambda i: (0, 0)),
            pl.BlockSpec((1, D), lambda i: (0, 0)),
            pl.BlockSpec((D, NE), lambda i: (0, 0)),
            pl.BlockSpec((1, NE), lambda i: (0, 0)),
        ],
        out_specs=(
            pl.BlockSpec((tm, D), lambda i: (i, 0)),
            pl.BlockSpec((1, 1, D), lambda i: (i, 0, 0)),
        ),
        compiler_params=_PARALLEL1,
    )(x, qp["wq"], qp["bq"], qp["embed"], qp["e2"])
    diff = jnp.sum(dpart) / (M * D)
    return q.reshape(N, H, W, D), diff


# ----------------------------------------------------------------------------
# Plain matmul + bias (used by the conv-transpose path), bf16 output
# ----------------------------------------------------------------------------
def _mm_bias_kernel(x_ref, w_ref, b_ref, o_ref):
    o_ref[...] = (
        jnp.dot(x_ref[...], w_ref[...], preferred_element_type=jnp.float32) + b_ref[...]
    ).astype(o_ref.dtype)


# ----------------------------------------------------------------------------
# JAX glue: im2col, conv / conv-transpose wrappers, pooling, blocks
# ----------------------------------------------------------------------------
def im2col(x_nhwc, kh, kw, stride, pad):
    # Activations are bf16 on entry, so the expanded cols matrix carries half the
    # HBM traffic of an f32 version.
    # TODO(synk): at production ECal sizes, replace this materialized im2col with a
    # kh*kw "arbitrary" reduction grid axis over shifted windows of the padded input.
    N, H, W, C = x_nhwc.shape
    xp = jnp.pad(x_nhwc, ((0, 0), (pad, pad), (pad, pad), (0, 0)))
    Ho = (H + 2 * pad - kh) // stride + 1
    Wo = (W + 2 * pad - kw) // stride + 1
    patches = []
    for i in range(kh):
        for j in range(kw):
            patches.append(
                xp[:, i: i + stride * (Ho - 1) + 1: stride,
                      j: j + stride * (Wo - 1) + 1: stride, :]
            )
    cols = jnp.concatenate(patches, axis=-1)                     # (N, Ho, Wo, kh*kw*C)
    return cols.reshape(N * Ho * Wo, kh * kw * C), (N, Ho, Wo)


def conv_bn_swish(x_nhwc, cp, bnp, stride, residual=None, extra_swish=False):
    """Conv2d + BatchNorm2d(batch stats) + Swish (+ residual | + extra Swish)."""
    assert not (extra_swish and residual is not None)
    kh, kw = cp["ksize"]
    pad = (kh - 1) // 2
    cols, (N, Ho, Wo) = im2col(x_nhwc, kh, kw, stride, pad)
    M, K = cols.shape
    cout = cp["w"].shape[1]
    res2 = None if residual is None else residual.reshape(M, cout)

    # Fused single-tile path (always taken at these problem sizes).  Note: this keeps
    # g == 1, trading the v7x second-TensorCore shard for removing one full HBM
    # activation round trip + one kernel launch per conv (the bigger win here).
    vmem_bytes = 2 * M * K + 2 * K * cout + 8 * M * cout
    if vmem_bytes <= _FUSED_VMEM_BUDGET:
        if res2 is None:
            kern = functools.partial(_conv_bn_swish_kernel, extra_swish=extra_swish)
            args = (cols, cp["w"], cp["b"], bnp["gamma"], bnp["beta"])
        else:
            kern = _conv_bn_swish_res_kernel
            args = (cols, cp["w"], cp["b"], bnp["gamma"], bnp["beta"], res2)
        out = pl.pallas_call(
            kern, out_shape=jax.ShapeDtypeStruct((M, cout), jnp.bfloat16)
        )(*args)
        return out.reshape(N, Ho, Wo, cout)

    # Multi-tile fallback for large images: bf16 y + per-tile stats, then a
    # lane-dense BN/Swish epilogue over (N*Ho, Wo*cout).
    y, s1, s2 = matmul_bias_stats(cols, cp["w"], cp["b"])
    mean = jnp.sum(s1, axis=(0, 1)) / M
    var = jnp.maximum(jnp.sum(s2, axis=(0, 1)) / M - mean * mean, 0.0)
    scale = bnp["gamma"].reshape(-1) * jax.lax.rsqrt(var + _BN_EPS)
    shift = bnp["beta"].reshape(-1) - mean * scale
    L = Wo * cout
    y2 = y.reshape(N * Ho, L)
    scale2 = jnp.tile(scale, Wo).reshape(1, L)
    shift2 = jnp.tile(shift, Wo).reshape(1, L)
    r2 = None if res2 is None else res2.reshape(N * Ho, L)
    out = bn_act_apply(y2, scale2, shift2, r2, extra_swish)
    return out.reshape(N, Ho, Wo, cout)


def conv_transpose2d(x_nhwc, ctp, target_tile=512):
    # ConvTranspose2d(kernel=4, stride=2, padding=1) via sub-pixel decomposition.
    # ctp["wmat"] is the precomputed packed (3*3*Cin, 4*Cout) weight (see prepare_params),
    # so a single matmul over a 3x3/pad-1 im2col produces all four output phases.
    N, H, W, _ = x_nhwc.shape
    cout = ctp["cout"]
    cols, _ = im2col(x_nhwc, 3, 3, 1, 1)                         # (N*H*W, 9*cin)
    M, K = cols.shape
    tm = _pick_row_tile(M, target_tile)
    g = M // tm
    out = pl.pallas_call(
        _mm_bias_kernel,
        out_shape=jax.ShapeDtypeStruct((M, 4 * cout), jnp.bfloat16),
        grid=(g,),
        in_specs=[
            pl.BlockSpec((tm, K), lambda i: (i, 0)),
            pl.BlockSpec((K, 4 * cout), lambda i: (0, 0)),
            pl.BlockSpec((1, 4 * cout), lambda i: (0, 0)),
        ],
        out_specs=pl.BlockSpec((tm, 4 * cout), lambda i: (i, 0)),
        compiler_params=_PARALLEL1,
    )(cols, ctp["wmat"], ctp["b4"])
    out = out.reshape(N, H, W, 2, 2, cout)
    # TODO(synk): fold this phase interleave into the consumer's im2col (or emit a
    # lane-interleaved slab from the kernel) to avoid an extra HBM transpose of the
    # largest decoder activation at production ECal sizes.
    out = jnp.transpose(out, (0, 1, 3, 2, 4, 5)).reshape(N, 2 * H, 2 * W, cout)
    return out


def maxpool2(x_nhwc):
    N, H, W, C = x_nhwc.shape
    return jnp.max(x_nhwc.reshape(N, H // 2, 2, W // 2, 2, C), axis=(2, 4))


def resblock(x, p, residual, stride, extra_swish=False):
    h = conv_bn_swish(x, p["conv1"], p["bn1"], stride)
    return conv_bn_swish(
        h, p["conv2"], p["bn2"], 1,
        residual=(x if residual else None),
        extra_swish=extra_swish,
    )


def encoder(x, p, stride):
    # Encoder(..., extra_residual_blocks=2, downsample='Once'):
    #   ResBlock(residual=False) -> Swish -> ResBlock -> MaxPool -> ResBlock
    # NOTE: the PyTorch Encoder never forwards its kernel_size arg to ResBlock, so
    # every conv is 3x3 (matching the reference module's actual behavior); the
    # module-level Swish after the first block is fused into its conv2 epilogue.
    x = resblock(x, p["rb0"], residual=False, stride=stride, extra_swish=True)
    x = resblock(x, p["rb1"], residual=True, stride=1)
    x = maxpool2(x)
    x = resblock(x, p["rb2"], residual=True, stride=1)
    return x


def decoder_once(x, p):
    # Decoder(..., extra_residual_blocks=2, upsample='Once')
    x = resblock(x, p["rb0"], True, 1)
    x = resblock(x, p["rb1"], True, 1)
    return conv_transpose2d(x, p["ct"])


def decoder_twice(x, p):
    # Decoder(..., extra_residual_blocks=2, upsample='Twice')
    x = resblock(x, p["rb0"], True, 1)
    x = conv_transpose2d(x, p["ct0"])
    x = resblock(x, p["rb1"], True, 1)
    return conv_transpose2d(x, p["ct1"])


def vqvae_forward(x_nchw, params):
    # bf16 activations end-to-end (cast once, before the first im2col).
    x = jnp.transpose(x_nchw, (0, 2, 3, 1)).astype(jnp.bfloat16)   # -> NHWC

    # encode
    enc_b = encoder(x, params["enc_b"], stride=2)
    enc_t = encoder(enc_b, params["enc_t"], stride=1)
    quant_t, diff_t = quantize_conv_vq(enc_t, params["quant_t"])
    dec_t = decoder_once(quant_t, params["dec_t"])
    cat_b = jnp.concatenate([dec_t, enc_b], axis=-1)
    quant_b, diff_b = quantize_conv_vq(cat_b, params["quant_b"])

    # decode
    up_t = conv_transpose2d(quant_t, params["upsample_t"])
    quant = jnp.concatenate([up_t, quant_b], axis=-1)
    dec = decoder_twice(quant, params["dec"])

    dec_nchw = jnp.transpose(dec.astype(jnp.float32), (0, 3, 1, 2))  # -> NCHW f32
    diff = (diff_t + diff_b).reshape(1)                              # matches unsqueeze(0)
    return dec_nchw, diff


# ----------------------------------------------------------------------------
# Parameter construction (f32, torch-like) and one-time kernel-ready preparation
# ----------------------------------------------------------------------------
def init_params(key, in_channel=3, channel=16, embed_dim=8, n_embed=32):
    keys = iter(jax.random.split(key, 64))

    def conv(kh, kw, cin, cout):
        w = jax.random.normal(next(keys), (kh, kw, cin, cout), jnp.float32)
        w = w * (1.0 / float(kh * kw * cin) ** 0.5)
        b = jax.random.normal(next(keys), (cout,), jnp.float32) * 0.01
        return {"w": w, "b": b}

    def bn(c):
        return {"gamma": jnp.ones((1, c), jnp.float32),
                "beta": jnp.zeros((1, c), jnp.float32)}

    def rb(cin, cout):
        return {"conv1": conv(3, 3, cin, cout), "bn1": bn(cout),
                "conv2": conv(3, 3, cout, cout), "bn2": bn(cout)}

    return {
        "enc_b": {"rb0": rb(in_channel, channel), "rb1": rb(channel, channel),
                  "rb2": rb(channel, channel)},
        "enc_t": {"rb0": rb(channel, channel), "rb1": rb(channel, channel),
                  "rb2": rb(channel, channel)},
        "quantize_conv_t": conv(1, 1, channel, embed_dim),
        "embed_t": jax.random.normal(next(keys), (embed_dim, n_embed), jnp.float32),
        # NOTE: conv-transpose weights are stored in the spatially-flipped
        # equivalent-conv HWIO layout (what torch_w.permute(2,3,0,1).flip(0,1) gives).
        "dec_t": {"rb0": rb(embed_dim, embed_dim), "rb1": rb(embed_dim, embed_dim),
                  "ct": conv(4, 4, embed_dim, embed_dim)},
        "quantize_conv_b": conv(1, 1, embed_dim + channel, embed_dim),
        "embed_b": jax.random.normal(next(keys), (embed_dim, n_embed), jnp.float32),
        "upsample_t": conv(4, 4, embed_dim, embed_dim),
        "dec": {"rb0": rb(2 * embed_dim, 2 * embed_dim),
                "ct0": conv(4, 4, 2 * embed_dim, 2 * embed_dim),
                "rb1": rb(2 * embed_dim, 2 * embed_dim),
                "ct1": conv(4, 4, 2 * embed_dim, in_channel)},
    }


def _prep_conv(p):
    kh, kw, cin, cout = p["w"].shape
    return {"w": p["w"].reshape(kh * kw * cin, cout).astype(jnp.bfloat16),
            "b": p["b"].reshape(1, cout).astype(jnp.float32),
            "ksize": (kh, kw)}


def _prep_bn(p):
    return {"gamma": p["gamma"].reshape(1, -1).astype(jnp.float32),
            "beta": p["beta"].reshape(1, -1).astype(jnp.float32)}


def _prep_rb(p):
    return {"conv1": _prep_conv(p["conv1"]), "bn1": _prep_bn(p["bn1"]),
            "conv2": _prep_conv(p["conv2"]), "bn2": _prep_bn(p["bn2"])}


def _prep_ct(p):
    # Pack the four 2x2 sub-pixel phase kernels of ConvTranspose2d(4, s=2, p=1)
    # into one (3*3*cin, 4*cout) matrix (zero-padded), done ONCE outside jit.
    wf = p["w"].astype(jnp.float32)
    _, _, cin, cout = wf.shape
    wp = jnp.zeros((3, 3, cin, 2, 2, cout), jnp.float32)
    for r in (0, 1):
        for c in (0, 1):
            for dy in (r, r + 1):
                for dx in (c, c + 1):
                    wp = wp.at[dy, dx, :, r, c, :].set(wf[2 * dy - r, 2 * dx - c])
    return {"wmat": wp.reshape(9 * cin, 4 * cout).astype(jnp.bfloat16),
            "b4": jnp.tile(p["b"], 4).reshape(1, 4 * cout).astype(jnp.float32),
            "cout": int(cout)}


def _prep_quant(conv_p, embed):
    _, _, cin, d = conv_p["w"].shape
    embed_f32 = embed.astype(jnp.float32)
    return {"wq": conv_p["w"].reshape(cin, d).astype(jnp.bfloat16),
            "bq": conv_p["b"].reshape(1, d).astype(jnp.float32),
            "embed": embed.astype(jnp.bfloat16),
            "e2": jnp.sum(embed_f32 * embed_f32, axis=0, keepdims=True)}


def prepare_params(p):
    return {
        "enc_b": {k: _prep_rb(p["enc_b"][k]) for k in ("rb0", "rb1", "rb2")},
        "enc_t": {k: _prep_rb(p["enc_t"][k]) for k in ("rb0", "rb1", "rb2")},
        "quant_t": _prep_quant(p["quantize_conv_t"], p["embed_t"]),
        "dec_t": {"rb0": _prep_rb(p["dec_t"]["rb0"]),
                  "rb1": _prep_rb(p["dec_t"]["rb1"]),
                  "ct": _prep_ct(p["dec_t"]["ct"])},
        "quant_b": _prep_quant(p["quantize_conv_b"], p["embed_b"]),
        "upsample_t": _prep_ct(p["upsample_t"]),
        "dec": {"rb0": _prep_rb(p["dec"]["rb0"]), "ct0": _prep_ct(p["dec"]["ct0"]),
                "rb1": _prep_rb(p["dec"]["rb1"]), "ct1": _prep_ct(p["dec"]["ct1"])},
    }


# ----------------------------------------------------------------------------
if __name__ == "__main__":
    key = jax.random.PRNGKey(0)
    pkey, xkey = jax.random.split(key)

    # Small VQVAE: in_channel=3, channel=16, embed_dim=8, n_embed=32
    raw_params = init_params(pkey, in_channel=3, channel=16, embed_dim=8, n_embed=32)
    params = prepare_params(raw_params)          # one-time, outside the jitted forward
    x = jax.random.normal(xkey, (2, 3, 16, 16), jnp.float32)   # NCHW, like PyTorch

    fwd = jax.jit(functools.partial(vqvae_forward, params=params))
    dec, diff = fwd(x)
    jax.block_until_ready((dec, diff))

    assert dec.shape == (2, 3, 16, 16), dec.shape
    assert diff.shape == (1,), diff.shape
    assert bool(jnp.all(jnp.isfinite(dec))) and bool(jnp.all(jnp.isfinite(diff)))
    print("KERNEL_OK")
</pallas_src>

<mosaic_0001>
module attributes {stable_mosaic.version = 11 : i64} {
  func.func @_conv_bn_swish_kernel(%arg0: memref<128x27xbf16, #tpu.memory_space<vmem>>, %arg1: memref<27x16xbf16, #tpu.memory_space<vmem>>, %arg2: memref<1x16xf32, #tpu.memory_space<vmem>>, %arg3: memref<1x16xf32, #tpu.memory_space<vmem>>, %arg4: memref<1x16xf32, #tpu.memory_space<vmem>>, %arg5: memref<128x16xbf16, #tpu.memory_space<vmem>>) attributes {dimension_semantics = [], scalar_prefetch = 0 : i64, scratch_operands = 0 : i64, tpu.core_type = #tpu.core_type<tc>} {
    %c0 = arith.constant 0 : index
    %c0_0 = arith.constant 0 : index
    %0 = vector.load %arg0[%c0, %c0_0] : memref<128x27xbf16, #tpu.memory_space<vmem>>, vector<128x27xbf16>
    %c0_1 = arith.constant 0 : index
    %c0_2 = arith.constant 0 : index
    %1 = vector.load %arg1[%c0_1, %c0_2] : memref<27x16xbf16, #tpu.memory_space<vmem>>, vector<27x16xbf16>
    %cst = arith.constant dense<0.000000e+00> : vector<128x16xf32>
    %2 = tpu.matmul %0, %1, %cst {dimension_numbers = #tpu.dot_dimension_numbers<[1], [0], [0], [1], [0, 0, 1, 1], [], []>} : vector<128x27xbf16>, vector<27x16xbf16>, vector<128x16xf32> -> vector<128x16xf32>
    %c0_3 = arith.constant 0 : index
    %c0_4 = arith.constant 0 : index
    %3 = vector.load %arg2[%c0_3, %c0_4] : memref<1x16xf32, #tpu.memory_space<vmem>>, vector<1x16xf32>
    %4 = vector.broadcast %3 : vector<1x16xf32> to vector<128x16xf32>
    %5 = arith.addf %2, %4 : vector<128x16xf32>
    %cst_5 = arith.constant dense<0.000000e+00> : vector<16xf32>
    %6 = vector.multi_reduction <add>, %5, %cst_5 [0] : vector<128x16xf32> to vector<16xf32>
    %7 = vector.shape_cast %6 : vector<16xf32> to vector<1x16xf32>
    %cst_6 = arith.constant 7.812500e-03 : f32
    %8 = vector.broadcast %cst_6 : f32 to vector<1x16xf32>
    %9 = arith.mulf %7, %8 : vector<1x16xf32>
    %10 = vector.broadcast %9 : vector<1x16xf32> to vector<128x16xf32>
    %11 = arith.subf %5, %10 : vector<128x16xf32>
    %12 = arith.mulf %11, %11 : vector<128x16xf32>
    %cst_7 = arith.constant dense<0.000000e+00> : vector<16xf32>
    %13 = vector.multi_reduction <add>, %12, %cst_7 [0] : vector<128x16xf32> to vector<16xf32>
    %14 = vector.shape_cast %13 : vector<16xf32> to vector<1x16xf32>
    %cst_8 = arith.constant 7.812500e-03 : f32
    %15 = vector.broadcast %cst_8 : f32 to vector<1x16xf32>
    %16 = arith.mulf %14, %15 : vector<1x16xf32>
    %c0_9 = arith.constant 0 : index
    %c0_10 = arith.constant 0 : index
    %17 = vector.load %arg3[%c0_9, %c0_10] : memref<1x16xf32, #tpu.memory_space<vmem>>, vector<1x16xf32>
    %cst_11 = arith.constant 9.99999974E-6 : f32
    %18 = vector.broadcast %cst_11 : f32 to vector<1x16xf32>
    %19 = arith.addf %16, %18 : vector<1x16xf32>
    %20 = math.rsqrt %19 : vector<1x16xf32>
    %21 = arith.mulf %17, %20 : vector<1x16xf32>
    %22 = vector.broadcast %21 : vector<1x16xf32> to vector<128x16xf32>
    %23 = arith.mulf %11, %22 : vector<128x16xf32>
    %c0_12 = arith.constant 0 : index
    %c0_13 = arith.constant 0 : index
    %24 = vector.load %arg4[%c0_12, %c0_13] : memref<1x16xf32, #tpu.memory_space<vmem>>, vector<1x16xf32>
    %25 = vector.broadcast %24 : vector<1x16xf32> to vector<128x16xf32>
    %26 = arith.addf %23, %25 : vector<128x16xf32>
    %27 = arith.negf %26 : vector<128x16xf32>
    %28 = math.exp %27 : vector<128x16xf32>
    %cst_14 = arith.constant 1.000000e+00 : f32
    %29 = vector.broadcast %cst_14 : f32 to vector<128x16xf32>
    %30 = arith.addf %29, %28 : vector<128x16xf32>
    %31 = arith.divf %29, %30 : vector<128x16xf32>
    %32 = arith.mulf %26, %31 : vector<128x16xf32>
    %33 = arith.truncf %32 : vector<128x16xf32> to vector<128x16xbf16>
    %c0_15 = arith.constant 0 : index
    %c0_16 = arith.constant 0 : index
    %34 = vector.load %arg5[%c0_15, %c0_16] : memref<128x16xbf16, #tpu.memory_space<vmem>>, vector<128x16xbf16>
    tpu.vector_store %arg5[%c0_15, %c0_16], %33 {strides = array<i32>} : memref<128x16xbf16, #tpu.memory_space<vmem>>, vector<128x16xbf16>,
    return
  }
}

module attributes {stable_mosaic.version = 11 : i64} {
  func.func @_conv_bn_swish_kernel(%arg0: memref<128x144xbf16, #tpu.memory_space<vmem>>, %arg1: memref<144x16xbf16, #tpu.memory_space<vmem>>, %arg2: memref<1x16xf32, #tpu.memory_space<vmem>>, %arg3: memref<1x16xf32, #tpu.memory_space<vmem>>, %arg4: memref<1x16xf32, #tpu.memory_space<vmem>>, %arg5: memref<128x16xbf16, #tpu.memory_space<vmem>>) attributes {dimension_semantics = [], scalar_prefetch = 0 : i64, scratch_operands = 0 : i64, tpu.core_type = #tpu.core_type<tc>} {
    %c0 = arith.constant 0 : index
    %c0_0 = arith.constant 0 : index
    %0 = vector.load %arg0[%c0, %c0_0] : memref<128x144xbf16, #tpu.memory_space<vmem>>, vector<128x144xbf16>
    %c0_1 = arith.constant 0 : index
    %c0_2 = arith.constant 0 : index
    %1 = vector.load %arg1[%c0_1, %c0_2] : memref<144x16xbf16, #tpu.memory_space<vmem>>, vector<144x16xbf16>
    %cst = arith.constant dense<0.000000e+00> : vector<128x16xf32>
    %2 = tpu.matmul %0, %1, %cst {dimension_numbers = #tpu.dot_dimension_numbers<[1], [0], [0], [1], [0, 0, 1, 1], [], []>} : vector<128x144xbf16>, vector<144x16xbf16>, vector<128x16xf32> -> vector<128x16xf32>
    %c0_3 = arith.constant 0 : index
    %c0_4 = arith.constant 0 : index
    %3 = vector.load %arg2[%c0_3, %c0_4] : memref<1x16xf32, #tpu.memory_space<vmem>>, vector<1x16xf32>
    %4 = vector.broadcast %3 : vector<1x16xf32> to vector<128x16xf32>
    %5 = arith.addf %2, %4 : vector<128x16xf32>
    %cst_5 = arith.constant dense<0.000000e+00> : vector<16xf32>
    %6 = vector.multi_reduction <add>, %5, %cst_5 [0] : vector<128x16xf32> to vector<16xf32>
    %7 = vector.shape_cast %6 : vector<16xf32> to vector<1x16xf32>
    %cst_6 = arith.constant 7.812500e-03 : f32
    %8 = vector.broadcast %cst_6 : f32 to vector<1x16xf32>
    %9 = arith.mulf %7, %8 : vector<1x16xf32>
    %10 = vector.broadcast %9 : vector<1x16xf32> to vector<128x16xf32>
    %11 = arith.subf %5, %10 : vector<128x16xf32>
    %12 = arith.mulf %11, %11 : vector<128x16xf32>
    %cst_7 = arith.constant dense<0.000000e+00> : vector<16xf32>
    %13 = vector.multi_reduction <add>, %12, %cst_7 [0] : vector<128x16xf32> to vector<16xf32>
    %14 = vector.shape_cast %13 : vector<16xf32> to vector<1x16xf32>
    %cst_8 = arith.constant 7.812500e-03 : f32
    %15 = vector.broadcast %cst_8 : f32 to vector<1x16xf32>
    %16 = arith.mulf %14, %15 : vector<1x16xf32>
    %c0_9 = arith.constant 0 : index
    %c0_10 = arith.constant 0 : index
    %17 = vector.load %arg3[%c0_9, %c0_10] : memref<1x16xf32, #tpu.memory_space<vmem>>, vector<1x16xf32>
    %cst_11 = arith.constant 9.99999974E-6 : f32
    %18 = vector.broadcast %cst_11 : f32 to vector<1x16xf32>
    %19 = arith.addf %16, %18 : vector<1x16xf32>
    %20 = math.rsqrt %19 : vector<1x16xf32>
    %21 = arith.mulf %17, %20 : vector<1x16xf32>
    %22 = vector.broadcast %21 : vector<1x16xf32> to vector<128x16xf32>
    %23 = arith.mulf %11, %22 : vector<128x16xf32>
    %c0_12 = arith.constant 0 : index
    %c0_13 = arith.constant 0 : index
    %24 = vector.load %arg4[%c0_12, %c0_13] : memref<1x16xf32, #tpu.memory_space<vmem>>, vector<1x16xf32>
    %25 = vector.broadcast %24 : vector<1x16xf32> to vector<128x16xf32>
    %26 = arith.addf %23, %25 : vector<128x16xf32>
    %27 = arith.negf %26 : vector<128x16xf32>
    %28 = math.exp %27 : vector<128x16xf32>
    %cst_14 = arith.constant 1.000000e+00 : f32
    %29 = vector.broadcast %cst_14 : f32 to vector<128x16xf32>
    %30 = arith.addf %29, %28 : vector<128x16xf32>
    %31 = arith.divf %29, %30 : vector<128x16xf32>
    %32 = arith.mulf %26, %31 : vector<128x16xf32>
    %33 = arith.negf %32 : vector<128x16xf32>
    %34 = math.exp %33 : vector<128x16xf32>
    %cst_15 = arith.constant 1.000000e+00 : f32
    %35 = vector.broadcast %cst_15 : f32 to vector<128x16xf32>
    %36 = arith.addf %35, %34 : vector<128x16xf32>
    %37 = arith.divf %35, %36 : vector<128x16xf32>
    %38 = arith.mulf %32, %37 : vector<128x16xf32>
    %39 = arith.truncf %38 : vector<128x16xf32> to vector<128x16xbf16>
    %c0_16 = arith.constant 0 : index
    %c0_17 = arith.constant 0 : index
    %40 = vector.load %arg5[%c0_16, %c0_17] : memref<128x16xbf16, #tpu.memory_space<vmem>>, vector<128x16xbf16>
    tpu.vector_store %arg5[%c0_16, %c0_17], %39 {strides = array<i32>} : memref<128x16xbf16, #tpu.memory_space<vmem>>, vector<128x16xbf16>,
    return
  }
}

module attributes {stable_mosaic.version = 11 : i64} {
  func.func @_conv_bn_swish_res_kernel(%arg0: memref<128x144xbf16, #tpu.memory_space<vmem>>, %arg1: memref<144x16xbf16, #tpu.memory_space<vmem>>, %arg2: memref<1x16xf32, #tpu.memory_space<vmem>>, %arg3: memref<1x16xf32, #tpu.memory_space<vmem>>, %arg4: memref<1x16xf32, #tpu.memory_space<vmem>>, %arg5: memref<128x16xbf16, #tpu.memory_space<vmem>>, %arg6: memref<128x16xbf16, #tpu.memory_space<vmem>>) attributes {dimension_semantics = [], scalar_prefetch = 0 : i64, scratch_operands = 0 : i64, tpu.core_type = #tpu.core_type<tc>} {
    %c0 = arith.constant 0 : index
    %c0_0 = arith.constant 0 : index
    %0 = vector.load %arg0[%c0, %c0_0] : memref<128x144xbf16, #tpu.memory_space<vmem>>, vector<128x144xbf16>
    %c0_1 = arith.constant 0 : index
    %c0_2 = arith.constant 0 : index
    %1 = vector.load %arg1[%c0_1, %c0_2] : memref<144x16xbf16, #tpu.memory_space<vmem>>, vector<144x16xbf16>
    %cst = arith.constant dense<0.000000e+00> : vector<128x16xf32>
    %2 = tpu.matmul %0, %1, %cst {dimension_numbers = #tpu.dot_dimension_numbers<[1], [0], [0], [1], [0, 0, 1, 1], [], []>} : vector<128x144xbf16>, vector<144x16xbf16>, vector<128x16xf32> -> vector<128x16xf32>
    %c0_3 = arith.constant 0 : index
    %c0_4 = arith.constant 0 : index
    %3 = vector.load %arg2[%c0_3, %c0_4] : memref<1x16xf32, #tpu.memory_space<vmem>>, vector<1x16xf32>
    %4 = vector.broadcast %3 : vector<1x16xf32> to vector<128x16xf32>
    %5 = arith.addf %2, %4 : vector<128x16xf32>
    %cst_5 = arith.constant dense<0.000000e+00> : vector<16xf32>
    %6 = vector.multi_reduction <add>, %5, %cst_5 [0] : vector<128x16xf32> to vector<16xf32>
    %7 = vector.shape_cast %6 : vector<16xf32> to vector<1x16xf32>
    %cst_6 = arith.constant 7.812500e-03 : f32
    %8 = vector.broadcast %cst_6 : f32 to vector<1x16xf32>
    %9 = arith.mulf %7, %8 : vector<1x16xf32>
    %10 = vector.broadcast %9 : vector<1x16xf32> to vector<128x16xf32>
    %11 = arith.subf %5, %10 : vector<128x16xf32>
    %12 = arith.mulf %11, %11 : vector<128x16xf32>
    %cst_7 = arith.constant dense<0.000000e+00> : vector<16xf32>
    %13 = vector.multi_reduction <add>, %12, %cst_7 [0] : vector<128x16xf32> to vector<16xf32>
    %14 = vector.shape_cast %13 : vector<16xf32> to vector<1x16xf32>
    %cst_8 = arith.constant 7.812500e-03 : f32
    %15 = vector.broadcast %cst_8 : f32 to vector<1x16xf32>
    %16 = arith.mulf %14, %15 : vector<1x16xf32>
    %c0_9 = arith.constant 0 : index
    %c0_10 = arith.constant 0 : index
    %17 = vector.load %arg3[%c0_9, %c0_10] : memref<1x16xf32, #tpu.memory_space<vmem>>, vector<1x16xf32>
    %cst_11 = arith.constant 9.99999974E-6 : f32
    %18 = vector.broadcast %cst_11 : f32 to vector<1x16xf32>
    %19 = arith.addf %16, %18 : vector<1x16xf32>
    %20 = math.rsqrt %19 : vector<1x16xf32>
    %21 = arith.mulf %17, %20 : vector<1x16xf32>
    %22 = vector.broadcast %21 : vector<1x16xf32> to vector<128x16xf32>
    %23 = arith.mulf %11, %22 : vector<128x16xf32>
    %c0_12 = arith.constant 0 : index
    %c0_13 = arith.constant 0 : index
    %24 = vector.load %arg4[%c0_12, %c0_13] : memref<1x16xf32, #tpu.memory_space<vmem>>, vector<1x16xf32>
    %25 = vector.broadcast %24 : vector<1x16xf32> to vector<128x16xf32>
    %26 = arith.addf %23, %25 : vector<128x16xf32>
    %c0_14 = arith.constant 0 : index
    %c0_15 = arith.constant 0 : index
    %27 = vector.load %arg5[%c0_14, %c0_15] : memref<128x16xbf16, #tpu.memory_space<vmem>>, vector<128x16xbf16>
    %28 = arith.extf %27 : vector<128x16xbf16> to vector<128x16xf32>
    %29 = arith.negf %26 : vector<128x16xf32>
    %30 = math.exp %29 : vector<128x16xf32>
    %cst_16 = arith.constant 1.000000e+00 : f32
    %31 = vector.broadcast %cst_16 : f32 to vector<128x16xf32>
    %32 = arith.addf %31, %30 : vector<128x16xf32>
    %33 = arith.divf %31, %32 : vector<128x16xf32>
    %34 = arith.mulf %26, %33 : vector<128x16xf32>
    %35 = arith.addf %28, %34 : vector<128x16xf32>
    %36 = arith.truncf %35 : vector<128x16xf32> to vector<128x16xbf16>
    %c0_17 = arith.constant 0 : index
    %c0_18 = arith.constant 0 : index
    %37 = vector.load %arg6[%c0_17, %c0_18] : memref<128x16xbf16, #tpu.memory_space<vmem>>, vector<128x16xbf16>
    tpu.vector_store %arg6[%c0_17, %c0_18], %36 {strides = array<i32>} : memref<128x16xbf16, #tpu.memory_space<vmem>>, vector<128x16xbf16>,
    return
  }
}

module attributes {stable_mosaic.version = 11 : i64} {
  func.func @_conv_bn_swish_kernel(%arg0: memref<128x144xbf16, #tpu.memory_space<vmem>>, %arg1: memref<144x16xbf16, #tpu.memory_space<vmem>>, %arg2: memref<1x16xf32, #tpu.memory_space<vmem>>, %arg3: memref<1x16xf32, #tpu.memory_space<vmem>>, %arg4: memref<1x16xf32, #tpu.memory_space<vmem>>, %arg5: memref<128x16xbf16, #tpu.memory_space<vmem>>) attributes {dimension_semantics = [], scalar_prefetch = 0 : i64, scratch_operands = 0 : i64, tpu.core_type = #tpu.core_type<tc>} {
    %c0 = arith.constant 0 : index
    %c0_0 = arith.constant 0 : index
    %0 = vector.load %arg0[%c0, %c0_0] : memref<128x144xbf16, #tpu.memory_space<vmem>>, vector<128x144xbf16>
    %c0_1 = arith.constant 0 : index
    %c0_2 = arith.constant 0 : index
    %1 = vector.load %arg1[%c0_1, %c0_2] : memref<144x16xbf16, #tpu.memory_space<vmem>>, vector<144x16xbf16>
    %cst = arith.constant dense<0.000000e+00> : vector<128x16xf32>
    %2 = tpu.matmul %0, %1, %cst {dimension_numbers = #tpu.dot_dimension_numbers<[1], [0], [0], [1], [0, 0, 1, 1], [], []>} : vector<128x144xbf16>, vector<144x16xbf16>, vector<128x16xf32> -> vector<128x16xf32>
    %c0_3 = arith.constant 0 : index
    %c0_4 = arith.constant 0 : index
    %3 = vector.load %arg2[%c0_3, %c0_4] : memref<1x16xf32, #tpu.memory_space<vmem>>, vector<1x16xf32>
    %4 = vector.broadcast %3 : vector<1x16xf32> to vector<128x16xf32>
    %5 = arith.addf %2, %4 : vector<128x16xf32>
    %cst_5 = arith.constant dense<0.000000e+00> : vector<16xf32>
    %6 = vector.multi_reduction <add>, %5, %cst_5 [0] : vector<128x16xf32> to vector<16xf32>
    %7 = vector.shape_cast %6 : vector<16xf32> to vector<1x16xf32>
    %cst_6 = arith.constant 7.812500e-03 : f32
    %8 = vector.broadcast %cst_6 : f32 to vector<1x16xf32>
    %9 = arith.mulf %7, %8 : vector<1x16xf32>
    %10 = vector.broadcast %9 : vector<1x16xf32> to vector<128x16xf32>
    %11 = arith.subf %5, %10 : vector<128x16xf32>
    %12 = arith.mulf %11, %11 : vector<128x16xf32>
    %cst_7 = arith.constant dense<0.000000e+00> : vector<16xf32>
    %13 = vector.multi_reduction <add>, %12, %cst_7 [0] : vector<128x16xf32> to vector<16xf32>
    %14 = vector.shape_cast %13 : vector<16xf32> to vector<1x16xf32>
    %cst_8 = arith.constant 7.812500e-03 : f32
    %15 = vector.broadcast %cst_8 : f32 to vector<1x16xf32>
    %16 = arith.mulf %14, %15 : vector<1x16xf32>
    %c0_9 = arith.constant 0 : index
    %c0_10 = arith.constant 0 : index
    %17 = vector.load %arg3[%c0_9, %c0_10] : memref<1x16xf32, #tpu.memory_space<vmem>>, vector<1x16xf32>
    %cst_11 = arith.constant 9.99999974E-6 : f32
    %18 = vector.broadcast %cst_11 : f32 to vector<1x16xf32>
    %19 = arith.addf %16, %18 : vector<1x16xf32>
    %20 = math.rsqrt %19 : vector<1x16xf32>
    %21 = arith.mulf %17, %20 : vector<1x16xf32>
    %22 = vector.broadcast %21 : vector<1x16xf32> to vector<128x16xf32>
    %23 = arith.mulf %11, %22 : vector<128x16xf32>
    %c0_12 = arith.constant 0 : index
    %c0_13 = arith.constant 0 : index
    %24 = vector.load %arg4[%c0_12, %c0_13] : memref<1x16xf32, #tpu.memory_space<vmem>>, vector<1x16xf32>
    %25 = vector.broadcast %24 : vector<1x16xf32> to vector<128x16xf32>
    %26 = arith.addf %23, %25 : vector<128x16xf32>
    %27 = arith.negf %26 : vector<128x16xf32>
    %28 = math.exp %27 : vector<128x16xf32>
    %cst_14 = arith.constant 1.000000e+00 : f32
    %29 = vector.broadcast %cst_14 : f32 to vector<128x16xf32>
    %30 = arith.addf %29, %28 : vector<128x16xf32>
    %31 = arith.divf %29, %30 : vector<128x16xf32>
    %32 = arith.mulf %26, %31 : vector<128x16xf32>
    %33 = arith.truncf %32 : vector<128x16xf32> to vector<128x16xbf16>
    %c0_15 = arith.constant 0 : index
    %c0_16 = arith.constant 0 : index
    %34 = vector.load %arg5[%c0_15, %c0_16] : memref<128x16xbf16, #tpu.memory_space<vmem>>, vector<128x16xbf16>
    tpu.vector_store %arg5[%c0_15, %c0_16], %33 {strides = array<i32>} : memref<128x16xbf16, #tpu.memory_space<vmem>>, vector<128x16xbf16>,
    return
  }
}

module attributes {stable_mosaic.version = 11 : i64} {
  func.func @_conv_bn_swish_kernel(%arg0: memref<32x144xbf16, #tpu.memory_space<vmem>>, %arg1: memref<144x16xbf16, #tpu.memory_space<vmem>>, %arg2: memref<1x16xf32, #tpu.memory_space<vmem>>, %arg3: memref<1x16xf32, #tpu.memory_space<vmem>>, %arg4: memref<1x16xf32, #tpu.memory_space<vmem>>, %arg5: memref<32x16xbf16, #tpu.memory_space<vmem>>) attributes {dimension_semantics = [], scalar_prefetch = 0 : i64, scratch_operands = 0 : i64, tpu.core_type = #tpu.core_type<tc>} {
    %c0 = arith.constant 0 : index
    %c0_0 = arith.constant 0 : index
    %0 = vector.load %arg0[%c0, %c0_0] : memref<32x144xbf16, #tpu.memory_space<vmem>>, vector<32x144xbf16>
    %c0_1 = arith.constant 0 : index
    %c0_2 = arith.constant 0 : index
    %1 = vector.load %arg1[%c0_1, %c0_2] : memref<144x16xbf16, #tpu.memory_space<vmem>>, vector<144x16xbf16>
    %cst = arith.constant dense<0.000000e+00> : vector<32x16xf32>
    %2 = tpu.matmul %0, %1, %cst {dimension_numbers = #tpu.dot_dimension_numbers<[1], [0], [0], [1], [0, 0, 1, 1], [], []>} : vector<32x144xbf16>, vector<144x16xbf16>, vector<32x16xf32> -> vector<32x16xf32>
    %c0_3 = arith.constant 0 : index
    %c0_4 = arith.constant 0 : index
    %3 = vector.load %arg2[%c0_3, %c0_4] : memref<1x16xf32, #tpu.memory_space<vmem>>, vector<1x16xf32>
    %4 = vector.broadcast %3 : vector<1x16xf32> to vector<32x16xf32>
    %5 = arith.addf %2, %4 : vector<32x16xf32>
    %cst_5 = arith.constant dense<0.000000e+00> : vector<16xf32>
    %6 = vector.multi_reduction <add>, %5, %cst_5 [0] : vector<32x16xf32> to vector<16xf32>
    %7 = vector.shape_cast %6 : vector<16xf32> to vector<1x16xf32>
    %cst_6 = arith.constant 3.125000e-02 : f32
    %8 = vector.broadcast %cst_6 : f32 to vector<1x16xf32>
    %9 = arith.mulf %7, %8 : vector<1x16xf32>
    %10 = vector.broadcast %9 : vector<1x16xf32> to vector<32x16xf32>
    %11 = arith.subf %5, %10 : vector<32x16xf32>
    %12 = arith.mulf %11, %11 : vector<32x16xf32>
    %cst_7 = arith.constant dense<0.000000e+00> : vector<16xf32>
    %13 = vector.multi_reduction <add>, %12, %cst_7 [0] : vector<32x16xf32> to vector<16xf32>
    %14 = vector.shape_cast %13 : vector<16xf32> to vector<1x16xf32>
    %cst_8 = arith.constant 3.125000e-02 : f32
    %15 = vector.broadcast %cst_8 : f32 to vector<1x16xf32>
    %16 = arith.mulf %14, %15 : vector<1x16xf32>
    %c0_9 = arith.constant 0 : index
    %c0_10 = arith.constant 0 : index
    %17 = vector.load %arg3[%c0_9, %c0_10] : memref<1x16xf32, #tpu.memory_space<vmem>>, vector<1x16xf32>
    %cst_11 = arith.constant 9.99999974E-6 : f32
    %18 = vector.broadcast %cst_11 : f32 to vector<1x16xf32>
    %19 = arith.addf %16, %18 : vector<1x16xf32>
    %20 = math.rsqrt %19 : vector<1x16xf32>
    %21 = arith.mulf %17, %20 : vector<1x16xf32>
    %22 = vector.broadcast %21 : vector<1x16xf32> to vector<32x16xf32>
    %23 = arith.mulf %11, %22 : vector<32x16xf32>
    %c0_12 = arith.constant 0 : index
    %c0_13 = arith.constant 0 : index
    %24 = vector.load %arg4[%c0_12, %c0_13] : memref<1x16xf32, #tpu.memory_space<vmem>>, vector<1x16xf32>
    %25 = vector.broadcast %24 : vector<1x16xf32> to vector<32x16xf32>
    %26 = arith.addf %23, %25 : vector<32x16xf32>
    %27 = arith.negf %26 : vector<32x16xf32>
    %28 = math.exp %27 : vector<32x16xf32>
    %cst_14 = arith.constant 1.000000e+00 : f32
    %29 = vector.broadcast %cst_14 : f32 to vector<32x16xf32>
    %30 = arith.addf %29, %28 : vector<32x16xf32>
    %31 = arith.divf %29, %30 : vector<32x16xf32>
    %32 = arith.mulf %26, %31 : vector<32x16xf32>
    %33 = arith.truncf %32 : vector<32x16xf32> to vector<32x16xbf16>
    %c0_15 = arith.constant 0 : index
    %c0_16 = arith.constant 0 : index
    %34 = vector.load %arg5[%c0_15, %c0_16] : memref<32x16xbf16, #tpu.memory_space<vmem>>, vector<32x16xbf16>
    tpu.vector_store %arg5[%c0_15, %c0_16], %33 {strides = array<i32>} : memref<32x16xbf16, #tpu.memory_space<vmem>>, vector<32x16xbf16>,
    return
  }
}

module attributes {stable_mosaic.version = 11 : i64} {
  func.func @_conv_bn_swish_res_kernel(%arg0: memref<32x144xbf16, #tpu.memory_space<vmem>>, %arg1: memref<144x16xbf16, #tpu.memory_space<vmem>>, %arg2: memref<1x16xf32, #tpu.memory_space<vmem>>, %arg3: memref<1x16xf32, #tpu.memory_space<vmem>>, %arg4: memref<1x16xf32, #tpu.memory_space<vmem>>, %arg5: memref<32x16xbf16, #tpu.memory_space<vmem>>, %arg6: memref<32x16xbf16, #tpu.memory_space<vmem>>) attributes {dimension_semantics = [], scalar_prefetch = 0 : i64, scratch_operands = 0 : i64, tpu.core_type = #tpu.core_type<tc>} {
    %c0 = arith.constant 0 : index
    %c0_0 = arith.constant 0 : index
    %0 = vector.load %arg0[%c0, %c0_0] : memref<32x144xbf16, #tpu.memory_space<vmem>>, vector<32x144xbf16>
    %c0_1 = arith.constant 0 : index
    %c0_2 = arith.constant 0 : index
    %1 = vector.load %arg1[%c0_1, %c0_2] : memref<144x16xbf16, #tpu.memory_space<vmem>>, vector<144x16xbf16>
    %cst = arith.constant dense<0.000000e+00> : vector<32x16xf32>
    %2 = tpu.matmul %0, %1, %cst {dimension_numbers = #tpu.dot_dimension_numbers<[1], [0], [0], [1], [0, 0, 1, 1], [], []>} : vector<32x144xbf16>, vector<144x16xbf16>, vector<32x16xf32> -> vector<32x16xf32>
    %c0_3 = arith.constant 0 : index
    %c0_4 = arith.constant 0 : index
    %3 = vector.load %arg2[%c0_3, %c0_4] : memref<1x16xf32, #tpu.memory_space<vmem>>, vector<1x16xf32>
    %4 = vector.broadcast %3 : vector<1x16xf32> to vector<32x16xf32>
    %5 = arith.addf %2, %4 : vector<32x16xf32>
    %cst_5 = arith.constant dense<0.000000e+00> : vector<16xf32>
    %6 = vector.multi_reduction <add>, %5, %cst_5 [0] : vector<32x16xf32> to vector<16xf32>
    %7 = vector.shape_cast %6 : vector<16xf32> to vector<1x16xf32>
    %cst_6 = arith.constant 3.125000e-02 : f32
    %8 = vector.broadcast %cst_6 : f32 to vector<1x16xf32>
    %9 = arith.mulf %7, %8 : vector<1x16xf32>
    %10 = vector.broadcast %9 : vector<1x16xf32> to vector<32x16xf32>
    %11 = arith.subf %5, %10 : vector<32x16xf32>
    %12 = arith.mulf %11, %11 : vector<32x16xf32>
    %cst_7 = arith.constant dense<0.000000e+00> : vector<16xf32>
    %13 = vector.multi_reduction <add>, %12, %cst_7 [0] : vector<32x16xf32> to vector<16xf32>
    %14 = vector.shape_cast %13 : vector<16xf32> to vector<1x16xf32>
    %cst_8 = arith.constant 3.125000e-02 : f32
    %15 = vector.broadcast %cst_8 : f32 to vector<1x16xf32>
    %16 = arith.mulf %14, %15 : vector<1x16xf32>
    %c0_9 = arith.constant 0 : index
    %c0_10 = arith.constant 0 : index
    %17 = vector.load %arg3[%c0_9, %c0_10] : memref<1x16xf32, #tpu.memory_space<vmem>>, vector<1x16xf32>
    %cst_11 = arith.constant 9.99999974E-6 : f32
    %18 = vector.broadcast %cst_11 : f32 to vector<1x16xf32>
    %19 = arith.addf %16, %18 : vector<1x16xf32>
    %20 = math.rsqrt %19 : vector<1x16xf32>
    %21 = arith.mulf %17, %20 : vector<1x16xf32>
    %22 = vector.broadcast %21 : vector<1x16xf32> to vector<32x16xf32>
    %23 = arith.mulf %11, %22 : vector<32x16xf32>
    %c0_12 = arith.constant 0 : index
    %c0_13 = arith.constant 0 : index
    %24 = vector.load %arg4[%c0_12, %c0_13] : memref<1x16xf32, #tpu.memory_space<vmem>>, vector<1x16xf32>
    %25 = vector.broadcast %24 : vector<1x16xf32> to vector<32x16xf32>
    %26 = arith.addf %23, %25 : vector<32x16xf32>
    %c0_14 = arith.constant 0 : index
    %c0_15 = arith.constant 0 : index
    %27 = vector.load %arg5[%c0_14, %c0_15] : memref<32x16xbf16, #tpu.memory_space<vmem>>, vector<32x16xbf16>
    %28 = arith.extf %27 : vector<32x16xbf16> to vector<32x16xf32>
    %29 = arith.negf %26 : vector<32x16xf32>
    %30 = math.exp %29 : vector<32x16xf32>
    %cst_16 = arith.constant 1.000000e+00 : f32
    %31 = vector.broadcast %cst_16 : f32 to vector<32x16xf32>
    %32 = arith.addf %31, %30 : vector<32x16xf32>
    %33 = arith.divf %31, %32 : vector<32x16xf32>
    %34 = arith.mulf %26, %33 : vector<32x16xf32>
    %35 = arith.addf %28, %34 : vector<32x16xf32>
    %36 = arith.truncf %35 : vector<32x16xf32> to vector<32x16xbf16>
    %c0_17 = arith.constant 0 : index
    %c0_18 = arith.constant 0 : index
    %37 = vector.load %arg6[%c0_17, %c0_18] : memref<32x16xbf16, #tpu.memory_space<vmem>>, vector<32x16xbf16>
    tpu.vector_store %arg6[%c0_17, %c0_18], %36 {strides = array<i32>} : memref<32x16xbf16, #tpu.memory_space<vmem>>, vector<32x16xbf16>,
    return
  }
}

module attributes {stable_mosaic.version = 11 : i64} {
  func.func @_conv_bn_swish_kernel(%arg0: memref<32x144xbf16, #tpu.memory_space<vmem>>, %arg1: memref<144x16xbf16, #tpu.memory_space<vmem>>, %arg2: memref<1x16xf32, #tpu.memory_space<vmem>>, %arg3: memref<1x16xf32, #tpu.memory_space<vmem>>, %arg4: memref<1x16xf32, #tpu.memory_space<vmem>>, %arg5: memref<32x16xbf16, #tpu.memory_space<vmem>>) attributes {dimension_semantics = [], scalar_prefetch = 0 : i64, scratch_operands = 0 : i64, tpu.core_type = #tpu.core_type<tc>} {
    %c0 = arith.constant 0 : index
    %c0_0 = arith.constant 0 : index
    %0 = vector.load %arg0[%c0, %c0_0] : memref<32x144xbf16, #tpu.memory_space<vmem>>, vector<32x144xbf16>
    %c0_1 = arith.constant 0 : index
    %c0_2 = arith.constant 0 : index
    %1 = vector.load %arg1[%c0_1, %c0_2] : memref<144x16xbf16, #tpu.memory_space<vmem>>, vector<144x16xbf16>
    %cst = arith.constant dense<0.000000e+00> : vector<32x16xf32>
    %2 = tpu.matmul %0, %1, %cst {dimension_numbers = #tpu.dot_dimension_numbers<[1], [0], [0], [1], [0, 0, 1, 1], [], []>} : vector<32x144xbf16>, vector<144x16xbf16>, vector<32x16xf32> -> vector<32x16xf32>
    %c0_3 = arith.constant 0 : index
    %c0_4 = arith.constant 0 : index
    %3 = vector.load %arg2[%c0_3, %c0_4] : memref<1x16xf32, #tpu.memory_space<vmem>>, vector<1x16xf32>
    %4 = vector.broadcast %3 : vector<1x16xf32> to vector<32x16xf32>
    %5 = arith.addf %2, %4 : vector<32x16xf32>
    %cst_5 = arith.constant dense<0.000000e+00> : vector<16xf32>
    %6 = vector.multi_reduction <add>, %5, %cst_5 [0] : vector<32x16xf32> to vector<16xf32>
    %7 = vector.shape_cast %6 : vector<16xf32> to vector<1x16xf32>
    %cst_6 = arith.constant 3.125000e-02 : f32
    %8 = vector.broadcast %cst_6 : f32 to vector<1x16xf32>
    %9 = arith.mulf %7, %8 : vector<1x16xf32>
    %10 = vector.broadcast %9 : vector<1x16xf32> to vector<32x16xf32>
    %11 = arith.subf %5, %10 : vector<32x16xf32>
    %12 = arith.mulf %11, %11 : vector<32x16xf32>
    %cst_7 = arith.constant dense<0.000000e+00> : vector<16xf32>
    %13 = vector.multi_reduction <add>, %12, %cst_7 [0] : vector<32x16xf32> to vector<16xf32>
    %14 = vector.shape_cast %13 : vector<16xf32> to vector<1x16xf32>
    %cst_8 = arith.constant 3.125000e-02 : f32
    %15 = vector.broadcast %cst_8 : f32 to vector<1x16xf32>
    %16 = arith.mulf %14, %15 : vector<1x16xf32>
    %c0_9 = arith.constant 0 : index
    %c0_10 = arith.constant 0 : index
    %17 = vector.load %arg3[%c0_9, %c0_10] : memref<1x16xf32, #tpu.memory_space<vmem>>, vector<1x16xf32>
    %cst_11 = arith.constant 9.99999974E-6 : f32
    %18 = vector.broadcast %cst_11 : f32 to vector<1x16xf32>
    %19 = arith.addf %16, %18 : vector<1x16xf32>
    %20 = math.rsqrt %19 : vector<1x16xf32>
    %21 = arith.mulf %17, %20 : vector<1x16xf32>
    %22 = vector.broadcast %21 : vector<1x16xf32> to vector<32x16xf32>
    %23 = arith.mulf %11, %22 : vector<32x16xf32>
    %c0_12 = arith.constant 0 : index
    %c0_13 = arith.constant 0 : index
    %24 = vector.load %arg4[%c0_12, %c0_13] : memref<1x16xf32, #tpu.memory_space<vmem>>, vector<1x16xf32>
    %25 = vector.broadcast %24 : vector<1x16xf32> to vector<32x16xf32>
    %26 = arith.addf %23, %25 : vector<32x16xf32>
    %27 = arith.negf %26 : vector<32x16xf32>
    %28 = math.exp %27 : vector<32x16xf32>
    %cst_14 = arith.constant 1.000000e+00 : f32
    %29 = vector.broadcast %cst_14 : f32 to vector<32x16xf32>
    %30 = arith.addf %29, %28 : vector<32x16xf32>
    %31 = arith.divf %29, %30 : vector<32x16xf32>
    %32 = arith.mulf %26, %31 : vector<32x16xf32>
    %33 = arith.negf %32 : vector<32x16xf32>
    %34 = math.exp %33 : vector<32x16xf32>
    %cst_15 = arith.constant 1.000000e+00 : f32
    %35 = vector.broadcast %cst_15 : f32 to vector<32x16xf32>
    %36 = arith.addf %35, %34 : vector<32x16xf32>
    %37 = arith.divf %35, %36 : vector<32x16xf32>
    %38 = arith.mulf %32, %37 : vector<32x16xf32>
    %39 = arith.truncf %38 : vector<32x16xf32> to vector<32x16xbf16>
    %c0_16 = arith.constant 0 : index
    %c0_17 = arith.constant 0 : index
    %40 = vector.load %arg5[%c0_16, %c0_17] : memref<32x16xbf16, #tpu.memory_space<vmem>>, vector<32x16xbf16>
    tpu.vector_store %arg5[%c0_16, %c0_17], %39 {strides = array<i32>} : memref<32x16xbf16, #tpu.memory_space<vmem>>, vector<32x16xbf16>,
    return
  }
}

module attributes {stable_mosaic.version = 11 : i64} {
  func.func @_conv_bn_swish_kernel(%arg0: memref<8x144xbf16, #tpu.memory_space<vmem>>, %arg1: memref<144x16xbf16, #tpu.memory_space<vmem>>, %arg2: memref<1x16xf32, #tpu.memory_space<vmem>>, %arg3: memref<1x16xf32, #tpu.memory_space<vmem>>, %arg4: memref<1x16xf32, #tpu.memory_space<vmem>>, %arg5: memref<8x16xbf16, #tpu.memory_space<vmem>>) attributes {dimension_semantics = [], scalar_prefetch = 0 : i64, scratch_operands = 0 : i64, tpu.core_type = #tpu.core_type<tc>} {
    %c0 = arith.constant 0 : index
    %c0_0 = arith.constant 0 : index
    %0 = vector.load %arg0[%c0, %c0_0] : memref<8x144xbf16, #tpu.memory_space<vmem>>, vector<8x144xbf16>
    %c0_1 = arith.constant 0 : index
    %c0_2 = arith.constant 0 : index
    %1 = vector.load %arg1[%c0_1, %c0_2] : memref<144x16xbf16, #tpu.memory_space<vmem>>, vector<144x16xbf16>
    %cst = arith.constant dense<0.000000e+00> : vector<8x16xf32>
    %2 = tpu.matmul %0, %1, %cst {dimension_numbers = #tpu.dot_dimension_numbers<[1], [0], [0], [1], [0, 0, 1, 1], [], []>} : vector<8x144xbf16>, vector<144x16xbf16>, vector<8x16xf32> -> vector<8x16xf32>
    %c0_3 = arith.constant 0 : index
    %c0_4 = arith.constant 0 : index
    %3 = vector.load %arg2[%c0_3, %c0_4] : memref<1x16xf32, #tpu.memory_space<vmem>>, vector<1x16xf32>
    %4 = vector.broadcast %3 : vector<1x16xf32> to vector<8x16xf32>
    %5 = arith.addf %2, %4 : vector<8x16xf32>
    %cst_5 = arith.constant dense<0.000000e+00> : vector<16xf32>
    %6 = vector.multi_reduction <add>, %5, %cst_5 [0] : vector<8x16xf32> to vector<16xf32>
    %7 = vector.shape_cast %6 : vector<16xf32> to vector<1x16xf32>
    %cst_6 = arith.constant 1.250000e-01 : f32
    %8 = vector.broadcast %cst_6 : f32 to vector<1x16xf32>
    %9 = arith.mulf %7, %8 : vector<1x16xf32>
    %10 = vector.broadcast %9 : vector<1x16xf32> to vector<8x16xf32>
    %11 = arith.subf %5, %10 : vector<8x16xf32>
    %12 = arith.mulf %11, %11 : vector<8x16xf32>
    %cst_7 = arith.constant dense<0.000000e+00> : vector<16xf32>
    %13 = vector.multi_reduction <add>, %12, %cst_7 [0] : vector<8x16xf32> to vector<16xf32>
    %14 = vector.shape_cast %13 : vector<16xf32> to vector<1x16xf32>
    %cst_8 = arith.constant 1.250000e-01 : f32
    %15 = vector.broadcast %cst_8 : f32 to vector<1x16xf32>
    %16 = arith.mulf %14, %15 : vector<1x16xf32>
    %c0_9 = arith.constant 0 : index
    %c0_10 = arith.constant 0 : index
    %17 = vector.load %arg3[%c0_9, %c0_10] : memref<1x16xf32, #tpu.memory_space<vmem>>, vector<1x16xf32>
    %cst_11 = arith.constant 9.99999974E-6 : f32
    %18 = vector.broadcast %cst_11 : f32 to vector<1x16xf32>
    %19 = arith.addf %16, %18 : vector<1x16xf32>
    %20 = math.rsqrt %19 : vector<1x16xf32>
    %21 = arith.mulf %17, %20 : vector<1x16xf32>
    %22 = vector.broadcast %21 : vector<1x16xf32> to vector<8x16xf32>
    %23 = arith.mulf %11, %22 : vector<8x16xf32>
    %c0_12 = arith.constant 0 : index
    %c0_13 = arith.constant 0 : index
    %24 = vector.load %arg4[%c0_12, %c0_13] : memref<1x16xf32, #tpu.memory_space<vmem>>, vector<1x16xf32>
    %25 = vector.broadcast %24 : vector<1x16xf32> to vector<8x16xf32>
    %26 = arith.addf %23, %25 : vector<8x16xf32>
    %27 = arith.negf %26 : vector<8x16xf32>
    %28 = math.exp %27 : vector<8x16xf32>
    %cst_14 = arith.constant 1.000000e+00 : f32
    %29 = vector.broadcast %cst_14 : f32 to vector<8x16xf32>
    %30 = arith.addf %29, %28 : vector<8x16xf32>
    %31 = arith.divf %29, %30 : vector<8x16xf32>
    %32 = arith.mulf %26, %31 : vector<8x16xf32>
    %33 = arith.truncf %32 : vector<8x16xf32> to vector<8x16xbf16>
    %c0_15 = arith.constant 0 : index
    %c0_16 = arith.constant 0 : index
    %34 = vector.load %arg5[%c0_15, %c0_16] : memref<8x16xbf16, #tpu.memory_space<vmem>>, vector<8x16xbf16>
    tpu.vector_store %arg5[%c0_15, %c0_16], %33 {strides = array<i32>} : memref<8x16xbf16, #tpu.memory_space<vmem>>, vector<8x16xbf16>,
    return
  }
}

module attributes {stable_mosaic.version = 11 : i64} {
  func.func @_conv_bn_swish_res_kernel(%arg0: memref<8x144xbf16, #tpu.memory_space<vmem>>, %arg1: memref<144x16xbf16, #tpu.memory_space<vmem>>, %arg2: memref<1x16xf32, #tpu.memory_space<vmem>>, %arg3: memref<1x16xf32, #tpu.memory_space<vmem>>, %arg4: memref<1x16xf32, #tpu.memory_space<vmem>>, %arg5: memref<8x16xbf16, #tpu.memory_space<vmem>>, %arg6: memref<8x16xbf16, #tpu.memory_space<vmem>>) attributes {dimension_semantics = [], scalar_prefetch = 0 : i64, scratch_operands = 0 : i64, tpu.core_type = #tpu.core_type<tc>} {
    %c0 = arith.constant 0 : index
    %c0_0 = arith.constant 0 : index
    %0 = vector.load %arg0[%c0, %c0_0] : memref<8x144xbf16, #tpu.memory_space<vmem>>, vector<8x144xbf16>
    %c0_1 = arith.constant 0 : index
    %c0_2 = arith.constant 0 : index
    %1 = vector.load %arg1[%c0_1, %c0_2] : memref<144x16xbf16, #tpu.memory_space<vmem>>, vector<144x16xbf16>
    %cst = arith.constant dense<0.000000e+00> : vector<8x16xf32>
    %2 = tpu.matmul %0, %1, %cst {dimension_numbers = #tpu.dot_dimension_numbers<[1], [0], [0], [1], [0, 0, 1, 1], [], []>} : vector<8x144xbf16>, vector<144x16xbf16>, vector<8x16xf32> -> vector<8x16xf32>
    %c0_3 = arith.constant 0 : index
    %c0_4 = arith.constant 0 : index
    %3 = vector.load %arg2[%c0_3, %c0_4] : memref<1x16xf32, #tpu.memory_space<vmem>>, vector<1x16xf32>
    %4 = vector.broadcast %3 : vector<1x16xf32> to vector<8x16xf32>
    %5 = arith.addf %2, %4 : vector<8x16xf32>
    %cst_5 = arith.constant dense<0.000000e+00> : vector<16xf32>
    %6 = vector.multi_reduction <add>, %5, %cst_5 [0] : vector<8x16xf32> to vector<16xf32>
    %7 = vector.shape_cast %6 : vector<16xf32> to vector<1x16xf32>
    %cst_6 = arith.constant 1.250000e-01 : f32
    %8 = vector.broadcast %cst_6 : f32 to vector<1x16xf32>
    %9 = arith.mulf %7, %8 : vector<1x16xf32>
    %10 = vector.broadcast %9 : vector<1x16xf32> to vector<8x16xf32>
    %11 = arith.subf %5, %10 : vector<8x16xf32>
    %12 = arith.mulf %11, %11 : vector<8x16xf32>
    %cst_7 = arith.constant dense<0.000000e+00> : vector<16xf32>
    %13 = vector.multi_reduction <add>, %12, %cst_7 [0] : vector<8x16xf32> to vector<16xf32>
    %14 = vector.shape_cast %13 : vector<16xf32> to vector<1x16xf32>
    %cst_8 = arith.constant 1.250000e-01 : f32
    %15 = vector.broadcast %cst_8 : f32 to vector<1x16xf32>
    %16 = arith.mulf %14, %15 : vector<1x16xf32>
    %c0_9 = arith.constant 0 : index
    %c0_10 = arith.constant 0 : index
    %17 = vector.load %arg3[%c0_9, %c0_10] : memref<1x16xf32, #tpu.memory_space<vmem>>, vector<1x16xf32>
    %cst_11 = arith.constant 9.99999974E-6 : f32
    %18 = vector.broadcast %cst_11 : f32 to vector<1x16xf32>
    %19 = arith.addf %16, %18 : vector<1x16xf32>
    %20 = math.rsqrt %19 : vector<1x16xf32>
    %21 = arith.mulf %17, %20 : vector<1x16xf32>
    %22 = vector.broadcast %21 : vector<1x16xf32> to vector<8x16xf32>
    %23 = arith.mulf %11, %22 : vector<8x16xf32>
    %c0_12 = arith.constant 0 : index
    %c0_13 = arith.constant 0 : index
    %24 = vector.load %arg4[%c0_12, %c0_13] : memref<1x16xf32, #tpu.memory_space<vmem>>, vector<1x16xf32>
    %25 = vector.broadcast %24 : vector<1x16xf32> to vector<8x16xf32>
    %26 = arith.addf %23, %25 : vector<8x16xf32>
    %c0_14 = arith.constant 0 : index
    %c0_15 = arith.constant 0 : index
    %27 = vector.load %arg5[%c0_14, %c0_15] : memref<8x16xbf16, #tpu.memory_space<vmem>>, vector<8x16xbf16>
    %28 = arith.extf %27 : vector<8x16xbf16> to vector<8x16xf32>
    %29 = arith.negf %26 : vector<8x16xf32>
    %30 = math.exp %29 : vector<8x16xf32>
    %cst_16 = arith.constant 1.000000e+00 : f32
    %31 = vector.broadcast %cst_16 : f32 to vector<8x16xf32>
    %32 = arith.addf %31, %30 : vector<8x16xf32>
    %33 = arith.divf %31, %32 : vector<8x16xf32>
    %34 = arith.mulf %26, %33 : vector<8x16xf32>
    %35 = arith.addf %28, %34 : vector<8x16xf32>
    %36 = arith.truncf %35 : vector<8x16xf32> to vector<8x16xbf16>
    %c0_17 = arith.constant 0 : index
    %c0_18 = arith.constant 0 : index
    %37 = vector.load %arg6[%c0_17, %c0_18] : memref<8x16xbf16, #tpu.memory_space<vmem>>, vector<8x16xbf16>
    tpu.vector_store %arg6[%c0_17, %c0_18], %36 {strides = array<i32>} : memref<8x16xbf16, #tpu.memory_space<vmem>>, vector<8x16xbf16>,
    return
  }
}

module attributes {stable_mosaic.version = 11 : i64} {
  func.func @_qconv_vq_kernel(%arg0: i32, %arg1: memref<8x16xbf16, #tpu.memory_space<vmem>>, %arg2: memref<16x8xbf16, #tpu.memory_space<vmem>>, %arg3: memref<1x8xf32, #tpu.memory_space<vmem>>, %arg4: memref<8x32xbf16, #tpu.memory_space<vmem>>, %arg5: memref<1x32xf32, #tpu.memory_space<vmem>>, %arg6: memref<8x8xbf16, #tpu.memory_space<vmem>>, %arg7: memref<1x1x8xf32, #tpu.memory_space<vmem>>) attributes {dimension_semantics = [#tpu.dimension_semantics<parallel>], iteration_bounds = array<i64: 1>, scalar_prefetch = 0 : i64, scratch_operands = 0 : i64, tpu.core_type = #tpu.core_type<tc>, window_params = [{transform_indices = @transform_0, window_bounds = array<i64: 8, 16>}, {pipeline_mode = #tpu.pipeline_mode<synchronous>, transform_indices = @transform_1, window_bounds = array<i64: 16, 8>}, {pipeline_mode = #tpu.pipeline_mode<synchronous>, transform_indices = @transform_2, window_bounds = array<i64: 1, 8>}, {pipeline_mode = #tpu.pipeline_mode<synchronous>, transform_indices = @transform_3, window_bounds = array<i64: 8, 32>}, {pipeline_mode = #tpu.pipeline_mode<synchronous>, transform_indices = @transform_4, window_bounds = array<i64: 1, 32>}, {transform_indices = @transform_5, window_bounds = array<i64: 8, 8>}, {transform_indices = @transform_6, window_bounds = array<i64: 1, 1, 8>}]} {
    %c0 = arith.constant 0 : index
    %c0_0 = arith.constant 0 : index
    %0 = vector.load %arg1[%c0, %c0_0] : memref<8x16xbf16, #tpu.memory_space<vmem>>, vector<8x16xbf16>
    %c0_1 = arith.constant 0 : index
    %c0_2 = arith.constant 0 : index
    %1 = vector.load %arg2[%c0_1, %c0_2] : memref<16x8xbf16, #tpu.memory_space<vmem>>, vector<16x8xbf16>
    %cst = arith.constant dense<0.000000e+00> : vector<8x8xf32>
    %2 = tpu.matmul %0, %1, %cst {dimension_numbers = #tpu.dot_dimension_numbers<[1], [0], [0], [1], [0, 0, 1, 1], [], []>} : vector<8x16xbf16>, vector<16x8xbf16>, vector<8x8xf32> -> vector<8x8xf32>
    %c0_3 = arith.constant 0 : index
    %c0_4 = arith.constant 0 : index
    %3 = vector.load %arg3[%c0_3, %c0_4] : memref<1x8xf32, #tpu.memory_space<vmem>>, vector<1x8xf32>
    %4 = vector.broadcast %3 : vector<1x8xf32> to vector<8x8xf32>
    %5 = arith.addf %2, %4 : vector<8x8xf32>
    %c0_5 = arith.constant 0 : index
    %c0_6 = arith.constant 0 : index
    %6 = vector.load %arg4[%c0_5, %c0_6] : memref<8x32xbf16, #tpu.memory_space<vmem>>, vector<8x32xbf16>
    %7 = arith.mulf %5, %5 : vector<8x8xf32>
    %cst_7 = arith.constant dense<0.000000e+00> : vector<8xf32>
    %8 = vector.multi_reduction <add>, %7, %cst_7 [1] : vector<8x8xf32> to vector<8xf32>
    %9 = vector.shape_cast %8 : vector<8xf32> to vector<8x1xf32>
    %10 = arith.truncf %5 : vector<8x8xf32> to vector<8x8xbf16>
    %cst_8 = arith.constant dense<0.000000e+00> : vector<8x32xf32>
    %11 = tpu.matmul %10, %6, %cst_8 {dimension_numbers = #tpu.dot_dimension_numbers<[1], [0], [0], [1], [0, 0, 1, 1], [], []>} : vector<8x8xbf16>, vector<8x32xbf16>, vector<8x32xf32> -> vector<8x32xf32>
    %cst_9 = arith.constant 2.000000e+00 : f32
    %12 = vector.broadcast %cst_9 : f32 to vector<8x32xf32>
    %13 = arith.mulf %12, %11 : vector<8x32xf32>
    %14 = vector.broadcast %9 : vector<8x1xf32> to vector<8x32xf32>
    %15 = arith.subf %14, %13 : vector<8x32xf32>
    %c0_10 = arith.constant 0 : index
    %c0_11 = arith.constant 0 : index
    %16 = vector.load %arg5[%c0_10, %c0_11] : memref<1x32xf32, #tpu.memory_space<vmem>>, vector<1x32xf32>
    %17 = vector.broadcast %16 : vector<1x32xf32> to vector<8x32xf32>
    %18 = arith.addf %15, %17 : vector<8x32xf32>
    %cst_12 = arith.constant dense<0x7F800000> : vector<8xf32>
    %19 = vector.multi_reduction <minimumf>, %18, %cst_12 [1] : vector<8x32xf32> to vector<8xf32>
    %20 = vector.shape_cast %19 : vector<8xf32> to vector<8x1xf32>
    %21 = tpu.iota {dimensions = array<i32: 1>} : vector<8x32xi32>
    %22 = vector.broadcast %20 : vector<8x1xf32> to vector<8x32xf32>
    %23 = arith.cmpf oeq, %18, %22 : vector<8x32xf32>
    %c32_i32 = arith.constant 32 : i32
    %24 = vector.broadcast %c32_i32 : i32 to vector<8x32xi32>
    %25 = arith.select %23, %21, %24 : vector<8x32xi1>, vector<8x32xi32>
    %cst_13 = arith.constant dense<2147483647> : vector<8xi32>
    %26 = vector.multi_reduction <minsi>, %25, %cst_13 [1] : vector<8x32xi32> to vector<8xi32>
    %27 = vector.shape_cast %26 : vector<8xi32> to vector<8x1xi32>
    %28 = vector.broadcast %27 : vector<8x1xi32> to vector<8x32xi32>
    %29 = arith.cmpi eq, %21, %28 : vector<8x32xi32>
    %30 = arith.extui %29 : vector<8x32xi1> to vector<8x32xi32>
    %31 = arith.sitofp %30 : vector<8x32xi32> to vector<8x32xf32>
    %32 = arith.truncf %31 : vector<8x32xf32> to vector<8x32xbf16>
    %cst_14 = arith.constant dense<0.000000e+00> : vector<8x8xf32>
    %33 = tpu.matmul %32, %6, %cst_14 {dimension_numbers = #tpu.dot_dimension_numbers<[1], [1], [0], [0], [0, 0, 1, 0], [], []>} : vector<8x32xbf16>, vector<8x32xbf16>, vector<8x8xf32> -> vector<8x8xf32>
    %34 = arith.subf %33, %5 : vector<8x8xf32>
    %35 = arith.subf %33, %5 : vector<8x8xf32>
    %36 = arith.mulf %34, %35 : vector<8x8xf32>
    %cst_15 = arith.constant dense<0.000000e+00> : vector<8xf32>
    %37 = vector.multi_reduction <add>, %36, %cst_15 [0] : vector<8x8xf32> to vector<8xf32>
    %38 = vector.shape_cast %37 : vector<8xf32> to vector<1x8xf32>
    %c0_16 = arith.constant 0 : index
    %c0_17 = arith.constant 0 : index
    %c0_18 = arith.constant 0 : index
    %39 = vector.load %arg7[%c0_16, %c0_17, %c0_18] : memref<1x1x8xf32, #tpu.memory_space<vmem>>, vector<1x1x8xf32>
    %40 = vector.shape_cast %39 : vector<1x1x8xf32> to vector<1x8xf32>
    %41 = vector.shape_cast %38 : vector<1x8xf32> to vector<1x1x8xf32>
    tpu.vector_store %arg7[%c0_16, %c0_17, %c0_18], %41 {strides = array<i32>} : memref<1x1x8xf32, #tpu.memory_space<vmem>>, vector<1x1x8xf32>,
    %42 = arith.truncf %33 : vector<8x8xf32> to vector<8x8xbf16>
    %c0_19 = arith.constant 0 : index
    %c0_20 = arith.constant 0 : index
    %43 = vector.load %arg6[%c0_19, %c0_20] : memref<8x8xbf16, #tpu.memory_space<vmem>>, vector<8x8xbf16>
    tpu.vector_store %arg6[%c0_19, %c0_20], %42 {strides = array<i32>} : memref<8x8xbf16, #tpu.memory_space<vmem>>, vector<8x8xbf16>,
    return
  }
  func.func @transform_0(%arg0: i32) -> (i32, i32) {
    %c0_i32 = arith.constant 0 : i32
    %c0_i32_0 = arith.constant 0 : i32
    return %arg0, %c0_i32 : i32, i32
  }
  func.func @transform_1(%arg0: i32) -> (i32, i32) {
    %c0_i32 = arith.constant 0 : i32
    %c0_i32_0 = arith.constant 0 : i32
    %c0_i32_1 = arith.constant 0 : i32
    return %c0_i32, %c0_i32_0 : i32, i32
  }
  func.func @transform_2(%arg0: i32) -> (i32, i32) {
    %c0_i32 = arith.constant 0 : i32
    %c0_i32_0 = arith.constant 0 : i32
    %c0_i32_1 = arith.constant 0 : i32
    return %c0_i32, %c0_i32_0 : i32, i32
  }
  func.func @transform_3(%arg0: i32) -> (i32, i32) {
    %c0_i32 = arith.constant 0 : i32
    %c0_i32_0 = arith.constant 0 : i32
    %c0_i32_1 = arith.constant 0 : i32
    return %c0_i32, %c0_i32_0 : i32, i32
  }
  func.func @transform_4(%arg0: i32) -> (i32, i32) {
    %c0_i32 = arith.constant 0 : i32
    %c0_i32_0 = arith.constant 0 : i32
    %c0_i32_1 = arith.constant 0 : i32
    return %c0_i32, %c0_i32_0 : i32, i32
  }
  func.func @transform_5(%arg0: i32) -> (i32, i32) {
    %c0_i32 = arith.constant 0 : i32
    %c0_i32_0 = arith.constant 0 : i32
    return %arg0, %c0_i32 : i32, i32
  }
  func.func @transform_6(%arg0: i32) -> (i32, i32, i32) {
    %c0_i32 = arith.constant 0 : i32
    %c0_i32_0 = arith.constant 0 : i32
    %c0_i32_1 = arith.constant 0 : i32
    return %arg0, %c0_i32, %c0_i32_0 : i32, i32, i32
  }
}

module attributes {stable_mosaic.version = 11 : i64} {
  func.func @_conv_bn_swish_kernel(%arg0: memref<8x72xbf16, #tpu.memory_space<vmem>>, %arg1: memref<72x8xbf16, #tpu.memory_space<vmem>>, %arg2: memref<1x8xf32, #tpu.memory_space<vmem>>, %arg3: memref<1x8xf32, #tpu.memory_space<vmem>>, %arg4: memref<1x8xf32, #tpu.memory_space<vmem>>, %arg5: memref<8x8xbf16, #tpu.memory_space<vmem>>) attributes {dimension_semantics = [], scalar_prefetch = 0 : i64, scratch_operands = 0 : i64, tpu.core_type = #tpu.core_type<tc>} {
    %c0 = arith.constant 0 : index
    %c0_0 = arith.constant 0 : index
    %0 = vector.load %arg0[%c0, %c0_0] : memref<8x72xbf16, #tpu.memory_space<vmem>>, vector<8x72xbf16>
    %c0_1 = arith.constant 0 : index
    %c0_2 = arith.constant 0 : index
    %1 = vector.load %arg1[%c0_1, %c0_2] : memref<72x8xbf16, #tpu.memory_space<vmem>>, vector<72x8xbf16>
    %cst = arith.constant dense<0.000000e+00> : vector<8x8xf32>
    %2 = tpu.matmul %0, %1, %cst {dimension_numbers = #tpu.dot_dimension_numbers<[1], [0], [0], [1], [0, 0, 1, 1], [], []>} : vector<8x72xbf16>, vector<72x8xbf16>, vector<8x8xf32> -> vector<8x8xf32>
    %c0_3 = arith.constant 0 : index
    %c0_4 = arith.constant 0 : index
    %3 = vector.load %arg2[%c0_3, %c0_4] : memref<1x8xf32, #tpu.memory_space<vmem>>, vector<1x8xf32>
    %4 = vector.broadcast %3 : vector<1x8xf32> to vector<8x8xf32>
    %5 = arith.addf %2, %4 : vector<8x8xf32>
    %cst_5 = arith.constant dense<0.000000e+00> : vector<8xf32>
    %6 = vector.multi_reduction <add>, %5, %cst_5 [0] : vector<8x8xf32> to vector<8xf32>
    %7 = vector.shape_cast %6 : vector<8xf32> to vector<1x8xf32>
    %cst_6 = arith.constant 1.250000e-01 : f32
    %8 = vector.broadcast %cst_6 : f32 to vector<1x8xf32>
    %9 = arith.mulf %7, %8 : vector<1x8xf32>
    %10 = vector.broadcast %9 : vector<1x8xf32> to vector<8x8xf32>
    %11 = arith.subf %5, %10 : vector<8x8xf32>
    %12 = arith.mulf %11, %11 : vector<8x8xf32>
    %cst_7 = arith.constant dense<0.000000e+00> : vector<8xf32>
    %13 = vector.multi_reduction <add>, %12, %cst_7 [0] : vector<8x8xf32> to vector<8xf32>
    %14 = vector.shape_cast %13 : vector<8xf32> to vector<1x8xf32>
    %cst_8 = arith.constant 1.250000e-01 : f32
    %15 = vector.broadcast %cst_8 : f32 to vector<1x8xf32>
    %16 = arith.mulf %14, %15 : vector<1x8xf32>
    %c0_9 = arith.constant 0 : index
    %c0_10 = arith.constant 0 : index
    %17 = vector.load %arg3[%c0_9, %c0_10] : memref<1x8xf32, #tpu.memory_space<vmem>>, vector<1x8xf32>
    %cst_11 = arith.constant 9.99999974E-6 : f32
    %18 = vector.broadcast %cst_11 : f32 to vector<1x8xf32>
    %19 = arith.addf %16, %18 : vector<1x8xf32>
    %20 = math.rsqrt %19 : vector<1x8xf32>
    %21 = arith.mulf %17, %20 : vector<1x8xf32>
    %22 = vector.broadcast %21 : vector<1x8xf32> to vector<8x8xf32>
    %23 = arith.mulf %11, %22 : vector<8x8xf32>
    %c0_12 = arith.constant 0 : index
    %c0_13 = arith.constant 0 : index
    %24 = vector.load %arg4[%c0_12, %c0_13] : memref<1x8xf32, #tpu.memory_space<vmem>>, vector<1x8xf32>
    %25 = vector.broadcast %24 : vector<1x8xf32> to vector<8x8xf32>
    %26 = arith.addf %23, %25 : vector<8x8xf32>
    %27 = arith.negf %26 : vector<8x8xf32>
    %28 = math.exp %27 : vector<8x8xf32>
    %cst_14 = arith.constant 1.000000e+00 : f32
    %29 = vector.broadcast %cst_14 : f32 to vector<8x8xf32>
    %30 = arith.addf %29, %28 : vector<8x8xf32>
    %31 = arith.divf %29, %30 : vector<8x8xf32>
    %32 = arith.mulf %26, %31 : vector<8x8xf32>
    %33 = arith.truncf %32 : vector<8x8xf32> to vector<8x8xbf16>
    %c0_15 = arith.constant 0 : index
    %c0_16 = arith.constant 0 : index
    %34 = vector.load %arg5[%c0_15, %c0_16] : memref<8x8xbf16, #tpu.memory_space<vmem>>, vector<8x8xbf16>
    tpu.vector_store %arg5[%c0_15, %c0_16], %33 {strides = array<i32>} : memref<8x8xbf16, #tpu.memory_space<vmem>>, vector<8x8xbf16>,
    return
  }
}

module attributes {stable_mosaic.version = 11 : i64} {
  func.func @_mm_bias_kernel(%arg0: i32, %arg1: memref<8x72xbf16, #tpu.memory_space<vmem>>, %arg2: memref<72x32xbf16, #tpu.memory_space<vmem>>, %arg3: memref<1x32xf32, #tpu.memory_space<vmem>>, %arg4: memref<8x32xbf16, #tpu.memory_space<vmem>>) attributes {dimension_semantics = [#tpu.dimension_semantics<parallel>], iteration_bounds = array<i64: 1>, scalar_prefetch = 0 : i64, scratch_operands = 0 : i64, tpu.core_type = #tpu.core_type<tc>, window_params = [{transform_indices = @transform_0, window_bounds = array<i64: 8, 72>}, {pipeline_mode = #tpu.pipeline_mode<synchronous>, transform_indices = @transform_1, window_bounds = array<i64: 72, 32>}, {pipeline_mode = #tpu.pipeline_mode<synchronous>, transform_indices = @transform_2, window_bounds = array<i64: 1, 32>}, {transform_indices = @transform_3, window_bounds = array<i64: 8, 32>}]} {
    %c0 = arith.constant 0 : index
    %c0_0 = arith.constant 0 : index
    %0 = vector.load %arg1[%c0, %c0_0] : memref<8x72xbf16, #tpu.memory_space<vmem>>, vector<8x72xbf16>
    %c0_1 = arith.constant 0 : index
    %c0_2 = arith.constant 0 : index
    %1 = vector.load %arg2[%c0_1, %c0_2] : memref<72x32xbf16, #tpu.memory_space<vmem>>, vector<72x32xbf16>
    %cst = arith.constant dense<0.000000e+00> : vector<8x32xf32>
    %2 = tpu.matmul %0, %1, %cst {dimension_numbers = #tpu.dot_dimension_numbers<[1], [0], [0], [1], [0, 0, 1, 1], [], []>} : vector<8x72xbf16>, vector<72x32xbf16>, vector<8x32xf32> -> vector<8x32xf32>
    %c0_3 = arith.constant 0 : index
    %c0_4 = arith.constant 0 : index
    %3 = vector.load %arg3[%c0_3, %c0_4] : memref<1x32xf32, #tpu.memory_space<vmem>>, vector<1x32xf32>
    %4 = vector.broadcast %3 : vector<1x32xf32> to vector<8x32xf32>
    %5 = arith.addf %2, %4 : vector<8x32xf32>
    %6 = arith.truncf %5 : vector<8x32xf32> to vector<8x32xbf16>
    %c0_5 = arith.constant 0 : index
    %c0_6 = arith.constant 0 : index
    %7 = vector.load %arg4[%c0_5, %c0_6] : memref<8x32xbf16, #tpu.memory_space<vmem>>, vector<8x32xbf16>
    tpu.vector_store %arg4[%c0_5, %c0_6], %6 {strides = array<i32>} : memref<8x32xbf16, #tpu.memory_space<vmem>>, vector<8x32xbf16>,
    return
  }
  func.func @transform_0(%arg0: i32) -> (i32, i32) {
    %c0_i32 = arith.constant 0 : i32
    %c0_i32_0 = arith.constant 0 : i32
    return %arg0, %c0_i32 : i32, i32
  }
  func.func @transform_1(%arg0: i32) -> (i32, i32) {
    %c0_i32 = arith.constant 0 : i32
    %c0_i32_0 = arith.constant 0 : i32
    %c0_i32_1 = arith.constant 0 : i32
    return %c0_i32, %c0_i32_0 : i32, i32
  }
  func.func @transform_2(%arg0: i32) -> (i32, i32) {
    %c0_i32 = arith.constant 0 : i32
    %c0_i32_0 = arith.constant 0 : i32
    %c0_i32_1 = arith.constant 0 : i32
    return %c0_i32, %c0_i32_0 : i32, i32
  }
  func.func @transform_3(%arg0: i32) -> (i32, i32) {
    %c0_i32 = arith.constant 0 : i32
    %c0_i32_0 = arith.constant 0 : i32
    return %arg0, %c0_i32 : i32, i32
  }
}

module attributes {stable_mosaic.version = 11 : i64} {
  func.func @_conv_bn_swish_res_kernel(%arg0: memref<8x72xbf16, #tpu.memory_space<vmem>>, %arg1: memref<72x8xbf16, #tpu.memory_space<vmem>>, %arg2: memref<1x8xf32, #tpu.memory_space<vmem>>, %arg3: memref<1x8xf32, #tpu.memory_space<vmem>>, %arg4: memref<1x8xf32, #tpu.memory_space<vmem>>, %arg5: memref<8x8xbf16, #tpu.memory_space<vmem>>, %arg6: memref<8x8xbf16, #tpu.memory_space<vmem>>) attributes {dimension_semantics = [], scalar_prefetch = 0 : i64, scratch_operands = 0 : i64, tpu.core_type = #tpu.core_type<tc>} {
    %c0 = arith.constant 0 : index
    %c0_0 = arith.constant 0 : index
    %0 = vector.load %arg0[%c0, %c0_0] : memref<8x72xbf16, #tpu.memory_space<vmem>>, vector<8x72xbf16>
    %c0_1 = arith.constant 0 : index
    %c0_2 = arith.constant 0 : index
    %1 = vector.load %arg1[%c0_1, %c0_2] : memref<72x8xbf16, #tpu.memory_space<vmem>>, vector<72x8xbf16>
    %cst = arith.constant dense<0.000000e+00> : vector<8x8xf32>
    %2 = tpu.matmul %0, %1, %cst {dimension_numbers = #tpu.dot_dimension_numbers<[1], [0], [0], [1], [0, 0, 1, 1], [], []>} : vector<8x72xbf16>, vector<72x8xbf16>, vector<8x8xf32> -> vector<8x8xf32>
    %c0_3 = arith.constant 0 : index
    %c0_4 = arith.constant 0 : index
    %3 = vector.load %arg2[%c0_3, %c0_4] : memref<1x8xf32, #tpu.memory_space<vmem>>, vector<1x8xf32>
    %4 = vector.broadcast %3 : vector<1x8xf32> to vector<8x8xf32>
    %5 = arith.addf %2, %4 : vector<8x8xf32>
    %cst_5 = arith.constant dense<0.000000e+00> : vector<8xf32>
    %6 = vector.multi_reduction <add>, %5, %cst_5 [0] : vector<8x8xf32> to vector<8xf32>
    %7 = vector.shape_cast %6 : vector<8xf32> to vector<1x8xf32>
    %cst_6 = arith.constant 1.250000e-01 : f32
    %8 = vector.broadcast %cst_6 : f32 to vector<1x8xf32>
    %9 = arith.mulf %7, %8 : vector<1x8xf32>
    %10 = vector.broadcast %9 : vector<1x8xf32> to vector<8x8xf32>
    %11 = arith.subf %5, %10 : vector<8x8xf32>
    %12 = arith.mulf %11, %11 : vector<8x8xf32>
    %cst_7 = arith.constant dense<0.000000e+00> : vector<8xf32>
    %13 = vector.multi_reduction <add>, %12, %cst_7 [0] : vector<8x8xf32> to vector<8xf32>
    %14 = vector.shape_cast %13 : vector<8xf32> to vector<1x8xf32>
    %cst_8 = arith.constant 1.250000e-01 : f32
    %15 = vector.broadcast %cst_8 : f32 to vector<1x8xf32>
    %16 = arith.mulf %14, %15 : vector<1x8xf32>
    %c0_9 = arith.constant 0 : index
    %c0_10 = arith.constant 0 : index
    %17 = vector.load %arg3[%c0_9, %c0_10] : memref<1x8xf32, #tpu.memory_space<vmem>>, vector<1x8xf32>
    %cst_11 = arith.constant 9.99999974E-6 : f32
    %18 = vector.broadcast %cst_11 : f32 to vector<1x8xf32>
    %19 = arith.addf %16, %18 : vector<1x8xf32>
    %20 = math.rsqrt %19 : vector<1x8xf32>
    %21 = arith.mulf %17, %20 : vector<1x8xf32>
    %22 = vector.broadcast %21 : vector<1x8xf32> to vector<8x8xf32>
    %23 = arith.mulf %11, %22 : vector<8x8xf32>
    %c0_12 = arith.constant 0 : index
    %c0_13 = arith.constant 0 : index
    %24 = vector.load %arg4[%c0_12, %c0_13] : memref<1x8xf32, #tpu.memory_space<vmem>>, vector<1x8xf32>
    %25 = vector.broadcast %24 : vector<1x8xf32> to vector<8x8xf32>
    %26 = arith.addf %23, %25 : vector<8x8xf32>
    %c0_14 = arith.constant 0 : index
    %c0_15 = arith.constant 0 : index
    %27 = vector.load %arg5[%c0_14, %c0_15] : memref<8x8xbf16, #tpu.memory_space<vmem>>, vector<8x8xbf16>
    %28 = arith.extf %27 : vector<8x8xbf16> to vector<8x8xf32>
    %29 = arith.negf %26 : vector<8x8xf32>
    %30 = math.exp %29 : vector<8x8xf32>
    %cst_16 = arith.constant 1.000000e+00 : f32
    %31 = vector.broadcast %cst_16 : f32 to vector<8x8xf32>
    %32 = arith.addf %31, %30 : vector<8x8xf32>
    %33 = arith.divf %31, %32 : vector<8x8xf32>
    %34 = arith.mulf %26, %33 : vector<8x8xf32>
    %35 = arith.addf %28, %34 : vector<8x8xf32>
    %36 = arith.truncf %35 : vector<8x8xf32> to vector<8x8xbf16>
    %c0_17 = arith.constant 0 : index
    %c0_18 = arith.constant 0 : index
    %37 = vector.load %arg6[%c0_17, %c0_18] : memref<8x8xbf16, #tpu.memory_space<vmem>>, vector<8x8xbf16>
    tpu.vector_store %arg6[%c0_17, %c0_18], %36 {strides = array<i32>} : memref<8x8xbf16, #tpu.memory_space<vmem>>, vector<8x8xbf16>,
    return
  }
}

module attributes {stable_mosaic.version = 11 : i64} {
  func.func @_qconv_vq_kernel(%arg0: i32, %arg1: memref<32x24xbf16, #tpu.memory_space<vmem>>, %arg2: memref<24x8xbf16, #tpu.memory_space<vmem>>, %arg3: memref<1x8xf32, #tpu.memory_space<vmem>>, %arg4: memref<8x32xbf16, #tpu.memory_space<vmem>>, %arg5: memref<1x32xf32, #tpu.memory_space<vmem>>, %arg6: memref<32x8xbf16, #tpu.memory_space<vmem>>, %arg7: memref<1x1x8xf32, #tpu.memory_space<vmem>>) attributes {dimension_semantics = [#tpu.dimension_semantics<parallel>], iteration_bounds = array<i64: 1>, scalar_prefetch = 0 : i64, scratch_operands = 0 : i64, tpu.core_type = #tpu.core_type<tc>, window_params = [{transform_indices = @transform_0, window_bounds = array<i64: 32, 24>}, {pipeline_mode = #tpu.pipeline_mode<synchronous>, transform_indices = @transform_1, window_bounds = array<i64: 24, 8>}, {pipeline_mode = #tpu.pipeline_mode<synchronous>, transform_indices = @transform_2, window_bounds = array<i64: 1, 8>}, {pipeline_mode = #tpu.pipeline_mode<synchronous>, transform_indices = @transform_3, window_bounds = array<i64: 8, 32>}, {pipeline_mode = #tpu.pipeline_mode<synchronous>, transform_indices = @transform_4, window_bounds = array<i64: 1, 32>}, {transform_indices = @transform_5, window_bounds = array<i64: 32, 8>}, {transform_indices = @transform_6, window_bounds = array<i64: 1, 1, 8>}]} {
    %c0 = arith.constant 0 : index
    %c0_0 = arith.constant 0 : index
    %0 = vector.load %arg1[%c0, %c0_0] : memref<32x24xbf16, #tpu.memory_space<vmem>>, vector<32x24xbf16>
    %c0_1 = arith.constant 0 : index
    %c0_2 = arith.constant 0 : index
    %1 = vector.load %arg2[%c0_1, %c0_2] : memref<24x8xbf16, #tpu.memory_space<vmem>>, vector<24x8xbf16>
    %cst = arith.constant dense<0.000000e+00> : vector<32x8xf32>
    %2 = tpu.matmul %0, %1, %cst {dimension_numbers = #tpu.dot_dimension_numbers<[1], [0], [0], [1], [0, 0, 1, 1], [], []>} : vector<32x24xbf16>, vector<24x8xbf16>, vector<32x8xf32> -> vector<32x8xf32>
    %c0_3 = arith.constant 0 : index
    %c0_4 = arith.constant 0 : index
    %3 = vector.load %arg3[%c0_3, %c0_4] : memref<1x8xf32, #tpu.memory_space<vmem>>, vector<1x8xf32>
    %4 = vector.broadcast %3 : vector<1x8xf32> to vector<32x8xf32>
    %5 = arith.addf %2, %4 : vector<32x8xf32>
    %c0_5 = arith.constant 0 : index
    %c0_6 = arith.constant 0 : index
    %6 = vector.load %arg4[%c0_5, %c0_6] : memref<8x32xbf16, #tpu.memory_space<vmem>>, vector<8x32xbf16>
    %7 = arith.mulf %5, %5 : vector<32x8xf32>
    %cst_7 = arith.constant dense<0.000000e+00> : vector<32xf32>
    %8 = vector.multi_reduction <add>, %7, %cst_7 [1] : vector<32x8xf32> to vector<32xf32>
    %9 = vector.shape_cast %8 : vector<32xf32> to vector<32x1xf32>
    %10 = arith.truncf %5 : vector<32x8xf32> to vector<32x8xbf16>
    %cst_8 = arith.constant dense<0.000000e+00> : vector<32x32xf32>
    %11 = tpu.matmul %10, %6, %cst_8 {dimension_numbers = #tpu.dot_dimension_numbers<[1], [0], [0], [1], [0, 0, 1, 1], [], []>} : vector<32x8xbf16>, vector<8x32xbf16>, vector<32x32xf32> -> vector<32x32xf32>
    %cst_9 = arith.constant 2.000000e+00 : f32
    %12 = vector.broadcast %cst_9 : f32 to vector<32x32xf32>
    %13 = arith.mulf %12, %11 : vector<32x32xf32>
    %14 = vector.broadcast %9 : vector<32x1xf32> to vector<32x32xf32>
    %15 = arith.subf %14, %13 : vector<32x32xf32>
    %c0_10 = arith.constant 0 : index
    %c0_11 = arith.constant 0 : index
    %16 = vector.load %arg5[%c0_10, %c0_11] : memref<1x32xf32, #tpu.memory_space<vmem>>, vector<1x32xf32>
    %17 = vector.broadcast %16 : vector<1x32xf32> to vector<32x32xf32>
    %18 = arith.addf %15, %17 : vector<32x32xf32>
    %cst_12 = arith.constant dense<0x7F800000> : vector<32xf32>
    %19 = vector.multi_reduction <minimumf>, %18, %cst_12 [1] : vector<32x32xf32> to vector<32xf32>
    %20 = vector.shape_cast %19 : vector<32xf32> to vector<32x1xf32>
    %21 = tpu.iota {dimensions = array<i32: 1>} : vector<32x32xi32>
    %22 = vector.broadcast %20 : vector<32x1xf32> to vector<32x32xf32>
    %23 = arith.cmpf oeq, %18, %22 : vector<32x32xf32>
    %c32_i32 = arith.constant 32 : i32
    %24 = vector.broadcast %c32_i32 : i32 to vector<32x32xi32>
    %25 = arith.select %23, %21, %24 : vector<32x32xi1>, vector<32x32xi32>
    %cst_13 = arith.constant dense<2147483647> : vector<32xi32>
    %26 = vector.multi_reduction <minsi>, %25, %cst_13 [1] : vector<32x32xi32> to vector<32xi32>
    %27 = vector.shape_cast %26 : vector<32xi32> to vector<32x1xi32>
    %28 = vector.broadcast %27 : vector<32x1xi32> to vector<32x32xi32>
    %29 = arith.cmpi eq, %21, %28 : vector<32x32xi32>
    %30 = arith.extui %29 : vector<32x32xi1> to vector<32x32xi32>
    %31 = arith.sitofp %30 : vector<32x32xi32> to vector<32x32xf32>
    %32 = arith.truncf %31 : vector<32x32xf32> to vector<32x32xbf16>
    %cst_14 = arith.constant dense<0.000000e+00> : vector<32x8xf32>
    %33 = tpu.matmul %32, %6, %cst_14 {dimension_numbers = #tpu.dot_dimension_numbers<[1], [1], [0], [0], [0, 0, 1, 0], [], []>} : vector<32x32xbf16>, vector<8x32xbf16>, vector<32x8xf32> -> vector<32x8xf32>
    %34 = arith.subf %33, %5 : vector<32x8xf32>
    %35 = arith.subf %33, %5 : vector<32x8xf32>
    %36 = arith.mulf %34, %35 : vector<32x8xf32>
    %cst_15 = arith.constant dense<0.000000e+00> : vector<8xf32>
    %37 = vector.multi_reduction <add>, %36, %cst_15 [0] : vector<32x8xf32> to vector<8xf32>
    %38 = vector.shape_cast %37 : vector<8xf32> to vector<1x8xf32>
    %c0_16 = arith.constant 0 : index
    %c0_17 = arith.constant 0 : index
    %c0_18 = arith.constant 0 : index
    %39 = vector.load %arg7[%c0_16, %c0_17, %c0_18] : memref<1x1x8xf32, #tpu.memory_space<vmem>>, vector<1x1x8xf32>
    %40 = vector.shape_cast %39 : vector<1x1x8xf32> to vector<1x8xf32>
    %41 = vector.shape_cast %38 : vector<1x8xf32> to vector<1x1x8xf32>
    tpu.vector_store %arg7[%c0_16, %c0_17, %c0_18], %41 {strides = array<i32>} : memref<1x1x8xf32, #tpu.memory_space<vmem>>, vector<1x1x8xf32>,
    %42 = arith.truncf %33 : vector<32x8xf32> to vector<32x8xbf16>
    %c0_19 = arith.constant 0 : index
    %c0_20 = arith.constant 0 : index
    %43 = vector.load %arg6[%c0_19, %c0_20] : memref<32x8xbf16, #tpu.memory_space<vmem>>, vector<32x8xbf16>
    tpu.vector_store %arg6[%c0_19, %c0_20], %42 {strides = array<i32>} : memref<32x8xbf16, #tpu.memory_space<vmem>>, vector<32x8xbf16>,
    return
  }
  func.func @transform_0(%arg0: i32) -> (i32, i32) {
    %c0_i32 = arith.constant 0 : i32
    %c0_i32_0 = arith.constant 0 : i32
    return %arg0, %c0_i32 : i32, i32
  }
  func.func @transform_1(%arg0: i32) -> (i32, i32) {
    %c0_i32 = arith.constant 0 : i32
    %c0_i32_0 = arith.constant 0 : i32
    %c0_i32_1 = arith.constant 0 : i32
    return %c0_i32, %c0_i32_0 : i32, i32
  }
  func.func @transform_2(%arg0: i32) -> (i32, i32) {
    %c0_i32 = arith.constant 0 : i32
    %c0_i32_0 = arith.constant 0 : i32
    %c0_i32_1 = arith.constant 0 : i32
    return %c0_i32, %c0_i32_0 : i32, i32
  }
  func.func @transform_3(%arg0: i32) -> (i32, i32) {
    %c0_i32 = arith.constant 0 : i32
    %c0_i32_0 = arith.constant 0 : i32
    %c0_i32_1 = arith.constant 0 : i32
    return %c0_i32, %c0_i32_0 : i32, i32
  }
  func.func @transform_4(%arg0: i32) -> (i32, i32) {
    %c0_i32 = arith.constant 0 : i32
    %c0_i32_0 = arith.constant 0 : i32
    %c0_i32_1 = arith.constant 0 : i32
    return %c0_i32, %c0_i32_0 : i32, i32
  }
  func.func @transform_5(%arg0: i32) -> (i32, i32) {
    %c0_i32 = arith.constant 0 : i32
    %c0_i32_0 = arith.constant 0 : i32
    return %arg0, %c0_i32 : i32, i32
  }
  func.func @transform_6(%arg0: i32) -> (i32, i32, i32) {
    %c0_i32 = arith.constant 0 : i32
    %c0_i32_0 = arith.constant 0 : i32
    %c0_i32_1 = arith.constant 0 : i32
    return %arg0, %c0_i32, %c0_i32_0 : i32, i32, i32
  }
}

module attributes {stable_mosaic.version = 11 : i64} {
  func.func @_mm_bias_kernel(%arg0: i32, %arg1: memref<32x144xbf16, #tpu.memory_space<vmem>>, %arg2: memref<144x64xbf16, #tpu.memory_space<vmem>>, %arg3: memref<1x64xf32, #tpu.memory_space<vmem>>, %arg4: memref<32x64xbf16, #tpu.memory_space<vmem>>) attributes {dimension_semantics = [#tpu.dimension_semantics<parallel>], iteration_bounds = array<i64: 1>, scalar_prefetch = 0 : i64, scratch_operands = 0 : i64, tpu.core_type = #tpu.core_type<tc>, window_params = [{transform_indices = @transform_0, window_bounds = array<i64: 32, 144>}, {pipeline_mode = #tpu.pipeline_mode<synchronous>, transform_indices = @transform_1, window_bounds = array<i64: 144, 64>}, {pipeline_mode = #tpu.pipeline_mode<synchronous>, transform_indices = @transform_2, window_bounds = array<i64: 1, 64>}, {transform_indices = @transform_3, window_bounds = array<i64: 32, 64>}]} {
    %c0 = arith.constant 0 : index
    %c0_0 = arith.constant 0 : index
    %0 = vector.load %arg1[%c0, %c0_0] : memref<32x144xbf16, #tpu.memory_space<vmem>>, vector<32x144xbf16>
    %c0_1 = arith.constant 0 : index
    %c0_2 = arith.constant 0 : index
    %1 = vector.load %arg2[%c0_1, %c0_2] : memref<144x64xbf16, #tpu.memory_space<vmem>>, vector<144x64xbf16>
    %cst = arith.constant dense<0.000000e+00> : vector<32x64xf32>
    %2 = tpu.matmul %0, %1, %cst {dimension_numbers = #tpu.dot_dimension_numbers<[1], [0], [0], [1], [0, 0, 1, 1], [], []>} : vector<32x144xbf16>, vector<144x64xbf16>, vector<32x64xf32> -> vector<32x64xf32>
    %c0_3 = arith.constant 0 : index
    %c0_4 = arith.constant 0 : index
    %3 = vector.load %arg3[%c0_3, %c0_4] : memref<1x64xf32, #tpu.memory_space<vmem>>, vector<1x64xf32>
    %4 = vector.broadcast %3 : vector<1x64xf32> to vector<32x64xf32>
    %5 = arith.addf %2, %4 : vector<32x64xf32>
    %6 = arith.truncf %5 : vector<32x64xf32> to vector<32x64xbf16>
    %c0_5 = arith.constant 0 : index
    %c0_6 = arith.constant 0 : index
    %7 = vector.load %arg4[%c0_5, %c0_6] : memref<32x64xbf16, #tpu.memory_space<vmem>>, vector<32x64xbf16>
    tpu.vector_store %arg4[%c0_5, %c0_6], %6 {strides = array<i32>} : memref<32x64xbf16, #tpu.memory_space<vmem>>, vector<32x64xbf16>,
    return
  }
  func.func @transform_0(%arg0: i32) -> (i32, i32) {
    %c0_i32 = arith.constant 0 : i32
    %c0_i32_0 = arith.constant 0 : i32
    return %arg0, %c0_i32 : i32, i32
  }
  func.func @transform_1(%arg0: i32) -> (i32, i32) {
    %c0_i32 = arith.constant 0 : i32
    %c0_i32_0 = arith.constant 0 : i32
    %c0_i32_1 = arith.constant 0 : i32
    return %c0_i32, %c0_i32_0 : i32, i32
  }
  func.func @transform_2(%arg0: i32) -> (i32, i32) {
    %c0_i32 = arith.constant 0 : i32
    %c0_i32_0 = arith.constant 0 : i32
    %c0_i32_1 = arith.constant 0 : i32
    return %c0_i32, %c0_i32_0 : i32, i32
  }
  func.func @transform_3(%arg0: i32) -> (i32, i32) {
    %c0_i32 = arith.constant 0 : i32
    %c0_i32_0 = arith.constant 0 : i32
    return %arg0, %c0_i32 : i32, i32
  }
}

module attributes {stable_mosaic.version = 11 : i64} {
  func.func @_mm_bias_kernel(%arg0: i32, %arg1: memref<128x144xbf16, #tpu.memory_space<vmem>>, %arg2: memref<144x12xbf16, #tpu.memory_space<vmem>>, %arg3: memref<1x12xf32, #tpu.memory_space<vmem>>, %arg4: memref<128x12xbf16, #tpu.memory_space<vmem>>) attributes {dimension_semantics = [#tpu.dimension_semantics<parallel>], iteration_bounds = array<i64: 1>, scalar_prefetch = 0 : i64, scratch_operands = 0 : i64, tpu.core_type = #tpu.core_type<tc>, window_params = [{transform_indices = @transform_0, window_bounds = array<i64: 128, 144>}, {pipeline_mode = #tpu.pipeline_mode<synchronous>, transform_indices = @transform_1, window_bounds = array<i64: 144, 12>}, {pipeline_mode = #tpu.pipeline_mode<synchronous>, transform_indices = @transform_2, window_bounds = array<i64: 1, 12>}, {transform_indices = @transform_3, window_bounds = array<i64: 128, 12>}]} {
    %c0 = arith.constant 0 : index
    %c0_0 = arith.constant 0 : index
    %0 = vector.load %arg1[%c0, %c0_0] : memref<128x144xbf16, #tpu.memory_space<vmem>>, vector<128x144xbf16>
    %c0_1 = arith.constant 0 : index
    %c0_2 = arith.constant 0 : index
    %1 = vector.load %arg2[%c0_1, %c0_2] : memref<144x12xbf16, #tpu.memory_space<vmem>>, vector<144x12xbf16>
    %cst = arith.constant dense<0.000000e+00> : vector<128x12xf32>
    %2 = tpu.matmul %0, %1, %cst {dimension_numbers = #tpu.dot_dimension_numbers<[1], [0], [0], [1], [0, 0, 1, 1], [], []>} : vector<128x144xbf16>, vector<144x12xbf16>, vector<128x12xf32> -> vector<128x12xf32>
    %c0_3 = arith.constant 0 : index
    %c0_4 = arith.constant 0 : index
    %3 = vector.load %arg3[%c0_3, %c0_4] : memref<1x12xf32, #tpu.memory_space<vmem>>, vector<1x12xf32>
    %4 = vector.broadcast %3 : vector<1x12xf32> to vector<128x12xf32>
    %5 = arith.addf %2, %4 : vector<128x12xf32>
    %6 = arith.truncf %5 : vector<128x12xf32> to vector<128x12xbf16>
    %c0_5 = arith.constant 0 : index
    %c0_6 = arith.constant 0 : index
    %7 = vector.load %arg4[%c0_5, %c0_6] : memref<128x12xbf16, #tpu.memory_space<vmem>>, vector<128x12xbf16>
    tpu.vector_store %arg4[%c0_5, %c0_6], %6 {strides = array<i32>} : memref<128x12xbf16, #tpu.memory_space<vmem>>, vector<128x12xbf16>,
    return
  }
  func.func @transform_0(%arg0: i32) -> (i32, i32) {
    %c0_i32 = arith.constant 0 : i32
    %c0_i32_0 = arith.constant 0 : i32
    return %arg0, %c0_i32 : i32, i32
  }
  func.func @transform_1(%arg0: i32) -> (i32, i32) {
    %c0_i32 = arith.constant 0 : i32
    %c0_i32_0 = arith.constant 0 : i32
    %c0_i32_1 = arith.constant 0 : i32
    return %c0_i32, %c0_i32_0 : i32, i32
  }
  func.func @transform_2(%arg0: i32) -> (i32, i32) {
    %c0_i32 = arith.constant 0 : i32
    %c0_i32_0 = arith.constant 0 : i32
    %c0_i32_1 = arith.constant 0 : i32
    return %c0_i32, %c0_i32_0 : i32, i32
  }
  func.func @transform_3(%arg0: i32) -> (i32, i32) {
    %c0_i32 = arith.constant 0 : i32
    %c0_i32_0 = arith.constant 0 : i32
    return %arg0, %c0_i32 : i32, i32
  }
}

</mosaic_0001>

<bundles_post_ra>
// kernel: vqvae_forward.26
= control target key start
LH: loop header
LB: loop body
LE: loop exit
PB: predicated region body
PF: predicated region fallthrough
CT: control target
= control target key end

     0   :  { %vm121_vm0 = vcmask 1044480   ;;  %vm122_vm1 = vcmask 1045504   ;;  %v844_v2 = vmov 65535   ;;  %vm96_vm2 = vcmask 220160   ;;  %s1690_s1 = inlined_call_operand.vmem [shape: bf16[27,16], index: 1, kind: input, shape index: {}]   ;;  %s1691_s2 = inlined_call_operand.vmem [shape: f32[1,16], index: 2, kind: input, shape index: {}]   ;;  %s1692_s0 = inlined_call_operand.vmem [shape: bf16[128,27], index: 0, kind: input, shape index: {}]   ;;  %s1693_s4 = inlined_call_operand.vmem [shape: f32[1,16], index: 4, kind: input, shape index: {}]   ;;  %s1694_s3 = inlined_call_operand.vmem [shape: f32[1,16], index: 3, kind: input, shape index: {}]   ;;  %s1695_s5 = inlined_call_operand.vmem [shape: bf16[128,16], index: 5, kind: output, shape index: {}]  }
   0x1   :  { %v733_v0 = vld [vmem:[%s1690_s1 + $0x8] sm:$0xf]  ;;  %v768_v1 = vld [vmem:[%s1690_s1 + $0x8] sm:$0x30]  ;;  %v123_v3 = vsel %vm121_vm0, 4294967295, %v844_v2  ;;  %v767_v7 = vld [vmem:[%s1690_s1] sm:$0xff] }
   0x2   :  { %v734_v4 = vor.u32 %v768_v1, %v733_v0  ;;  %v124_v5 = vsel %vm122_vm1, %v123_v3, 0  ;;  %v759_v8 = vld [vmem:[%s1692_s0] sm:$0xff]  ;;  %v761_v9 = vld [vmem:[%s1692_s0 + $0x10] sm:$0xff]  ;;  %v760_v12 = vld [vmem:[%s1692_s0 + $0x8] sm:$0xff]  ;;  %vm177_vm3 = vcmask 130048  }
   0x3   :  { %v763_v10 = vld [vmem:[%s1692_s0 + $0x20] sm:$0xff]  ;;  %v765_v11 = vld [vmem:[%s1692_s0 + $0x30] sm:$0xff]  ;;  %v762_v13 = vld [vmem:[%s1692_s0 + $0x18] sm:$0xff] }
   0x4   :  { %v126_v6 = vand.u32 %v734_v4, %v124_v5  ;;  %v764_v14 = vld [vmem:[%s1692_s0 + $0x28] sm:$0xff]  ;;  %v766_v15 = vld [vmem:[%s1692_s0 + $0x38] sm:$0xff]  ;;  %v776_v22 = vld [vmem:[%s1691_s2] ss:$0 sm:$0xff] }
   0x6   :  { %134 = vmatpush.bf16.msra.mxu0 %v126_v6  ;;  %769 = vmatpush.bf16.msra.mxu1 %v126_v6 }
   0x7   :  { %770 = vmatpush.bf16.msra.mxu2 %v126_v6  ;;  %771 = vmatpush.bf16.msra.mxu3 %v126_v6 }
   0xa   :  { %135 = vmatpush.bf16.msra.mxu0 %v767_v7  ;;  %772 = vmatpush.bf16.msra.mxu1 %v767_v7 }
   0xb   :  { %773 = vmatpush.bf16.msra.mxu2 %v767_v7  ;;  %774 = vmatpush.bf16.msra.mxu3 %v767_v7 }
   0xd   :  { %735 = vmatmul.msk.bf16.vlgmr.msra.gmra.mxu0 %vm96_vm2, %v759_v8  ;;  %737 = vmatmul.msk.bf16.vlgmr.msra.gmra.mxu1 %vm96_vm2, %v761_v9 }
   0xe   :  { %739 = vmatmul.msk.bf16.vlgmr.msra.gmra.mxu2 %vm96_vm2, %v763_v10  ;;  %741 = vmatmul.msk.bf16.vlgmr.msra.gmra.mxu3 %vm96_vm2, %v765_v11 }
  0x1d   :  { %736 = vmatmul.msk.bf16.gmra.mxu0 %vm96_vm2, %v760_v12  ;;  %738 = vmatmul.msk.bf16.gmra.mxu1 %vm96_vm2, %v762_v13 }
  0x1e   :  { %740 = vmatmul.msk.bf16.gmra.mxu2 %vm96_vm2, %v764_v14  ;;  %742 = vmatmul.msk.bf16.gmra.mxu3 %vm96_vm2, %v766_v15 }
  0x8a   :  { %v137_v16 = vpop.f32.mrf.mxu0  ;;  %v147_v17 = vpop.f32.mrf.mxu1 }
  0x8b   :  { %v138_v27 = vadd.f32 %v776_v22, %v137_v16  ;;  %v148_v35 = vadd.f32 %v776_v22, %v147_v17 }
  0x8d   :  { %v178_v30 = vsel %vm177_vm3, %v138_v27, 0.0  ;;  %v185_v43 = vsel %vm177_vm3, %v148_v35, 0.0 }
  0x91   :  { %v157_v18 = vpop.f32.mrf.mxu2  ;;  %v167_v21 = vpop.f32.mrf.mxu3 }
  0x92   :  { %v139_v19 = vpop.f32.mrf.mxu0  ;;  %v149_v20 = vpop.f32.mrf.mxu1  ;;  %v158_v49 = vadd.f32 %v776_v22, %v157_v18  ;;  %v168_v63 = vadd.f32 %v776_v22, %v167_v21 }
  0x93   :  { %v919_v25 = vadd.f32 %v776_v22, %v139_v19  ;;  %v150_v39 = vadd.f32 %v776_v22, %v149_v20 }
  0x94   :  { %v193_v57 = vsel %vm177_vm3, %v158_v49, 0.0  ;;  %v201_v6 = vsel %vm177_vm3, %v168_v63, 0.0 }
  0x95   :  { %v179_v29 = vsel %vm177_vm3, %v919_v25, 0.0  ;;  %v187_v46 = vsel %vm177_vm3, %v150_v39, 0.0 }
  0x96   :  { %v180_v32 = vadd.f32 %v179_v29, %v178_v30 }
  0x99   :  { %v159_v24 = vpop.f32.mrf.mxu2  ;;  %v169_v34 = vpop.f32.mrf.mxu3 }
  0x9a   :  { %v142_v23 = vpop.f32.mrf.mxu0  ;;  %v152_v26 = vpop.f32.mrf.mxu1  ;;  %v160_v53 = vadd.f32 %v776_v22, %v159_v24  ;;  %v170_v2 = vadd.f32 %v776_v22, %v169_v34 }
  0x9b   :  { %v143_v28 = vadd.f32 %v776_v22, %v142_v23  ;;  %v153_v44 = vadd.f32 %v776_v22, %v152_v26 }
  0x9c   :  { %v195_v60 = vsel %vm177_vm3, %v160_v53, 0.0  ;;  %v203_v9 = vsel %vm177_vm3, %v170_v2, 0.0 }
  0x9d   :  { %v181_v31 = vsel %vm177_vm3, %v143_v28, 0.0  ;;  %v189_v50 = vsel %vm177_vm3, %v153_v44, 0.0 }
  0x9e   :  { %v182_v37 = vadd.f32 %v181_v31, %v180_v32 }
  0xa1   :  { %v162_v38 = vpop.f32.mrf.mxu2  ;;  %v172_v52 = vpop.f32.mrf.mxu3 }
  0xa2   :  { %v144_v33 = vpop.f32.mrf.mxu0  ;;  %v154_v42 = vpop.f32.mrf.mxu1  ;;  %v163_v58 = vadd.f32 %v776_v22, %v162_v38  ;;  %v173_v7 = vadd.f32 %v776_v22, %v172_v52 }
  0xa3   :  { %v145_v36 = vadd.f32 %v776_v22, %v144_v33  ;;  %v155_v47 = vadd.f32 %v776_v22, %v154_v42 }
  0xa4   :  { %v197_v0 = vsel %vm177_vm3, %v163_v58, 0.0  ;;  %v205_v12 = vsel %vm177_vm3, %v173_v7, 0.0 }
  0xa5   :  { %v183_v40 = vsel %vm177_vm3, %v145_v36, 0.0  ;;  %v191_v54 = vsel %vm177_vm3, %v155_v47, 0.0 }
  0xa6   :  { %v184_v41 = vadd.f32 %v183_v40, %v182_v37 }
  0xa8   :  { %v186_v45 = vadd.f32 %v185_v43, %v184_v41 }
  0xa9   :  { %v164_v56 = vpop.f32.mrf.mxu2  ;;  %v174_v5 = vpop.f32.mrf.mxu3 }
  0xaa   :  { %v188_v48 = vadd.f32 %v187_v46, %v186_v45  ;;  %v165_v61 = vadd.f32 %v776_v22, %v164_v56  ;;  %v175_v10 = vadd.f32 %v776_v22, %v174_v5 }
  0xac   :  { %v190_v51 = vadd.f32 %v189_v50, %v188_v48  ;;  %v199_v3 = vsel %vm177_vm3, %v165_v61, 0.0  ;;  %v207_v14 = vsel %vm177_vm3, %v175_v10, 0.0 }
  0xae   :  { %v192_v55 = vadd.f32 %v191_v54, %v190_v51 }
  0xb0   :  { %v194_v59 = vadd.f32 %v193_v57, %v192_v55 }
  0xb2   :  { %v196_v62 = vadd.f32 %v195_v60, %v194_v59 }
  0xb4   :  { %v198_v1 = vadd.f32 %v197_v0, %v196_v62 }
  0xb6   :  { %v200_v4 = vadd.f32 %v199_v3, %v198_v1 }
  0xb8   :  { %v202_v8 = vadd.f32 %v201_v6, %v200_v4 }
  0xba   :  { %v204_v11 = vadd.f32 %v203_v9, %v202_v8 }
  0xbc   :  { %v206_v13 = vadd.f32 %v205_v12, %v204_v11 }
  0xbe   :  { %v208_v15 = vadd.f32 %v207_v14, %v206_v13 }
  0xc0   :  { %v209_v16 = vrot.slane %v208_v15, 4 }
  0xc2   :  { %v210_v17 = vadd.f32 %v209_v16, %v208_v15 }
  0xc4   :  { %v211_v18 = vrot.slane %v210_v17, 2 }
  0xc6   :  { %v212_v19 = vadd.f32 %v211_v18, %v210_v17 }
  0xc8   :  { %v213_v20 = vrot.slane %v212_v19, 1 }
  0xca   :  { %v214_v21 = vadd.f32 %v213_v20, %v212_v19 }
  0xcc   :  { %v215_v23 = vmul.f32 0.0078125, %v214_v21 }
  0xce   :  { %v938_v24 = vsub.f32 %v138_v27, %v215_v23  ;;  %v941_v26 = vsub.f32 %v919_v25, %v215_v23  ;;  %v943_v22 = vsub.f32 %v143_v28, %v215_v23  ;;  %v945_v29 = vsub.f32 %v145_v36, %v215_v23 }
  0xcf   :  { %v951_v32 = vsub.f32 %v148_v35, %v215_v23  ;;  %v955_v27 = vsub.f32 %v150_v39, %v215_v23  ;;  %v961_v37 = vsub.f32 %v153_v44, %v215_v23  ;;  %v966_v41 = vsub.f32 %v155_v47, %v215_v23 }
  0xd0   :  { %v232_v30 = vmul.f32 %v938_v24, %v938_v24  ;;  %v233_v31 = vmul.f32 %v941_v26, %v941_v26  ;;  %v234_v33 = vmul.f32 %v943_v22, %v943_v22  ;;  %v235_v25 = vmul.f32 %v945_v29, %v945_v29 }
  0xd1   :  { %v236_v38 = vmul.f32 %v951_v32, %v951_v32  ;;  %v237_v39 = vmul.f32 %v955_v27, %v955_v27  ;;  %v971_v45 = vsub.f32 %v158_v49, %v215_v23  ;;  %v238_v44 = vmul.f32 %v961_v37, %v961_v37 }
  0xd2   :  { %v248_v28 = vsel %vm177_vm3, %v232_v30, 0.0  ;;  %v249_v34 = vsel %vm177_vm3, %v233_v31, 0.0  ;;  %v251_v35 = vsel %vm177_vm3, %v234_v33, 0.0  ;;  %v253_v42 = vsel %vm177_vm3, %v235_v25, 0.0 }
  0xd3   :  { %v250_v36 = vadd.f32 %v249_v34, %v248_v28  ;;  %v255_v46 = vsel %vm177_vm3, %v236_v38, 0.0  ;;  %v976_v50 = vsub.f32 %v160_v53, %v215_v23  ;;  %v239_v47 = vmul.f32 %v966_v41, %v966_v41 }
  0xd4   :  { %v257_v51 = vsel %vm177_vm3, %v237_v39, 0.0  ;;  %v226_v54 = vsub.f32 %v163_v58, %v215_v23  ;;  %v240_v55 = vmul.f32 %v971_v45, %v971_v45  ;;  %v259_v49 = vsel %vm177_vm3, %v238_v44, 0.0 }
  0xd5   :  { %v252_v40 = vadd.f32 %v251_v35, %v250_v36  ;;  %v984_v57 = vsub.f32 %v165_v61, %v215_v23  ;;  %v241_v59 = vmul.f32 %v976_v50, %v976_v50  ;;  %v261_v53 = vsel %vm177_vm3, %v239_v47, 0.0 }
  0xd6   :  { %v989_v62 = vsub.f32 %v168_v63, %v215_v23  ;;  %v242_v0 = vmul.f32 %v226_v54, %v226_v54  ;;  %v263_v1 = vsel %vm177_vm3, %v240_v55, 0.0  ;;  %v992_v3 = vsub.f32 %v170_v2, %v215_v23 }
  0xd7   :  { %v254_v43 = vadd.f32 %v253_v42, %v252_v40  ;;  %v243_v4 = vmul.f32 %v984_v57, %v984_v57  ;;  %v265_v61 = vsel %vm177_vm3, %v241_v59, 0.0  ;;  %v997_v6 = vsub.f32 %v173_v7, %v215_v23 }
  0xd8   :  { %v244_v8 = vmul.f32 %v989_v62, %v989_v62  ;;  %v267_v63 = vsel %vm177_vm3, %v242_v0, 0.0  ;;  %v1002_v11 = vsub.f32 %v175_v10, %v215_v23  ;;  %v245_v2 = vmul.f32 %v992_v3, %v992_v3 }
  0xd9   :  { %v256_v48 = vadd.f32 %v255_v46, %v254_v43  ;;  %v269_v12 = vsel %vm177_vm3, %v243_v4, 0.0  ;;  %v246_v14 = vmul.f32 %v997_v6, %v997_v6  ;;  %v286_v43 = vld [vmem:[%s1694_s3] sm:$0x1] }
  0xda   :  { %v271_v7 = vsel %vm177_vm3, %v244_v8, 0.0  ;;  %v247_v16 = vmul.f32 %v1002_v11, %v1002_v11  ;;  %v273_v17 = vsel %vm177_vm3, %v245_v2, 0.0 }
  0xdb   :  { %v258_v52 = vadd.f32 %v257_v51, %v256_v48  ;;  %v275_v10 = vsel %vm177_vm3, %v246_v14, 0.0 }
  0xdc   :  { %v277_v20 = vsel %vm177_vm3, %v247_v16, 0.0 }
  0xdd   :  { %v260_v56 = vadd.f32 %v259_v49, %v258_v52  ;;  %v1022_v52 = vld [vmem:[%s1693_s4] ss:$0 sm:$0xff] }
  0xdf   :  { %v262_v60 = vadd.f32 %v261_v53, %v260_v56 }
  0xe1   :  { %v264_v58 = vadd.f32 %v263_v1, %v262_v60 }
  0xe3   :  { %v266_v5 = vadd.f32 %v265_v61, %v264_v58 }
  0xe5   :  { %v268_v9 = vadd.f32 %v267_v63, %v266_v5 }
  0xe7   :  { %v270_v13 = vadd.f32 %v269_v12, %v268_v9 }
  0xe9   :  { %v272_v15 = vadd.f32 %v271_v7, %v270_v13 }
  0xeb   :  { %v274_v18 = vadd.f32 %v273_v17, %v272_v15 }
  0xed   :  { %v276_v19 = vadd.f32 %v275_v10, %v274_v18 }
  0xef   :  { %v278_v21 = vadd.f32 %v277_v20, %v276_v19 }
  0xf1   :  { %v279_v23 = vrot.slane %v278_v21, 4 }
  0xf3   :  { %v280_v30 = vadd.f32 %v279_v23, %v278_v21 }
  0xf5   :  { %v281_v31 = vrot.slane %v280_v30, 2 }
  0xf7   :  { %v282_v33 = vadd.f32 %v281_v31, %v280_v30 }
  0xf9   :  { %v283_v25 = vrot.slane %v282_v33, 1 }
  0xfb   :  { %v284_v28 = vadd.f32 %v283_v25, %v282_v33 }
  0xfd   :  { %v285_v34 = vmul.f32 0.0078125, %v284_v28 }
  0xff   :  { %v287_v36 = vadd.f32 1e-05, %v285_v34 }
 0x101   :  { %778 = vrsqrt.f32 %v287_v36  ;;  %vm294_vm5 = vweird.f32 %v287_v36 }
 0x107   :  { %v779_v38 = vpop.eup %778 }
 0x108   :  { %v289_v35 = vmul.f32 %v779_v38, %v287_v36  ;;  %vm295_vm4 = vweird.f32 %v779_v38 }
 0x109   :  { %vm296_vm6 = vmor %vm294_vm5, %vm295_vm4 }
 0x10a   :  { %v290_v40 = vmul.f32 %v779_v38, %v289_v35 }
 0x10c   :  { %v291_v39 = vmul.f32 0.5, %v290_v40 }
 0x10e   :  { %v292_v42 = vsub.f32 1.5, %v291_v39 }
 0x110   :  { %v293_v44 = vmul.f32 %v779_v38, %v292_v42 }
 0x112   :  { %v297_v46 = vsel %vm296_vm6, %v779_v38, %v293_v44 }
 0x113   :  { %v298_v48 = vmul.f32 %v297_v46, %v286_v43 }
 0x115   :  { %v300_v47 = vperm.slane %v298_v48, 0 }
 0x117   :  { %v302_v51 = vmul.f32 %v300_v47, %v938_v24  ;;  %v303_v55 = vmul.f32 %v300_v47, %v941_v26  ;;  %v311_v49 = vmul.f32 %v300_v47, %v976_v50  ;;  %v312_v56 = vmul.f32 %v300_v47, %v226_v54 }
 0x118   :  { %v304_v59 = vmul.f32 %v300_v47, %v943_v22  ;;  %v305_v53 = vmul.f32 %v300_v47, %v945_v29  ;;  %v306_v60 = vmul.f32 %v300_v47, %v951_v32  ;;  %v307_v24 = vmul.f32 %v300_v47, %v955_v27 }
 0x119   :  { %v1030_v0 = vadd.f32 %v1022_v52, %v302_v51  ;;  %v1034_v1 = vadd.f32 %v1022_v52, %v303_v55  ;;  %v308_v58 = vmul.f32 %v300_v47, %v961_v37  ;;  %v309_v22 = vmul.f32 %v300_v47, %v966_v41 }
 0x11a   :  { %v1038_v26 = vadd.f32 %v1022_v52, %v304_v59  ;;  %v1041_v50 = vadd.f32 %v1022_v52, %v305_v53  ;;  %v1045_v29 = vadd.f32 %v1022_v52, %v306_v60  ;;  %v310_v27 = vmul.f32 %v300_v47, %v971_v45 }
 0x11b   :  { %v743_v32 = vmul.f32 -1.442695, %v1030_v0  ;;  %v1050_v54 = vadd.f32 %v1022_v52, %v307_v24  ;;  %v744_v37 = vmul.f32 -1.442695, %v1034_v1  ;;  %v1054_v4 = vadd.f32 %v1022_v52, %v308_v58 }
 0x11c   :  { %v745_v61 = vmul.f32 -1.442695, %v1038_v26  ;;  %v746_v5 = vmul.f32 -1.442695, %v1041_v50  ;;  %v313_v41 = vmul.f32 %v300_v47, %v984_v57  ;;  %v1060_v8 = vadd.f32 %v1022_v52, %v309_v22 }
 0x11d   :  { %780 = vpow2.f32 %v743_v32  ;;  %v747_v45 = vmul.f32 -1.442695, %v1045_v29  ;;  %v1064_v63 = vadd.f32 %v1022_v52, %v310_v27  ;;  %v748_v9 = vmul.f32 -1.442695, %v1050_v54 }
 0x11e   :  { %782 = vpow2.f32 %v744_v37  ;;  %v1068_v2 = vadd.f32 %v1022_v52, %v311_v49  ;;  %v749_v12 = vmul.f32 -1.442695, %v1054_v4  ;;  %v1072_v57 = vadd.f32 %v1022_v52, %v312_v56 }
 0x11f   :  { %784 = vpow2.f32 %v745_v61  ;;  %v1075_v13 = vadd.f32 %v1022_v52, %v313_v41  ;;  %v750_v14 = vmul.f32 -1.442695, %v1060_v8  ;;  %v751_v7 = vmul.f32 -1.442695, %v1064_v63 }
 0x120   :  { %786 = vpow2.f32 %v746_v5  ;;  %v752_v16 = vmul.f32 -1.442695, %v1068_v2  ;;  %v753_v18 = vmul.f32 -1.442695, %v1072_v57  ;;  %v314_v19 = vmul.f32 %v300_v47, %v989_v62 }
 0x121   :  { %788 = vpow2.f32 %v747_v45  ;;  %v754_v20 = vmul.f32 -1.442695, %v1075_v13  ;;  %v315_v23 = vmul.f32 %v300_v47, %v992_v3  ;;  %v316_v33 = vmul.f32 %v300_v47, %v997_v6 }
 0x122   :  { %790 = vpow2.f32 %v748_v9  ;;  %v317_v36 = vmul.f32 %v300_v47, %v1002_v11  ;;  %v1093_v38 = vadd.f32 %v1022_v52, %v314_v19 }
 0x123   :  { %v781_v15 = vpop.eup %780  ;;  %792 = vpow2.f32 %v749_v12  ;;  %v1098_v35 = vadd.f32 %v1022_v52, %v315_v23  ;;  %v1104_v39 = vadd.f32 %v1022_v52, %v316_v33 }
 0x124   :  { %v783_v17 = vpop.eup %782  ;;  %794 = vpow2.f32 %v750_v14  ;;  %v1084_v30 = vadd.f32 1.0, %v781_v15  ;;  %v1113_v46 = vadd.f32 %v1022_v52, %v317_v36  ;;  %v755_v48 = vmul.f32 -1.442695, %v1093_v38 }
 0x125   :  { %v785_v10 = vpop.eup %784  ;;  %796 = vpow2.f32 %v751_v7  ;;  %v1087_v25 = vadd.f32 1.0, %v783_v17  ;;  %1698 = vst [vmem:[#allocation2_spill] sm:$0xff] %v1104_v39  ;;  %v756_v51 = vmul.f32 -1.442695, %v1098_v35  ;;  %v757_v49 = vmul.f32 -1.442695, %v1104_v39 }
 0x126   :  { %v787_v21 = vpop.eup %786  ;;  %798 = vpow2.f32 %v752_v16  ;;  %v1089_v34 = vadd.f32 1.0, %v785_v10  ;;  %1699 = vst [vmem:[#allocation3_spill] sm:$0xff] %v1113_v46  ;;  %v758_v59 = vmul.f32 -1.442695, %v1113_v46  ;;  %v413_v53 = vand.u32 2147483648, %v1084_v30 }
 0x127   :  { %v789_v31 = vpop.eup %788  ;;  %800 = vpow2.f32 %v753_v18  ;;  %v1095_v3 = vadd.f32 1.0, %v787_v21  ;;  %v428_v24 = vand.u32 2147483648, %v1087_v25  ;;  %v411_v27 = vand.u32 2147483647, %v1084_v30 }
 0x128   :  { %v791_v28 = vpop.eup %790  ;;  %802 = vpow2.f32 %v754_v20  ;;  %v1100_v6 = vadd.f32 1.0, %v789_v31  ;;  %v426_v61 = vand.u32 2147483647, %v1087_v25  ;;  %v1143_v41 = vor.u32 1.1754944e-38, %v413_v53 }
 0x129   :  { %v793_v62 = vpop.eup %792  ;;  %804 = vrcp.f32 %v1084_v30  ;;  %v1106_v42 = vadd.f32 1.0, %v791_v28  ;;  %v443_v9 = vand.u32 2147483648, %v1089_v34  ;;  %v1152_v7 = vor.u32 1.1754944e-38, %v428_v24 }
 0x12a   :  { %v795_v40 = vpop.eup %794  ;;  %806 = vrcp.f32 %v1087_v25  ;;  %v1109_v43 = vadd.f32 1.0, %v793_v62  ;;  %v441_v15 = vand.u32 2147483647, %v1089_v34  ;;  %v458_v19 = vand.u32 2147483648, %v1095_v3 }
 0x12b   :  { %v797_v11 = vpop.eup %796  ;;  %808 = vrcp.f32 %v1089_v34  ;;  %v1150_v14 = vadd.f32 1.0, %v795_v40  ;;  %v456_v33 = vand.u32 2147483647, %v1095_v3  ;;  %vm407_vm7 = vweird.f32 %v1084_v30 }
 0x12c   :  { %v799_v44 = vpop.eup %798  ;;  %810 = vrcp.f32 %v1095_v3  ;;  %v1157_v18 = vadd.f32 1.0, %v797_v11  ;;  %v1170_v11 = vor.u32 1.1754944e-38, %v443_v9  ;;  %vm422_vm8 = vweird.f32 %v1087_v25 }
 0x12d   :  { %v801_v47 = vpop.eup %800  ;;  %812 = vrcp.f32 %v1100_v6  ;;  %v1159_v10 = vadd.f32 1.0, %v799_v44  ;;  %vm437_vm9 = vweird.f32 %v1089_v34  ;;  %v1183_v24 = vor.u32 1.1754944e-38, %v458_v19 }
 0x12e   :  { %v803_v55 = vpop.eup %802  ;;  %814 = vrcp.f32 %v1106_v42  ;;  %v1167_v36 = vadd.f32 1.0, %v801_v47  ;;  %vm452_vm10 = vweird.f32 %v1095_v3  ;;  %vm1197_vm12 = vcmp.eq.f32.partialorder %v411_v27, 8.507059e+37 }
 0x12f   :  { %v1121_v56 = vpop.eup %804  ;;  %816 = vrcp.f32 %v1109_v43  ;;  %vm1201_vm13 = vcmp.eq.f32.partialorder %v426_v61, 8.507059e+37  ;;  %vm1211_vm0 = vcmp.eq.f32.partialorder %v441_v15, 8.507059e+37  ;;  %vm1221_vm3 = vcmp.eq.f32.partialorder %v456_v33, 8.507059e+37 }
 0x130   :  { %v1124_v52 = vpop.eup %806  ;;  %818 = vpow2.f32 %v755_v48  ;;  %v403_v32 = vmul.f32 %v1121_v56, %v1084_v30  ;;  %v1174_v48 = vadd.f32 1.0, %v803_v55  ;;  %vm408_vm15 = vweird.f32 %v1121_v56 }
 0x131   :  { %v1128_v60 = vpop.eup %808  ;;  %820 = vpow2.f32 %v756_v51  ;;  %v418_v37 = vmul.f32 %v1124_v52, %v1087_v25  ;;  %vm423_vm2 = vweird.f32 %v1124_v52  ;;  %vm1238_vm6 = vmor %vm407_vm7, %vm408_vm15 }
 0x132   :  { %v1131_v58 = vpop.eup %810  ;;  %822 = vpow2.f32 %v757_v49  ;;  %v433_v45 = vmul.f32 %v1128_v60, %v1089_v34  ;;  %v404_v23 = vsub.f32 1.0, %v403_v32  ;;  %vm438_vm4 = vweird.f32 %v1128_v60  ;;  %vm1256_vm7 = vmor %vm422_vm8, %vm423_vm2 }
 0x133   :  { %v1133_v22 = vpop.eup %812  ;;  %824 = vpow2.f32 %v758_v59  ;;  %v448_v16 = vmul.f32 %v1131_v58, %v1095_v3  ;;  %v419_v31 = vsub.f32 1.0, %v418_v37  ;;  %v473_v59 = vand.u32 2147483648, %v1100_v6  ;;  %vm1274_vm8 = vmor %vm437_vm9, %vm438_vm4 }
 0x134   :  { %v1141_v5 = vpop.eup %814  ;;  %v463_v20 = vmul.f32 %v1133_v22, %v1100_v6  ;;  %v434_v40 = vsub.f32 1.0, %v433_v45  ;;  %v471_v37 = vand.u32 2147483647, %v1100_v6  ;;  %v405_v55 = vmul.f32 %v1121_v56, %v404_v23 }
 0x135   :  { %v1148_v12 = vpop.eup %816  ;;  %v478_v28 = vmul.f32 %v1141_v5, %v1106_v42  ;;  %v449_v49 = vsub.f32 1.0, %v448_v16  ;;  %v420_v9 = vmul.f32 %v1124_v52, %v419_v31  ;;  %826 = vrcp.f32 %v1150_v14 }
 0x136   :  { %v819_v17 = vpop.eup %818  ;;  %v493_v44 = vmul.f32 %v1148_v12, %v1109_v43  ;;  %v464_v32 = vsub.f32 1.0, %v463_v20  ;;  %828 = vrcp.f32 %v1157_v18  ;;  %v406_v61 = vadd.f32 %v1121_v56, %v405_v55 }
 0x137   :  { %v821_v21 = vpop.eup %820  ;;  %v1176_v51 = vadd.f32 1.0, %v819_v17  ;;  %v479_v16 = vsub.f32 1.0, %v478_v28  ;;  %v435_v17 = vmul.f32 %v1128_v60, %v434_v40  ;;  %v450_v31 = vmul.f32 %v1131_v58, %v449_v49 }
 0x138   :  { %v823_v62 = vpop.eup %822  ;;  %v1180_v47 = vadd.f32 1.0, %v821_v21  ;;  %v486_v21 = vand.u32 2147483647, %v1106_v42  ;;  %v494_v19 = vsub.f32 1.0, %v493_v44  ;;  %v1206_v28 = vor.u32 1.1754944e-38, %v473_v59 }
 0x139   :  { %v825_v53 = vpop.eup %824  ;;  %v1186_v45 = vadd.f32 1.0, %v823_v62  ;;  %v488_v40 = vand.u32 2147483648, %v1106_v42  ;;  %v465_v27 = vmul.f32 %v1133_v22, %v464_v32  ;;  %v421_v49 = vadd.f32 %v1124_v52, %v420_v9 }
 0x13a   :  { %v1195_v20 = vadd.f32 1.0, %v825_v53  ;;  %v480_v15 = vmul.f32 %v1141_v5, %v479_v16  ;;  %v436_v53 = vadd.f32 %v1128_v60, %v435_v17  ;;  %vm1228_vm5 = vcmp.eq.f32.partialorder %v471_v37, 8.507059e+37 }
 0x13b   :  { %v495_v55 = vmul.f32 %v1148_v12, %v494_v19  ;;  %830 = vrcp.f32 %v1159_v10  ;;  %v451_v9 = vadd.f32 %v1131_v58, %v450_v31  ;;  %vm453_vm1 = vweird.f32 %v1131_v58  ;;  %v1250_v17 = vpop.eup %826 }
 0x13c   :  { %vm1244_vm14 = vcmp.eq.f32.partialorder %v486_v21, 8.507059e+37  ;;  %v501_v16 = vand.u32 2147483647, %v1109_v43  ;;  %832 = vrcp.f32 %v1167_v36  ;;  %v466_v19 = vadd.f32 %v1133_v22, %v465_v27  ;;  %v1280_v39 = vpop.eup %828 }
 0x13d   :  { %vm468_vm15 = vweird.f32 %v1133_v22  ;;  %vm483_vm11 = vweird.f32 %v1141_v5  ;;  %v503_v21 = vand.u32 2147483648, %v1109_v43  ;;  %v410_v31 = vsel %vm1238_vm6, %v1121_v56, %v406_v61  ;;  %vm1289_vm6 = vmor %vm452_vm10, %vm453_vm1 }
 0x13e   :  { %v425_v25 = vsel %vm1256_vm7, %v1124_v52, %v421_v49  ;;  %v481_v46 = vadd.f32 %v1141_v5, %v480_v15  ;;  %vm498_vm2 = vweird.f32 %v1148_v12  ;;  %v440_v56 = vsel %vm1274_vm8, %v1128_v60, %v436_v53 }
 0x13f   :  { %v496_v52 = vadd.f32 %v1148_v12, %v495_v55  ;;  %v508_v61 = vmul.f32 %v1250_v17, %v1150_v14  ;;  %834 = vrcp.f32 %v1174_v48  ;;  %v455_v49 = vsel %vm1289_vm6, %v1131_v58, %v451_v9 }
 0x140   :  { %vm1720_vm9 = vweird.f32 %v1100_v6  ;;  %v489_v60 = vor.u32 1.1754944e-38, %v488_v40  ;;  %vm1308_vm10 = vcmp.eq.f32.partialorder %v501_v16, 8.507059e+37  ;;  %v523_v53 = vmul.f32 %v1280_v39, %v1157_v18 }
 0x141   :  { %vm1304_vm4 = vmor %vm1720_vm9, %vm468_vm15  ;;  %v1314_v55 = vpop.eup %830  ;;  %v1319_v58 = vsel %vm1197_vm12, %v1143_v41, %v410_v31  ;;  %v1324_v6 = vsel %vm1201_vm13, %v1152_v7, %v425_v25  ;;  %vm1725_vm1 = vweird.f32 %v1106_v42  ;;  %836 = vrcp.f32 %v1176_v51 }
 0x142   :  { %v470_v40 = vsel %vm1304_vm4, %v1133_v22, %v466_v19  ;;  %vm1333_vm7 = vmor %vm1725_vm1, %vm483_vm11  ;;  %v1338_v41 = vpop.eup %832  ;;  %v1343_v7 = vsel %vm1211_vm0, %v1170_v11, %v440_v56  ;;  %vm1728_vm11 = vweird.f32 %v1109_v43  ;;  %v504_v62 = vor.u32 1.1754944e-38, %v503_v21 }
 0x143   :  { %v485_v22 = vsel %vm1333_vm7, %v1141_v5, %v481_v46  ;;  %vm1352_vm12 = vmor %vm1728_vm11, %vm498_vm2  ;;  %v538_v23 = vmul.f32 %v1314_v55, %v1159_v10  ;;  %v1361_v11 = vsel %vm1221_vm3, %v1183_v24, %v455_v49  ;;  %v509_v5 = vsub.f32 1.0, %v508_v61 }
 0x144   :  { %v500_v46 = vsel %vm1352_vm12, %v1148_v12, %v496_v52  ;;  %v553_v43 = vmul.f32 %v1338_v41, %v1167_v36  ;;  %v1371_v44 = vsel %vm1228_vm5, %v1206_v28, %v470_v40  ;;  %v516_v9 = vand.u32 2147483647, %v1150_v14 }
 0x145   :  { %v518_v16 = vand.u32 2147483648, %v1150_v14  ;;  %v524_v59 = vsub.f32 1.0, %v523_v53  ;;  %v1375_v24 = vpop.eup %834  ;;  %v1379_v30 = vsel %vm1244_vm14, %v489_v60, %v485_v22  ;;  %vm512_vm13 = vweird.f32 %v1150_v14 }
 0x146   :  { %v533_v12 = vand.u32 2147483648, %v1157_v18  ;;  %v539_v19 = vsub.f32 1.0, %v538_v23  ;;  %838 = vrcp.f32 %v1180_v47  ;;  %v1386_v28 = vsel %vm1308_vm10, %v504_v62, %v500_v46 }
 0x147   :  { %v531_v32 = vand.u32 2147483647, %v1157_v18  ;;  %v554_v21 = vsub.f32 1.0, %v553_v43  ;;  %v568_v31 = vmul.f32 %v1375_v24, %v1174_v48  ;;  %v1391_v37 = vpop.eup %836  ;;  %v510_v25 = vmul.f32 %v1250_v17, %v509_v5 }
 0x148   :  { %vm527_vm14 = vweird.f32 %v1157_v18  ;;  %v546_v27 = vand.u32 2147483647, %v1159_v10  ;;  %v548_v56 = vand.u32 2147483648, %v1159_v10  ;;  %v519_v34 = vor.u32 1.1754944e-38, %v518_v16 }
 0x149   :  { %v525_v52 = vmul.f32 %v1280_v39, %v524_v59  ;;  %v561_v61 = vand.u32 2147483647, %v1167_v36  ;;  %v569_v49 = vsub.f32 1.0, %v568_v31  ;;  %vm1399_vm0 = vcmp.eq.f32.partialorder %v516_v9, 8.507059e+37 }
 0x14a   :  { %v534_v60 = vor.u32 1.1754944e-38, %v533_v12  ;;  %v540_v15 = vmul.f32 %v1314_v55, %v539_v19  ;;  %vm542_vm3 = vweird.f32 %v1159_v10  ;;  %v583_v53 = vmul.f32 %v1391_v37, %v1176_v51 }
 0x14b   :  { %vm513_vm5 = vweird.f32 %v1250_v17  ;;  %vm1408_vm15 = vcmp.eq.f32.partialorder %v531_v32, 8.507059e+37  ;;  %v555_v33 = vmul.f32 %v1338_v41, %v554_v21  ;;  %vm557_vm8 = vweird.f32 %v1167_v36 }
 0x14c   :  { %v563_v22 = vand.u32 2147483648, %v1167_v36  ;;  %v1415_v42 = vpop.eup %838  ;;  %v511_v62 = vadd.f32 %v1250_v17, %v510_v25  ;;  %vm528_vm2 = vweird.f32 %v1280_v39  ;;  %vm1419_vm6 = vcmp.eq.f32.partialorder %v546_v27, 8.507059e+37  ;;  %vm1440_vm10 = vmor %vm512_vm13, %vm513_vm5 }
 0x14d   :  { %v549_v46 = vor.u32 1.1754944e-38, %v548_v56  ;;  %840 = vrcp.f32 %v1186_v45  ;;  %v526_v5 = vadd.f32 %v1280_v39, %v525_v52  ;;  %vm1425_vm9 = vcmp.eq.f32.partialorder %v561_v61, 8.507059e+37  ;;  %vm1454_vm11 = vmor %vm527_vm14, %vm528_vm2 }
 0x14e   :  { %v570_v9 = vmul.f32 %v1375_v24, %v569_v49  ;;  %v576_v16 = vand.u32 2147483647, %v1174_v48  ;;  %v578_v59 = vand.u32 2147483648, %v1174_v48  ;;  %v541_v12 = vadd.f32 %v1314_v55, %v540_v15 }
 0x14f   :  { %vm543_vm4 = vweird.f32 %v1314_v55  ;;  %v584_v19 = vsub.f32 1.0, %v583_v53  ;;  %v598_v32 = vmul.f32 %v1415_v42, %v1180_v47  ;;  %v556_v31 = vadd.f32 %v1338_v41, %v555_v33 }
 0x150   :  { %vm558_vm1 = vweird.f32 %v1338_v41  ;;  %v564_v25 = vor.u32 1.1754944e-38, %v563_v22  ;;  %vm572_vm7 = vweird.f32 %v1174_v48  ;;  %v515_v27 = vsel %vm1440_vm10, %v1250_v17, %v511_v62  ;;  %vm1469_vm13 = vmor %vm542_vm3, %vm543_vm4 }
 0x151   :  { %vm587_vm12 = vweird.f32 %v1176_v51  ;;  %v591_v56 = vand.u32 2147483647, %v1176_v51  ;;  %v593_v52 = vand.u32 2147483648, %v1176_v51  ;;  %842 = vrcp.f32 %v1195_v20  ;;  %vm1488_vm3 = vmor %vm557_vm8, %vm558_vm1 }
 0x152   :  { %v530_v17 = vsel %vm1454_vm11, %v1280_v39, %v526_v5  ;;  %v571_v61 = vadd.f32 %v1375_v24, %v570_v9  ;;  %vm573_vm14 = vweird.f32 %v1375_v24  ;;  %vm1475_vm5 = vcmp.eq.f32.partialorder %v576_v16, 8.507059e+37 }
 0x153   :  { %v1479_v15 = vpop.eup %840  ;;  %v545_v39 = vsel %vm1469_vm13, %v1314_v55, %v541_v12  ;;  %v579_v53 = vor.u32 1.1754944e-38, %v578_v59  ;;  %v585_v33 = vmul.f32 %v1391_v37, %v584_v19  ;;  %v599_v22 = vsub.f32 1.0, %v598_v32  ;;  %vm1505_vm8 = vmor %vm572_vm7, %vm573_vm14 }
 0x154   :  { %v520_v62 = vsel %vm1399_vm0, %v519_v34, %v515_v27  ;;  %v560_v5 = vsel %vm1488_vm3, %v1338_v41, %v556_v31  ;;  %v608_v55 = vand.u32 2147483648, %v1180_v47  ;;  %v613_v36 = vmul.f32 %v1479_v15, %v1186_v45 }
 0x155   :  { %v535_v9 = vsel %vm1408_vm15, %v534_v60, %v530_v17  ;;  %vm588_vm0 = vweird.f32 %v1391_v37  ;;  %v594_v34 = vor.u32 1.1754944e-38, %v593_v52  ;;  %vm602_vm2 = vweird.f32 %v1180_v47 }
 0x156   :  { %v606_v41 = vand.u32 2147483647, %v1180_v47  ;;  %v550_v3 = vsel %vm1419_vm6, %v549_v46, %v545_v39  ;;  %v575_v60 = vsel %vm1505_vm8, %v1375_v24, %v571_v61  ;;  %v614_v40 = vsub.f32 1.0, %v613_v36  ;;  %vm1548_vm10 = vmor %vm587_vm12, %vm588_vm0 }
 0x157   :  { %v621_v48 = vand.u32 2147483647, %v1186_v45  ;;  %v1518_v59 = vpop.eup %842  ;;  %v565_v12 = vsel %vm1425_vm9, %v564_v25, %v560_v5  ;;  %v586_v19 = vadd.f32 %v1391_v37, %v585_v33  ;;  %v600_v32 = vmul.f32 %v1415_v42, %v599_v22 }
 0x158   :  { %vm603_vm15 = vweird.f32 %v1415_v42  ;;  %vm1525_vm4 = vcmp.eq.f32.partialorder %v591_v56, 8.507059e+37  ;;  %v609_v46 = vor.u32 1.1754944e-38, %v608_v55  ;;  %v615_v24 = vmul.f32 %v1479_v15, %v614_v40 }
 0x159   :  { %v628_v21 = vmul.f32 %v1518_v59, %v1195_v20  ;;  %v642_v43 = vmul.f32 %v1319_v58, %v1030_v0  ;;  %v580_v31 = vsel %vm1475_vm5, %v579_v53, %v575_v60  ;;  %vm1536_vm6 = vcmp.eq.f32.partialorder %v606_v41, 8.507059e+37  ;;  %vm1578_vm13 = vmor %vm602_vm2, %vm603_vm15 }
 0x15a   :  { %vm617_vm9 = vweird.f32 %v1186_v45  ;;  %v623_v27 = vand.u32 2147483648, %v1186_v45  ;;  %v643_v14 = vmul.f32 %v1324_v6, %v1034_v1  ;;  %vm1552_vm1 = vcmp.eq.f32.partialorder %v621_v48, 8.507059e+37 }
 0x15b   :  { %v629_v56 = vsub.f32 1.0, %v628_v21  ;;  %vm632_vm7 = vweird.f32 %v1195_v20  ;;  %v644_v52 = vmul.f32 %v1343_v7, %v1038_v26  ;;  %v590_v1 = vsel %vm1548_vm10, %v1391_v37, %v586_v19 }
 0x15c   :  { %v601_v51 = vadd.f32 %v1415_v42, %v600_v32  ;;  %vm618_vm11 = vweird.f32 %v1479_v15  ;;  %v645_v6 = vmul.f32 %v1361_v11, %v1041_v50  ;;  %v616_v17 = vadd.f32 %v1479_v15, %v615_v24 }
 0x15d   :  { %v630_v18 = vmul.f32 %v1518_v59, %v629_v56  ;;  %v646_v61 = vmul.f32 %v1371_v44, %v1045_v29  ;;  %v658_v49 = vpack.c.bf16 %v642_v43, %v642_v43  ;;  %vm633_vm12 = vweird.f32 %v1518_v59  ;;  %vm1593_vm14 = vmor %vm617_vm9, %vm618_vm11 }
 0x15e   :  { %v636_v26 = vand.u32 2147483647, %v1195_v20  ;;  %v647_v7 = vmul.f32 %v1379_v30, %v1050_v54  ;;  %v659_v37 = vpack.c.bf16 %v643_v14, %v643_v14  ;;  %v638_v29 = vand.u32 2147483648, %v1195_v20  ;;  %vm1605_vm3 = vmor %vm632_vm7, %vm633_vm12 }
 0x15f   :  { %v631_v11 = vadd.f32 %v1518_v59, %v630_v18  ;;  %v648_v44 = vmul.f32 %v1386_v28, %v1054_v4  ;;  %v660_v39 = vpack.c.bf16 %v644_v52, %v644_v52  ;;  %v605_v54 = vsel %vm1578_vm13, %v1415_v42, %v601_v51 }
 0x160   :  { %v649_v30 = vmul.f32 %v520_v62, %v1060_v8  ;;  %v661_v10 = vpack.c.bf16 %v645_v6, %v645_v6  ;;  %vm674_vm5 = vcmask 125952   ;;  %v620_v4 = vsel %vm1593_vm14, %v1479_v15, %v616_v17 }
 0x161   :  { %v624_v28 = vor.u32 1.1754944e-38, %v623_v27  ;;  %v650_v45 = vmul.f32 %v535_v9, %v1064_v63  ;;  %v662_v53 = vpack.c.bf16 %v646_v61, %v646_v61  ;;  %675 = vst.msk [vmem:[%s1695_s5] sm:$0xf] %vm674_vm5, %v658_v49  ;;  %v595_v8 = vsel %vm1525_vm4, %v594_v34, %v590_v1 }
 0x162   :  { %v635_v15 = vsel %vm1605_vm3, %v1518_v59, %v631_v11  ;;  %v651_v20 = vmul.f32 %v550_v3, %v1068_v2  ;;  %v663_v33 = vpack.c.bf16 %v647_v7, %v647_v7  ;;  %676 = vst.msk [vmem:[%s1695_s5 + $0x4] sm:$0xf] %vm674_vm5, %v659_v37  ;;  %v610_v63 = vsel %vm1536_vm6, %v609_v46, %v605_v54 }
 0x163   :  { %v639_v22 = vor.u32 1.1754944e-38, %v638_v29  ;;  %v652_v62 = vmul.f32 %v565_v12, %v1072_v57  ;;  %v664_v5 = vpack.c.bf16 %v648_v44, %v648_v44  ;;  %677 = vst.msk [vmem:[%s1695_s5 + $0x8] sm:$0xf] %vm674_vm5, %v660_v39  ;;  %v625_v2 = vsel %vm1552_vm1, %v624_v28, %v620_v4 }
 0x164   :  { %vm637_vm8 = vcmp.eq.f32.partialorder %v636_v26, 8.507059e+37  ;;  %v653_v55 = vmul.f32 %v580_v31, %v1075_v13  ;;  %v665_v36 = vpack.c.bf16 %v649_v30, %v649_v30  ;;  %678 = vst.msk [vmem:[%s1695_s5 + $0xc] sm:$0xf] %vm674_vm5, %v661_v10  ;;  %v654_v57 = vmul.f32 %v595_v8, %v1093_v38  ;;  %v1765_v13 = vld [vmem:[#allocation2_spill] sm:$0xff]  ;;  %v1766_v38 = vld [vmem:[#allocation3_spill] sm:$0xff] }
 0x165   :  { %v640_v9 = vsel %vm637_vm8, %v639_v22, %v635_v15  ;;  %v666_v16 = vpack.c.bf16 %v650_v45, %v650_v45  ;;  %679 = vst.msk [vmem:[%s1695_s5 + $0x10] sm:$0xf] %vm674_vm5, %v662_v53  ;;  %v655_v34 = vmul.f32 %v610_v63, %v1098_v35  ;;  %v667_v41 = vpack.c.bf16 %v651_v20, %v651_v20 }
 0x166   :  { %680 = vst.msk [vmem:[%s1695_s5 + $0x14] sm:$0xf] %vm674_vm5, %v663_v33  ;;  %v656_v3 = vmul.f32 %v625_v2, %v1765_v13  ;;  %v668_v60 = vpack.c.bf16 %v652_v62, %v652_v62  ;;  %v657_v40 = vmul.f32 %v640_v9, %v1766_v38  ;;  %v669_v48 = vpack.c.bf16 %v653_v55, %v653_v55 }
 0x167   :  { %681 = vst.msk [vmem:[%s1695_s5 + $0x18] sm:$0xf] %vm674_vm5, %v664_v5  ;;  %v670_v35 = vpack.c.bf16 %v654_v57, %v654_v57  ;;  %v671_v59 = vpack.c.bf16 %v655_v34, %v655_v34 }
 0x168   :  { %682 = vst.msk [vmem:[%s1695_s5 + $0x1c] sm:$0xf] %vm674_vm5, %v665_v36  ;;  %v672_v12 = vpack.c.bf16 %v656_v3, %v656_v3  ;;  %v673_v19 = vpack.c.bf16 %v657_v40, %v657_v40 }
 0x169   :  { %683 = vst.msk [vmem:[%s1695_s5 + $0x20] sm:$0xf] %vm674_vm5, %v666_v16 }
 0x16a   :  { %684 = vst.msk [vmem:[%s1695_s5 + $0x24] sm:$0xf] %vm674_vm5, %v667_v41 }
 0x16b   :  { %685 = vst.msk [vmem:[%s1695_s5 + $0x28] sm:$0xf] %vm674_vm5, %v668_v60 }
 0x16c   :  { %686 = vst.msk [vmem:[%s1695_s5 + $0x2c] sm:$0xf] %vm674_vm5, %v669_v48 }
 0x16d   :  { %687 = vst.msk [vmem:[%s1695_s5 + $0x30] sm:$0xf] %vm674_vm5, %v670_v35 }
 0x16e   :  { %688 = vst.msk [vmem:[%s1695_s5 + $0x34] sm:$0xf] %vm674_vm5, %v671_v59 }
 0x16f   :  { %689 = vst.msk [vmem:[%s1695_s5 + $0x38] sm:$0xf] %vm674_vm5, %v672_v12 }
 0x170   :  { %690 = vst.msk [vmem:[%s1695_s5 + $0x3c] sm:$0xf] %vm674_vm5, %v673_v19 }

// kernel: vqvae_forward.27
= control target key start
LH: loop header
LB: loop body
LE: loop exit
PB: predicated region body
PF: predicated region fallthrough
CT: control target
= control target key end

     0   :  { %vm185_vm0 = vcmask 130048   ;;  %s3029_s1 = inlined_call_operand.vmem [shape: bf16[144,16], index: 1, kind: input, shape index: {}]   ;;  %s3030_s0 = inlined_call_operand.vmem [shape: bf16[128,144], index: 0, kind: input, shape index: {}]   ;;  %s3031_s2 = inlined_call_operand.vmem [shape: f32[1,16], index: 2, kind: input, shape index: {}]   ;;  %s3032_s4 = inlined_call_operand.vmem [shape: f32[1,16], index: 4, kind: input, shape index: {}]   ;;  %s3033_s3 = inlined_call_operand.vmem [shape: f32[1,16], index: 3, kind: input, shape index: {}]   ;;  %s3034_s5 = inlined_call_operand.vmem [shape: bf16[128,16], index: 5, kind: output, shape index: {}]  }
   0x1   :  { %v1308_v0 = vld [vmem:[%s3029_s1 + $0x38] sm:$0xff]  ;;  %v1309_v1 = vld [vmem:[%s3029_s1 + $0x40] sm:$0xff]  ;;  %v1149_v3 = vld [vmem:[%s3030_s0 + $0x8] sm:$0xf0] }
   0x2   :  { %v1285_v2 = vld [vmem:[%s3030_s0 + $0x4] sm:$0xf]  ;;  %210 = vmatpush.bf16.msra.mxu0 %v1308_v0  ;;  %266 = vmatpush.bf16.msra.mxu1 %v1309_v1  ;;  %v1307_v5 = vld [vmem:[%s3029_s1 + $0x30] sm:$0xff]  ;;  %v1306_v6 = vld [vmem:[%s3029_s1 + $0x28] sm:$0xff] }
   0x3   :  { %v1152_v4 = vor.u32 %v1285_v2, %v1149_v3  ;;  %1310 = vmatpush.bf16.msra.mxu2 %v1308_v0  ;;  %1318 = vmatpush.bf16.msra.mxu3 %v1309_v1  ;;  %v1305_v7 = vld [vmem:[%s3029_s1 + $0x20] sm:$0xff]  ;;  %v1304_v8 = vld [vmem:[%s3029_s1 + $0x18] sm:$0xff]  ;;  %v1287_v9 = vld [vmem:[%s3030_s0 + $0x14] sm:$0xf] }
   0x4   :  { %v1157_v10 = vld [vmem:[%s3030_s0 + $0x18] sm:$0xf0]  ;;  %v1303_v12 = vld [vmem:[%s3029_s1 + $0x10] sm:$0xff]  ;;  %v1302_v16 = vld [vmem:[%s3029_s1 + $0x8] sm:$0xff] }
   0x5   :  { %1245 = vmatmul.msk.bf16.vlgmr.msra.gmra.mxu1 %vm185_vm0, %v1152_v4  ;;  %v1160_v11 = vor.u32 %v1287_v9, %v1157_v10  ;;  %v1295_v13 = vld [vmem:[%s3030_s0 + $0x54] sm:$0xf]  ;;  %v1189_v14 = vld [vmem:[%s3030_s0 + $0x58] sm:$0xf0]  ;;  %v1301_v17 = vld [vmem:[%s3029_s1] sm:$0xff] }
   0x6   :  { %211 = vmatpush.bf16.msra.mxu0 %v1307_v5  ;;  %v1192_v15 = vor.u32 %v1295_v13, %v1189_v14  ;;  %v1147_v18 = vld [vmem:[%s3030_s0] sm:$0xf]  ;;  %v1286_v19 = vld [vmem:[%s3030_s0 + $0x4] sm:$0xf0]  ;;  %v1289_v24 = vld [vmem:[%s3030_s0 + $0x24] sm:$0xf] }
   0x7   :  { %1311 = vmatpush.bf16.msra.mxu2 %v1307_v5  ;;  %v1179_v20 = vld [vmem:[%s3030_s0 + $0x40] sm:$0xf]  ;;  %v1294_v21 = vld [vmem:[%s3030_s0 + $0x44] sm:$0xf0]  ;;  %v1148_v22 = vor.u32 %v1286_v19, %v1147_v18  ;;  %v1165_v25 = vld [vmem:[%s3030_s0 + $0x28] sm:$0xf0] }
   0x8   :  { %1250 = vmatmul.msk.bf16.vlgmr.msra.gmra.mxu3 %vm185_vm0, %v1192_v15  ;;  %v1180_v23 = vor.u32 %v1294_v21, %v1179_v20  ;;  %v1168_v26 = vor.u32 %v1289_v24, %v1165_v25  ;;  %v1297_v27 = vld [vmem:[%s3030_s0 + $0x64] sm:$0xf]  ;;  %v1197_v28 = vld [vmem:[%s3030_s0 + $0x68] sm:$0xf0]  ;;  %v1155_v30 = vld [vmem:[%s3030_s0 + $0x10] sm:$0xf] }
   0x9   :  { %v1200_v29 = vor.u32 %v1297_v27, %v1197_v28  ;;  %v1288_v31 = vld [vmem:[%s3030_s0 + $0x14] sm:$0xf0]  ;;  %v1187_v32 = vld [vmem:[%s3030_s0 + $0x50] sm:$0xf]  ;;  %v1291_v36 = vld [vmem:[%s3030_s0 + $0x34] sm:$0xf] }
   0xa   :  { %212 = vmatpush.bf16.msra.mxu0 %v1306_v6  ;;  %v1296_v33 = vld [vmem:[%s3030_s0 + $0x54] sm:$0xf0]  ;;  %v1156_v34 = vor.u32 %v1288_v31, %v1155_v30  ;;  %v1173_v37 = vld [vmem:[%s3030_s0 + $0x38] sm:$0xf0]  ;;  %v1299_v39 = vld [vmem:[%s3030_s0 + $0x74] sm:$0xf] }
   0xb   :  { %1312 = vmatpush.bf16.msra.mxu2 %v1306_v6  ;;  %v1188_v35 = vor.u32 %v1296_v33, %v1187_v32  ;;  %v1176_v38 = vor.u32 %v1291_v36, %v1173_v37  ;;  %v1205_v40 = vld [vmem:[%s3030_s0 + $0x78] sm:$0xf0]  ;;  %v1163_v42 = vld [vmem:[%s3030_s0 + $0x20] sm:$0xf]  ;;  %v1290_v43 = vld [vmem:[%s3030_s0 + $0x24] sm:$0xf0] }
   0xc   :  { %v1208_v41 = vor.u32 %v1299_v39, %v1205_v40  ;;  %v1195_v44 = vld [vmem:[%s3030_s0 + $0x60] sm:$0xf]  ;;  %v1298_v45 = vld [vmem:[%s3030_s0 + $0x64] sm:$0xf0]  ;;  %v1164_v46 = vor.u32 %v1290_v43, %v1163_v42  ;;  %v1293_v48 = vld [vmem:[%s3030_s0 + $0x44] sm:$0xf] }
   0xd   :  { %v1196_v47 = vor.u32 %v1298_v45, %v1195_v44  ;;  %v1181_v49 = vld [vmem:[%s3030_s0 + $0x48] sm:$0xf0]  ;;  %v1171_v51 = vld [vmem:[%s3030_s0 + $0x30] sm:$0xf]  ;;  %v1292_v52 = vld [vmem:[%s3030_s0 + $0x34] sm:$0xf0] }
   0xe   :  { %213 = vmatpush.bf16.msra.mxu0 %v1305_v7  ;;  %v1184_v50 = vor.u32 %v1293_v48, %v1181_v49  ;;  %v1203_v53 = vld [vmem:[%s3030_s0 + $0x70] sm:$0xf]  ;;  %v1300_v54 = vld [vmem:[%s3030_s0 + $0x74] sm:$0xf0]  ;;  %v1172_v55 = vor.u32 %v1292_v52, %v1171_v51 }
   0xf   :  { %1313 = vmatpush.bf16.msra.mxu2 %v1305_v7  ;;  %v1204_v56 = vor.u32 %v1300_v54, %v1203_v53 }
  0x12   :  { %214 = vmatpush.bf16.msra.mxu0 %v1304_v8 }
  0x13   :  { %1314 = vmatpush.bf16.msra.mxu2 %v1304_v8 }
  0x15   :  { %1246 = vmatmul.msk.bf16.gmra.mxu1 %vm185_vm0, %v1160_v11  ;;  %v1615_v11 = vld [vmem:[%s3031_s2] ss:$0 sm:$0xff] }
  0x16   :  { %215 = vmatpush.bf16.msra.mxu0 %v1303_v12 }
  0x17   :  { %1315 = vmatpush.bf16.msra.mxu2 %v1303_v12 }
  0x18   :  { %1251 = vmatmul.msk.bf16.gmra.mxu3 %vm185_vm0, %v1200_v29 }
  0x1a   :  { %216 = vmatpush.bf16.msra.mxu0 %v1302_v16 }
  0x1b   :  { %1316 = vmatpush.bf16.msra.mxu2 %v1302_v16 }
  0x1e   :  { %217 = vmatpush.bf16.msra.mxu0 %v1301_v17 }
  0x1f   :  { %1317 = vmatpush.bf16.msra.mxu2 %v1301_v17 }
  0x21   :  { %218 = vmatmul.bf16.vlgmr.msra.gmra.mxu0 %v1148_v22 }
  0x22   :  { %238 = vmatmul.bf16.vlgmr.msra.gmra.mxu2 %v1180_v23 }
  0x25   :  { %1247 = vmatmul.msk.bf16.gmra.mxu1 %vm185_vm0, %v1168_v26 }
  0x28   :  { %1252 = vmatmul.msk.bf16.gmra.mxu3 %vm185_vm0, %v1208_v41 }
  0x31   :  { %223 = vmatmul.bf16.gmra.mxu0 %v1156_v34 }
  0x32   :  { %243 = vmatmul.bf16.gmra.mxu2 %v1188_v35 }
  0x35   :  { %1248 = vmatmul.msk.bf16.gmra.mxu1 %vm185_vm0, %v1176_v38 }
  0x41   :  { %228 = vmatmul.bf16.gmra.mxu0 %v1164_v46 }
  0x42   :  { %248 = vmatmul.bf16.gmra.mxu2 %v1196_v47 }
  0x45   :  { %1249 = vmatmul.msk.bf16.gmra.mxu1 %vm185_vm0, %v1184_v50 }
  0x51   :  { %233 = vmatmul.bf16.gmra.mxu0 %v1172_v55 }
  0x52   :  { %253 = vmatmul.bf16.gmra.mxu2 %v1204_v56 }
  0x82   :  { %v268_v57 = vpop.f32.mrf.mxu1 }
  0x8a   :  { %v270_v58 = vpop.f32.mrf.mxu1 }
  0x8b   :  { %v293_v4 = vpop.f32.mrf.mxu3 }
  0x92   :  { %v273_v59 = vpop.f32.mrf.mxu1 }
  0x93   :  { %v295_v8 = vpop.f32.mrf.mxu3 }
  0x9a   :  { %v275_v60 = vpop.f32.mrf.mxu1 }
  0x9b   :  { %v298_v16 = vpop.f32.mrf.mxu3 }
  0x9e   :  { %v219_v61 = vpop.f32.mrf.mxu0 }
  0x9f   :  { %v220_v17 = vadd.f32 %v1615_v11, %v219_v61 }
  0xa1   :  { %v1623_v21 = vadd.f32 %v268_v57, %v220_v17 }
  0xa2   :  { %v278_v63 = vpop.f32.mrf.mxu1 }
  0xa3   :  { %v308_v30 = vsel %vm185_vm0, %v1623_v21, 0.0  ;;  %v300_v35 = vpop.f32.mrf.mxu3 }
  0xa5   :  { %v239_v62 = vpop.f32.mrf.mxu2 }
  0xa6   :  { %v221_v0 = vpop.f32.mrf.mxu0  ;;  %v240_v46 = vadd.f32 %v1615_v11, %v239_v62 }
  0xa7   :  { %v222_v13 = vadd.f32 %v1615_v11, %v221_v0 }
  0xa9   :  { %v1620_v19 = vadd.f32 %v270_v58, %v222_v13 }
  0xaa   :  { %v280_v3 = vpop.f32.mrf.mxu1 }
  0xab   :  { %v309_v24 = vsel %vm185_vm0, %v1620_v19, 0.0  ;;  %v303_v56 = vpop.f32.mrf.mxu3 }
  0xac   :  { %v310_v34 = vadd.f32 %v309_v24, %v308_v30 }
  0xad   :  { %v241_v1 = vpop.f32.mrf.mxu2 }
  0xae   :  { %v224_v2 = vpop.f32.mrf.mxu0  ;;  %v242_v51 = vadd.f32 %v1615_v11, %v241_v1 }
  0xaf   :  { %v225_v18 = vadd.f32 %v1615_v11, %v224_v2 }
  0xb1   :  { %v1625_v22 = vadd.f32 %v273_v59, %v225_v18 }
  0xb2   :  { %v283_v7 = vpop.f32.mrf.mxu1 }
  0xb3   :  { %v311_v31 = vsel %vm185_vm0, %v1625_v22, 0.0 }
  0xb4   :  { %v312_v38 = vadd.f32 %v311_v31, %v310_v34 }
  0xb5   :  { %v244_v5 = vpop.f32.mrf.mxu2 }
  0xb6   :  { %v226_v6 = vpop.f32.mrf.mxu0  ;;  %v245_v52 = vadd.f32 %v1615_v11, %v244_v5 }
  0xb7   :  { %v227_v20 = vadd.f32 %v1615_v11, %v226_v6 }
  0xb8   :  { %v1662_v61 = vadd.f32 %v293_v4, %v245_v52 }
  0xb9   :  { %v1630_v25 = vadd.f32 %v275_v60, %v227_v20 }
  0xba   :  { %v285_v12 = vpop.f32.mrf.mxu1 }
  0xbb   :  { %v313_v36 = vsel %vm185_vm0, %v1630_v25, 0.0 }
  0xbc   :  { %v314_v41 = vadd.f32 %v313_v36, %v312_v38 }
  0xbd   :  { %v246_v9 = vpop.f32.mrf.mxu2 }
  0xbe   :  { %v229_v10 = vpop.f32.mrf.mxu0  ;;  %v247_v57 = vadd.f32 %v1615_v11, %v246_v9 }
  0xbf   :  { %v230_v23 = vadd.f32 %v1615_v11, %v229_v10 }
  0xc0   :  { %v1667_v1 = vadd.f32 %v295_v8, %v247_v57 }
  0xc1   :  { %v1637_v32 = vadd.f32 %v278_v63, %v230_v23 }
  0xc2   :  { %v288_v28 = vpop.f32.mrf.mxu1 }
  0xc3   :  { %v315_v39 = vsel %vm185_vm0, %v1637_v32, 0.0  ;;  %v1656_v53 = vadd.f32 %v288_v28, %v240_v46 }
  0xc4   :  { %v316_v43 = vadd.f32 %v315_v39, %v314_v41 }
  0xc5   :  { %v249_v14 = vpop.f32.mrf.mxu2  ;;  %v323_v62 = vsel %vm185_vm0, %v1656_v53, 0.0 }
  0xc6   :  { %v231_v15 = vpop.f32.mrf.mxu0  ;;  %v250_v63 = vadd.f32 %v1615_v11, %v249_v14 }
  0xc7   :  { %v232_v26 = vadd.f32 %v1615_v11, %v231_v15  ;;  %v305_v15 = vpop.f32.mrf.mxu3 }
  0xc8   :  { %v299_v4 = vadd.f32 %v298_v16, %v250_v63 }
  0xc9   :  { %v1642_v37 = vadd.f32 %v280_v3, %v232_v26 }
  0xca   :  { %v290_v50 = vpop.f32.mrf.mxu1  ;;  %v331_v17 = vsel %vm185_vm0, %v299_v4, 0.0 }
  0xcb   :  { %v317_v42 = vsel %vm185_vm0, %v1642_v37, 0.0  ;;  %v1659_v58 = vadd.f32 %v290_v50, %v242_v51 }
  0xcc   :  { %v318_v49 = vadd.f32 %v317_v42, %v316_v43 }
  0xcd   :  { %v251_v27 = vpop.f32.mrf.mxu2  ;;  %v325_v2 = vsel %vm185_vm0, %v1659_v58, 0.0 }
  0xce   :  { %v234_v29 = vpop.f32.mrf.mxu0  ;;  %v252_v3 = vadd.f32 %v1615_v11, %v251_v27 }
  0xcf   :  { %v235_v33 = vadd.f32 %v1615_v11, %v234_v29 }
  0xd0   :  { %v301_v13 = vadd.f32 %v300_v35, %v252_v3 }
  0xd1   :  { %v1646_v40 = vadd.f32 %v283_v7, %v235_v33  ;;  %v327_v7 = vsel %vm185_vm0, %v1662_v61, 0.0 }
  0xd2   :  { %v333_v23 = vsel %vm185_vm0, %v301_v13, 0.0 }
  0xd3   :  { %v319_v47 = vsel %vm185_vm0, %v1646_v40, 0.0 }
  0xd4   :  { %v320_v55 = vadd.f32 %v319_v47, %v318_v49 }
  0xd5   :  { %v254_v45 = vpop.f32.mrf.mxu2 }
  0xd6   :  { %v236_v44 = vpop.f32.mrf.mxu0  ;;  %v255_v9 = vadd.f32 %v1615_v11, %v254_v45 }
  0xd7   :  { %v237_v48 = vadd.f32 %v1615_v11, %v236_v44 }
  0xd8   :  { %v304_v18 = vadd.f32 %v303_v56, %v255_v9 }
  0xd9   :  { %v286_v54 = vadd.f32 %v285_v12, %v237_v48  ;;  %v329_v12 = vsel %vm185_vm0, %v1667_v1, 0.0 }
  0xda   :  { %v335_v16 = vsel %vm185_vm0, %v304_v18, 0.0 }
  0xdb   :  { %v321_v59 = vsel %vm185_vm0, %v286_v54, 0.0 }
  0xdc   :  { %v322_v60 = vadd.f32 %v321_v59, %v320_v55 }
  0xdd   :  { %v256_v6 = vpop.f32.mrf.mxu2 }
  0xde   :  { %v324_v0 = vadd.f32 %v323_v62, %v322_v60  ;;  %v257_v8 = vadd.f32 %v1615_v11, %v256_v6 }
  0xe0   :  { %v326_v5 = vadd.f32 %v325_v2, %v324_v0  ;;  %v306_v24 = vadd.f32 %v305_v15, %v257_v8 }
  0xe2   :  { %v328_v10 = vadd.f32 %v327_v7, %v326_v5  ;;  %v337_v28 = vsel %vm185_vm0, %v306_v24, 0.0 }
  0xe4   :  { %v330_v14 = vadd.f32 %v329_v12, %v328_v10 }
  0xe6   :  { %v332_v20 = vadd.f32 %v331_v17, %v330_v14 }
  0xe8   :  { %v334_v26 = vadd.f32 %v333_v23, %v332_v20 }
  0xea   :  { %v336_v27 = vadd.f32 %v335_v16, %v334_v26 }
  0xec   :  { %v338_v29 = vadd.f32 %v337_v28, %v336_v27 }
  0xee   :  { %v339_v30 = vrot.slane %v338_v29, 4 }
  0xf0   :  { %v340_v31 = vadd.f32 %v339_v30, %v338_v29 }
  0xf2   :  { %v341_v33 = vrot.slane %v340_v31, 2 }
  0xf4   :  { %v342_v11 = vadd.f32 %v341_v33, %v340_v31 }
  0xf6   :  { %v343_v34 = vrot.slane %v342_v11, 1 }
  0xf8   :  { %v344_v35 = vadd.f32 %v343_v34, %v342_v11 }
  0xfa   :  { %v345_v36 = vmul.f32 0.0078125, %v344_v35 }
  0xfc   :  { %v1683_v38 = vsub.f32 %v1623_v21, %v345_v36  ;;  %v1686_v39 = vsub.f32 %v1620_v19, %v345_v36  ;;  %v1689_v41 = vsub.f32 %v1625_v22, %v345_v36  ;;  %v1692_v42 = vsub.f32 %v1630_v25, %v345_v36 }
  0xfd   :  { %v1699_v45 = vsub.f32 %v1637_v32, %v345_v36  ;;  %v1704_v19 = vsub.f32 %v1642_v37, %v345_v36  ;;  %v1711_v48 = vsub.f32 %v1646_v40, %v345_v36  ;;  %v1716_v51 = vsub.f32 %v286_v54, %v345_v36 }
  0xfe   :  { %v362_v43 = vmul.f32 %v1683_v38, %v1683_v38  ;;  %v363_v44 = vmul.f32 %v1686_v39, %v1686_v39  ;;  %v364_v21 = vmul.f32 %v1689_v41, %v1689_v41  ;;  %v365_v22 = vmul.f32 %v1692_v42, %v1692_v42 }
  0xff   :  { %v366_v32 = vmul.f32 %v1699_v45, %v1699_v45  ;;  %v367_v37 = vmul.f32 %v1704_v19, %v1704_v19  ;;  %v1722_v56 = vsub.f32 %v1656_v53, %v345_v36  ;;  %v368_v40 = vmul.f32 %v1711_v48, %v1711_v48 }
 0x100   :  { %v378_v25 = vsel %vm185_vm0, %v362_v43, 0.0  ;;  %v379_v46 = vsel %vm185_vm0, %v363_v44, 0.0  ;;  %v381_v49 = vsel %vm185_vm0, %v364_v21, 0.0  ;;  %v383_v52 = vsel %vm185_vm0, %v365_v22, 0.0 }
 0x101   :  { %v380_v47 = vadd.f32 %v379_v46, %v378_v25  ;;  %v385_v57 = vsel %vm185_vm0, %v366_v32, 0.0  ;;  %v1728_v60 = vsub.f32 %v1659_v58, %v345_v36  ;;  %v369_v54 = vmul.f32 %v1716_v51, %v1716_v51 }
 0x102   :  { %v387_v62 = vsel %vm185_vm0, %v367_v37, 0.0  ;;  %v1734_v0 = vsub.f32 %v1662_v61, %v345_v36  ;;  %v370_v53 = vmul.f32 %v1722_v56, %v1722_v56  ;;  %v389_v2 = vsel %vm185_vm0, %v368_v40, 0.0 }
 0x103   :  { %v382_v50 = vadd.f32 %v381_v49, %v380_v47  ;;  %v1740_v5 = vsub.f32 %v1667_v1, %v345_v36  ;;  %v371_v58 = vmul.f32 %v1728_v60, %v1728_v60  ;;  %v391_v6 = vsel %vm185_vm0, %v369_v54, 0.0 }
 0x104   :  { %v1745_v9 = vsub.f32 %v299_v4, %v345_v36  ;;  %v372_v61 = vmul.f32 %v1734_v0, %v1734_v0  ;;  %v393_v10 = vsel %vm185_vm0, %v370_v53, 0.0  ;;  %v1750_v8 = vsub.f32 %v301_v13, %v345_v36 }
 0x105   :  { %v384_v55 = vadd.f32 %v383_v52, %v382_v50  ;;  %v373_v1 = vmul.f32 %v1740_v5, %v1740_v5  ;;  %v395_v14 = vsel %vm185_vm0, %v371_v58, 0.0  ;;  %v1755_v17 = vsub.f32 %v304_v18, %v345_v36 }
 0x106   :  { %v374_v4 = vmul.f32 %v1745_v9, %v1745_v9  ;;  %v397_v20 = vsel %vm185_vm0, %v372_v61, 0.0  ;;  %v1760_v26 = vsub.f32 %v306_v24, %v345_v36  ;;  %v375_v13 = vmul.f32 %v1750_v8, %v1750_v8 }
 0x107   :  { %v386_v59 = vadd.f32 %v385_v57, %v384_v55  ;;  %v399_v16 = vsel %vm185_vm0, %v373_v1, 0.0  ;;  %v376_v28 = vmul.f32 %v1755_v17, %v1755_v17  ;;  %v416_v55 = vld [vmem:[%s3033_s3] sm:$0x1] }
 0x108   :  { %v401_v18 = vsel %vm185_vm0, %v374_v4, 0.0  ;;  %v377_v30 = vmul.f32 %v1760_v26, %v1760_v26  ;;  %v403_v31 = vsel %vm185_vm0, %v375_v13, 0.0 }
 0x109   :  { %v388_v63 = vadd.f32 %v387_v62, %v386_v59  ;;  %v405_v24 = vsel %vm185_vm0, %v376_v28, 0.0 }
 0x10a   :  { %v407_v34 = vsel %vm185_vm0, %v377_v30, 0.0 }
 0x10b   :  { %v390_v3 = vadd.f32 %v389_v2, %v388_v63  ;;  %v1783_v63 = vld [vmem:[%s3032_s4] ss:$0 sm:$0xff] }
 0x10d   :  { %v392_v7 = vadd.f32 %v391_v6, %v390_v3 }
 0x10f   :  { %v394_v12 = vadd.f32 %v393_v10, %v392_v7 }
 0x111   :  { %v396_v15 = vadd.f32 %v395_v14, %v394_v12 }
 0x113   :  { %v398_v23 = vadd.f32 %v397_v20, %v396_v15 }
 0x115   :  { %v400_v27 = vadd.f32 %v399_v16, %v398_v23 }
 0x117   :  { %v402_v29 = vadd.f32 %v401_v18, %v400_v27 }
 0x119   :  { %v404_v33 = vadd.f32 %v403_v31, %v402_v29 }
 0x11b   :  { %v406_v11 = vadd.f32 %v405_v24, %v404_v33 }
 0x11d   :  { %v408_v35 = vadd.f32 %v407_v34, %v406_v11 }
 0x11f   :  { %v409_v36 = vrot.slane %v408_v35, 4 }
 0x121   :  { %v410_v43 = vadd.f32 %v409_v36, %v408_v35 }
 0x123   :  { %v411_v44 = vrot.slane %v410_v43, 2 }
 0x125   :  { %v412_v21 = vadd.f32 %v411_v44, %v410_v43 }
 0x127   :  { %v413_v22 = vrot.slane %v412_v21, 1 }
 0x129   :  { %v414_v25 = vadd.f32 %v413_v22, %v412_v21 }
 0x12b   :  { %v415_v46 = vmul.f32 0.0078125, %v414_v25 }
 0x12d   :  { %v417_v47 = vadd.f32 1e-05, %v415_v46 }
 0x12f   :  { %1321 = vrsqrt.f32 %v417_v47  ;;  %vm424_vm2 = vweird.f32 %v417_v47 }
 0x135   :  { %v1322_v32 = vpop.eup %1321 }
 0x136   :  { %v419_v49 = vmul.f32 %v1322_v32, %v417_v47  ;;  %vm425_vm1 = vweird.f32 %v1322_v32 }
 0x137   :  { %vm426_vm3 = vmor %vm424_vm2, %vm425_vm1 }
 0x138   :  { %v420_v50 = vmul.f32 %v1322_v32, %v419_v49 }
 0x13a   :  { %v421_v37 = vmul.f32 0.5, %v420_v50 }
 0x13c   :  { %v422_v52 = vsub.f32 1.5, %v421_v37 }
 0x13e   :  { %v423_v40 = vmul.f32 %v1322_v32, %v422_v52 }
 0x140   :  { %v427_v57 = vsel %vm426_vm3, %v1322_v32, %v423_v40 }
 0x141   :  { %v428_v59 = vmul.f32 %v427_v57, %v416_v55 }
 0x143   :  { %v1776_v54 = vperm.slane %v428_v59, 0 }
 0x145   :  { %v432_v62 = vmul.f32 %v1776_v54, %v1683_v38  ;;  %v433_v53 = vmul.f32 %v1776_v54, %v1686_v39  ;;  %v434_v2 = vmul.f32 %v1776_v54, %v1689_v41  ;;  %v435_v58 = vmul.f32 %v1776_v54, %v1692_v42 }
 0x146   :  { %v436_v38 = vmul.f32 %v1776_v54, %v1699_v45  ;;  %v437_v39 = vmul.f32 %v1776_v54, %v1704_v19  ;;  %v438_v41 = vmul.f32 %v1776_v54, %v1711_v48  ;;  %v439_v42 = vmul.f32 %v1776_v54, %v1716_v51 }
 0x147   :  { %v1790_v3 = vadd.f32 %v1783_v63, %v432_v62  ;;  %v1795_v6 = vadd.f32 %v1783_v63, %v433_v53  ;;  %v1800_v7 = vadd.f32 %v1783_v63, %v434_v2  ;;  %v1810_v10 = vadd.f32 %v1783_v63, %v435_v58 }
 0x148   :  { %v440_v45 = vmul.f32 %v1776_v54, %v1722_v56  ;;  %v1816_v1 = vadd.f32 %v1783_v63, %v436_v38  ;;  %v441_v48 = vmul.f32 %v1776_v54, %v1728_v60  ;;  %v1822_v14 = vadd.f32 %v1783_v63, %v437_v39 }
 0x149   :  { %v1253_v61 = vmul.f32 -1.442695, %v1790_v3  ;;  %v1254_v12 = vmul.f32 -1.442695, %v1795_v6  ;;  %v1255_v19 = vmul.f32 -1.442695, %v1800_v7  ;;  %v442_v51 = vmul.f32 %v1776_v54, %v1734_v0 }
 0x14a   :  { %v1827_v15 = vadd.f32 %v1783_v63, %v438_v41  ;;  %v1830_v56 = vadd.f32 %v1783_v63, %v439_v42  ;;  %v1256_v4 = vmul.f32 -1.442695, %v1810_v10  ;;  %v1834_v20 = vadd.f32 %v1783_v63, %v440_v45 }
 0x14b   :  { %1323 = vpow2.f32 %v1253_v61  ;;  %v1257_v60 = vmul.f32 -1.442695, %v1816_v1  ;;  %v1838_v23 = vadd.f32 %v1783_v63, %v441_v48  ;;  %v1258_v0 = vmul.f32 -1.442695, %v1822_v14 }
 0x14c   :  { %1325 = vpow2.f32 %v1254_v12  ;;  %v443_v13 = vmul.f32 %v1776_v54, %v1740_v5  ;;  %v1844_v16 = vadd.f32 %v1783_v63, %v442_v51  ;;  %v1259_v27 = vmul.f32 -1.442695, %v1827_v15 }
 0x14d   :  { %1327 = vpow2.f32 %v1255_v19  ;;  %v444_v28 = vmul.f32 %v1776_v54, %v1745_v9  ;;  %v1260_v18 = vmul.f32 -1.442695, %v1830_v56  ;;  %v1261_v30 = vmul.f32 -1.442695, %v1834_v20 }
 0x14e   :  { %1329 = vpow2.f32 %v1256_v4  ;;  %v1262_v33 = vmul.f32 -1.442695, %v1838_v23  ;;  %v1853_v24 = vadd.f32 %v1783_v63, %v443_v13  ;;  %v1263_v11 = vmul.f32 -1.442695, %v1844_v16 }
 0x14f   :  { %1331 = vpow2.f32 %v1257_v60  ;;  %v1857_v9 = vadd.f32 %v1783_v63, %v444_v28  ;;  %v445_v43 = vmul.f32 %v1776_v54, %v1750_v8  ;;  %v446_v22 = vmul.f32 %v1776_v54, %v1755_v17 }
 0x150   :  { %1333 = vpow2.f32 %v1258_v0  ;;  %v1264_v25 = vmul.f32 -1.442695, %v1853_v24  ;;  %v447_v52 = vmul.f32 %v1776_v54, %v1760_v26 }
 0x151   :  { %v1324_v29 = vpop.eup %1323  ;;  %1335 = vpow2.f32 %v1259_v27  ;;  %v1265_v47 = vmul.f32 -1.442695, %v1857_v9  ;;  %v1876_v50 = vadd.f32 %v1783_v63, %v445_v43  ;;  %v1884_v55 = vadd.f32 %v1783_v63, %v446_v22 }
 0x152   :  { %v1326_v31 = vpop.eup %1325  ;;  %1337 = vpow2.f32 %v1260_v18  ;;  %v1859_v34 = vadd.f32 1.0, %v1324_v29  ;;  %v1898_v54 = vadd.f32 %v1783_v63, %v447_v52 }
 0x153   :  { %v1328_v5 = vpop.eup %1327  ;;  %1339 = vpow2.f32 %v1261_v30  ;;  %v1861_v35 = vadd.f32 1.0, %v1326_v31  ;;  %v1266_v2 = vmul.f32 -1.442695, %v1876_v50  ;;  %v1267_v58 = vmul.f32 -1.442695, %v1884_v55 }
 0x154   :  { %v1330_v36 = vpop.eup %1329  ;;  %1341 = vpow2.f32 %v1262_v33  ;;  %v1865_v44 = vadd.f32 1.0, %v1328_v5  ;;  %3037 = vst [vmem:[#allocation2_spill] sm:$0xff] %v1898_v54  ;;  %v543_v39 = vand.u32 2147483648, %v1859_v34  ;;  %v1268_v19 = vmul.f32 -1.442695, %v1898_v54 }
 0x155   :  { %v1332_v21 = vpop.eup %1331  ;;  %1343 = vpow2.f32 %v1263_v11  ;;  %v1872_v49 = vadd.f32 1.0, %v1330_v36  ;;  %v558_v61 = vand.u32 2147483648, %v1861_v35  ;;  %v541_v4 = vand.u32 2147483647, %v1859_v34 }
 0x156   :  { %v1334_v46 = vpop.eup %1333  ;;  %1345 = vrcp.f32 %v1859_v34  ;;  %v1878_v37 = vadd.f32 1.0, %v1332_v21  ;;  %v1919_v60 = vor.u32 1.1754944e-38, %v543_v39  ;;  %v556_v0 = vand.u32 2147483647, %v1861_v35 }
 0x157   :  { %v1336_v32 = vpop.eup %1335  ;;  %1347 = vrcp.f32 %v1861_v35  ;;  %v1886_v40 = vadd.f32 1.0, %v1334_v46  ;;  %v1926_v28 = vor.u32 1.1754944e-38, %v558_v61  ;;  %v571_v18 = vand.u32 2147483647, %v1865_v44 }
 0x158   :  { %v1338_v8 = vpop.eup %1337  ;;  %1349 = vrcp.f32 %v1865_v44  ;;  %v1888_v59 = vadd.f32 1.0, %v1336_v32  ;;  %v573_v29 = vand.u32 2147483648, %v1865_v44  ;;  %v588_v11 = vand.u32 2147483648, %v1872_v49 }
 0x159   :  { %v1340_v17 = vpop.eup %1339  ;;  %1351 = vpow2.f32 %v1264_v25  ;;  %v1924_v27 = vadd.f32 1.0, %v1338_v8  ;;  %vm537_vm4 = vweird.f32 %v1859_v34  ;;  %vm552_vm5 = vweird.f32 %v1861_v35 }
 0x15a   :  { %v1342_v57 = vpop.eup %1341  ;;  %1353 = vpow2.f32 %v1265_v47  ;;  %v1935_v36 = vadd.f32 1.0, %v1340_v17  ;;  %v586_v47 = vand.u32 2147483647, %v1872_v49  ;;  %vm567_vm6 = vweird.f32 %v1865_v44 }
 0x15b   :  { %v1344_v62 = vpop.eup %1343  ;;  %1355 = vrcp.f32 %v1872_v49  ;;  %v1940_v25 = vadd.f32 1.0, %v1342_v57  ;;  %v1959_v61 = vor.u32 1.1754944e-38, %v588_v11  ;;  %vm582_vm7 = vweird.f32 %v1872_v49 }
 0x15c   :  { %v1891_v53 = vpop.eup %1345  ;;  %1357 = vrcp.f32 %v1878_v37  ;;  %v1942_v46 = vadd.f32 1.0, %v1344_v62  ;;  %vm1971_vm9 = vcmp.eq.f32.partialorder %v541_v4, 8.507059e+37  ;;  %vm1975_vm10 = vcmp.eq.f32.partialorder %v556_v0, 8.507059e+37 }
 0x15d   :  { %v1895_v26 = vpop.eup %1347  ;;  %1359 = vrcp.f32 %v1886_v40  ;;  %v533_v12 = vmul.f32 %v1891_v53, %v1859_v34  ;;  %vm538_vm8 = vweird.f32 %v1891_v53  ;;  %vm1979_vm11 = vcmp.eq.f32.partialorder %v571_v18, 8.507059e+37 }
 0x15e   :  { %v1902_v38 = vpop.eup %1349  ;;  %1361 = vrcp.f32 %v1888_v59  ;;  %v548_v63 = vmul.f32 %v1895_v26, %v1861_v35  ;;  %vm597_vm12 = vweird.f32 %v1878_v37  ;;  %vm553_vm13 = vweird.f32 %v1895_v26  ;;  %vm2001_vm0 = vmor %vm537_vm4, %vm538_vm8 }
 0x15f   :  { %v1352_v41 = vpop.eup %1351  ;;  %1363 = vpow2.f32 %v1266_v2  ;;  %v563_v48 = vmul.f32 %v1902_v38, %v1865_v44  ;;  %v534_v31 = vsub.f32 1.0, %v533_v12  ;;  %v1953_v2 = vor.u32 1.1754944e-38, %v573_v29  ;;  %vm2011_vm1 = vmor %vm552_vm5, %vm553_vm13 }
 0x160   :  { %v1354_v42 = vpop.eup %1353  ;;  %1365 = vpow2.f32 %v1267_v58  ;;  %v549_v33 = vsub.f32 1.0, %v548_v63  ;;  %v1948_v17 = vadd.f32 1.0, %v1352_v41  ;;  %vm612_vm14 = vweird.f32 %v1886_v40 }
 0x161   :  { %v1911_v45 = vpop.eup %1355  ;;  %1367 = vpow2.f32 %v1268_v19  ;;  %v564_v43 = vsub.f32 1.0, %v563_v48  ;;  %v1950_v52 = vadd.f32 1.0, %v1354_v42  ;;  %v535_v62 = vmul.f32 %v1891_v53, %v534_v31 }
 0x162   :  { %v1916_v51 = vpop.eup %1357  ;;  %v578_v5 = vmul.f32 %v1911_v45, %v1872_v49  ;;  %v550_v58 = vmul.f32 %v1895_v26, %v549_v33  ;;  %v601_v42 = vand.u32 2147483647, %v1878_v37  ;;  %1369 = vrcp.f32 %v1924_v27 }
 0x163   :  { %v1922_v13 = vpop.eup %1359  ;;  %v593_v21 = vmul.f32 %v1916_v51, %v1878_v37  ;;  %v565_v12 = vmul.f32 %v1902_v38, %v564_v43  ;;  %v603_v48 = vand.u32 2147483648, %v1878_v37  ;;  %v616_v43 = vand.u32 2147483647, %v1886_v40 }
 0x164   :  { %v1930_v30 = vpop.eup %1361  ;;  %v608_v32 = vmul.f32 %v1922_v13, %v1886_v40  ;;  %v579_v39 = vsub.f32 1.0, %v578_v5  ;;  %1371 = vrcp.f32 %v1935_v36  ;;  %v536_v4 = vadd.f32 %v1891_v53, %v535_v62 }
 0x165   :  { %v1364_v22 = vpop.eup %1363  ;;  %v623_v57 = vmul.f32 %v1930_v30, %v1888_v59  ;;  %v594_v41 = vsub.f32 1.0, %v593_v21  ;;  %v566_v18 = vadd.f32 %v1902_v38, %v565_v12  ;;  %vm568_vm15 = vweird.f32 %v1902_v38 }
 0x166   :  { %v1366_v8 = vpop.eup %1365  ;;  %v1964_v63 = vadd.f32 1.0, %v1364_v22  ;;  %v609_v29 = vsub.f32 1.0, %v608_v32  ;;  %v551_v22 = vadd.f32 %v1895_v26, %v550_v58  ;;  %v580_v0 = vmul.f32 %v1911_v45, %v579_v39  ;;  %vm2037_vm5 = vmor %vm567_vm6, %vm568_vm15 }
 0x167   :  { %v1966_v19 = vadd.f32 1.0, %v1366_v8  ;;  %v1368_v31 = vpop.eup %1367  ;;  %v624_v21 = vsub.f32 1.0, %v623_v57  ;;  %v595_v32 = vmul.f32 %v1916_v51, %v594_v41  ;;  %1373 = vrcp.f32 %v1940_v25 }
 0x168   :  { %v1995_v8 = vadd.f32 1.0, %v1368_v31  ;;  %v604_v62 = vor.u32 1.1754944e-38, %v603_v48  ;;  %v610_v58 = vmul.f32 %v1922_v13, %v609_v29  ;;  %1375 = vrcp.f32 %v1942_v46  ;;  %v2007_v39 = vpop.eup %1369 }
 0x169   :  { %vm583_vm2 = vweird.f32 %v1911_v45  ;;  %vm2016_vm3 = vcmp.eq.f32.partialorder %v586_v47, 8.507059e+37  ;;  %vm2020_vm4 = vcmp.eq.f32.partialorder %v601_v42, 8.507059e+37  ;;  %v618_v48 = vand.u32 2147483648, %v1886_v40 }
 0x16a   :  { %v625_v29 = vmul.f32 %v1930_v30, %v624_v21  ;;  %v631_v35 = vand.u32 2147483647, %v1888_v59  ;;  %v540_v31 = vsel %vm2001_vm0, %v1891_v53, %v536_v4  ;;  %v555_v47 = vsel %vm2011_vm1, %v1895_v26, %v551_v22  ;;  %v2047_v53 = vpop.eup %1371  ;;  %vm2067_vm15 = vmor %vm582_vm7, %vm583_vm2 }
 0x16b   :  { %v581_v21 = vadd.f32 %v1911_v45, %v580_v0  ;;  %vm598_vm8 = vweird.f32 %v1916_v51  ;;  %vm2043_vm13 = vcmp.eq.f32.partialorder %v616_v43, 8.507059e+37  ;;  %v570_v26 = vsel %vm2037_vm5, %v1902_v38, %v566_v18 }
 0x16c   :  { %v596_v44 = vadd.f32 %v1916_v51, %v595_v32  ;;  %v638_v4 = vmul.f32 %v2007_v39, %v1924_v27  ;;  %1377 = vrcp.f32 %v1948_v17  ;;  %v611_v22 = vadd.f32 %v1922_v13, %v610_v58  ;;  %vm2095_vm7 = vmor %vm597_vm12, %vm598_vm8 }
 0x16d   :  { %vm613_vm6 = vweird.f32 %v1922_v13  ;;  %v633_v43 = vand.u32 2147483648, %v1888_v59  ;;  %v653_v0 = vmul.f32 %v2047_v53, %v1935_v36  ;;  %v2061_v57 = vpop.eup %1373  ;;  %v619_v18 = vor.u32 1.1754944e-38, %v618_v48 }
 0x16e   :  { %v626_v32 = vadd.f32 %v1930_v30, %v625_v29  ;;  %vm627_vm0 = vweird.f32 %v1888_v59  ;;  %vm628_vm1 = vweird.f32 %v1930_v30  ;;  %v2074_v58 = vpop.eup %1375  ;;  %v2079_v12 = vsel %vm1971_vm9, %v1919_v60, %v540_v31 }
 0x16f   :  { %v2084_v49 = vsel %vm1975_vm10, %v1926_v28, %v555_v47  ;;  %v2089_v48 = vsel %vm1979_vm11, %v1953_v2, %v570_v26  ;;  %vm2099_vm9 = vcmp.eq.f32.partialorder %v631_v35, 8.507059e+37  ;;  %v585_v28 = vsel %vm2067_vm15, %v1911_v45, %v581_v21  ;;  %vm2113_vm10 = vmor %vm612_vm14, %vm613_vm6 }
 0x170   :  { %v600_v2 = vsel %vm2095_vm7, %v1916_v51, %v596_v44  ;;  %v639_v33 = vsub.f32 1.0, %v638_v4  ;;  %v668_v5 = vmul.f32 %v2061_v57, %v1940_v25  ;;  %v615_v45 = vsel %vm2113_vm10, %v1922_v13, %v611_v22  ;;  %vm2122_vm11 = vmor %vm627_vm0, %vm628_vm1 }
 0x171   :  { %v634_v51 = vor.u32 1.1754944e-38, %v633_v43  ;;  %v654_v29 = vsub.f32 1.0, %v653_v0  ;;  %v683_v40 = vmul.f32 %v2074_v58, %v1942_v46  ;;  %v630_v31 = vsel %vm2122_vm11, %v1930_v30, %v626_v32 }
 0x172   :  { %v2128_v35 = vpop.eup %1377  ;;  %v646_v47 = vand.u32 2147483647, %v1924_v27  ;;  %v648_v42 = vand.u32 2147483648, %v1924_v27  ;;  %1379 = vrcp.f32 %v1950_v52  ;;  %v2139_v13 = vsel %vm2016_vm3, %v1959_v61, %v585_v28 }
 0x173   :  { %v2143_v21 = vsel %vm2020_vm4, %v604_v62, %v600_v2  ;;  %v661_v26 = vand.u32 2147483647, %v1935_v36  ;;  %v663_v44 = vand.u32 2147483648, %v1935_v36  ;;  %v2149_v30 = vsel %vm2043_vm13, %v619_v18, %v615_v45 }
 0x174   :  { %v640_v4 = vmul.f32 %v2007_v39, %v639_v33  ;;  %vm642_vm12 = vweird.f32 %v1924_v27  ;;  %v669_v22 = vsub.f32 1.0, %v668_v5  ;;  %v2155_v61 = vsel %vm2099_vm9, %v634_v51, %v630_v31 }
 0x175   :  { %v655_v62 = vmul.f32 %v2047_v53, %v654_v29  ;;  %v684_v34 = vsub.f32 1.0, %v683_v40  ;;  %v698_v41 = vmul.f32 %v2128_v35, %v1948_v17  ;;  %vm2160_vm14 = vcmp.eq.f32.partialorder %v646_v47, 8.507059e+37 }
 0x176   :  { %v649_v54 = vor.u32 1.1754944e-38, %v648_v42  ;;  %vm657_vm2 = vweird.f32 %v1935_v36  ;;  %v678_v0 = vand.u32 2147483648, %v1940_v25  ;;  %1381 = vrcp.f32 %v1964_v63 }
 0x177   :  { %vm2167_vm3 = vcmp.eq.f32.partialorder %v661_v26, 8.507059e+37  ;;  %v664_v18 = vor.u32 1.1754944e-38, %v663_v44  ;;  %vm672_vm4 = vweird.f32 %v1940_v25  ;;  %v676_v32 = vand.u32 2147483647, %v1940_v25 }
 0x178   :  { %v2173_v59 = vpop.eup %1379  ;;  %v641_v60 = vadd.f32 %v2007_v39, %v640_v4  ;;  %vm643_vm5 = vweird.f32 %v2007_v39  ;;  %v670_v28 = vmul.f32 %v2061_v57, %v669_v22  ;;  %1383 = vrcp.f32 %v1966_v19 }
 0x179   :  { %v656_v2 = vadd.f32 %v2047_v53, %v655_v62  ;;  %vm658_vm8 = vweird.f32 %v2047_v53  ;;  %v685_v37 = vmul.f32 %v2074_v58, %v684_v34  ;;  %v699_v33 = vsub.f32 1.0, %v698_v41  ;;  %vm2187_vm6 = vmor %vm642_vm12, %vm643_vm5 }
 0x17a   :  { %v679_v5 = vor.u32 1.1754944e-38, %v678_v0  ;;  %vm687_vm13 = vweird.f32 %v1942_v46  ;;  %v691_v45 = vand.u32 2147483647, %v1942_v46  ;;  %v693_v11 = vand.u32 2147483648, %v1942_v46  ;;  %vm2209_vm1 = vmor %vm657_vm2, %vm658_vm8 }
 0x17b   :  { %vm673_vm15 = vweird.f32 %v2061_v57  ;;  %vm2192_vm0 = vcmp.eq.f32.partialorder %v676_v32, 8.507059e+37  ;;  %v706_v40 = vand.u32 2147483647, %v1948_v17  ;;  %v708_v31 = vand.u32 2147483648, %v1948_v17 }
 0x17c   :  { %v713_v47 = vmul.f32 %v2173_v59, %v1950_v52  ;;  %v2200_v42 = vpop.eup %1381  ;;  %v645_v27 = vsel %vm2187_vm6, %v2007_v39, %v641_v60  ;;  %v671_v44 = vadd.f32 %v2061_v57, %v670_v28  ;;  %v723_v4 = vand.u32 2147483648, %v1950_v52  ;;  %vm2236_vm11 = vmor %vm672_vm4, %vm673_vm15 }
 0x17d   :  { %1385 = vrcp.f32 %v1995_v8  ;;  %v660_v22 = vsel %vm2209_vm1, %v2047_v53, %v656_v2  ;;  %v686_v39 = vadd.f32 %v2074_v58, %v685_v37  ;;  %vm688_vm7 = vweird.f32 %v2074_v58 }
 0x17e   :  { %v700_v36 = vmul.f32 %v2128_v35, %v699_v33  ;;  %v2222_v62 = vpop.eup %1383  ;;  %vm2224_vm9 = vcmp.eq.f32.partialorder %v691_v45, 8.507059e+37  ;;  %v694_v41 = vor.u32 1.1754944e-38, %v693_v11  ;;  %vm702_vm10 = vweird.f32 %v1948_v17 }
 0x17f   :  { %v721_v0 = vand.u32 2147483647, %v1950_v52  ;;  %v650_v53 = vsel %vm2160_vm14, %v649_v54, %v645_v27  ;;  %vm2240_vm12 = vcmp.eq.f32.partialorder %v706_v40, 8.507059e+37  ;;  %v709_v28 = vor.u32 1.1754944e-38, %v708_v31  ;;  %vm2255_vm14 = vmor %vm687_vm13, %vm688_vm7 }
 0x180   :  { %v714_v2 = vsub.f32 1.0, %v713_v47  ;;  %v728_v37 = vmul.f32 %v2200_v42, %v1964_v63  ;;  %v665_v43 = vsel %vm2167_vm3, %v664_v18, %v660_v22  ;;  %v675_v25 = vsel %vm2236_vm11, %v2061_v57, %v671_v44 }
 0x181   :  { %vm703_vm2 = vweird.f32 %v2128_v35  ;;  %v2260_v33 = vor.u32 1.1754944e-38, %v723_v4  ;;  %v690_v38 = vsel %vm2255_vm14, %v2074_v58, %v686_v39  ;;  %v701_v18 = vadd.f32 %v2128_v35, %v700_v36 }
 0x182   :  { %vm717_vm3 = vweird.f32 %v1950_v52  ;;  %v743_v57 = vmul.f32 %v2222_v62, %v1966_v19  ;;  %v2271_v46 = vmul.f32 %v2079_v12, %v1790_v3  ;;  %vm718_vm4 = vweird.f32 %v2173_v59  ;;  %vm2297_vm5 = vmor %vm702_vm10, %vm703_vm2 }
 0x183   :  { %v2273_v45 = vpop.eup %1385  ;;  %v736_v11 = vand.u32 2147483647, %v1964_v63  ;;  %v738_v51 = vand.u32 2147483648, %v1964_v63  ;;  %v2280_v58 = vmul.f32 %v2084_v49, %v1795_v6  ;;  %v715_v40 = vmul.f32 %v2173_v59, %v714_v2  ;;  %vm2350_vm1 = vmor %vm717_vm3, %vm718_vm4 }
 0x184   :  { %v729_v31 = vsub.f32 1.0, %v728_v37  ;;  %v758_v47 = vmul.f32 %v2273_v45, %v1995_v8  ;;  %v2287_v3 = vmul.f32 %v2089_v48, %v1800_v7  ;;  %v680_v12 = vsel %vm2192_vm0, %v679_v5, %v675_v25 }
 0x185   :  { %v695_v27 = vsel %vm2224_vm9, %v694_v41, %v690_v38  ;;  %vm733_vm8 = vweird.f32 %v2200_v42  ;;  %v2304_v7 = vmul.f32 %v2139_v13, %v1810_v10  ;;  %v705_v49 = vsel %vm2297_vm5, %v2128_v35, %v701_v18 }
 0x186   :  { %vm732_vm13 = vweird.f32 %v1964_v63  ;;  %v744_v48 = vsub.f32 1.0, %v743_v57  ;;  %v2312_v17 = vmul.f32 %v2143_v21, %v1816_v1  ;;  %v1269_v5 = vmul.f32 -1.442695, %v2271_v46 }
 0x187   :  { %v739_v29 = vor.u32 1.1754944e-38, %v738_v51  ;;  %v759_v26 = vsub.f32 1.0, %v758_v47  ;;  %v2317_v44 = vmul.f32 %v2149_v30, %v1822_v14  ;;  %v1270_v10 = vmul.f32 -1.442695, %v2280_v58  ;;  %vm2384_vm10 = vmor %vm732_vm13, %vm733_vm8 }
 0x188   :  { %v716_v13 = vadd.f32 %v2173_v59, %v715_v40  ;;  %v730_v35 = vmul.f32 %v2200_v42, %v729_v31  ;;  %vm747_vm6 = vweird.f32 %v1966_v19  ;;  %v751_v4 = vand.u32 2147483647, %v1966_v19 }
 0x189   :  { %v1271_v1 = vmul.f32 -1.442695, %v2287_v3  ;;  %v710_v21 = vsel %vm2240_vm12, %v709_v28, %v705_v49  ;;  %vm2327_vm15 = vcmp.eq.f32.partialorder %v721_v0, 8.507059e+37  ;;  %v753_v14 = vand.u32 2147483648, %v1966_v19 }
 0x18a   :  { %v2334_v30 = vmul.f32 %v2155_v61, %v1827_v15  ;;  %v1272_v39 = vmul.f32 -1.442695, %v2304_v7  ;;  %vm2337_vm0 = vcmp.eq.f32.partialorder %v736_v11, 8.507059e+37  ;;  %v745_v34 = vmul.f32 %v2222_v62, %v744_v48 }
 0x18b   :  { %v2343_v41 = vmul.f32 %v650_v53, %v1830_v56  ;;  %1387 = vpow2.f32 %v1269_v5  ;;  %v1273_v0 = vmul.f32 -1.442695, %v2312_v17  ;;  %v760_v61 = vmul.f32 %v2273_v45, %v759_v26 }
 0x18c   :  { %v2356_v32 = vmul.f32 %v665_v43, %v1834_v20  ;;  %1389 = vpow2.f32 %v1270_v10  ;;  %v1274_v56 = vmul.f32 -1.442695, %v2317_v44  ;;  %v720_v53 = vsel %vm2350_vm1, %v2173_v59, %v716_v13 }
 0x18d   :  { %v731_v60 = vadd.f32 %v2200_v42, %v730_v35  ;;  %vm2363_vm7 = vcmp.eq.f32.partialorder %v751_v4, 8.507059e+37  ;;  %v2368_v28 = vmul.f32 %v680_v12, %v1838_v23  ;;  %1391 = vpow2.f32 %v1271_v1 }
 0x18e   :  { %vm748_vm9 = vweird.f32 %v2222_v62  ;;  %v2372_v20 = vmul.f32 %v695_v27, %v1844_v16  ;;  %1393 = vpow2.f32 %v1272_v39  ;;  %v1275_v2 = vmul.f32 -1.442695, %v2334_v30  ;;  %v3100_v39 = vld [vmem:[#allocation2_spill] sm:$0xff] }
 0x18f   :  { %v746_v59 = vadd.f32 %v2222_v62, %v745_v34  ;;  %v2377_v37 = vmul.f32 %v710_v21, %v1853_v24  ;;  %1395 = vpow2.f32 %v1273_v0  ;;  %v1276_v43 = vmul.f32 -1.442695, %v2343_v41  ;;  %vm2401_vm12 = vmor %vm747_vm6, %vm748_vm9 }
 0x190   :  { %v761_v16 = vadd.f32 %v2273_v45, %v760_v61  ;;  %vm763_vm11 = vweird.f32 %v2273_v45  ;;  %1397 = vpow2.f32 %v1274_v56  ;;  %v1277_v25 = vmul.f32 -1.442695, %v2356_v32 }
 0x191   :  { %v1388_v24 = vpop.eup %1387  ;;  %v735_v54 = vsel %vm2384_vm10, %v2200_v42, %v731_v60  ;;  %v766_v38 = vand.u32 2147483647, %v1995_v8  ;;  %v768_v63 = vand.u32 2147483648, %v1995_v8  ;;  %v1278_v18 = vmul.f32 -1.442695, %v2368_v28 }
 0x192   :  { %v1390_v57 = vpop.eup %1389  ;;  %v754_v51 = vor.u32 1.1754944e-38, %v753_v14  ;;  %vm762_vm14 = vweird.f32 %v1995_v8  ;;  %1399 = vpow2.f32 %v1275_v2  ;;  %v1279_v42 = vmul.f32 -1.442695, %v2372_v20 }
 0x193   :  { %v1392_v40 = vpop.eup %1391  ;;  %v725_v31 = vsel %vm2327_vm15, %v2260_v33, %v720_v53  ;;  %v750_v47 = vsel %vm2401_vm12, %v2222_v62, %v746_v59  ;;  %vm2415_vm2 = vmor %vm762_vm14, %vm763_vm11  ;;  %1401 = vpow2.f32 %v1276_v43  ;;  %v1280_v8 = vmul.f32 -1.442695, %v2377_v37 }
 0x194   :  { %v1394_v12 = vpop.eup %1393  ;;  %v740_v27 = vsel %vm2337_vm0, %v739_v29, %v735_v54  ;;  %v765_v33 = vsel %vm2415_vm2, %v2273_v45, %v761_v16  ;;  %1403 = vpow2.f32 %v1277_v25  ;;  %v2425_v6 = vadd.f32 1.0, %v1388_v24 }
 0x195   :  { %v1396_v62 = vpop.eup %1395  ;;  %vm767_vm3 = vcmp.eq.f32.partialorder %v766_v38, 8.507059e+37  ;;  %v769_v49 = vor.u32 1.1754944e-38, %v768_v63  ;;  %1405 = vpow2.f32 %v1278_v18  ;;  %v2427_v48 = vadd.f32 1.0, %v1390_v57 }
 0x196   :  { %v1398_v5 = vpop.eup %1397  ;;  %v755_v26 = vsel %vm2363_vm7, %v754_v51, %v750_v47  ;;  %v2432_v10 = vmul.f32 %v725_v31, %v1857_v9  ;;  %1407 = vpow2.f32 %v1279_v42  ;;  %v2434_v29 = vadd.f32 1.0, %v1392_v40 }
 0x197   :  { %v770_v45 = vsel %vm767_vm3, %v769_v49, %v765_v33  ;;  %v2437_v13 = vmul.f32 %v740_v27, %v1876_v50  ;;  %1409 = vpow2.f32 %v1280_v8  ;;  %v2439_v35 = vadd.f32 1.0, %v1394_v12 }
 0x198   :  { %v1400_v4 = vpop.eup %1399  ;;  %v2441_v1 = vadd.f32 1.0, %v1396_v62  ;;  %1411 = vrcp.f32 %v2425_v6  ;;  %v2445_v22 = vmul.f32 %v755_v26, %v1884_v55  ;;  %v2447_v9 = vadd.f32 1.0, %v1398_v5 }
 0x199   :  { %v1402_v21 = vpop.eup %1401  ;;  %1413 = vrcp.f32 %v2427_v48  ;;  %v2451_v50 = vmul.f32 %v770_v45, %v3100_v39  ;;  %v1281_v36 = vmul.f32 -1.442695, %v2432_v10  ;;  %v1282_v0 = vmul.f32 -1.442695, %v2437_v13 }
 0x19a   :  { %v1404_v14 = vpop.eup %1403  ;;  %1415 = vrcp.f32 %v2434_v29  ;;  %v2457_v55 = vadd.f32 1.0, %v1400_v4  ;;  %v1283_v56 = vmul.f32 -1.442695, %v2445_v22  ;;  %v863_v2 = vand.u32 2147483648, %v2425_v6 }
 0x19b   :  { %3101 = vst [vmem:[#allocation2_spill] sm:$0xff] %v2451_v50  ;;  %v1406_v34 = vpop.eup %1405  ;;  %1417 = vrcp.f32 %v2439_v35  ;;  %v1284_v60 = vmul.f32 -1.442695, %v2451_v50  ;;  %v878_v16 = vand.u32 2147483648, %v2427_v48  ;;  %v861_v24 = vand.u32 2147483647, %v2425_v6 }
 0x19c   :  { %v1408_v15 = vpop.eup %1407  ;;  %1419 = vrcp.f32 %v2441_v1  ;;  %v2483_v63 = vor.u32 1.1754944e-38, %v863_v2  ;;  %v876_v18 = vand.u32 2147483647, %v2427_v48  ;;  %v893_v11 = vand.u32 2147483648, %v2434_v29 }
 0x19d   :  { %v1410_v61 = vpop.eup %1409  ;;  %1421 = vrcp.f32 %v2447_v9  ;;  %v2489_v42 = vadd.f32 1.0, %v1402_v21  ;;  %v891_v40 = vand.u32 2147483647, %v2434_v29  ;;  %v2496_v8 = vadd.f32 1.0, %v1404_v14 }
 0x19e   :  { %v2462_v53 = vpop.eup %1411  ;;  %1423 = vpow2.f32 %v1281_v36  ;;  %v2498_v27 = vor.u32 1.1754944e-38, %v878_v16  ;;  %v2504_v49 = vadd.f32 1.0, %v1406_v34  ;;  %v2506_v5 = vadd.f32 1.0, %v1408_v15 }
 0x19f   :  { %v2465_v52 = vpop.eup %1413  ;;  %1425 = vpow2.f32 %v1282_v0  ;;  %v853_v23 = vmul.f32 %v2462_v53, %v2425_v6  ;;  %vm857_vm4 = vweird.f32 %v2425_v6  ;;  %v908_v45 = vand.u32 2147483648, %v2439_v35 }
 0x1a0   :  { %v2468_v59 = vpop.eup %1415  ;;  %1427 = vrcp.f32 %v2457_v55  ;;  %v868_v54 = vmul.f32 %v2465_v52, %v2427_v48  ;;  %vm872_vm5 = vweird.f32 %v2427_v48  ;;  %v2511_v14 = vor.u32 1.1754944e-38, %v893_v11 }
 0x1a1   :  { %v2471_v43 = vpop.eup %1417  ;;  %1429 = vpow2.f32 %v1283_v56  ;;  %v883_v57 = vmul.f32 %v2468_v59, %v2434_v29  ;;  %v854_v12 = vsub.f32 1.0, %v853_v23  ;;  %v906_v39 = vand.u32 2147483647, %v2439_v35 }
 0x1a2   :  { %v2476_v25 = vpop.eup %1419  ;;  %1431 = vpow2.f32 %v1284_v60  ;;  %v898_v31 = vmul.f32 %v2471_v43, %v2439_v35  ;;  %v869_v26 = vsub.f32 1.0, %v868_v54  ;;  %v923_v36 = vand.u32 2147483648, %v2441_v1 }
 0x1a3   :  { %v2481_v38 = vpop.eup %1421  ;;  %v913_v47 = vmul.f32 %v2476_v25, %v2441_v1  ;;  %v884_v21 = vsub.f32 1.0, %v883_v57  ;;  %v2515_v34 = vadd.f32 1.0, %v1410_v61  ;;  %vm887_vm8 = vweird.f32 %v2434_v29 }
 0x1a4   :  { %v1424_v51 = vpop.eup %1423  ;;  %v928_v33 = vmul.f32 %v2481_v38, %v2447_v9  ;;  %v899_v56 = vsub.f32 1.0, %v898_v31  ;;  %v855_v2 = vmul.f32 %v2462_v53, %v854_v12  ;;  %vm902_vm13 = vweird.f32 %v2439_v35 }
 0x1a5   :  { %v1426_v19 = vpop.eup %1425  ;;  %v2517_v15 = vadd.f32 1.0, %v1424_v51  ;;  %v914_v60 = vsub.f32 1.0, %v913_v47  ;;  %v921_v23 = vand.u32 2147483647, %v2441_v1  ;;  %v870_v11 = vmul.f32 %v2465_v52, %v869_v26 }
 0x1a6   :  { %v2502_v62 = vpop.eup %1427  ;;  %v929_v16 = vsub.f32 1.0, %v928_v33  ;;  %v2525_v57 = vadd.f32 1.0, %v1426_v19  ;;  %v2530_v51 = vor.u32 1.1754944e-38, %v908_v45  ;;  %vm2535_vm15 = vcmp.eq.f32.partialorder %v861_v24, 8.507059e+37 }
 0x1a7   :  { %v1430_v4 = vpop.eup %1429  ;;  %v943_v54 = vmul.f32 %v2502_v62, %v2457_v55  ;;  %v885_v12 = vmul.f32 %v2468_v59, %v884_v21  ;;  %v2540_v33 = vor.u32 1.1754944e-38, %v923_v36  ;;  %1433 = vrcp.f32 %v2489_v42 }
 0x1a8   :  { %v1432_v0 = vpop.eup %1431  ;;  %v2527_v61 = vadd.f32 1.0, %v1430_v4  ;;  %vm858_vm1 = vweird.f32 %v2462_v53  ;;  %vm873_vm7 = vweird.f32 %v2465_v52  ;;  %vm2546_vm9 = vcmp.eq.f32.partialorder %v876_v18, 8.507059e+37 }
 0x1a9   :  { %v2533_v31 = vadd.f32 1.0, %v1432_v0  ;;  %v900_v24 = vmul.f32 %v2471_v43, %v899_v56  ;;  %v915_v26 = vmul.f32 %v2476_v25, %v914_v60  ;;  %v856_v45 = vadd.f32 %v2462_v53, %v855_v2  ;;  %vm2575_vm2 = vmor %vm857_vm4, %vm858_vm1 }
 0x1aa   :  { %vm2553_vm10 = vcmp.eq.f32.partialorder %v891_v40, 8.507059e+37  ;;  %v930_v21 = vmul.f32 %v2481_v38, %v929_v16  ;;  %v944_v36 = vsub.f32 1.0, %v943_v54  ;;  %1435 = vrcp.f32 %v2496_v8  ;;  %vm2588_vm6 = vmor %vm872_vm5, %vm873_vm7 }
 0x1ab   :  { %v871_v18 = vadd.f32 %v2465_v52, %v870_v11  ;;  %vm888_vm11 = vweird.f32 %v2468_v59  ;;  %vm2561_vm12 = vcmp.eq.f32.partialorder %v906_v39, 8.507059e+37  ;;  %vm2565_vm14 = vcmp.eq.f32.partialorder %v921_v23, 8.507059e+37 }
 0x1ac   :  { %v936_v40 = vand.u32 2147483647, %v2447_v9  ;;  %v938_v60 = vand.u32 2147483648, %v2447_v9  ;;  %v886_v39 = vadd.f32 %v2468_v59, %v885_v12  ;;  %vm903_vm3 = vweird.f32 %v2471_v43  ;;  %vm2605_vm5 = vmor %vm887_vm8, %vm888_vm11 }
 0x1ad   :  { %vm947_vm0 = vweird.f32 %v2457_v55  ;;  %v951_v23 = vand.u32 2147483647, %v2457_v55  ;;  %1437 = vrcp.f32 %v2504_v49  ;;  %v901_v16 = vadd.f32 %v2471_v43, %v900_v24  ;;  %v2596_v11 = vpop.eup %1433  ;;  %vm2619_vm7 = vmor %vm902_vm13, %vm903_vm3 }
 0x1ae   :  { %v916_v54 = vadd.f32 %v2476_v25, %v915_v26  ;;  %vm918_vm4 = vweird.f32 %v2476_v25  ;;  %vm933_vm1 = vweird.f32 %v2481_v38  ;;  %v860_v12 = vsel %vm2575_vm2, %v2462_v53, %v856_v45 }
 0x1af   :  { %v931_v24 = vadd.f32 %v2481_v38, %v930_v21  ;;  %v945_v26 = vmul.f32 %v2502_v62, %v944_v36  ;;  %1439 = vrcp.f32 %v2506_v5  ;;  %v875_v50 = vsel %vm2588_vm6, %v2465_v52, %v871_v18 }
 0x1b0   :  { %vm2623_vm8 = vcmp.eq.f32.partialorder %v936_v40, 8.507059e+37  ;;  %v939_v45 = vor.u32 1.1754944e-38, %v938_v60  ;;  %v953_v21 = vand.u32 2147483648, %v2457_v55  ;;  %v2628_v36 = vpop.eup %1435  ;;  %v890_v52 = vsel %vm2605_vm5, %v2468_v59, %v886_v39 }
 0x1b1   :  { %vm3122_vm13 = vweird.f32 %v2441_v1  ;;  %vm948_vm11 = vweird.f32 %v2502_v62  ;;  %vm2642_vm2 = vcmp.eq.f32.partialorder %v951_v23, 8.507059e+37  ;;  %v958_v40 = vmul.f32 %v2596_v11, %v2489_v42 }
 0x1b2   :  { %vm2637_vm6 = vmor %vm3122_vm13, %vm918_vm4  ;;  %1441 = vrcp.f32 %v2515_v34  ;;  %v2652_v59 = vsel %vm2535_vm15, %v2483_v63, %v860_v12  ;;  %v905_v1 = vsel %vm2619_vm7, %v2471_v43, %v901_v16  ;;  %vm3127_vm3 = vweird.f32 %v2447_v9 }
 0x1b3   :  { %v920_v60 = vsel %vm2637_vm6, %v2476_v25, %v916_v54  ;;  %vm2664_vm4 = vmor %vm3127_vm3, %vm933_vm1  ;;  %v973_v63 = vmul.f32 %v2628_v36, %v2496_v8  ;;  %v2670_v47 = vpop.eup %1437  ;;  %v2675_v43 = vsel %vm2546_vm9, %v2498_v27, %v875_v50  ;;  %v946_v9 = vadd.f32 %v2502_v62, %v945_v26 }
 0x1b4   :  { %v935_v25 = vsel %vm2664_vm4, %v2481_v38, %v931_v24  ;;  %1443 = vrcp.f32 %v2517_v15  ;;  %v2685_v39 = vsel %vm2553_vm10, %v2511_v14, %v890_v52  ;;  %v954_v23 = vor.u32 1.1754944e-38, %v953_v21  ;;  %vm2711_vm15 = vmor %vm947_vm0, %vm948_vm11 }
 0x1b5   :  { %v968_v6 = vand.u32 2147483648, %v2489_v42  ;;  %v988_v50 = vmul.f32 %v2670_v47, %v2504_v49  ;;  %v2690_v27 = vpop.eup %1439  ;;  %v2695_v38 = vsel %vm2561_vm12, %v2530_v51, %v905_v1  ;;  %v2700_v19 = vsel %vm2565_vm14, %v2540_v33, %v920_v60 }
 0x1b6   :  { %v959_v14 = vsub.f32 1.0, %v958_v40  ;;  %v966_v4 = vand.u32 2147483647, %v2489_v42  ;;  %v2705_v16 = vsel %vm2623_vm8, %v939_v45, %v935_v25  ;;  %vm962_vm9 = vweird.f32 %v2489_v42 }
 0x1b7   :  { %v974_v51 = vsub.f32 1.0, %v973_v63  ;;  %v989_v33 = vsub.f32 1.0, %v988_v50  ;;  %v1003_v56 = vmul.f32 %v2690_v27, %v2506_v5  ;;  %v950_v12 = vsel %vm2711_vm15, %v2502_v62, %v946_v9 }
 0x1b8   :  { %v2718_v54 = vpop.eup %1441  ;;  %vm977_vm10 = vweird.f32 %v2496_v8  ;;  %v983_v55 = vand.u32 2147483648, %v2496_v8  ;;  %1445 = vrcp.f32 %v2525_v57  ;;  %v969_v48 = vor.u32 1.1754944e-38, %v968_v6 }
 0x1b9   :  { %v981_v24 = vand.u32 2147483647, %v2496_v8  ;;  %v998_v26 = vand.u32 2147483648, %v2504_v49  ;;  %v1004_v29 = vsub.f32 1.0, %v1003_v56  ;;  %v960_v45 = vmul.f32 %v2596_v11, %v959_v14 }
 0x1ba   :  { %v2728_v53 = vpop.eup %1443  ;;  %v996_v21 = vand.u32 2147483647, %v2504_v49  ;;  %v1011_v62 = vand.u32 2147483647, %v2506_v5  ;;  %v1018_v52 = vmul.f32 %v2718_v54, %v2515_v34  ;;  %v2737_v35 = vsel %vm2642_vm2, %v954_v23, %v950_v12 }
 0x1bb   :  { %v975_v40 = vmul.f32 %v2628_v36, %v974_v51  ;;  %v990_v1 = vmul.f32 %v2670_v47, %v989_v33  ;;  %vm992_vm0 = vweird.f32 %v2504_v49  ;;  %vm2742_vm12 = vcmp.eq.f32.partialorder %v966_v4, 8.507059e+37 }
 0x1bc   :  { %v984_v2 = vor.u32 1.1754944e-38, %v983_v55  ;;  %v1005_v63 = vmul.f32 %v2690_v27, %v1004_v29  ;;  %v1019_v25 = vsub.f32 1.0, %v1018_v52  ;;  %v1033_v9 = vmul.f32 %v2728_v53, %v2517_v15 }
 0x1bd   :  { %vm963_vm14 = vweird.f32 %v2596_v11  ;;  %vm2750_vm1 = vcmp.eq.f32.partialorder %v981_v24, 8.507059e+37  ;;  %v999_v23 = vor.u32 1.1754944e-38, %v998_v26  ;;  %vm1007_vm5 = vweird.f32 %v2506_v5 }
 0x1be   :  { %v1013_v6 = vand.u32 2147483648, %v2506_v5  ;;  %v2756_v50 = vpop.eup %1445  ;;  %v961_v14 = vadd.f32 %v2596_v11, %v960_v45  ;;  %vm978_vm7 = vweird.f32 %v2628_v36  ;;  %vm2760_vm8 = vcmp.eq.f32.partialorder %v996_v21, 8.507059e+37  ;;  %vm2778_vm2 = vmor %vm962_vm9, %vm963_vm14 }
 0x1bf   :  { %vm2764_vm13 = vcmp.eq.f32.partialorder %v1011_v62, 8.507059e+37  ;;  %v1026_v51 = vand.u32 2147483647, %v2515_v34  ;;  %1447 = vrcp.f32 %v2527_v61  ;;  %v976_v33 = vadd.f32 %v2628_v36, %v975_v40  ;;  %vm2788_vm3 = vmor %vm977_vm10, %vm978_vm7 }
 0x1c0   :  { %v991_v56 = vadd.f32 %v2670_v47, %v990_v1  ;;  %vm993_vm6 = vweird.f32 %v2670_v47  ;;  %vm1008_vm11 = vweird.f32 %v2690_v27  ;;  %v1006_v55 = vadd.f32 %v2690_v27, %v1005_v63 }
 0x1c1   :  { %v1020_v24 = vmul.f32 %v2718_v54, %v1019_v25  ;;  %v1034_v26 = vsub.f32 1.0, %v1033_v9  ;;  %v1048_v29 = vmul.f32 %v2756_v50, %v2525_v57  ;;  %v1014_v21 = vor.u32 1.1754944e-38, %v1013_v6  ;;  %vm2800_vm15 = vmor %vm992_vm0, %vm993_vm6 }
 0x1c2   :  { %vm1022_vm4 = vweird.f32 %v2515_v34  ;;  %v1028_v42 = vand.u32 2147483648, %v2515_v34  ;;  %v1043_v62 = vand.u32 2147483648, %v2517_v15  ;;  %v965_v52 = vsel %vm2778_vm2, %v2596_v11, %v961_v14  ;;  %vm2821_vm0 = vmor %vm1007_vm5, %vm1008_vm11 }
 0x1c3   :  { %vm2804_vm9 = vcmp.eq.f32.partialorder %v1026_v51, 8.507059e+37  ;;  %vm1037_vm10 = vweird.f32 %v2517_v15  ;;  %v1041_v1 = vand.u32 2147483647, %v2517_v15  ;;  %1449 = vrcp.f32 %v2533_v31 }
 0x1c4   :  { %v980_v11 = vsel %vm2788_vm3, %v2628_v36, %v976_v33  ;;  %v995_v49 = vsel %vm2800_vm15, %v2670_v47, %v991_v56  ;;  %vm1023_vm14 = vweird.f32 %v2718_v54  ;;  %v1058_v25 = vand.u32 2147483648, %v2525_v57 }
 0x1c5   :  { %v2827_v9 = vpop.eup %1447  ;;  %v1010_v36 = vsel %vm2821_vm0, %v2690_v27, %v1006_v55  ;;  %v1021_v47 = vadd.f32 %v2718_v54, %v1020_v24  ;;  %v1035_v6 = vmul.f32 %v2728_v53, %v1034_v26  ;;  %v1049_v14 = vsub.f32 1.0, %v1048_v29 }
 0x1c6   :  { %v970_v5 = vsel %vm2742_vm12, %v969_v48, %v965_v52  ;;  %v1029_v51 = vor.u32 1.1754944e-38, %v1028_v42  ;;  %v1044_v33 = vor.u32 1.1754944e-38, %v1043_v62  ;;  %v1063_v56 = vmul.f32 %v2827_v9, %v2527_v61  ;;  %vm2851_vm12 = vmor %vm1022_vm4, %vm1023_vm14 }
 0x1c7   :  { %v985_v12 = vsel %vm2750_vm1, %v984_v2, %v980_v11  ;;  %vm1038_vm5 = vweird.f32 %v2728_v53  ;;  %vm1052_vm7 = vweird.f32 %v2525_v57  ;;  %v1056_v27 = vand.u32 2147483647, %v2525_v57 }
 0x1c8   :  { %v1000_v55 = vsel %vm2760_vm8, %v999_v23, %v995_v49  ;;  %v1015_v48 = vsel %vm2764_vm13, %v1014_v21, %v1010_v36  ;;  %vm1053_vm1 = vweird.f32 %v2756_v50  ;;  %v1064_v2 = vsub.f32 1.0, %v1063_v56  ;;  %vm2888_vm2 = vmor %vm1037_vm10, %vm1038_vm5 }
 0x1c9   :  { %v2856_v18 = vpop.eup %1449  ;;  %v1025_v23 = vsel %vm2851_vm12, %v2718_v54, %v1021_v47  ;;  %v1036_v4 = vadd.f32 %v2728_v53, %v1035_v6  ;;  %vm2862_vm8 = vcmp.eq.f32.partialorder %v1041_v1, 8.507059e+37  ;;  %v1050_v34 = vmul.f32 %v2756_v50, %v1049_v14 }
 0x1ca   :  { %v1059_v24 = vor.u32 1.1754944e-38, %v1058_v25  ;;  %v1065_v26 = vmul.f32 %v2827_v9, %v1064_v2  ;;  %vm1067_vm13 = vweird.f32 %v2527_v61  ;;  %v1078_v29 = vmul.f32 %v2856_v18, %v2533_v31 }
 0x1cb   :  { %v1092_v45 = vmul.f32 %v2652_v59, %v2271_v46  ;;  %vm2873_vm6 = vcmp.eq.f32.partialorder %v1056_v27, 8.507059e+37  ;;  %v1071_v21 = vand.u32 2147483647, %v2527_v61  ;;  %v1073_v42 = vand.u32 2147483648, %v2527_v61 }
 0x1cc   :  { %vm1082_vm11 = vweird.f32 %v2533_v31  ;;  %v1093_v62 = vmul.f32 %v2675_v43, %v2280_v58  ;;  %v1030_v52 = vsel %vm2804_vm9, %v1029_v51, %v1025_v23  ;;  %v1079_v59 = vsub.f32 1.0, %v1078_v29  ;;  %vm2917_vm9 = vmor %vm1052_vm7, %vm1053_vm1 }
 0x1cd   :  { %v1086_v40 = vand.u32 2147483647, %v2533_v31  ;;  %v1094_v1 = vmul.f32 %v2685_v39, %v2287_v3  ;;  %v1040_v58 = vsel %vm2888_vm2, %v2728_v53, %v1036_v4  ;;  %v1051_v43 = vadd.f32 %v2756_v50, %v1050_v34 }
 0x1ce   :  { %vm1068_vm3 = vweird.f32 %v2827_v9  ;;  %v1095_v15 = vmul.f32 %v2695_v38, %v2304_v7  ;;  %v1066_v8 = vadd.f32 %v2827_v9, %v1065_v26  ;;  %v1080_v11 = vmul.f32 %v2856_v18, %v1079_v59 }
 0x1cf   :  { %v1096_v49 = vmul.f32 %v2700_v19, %v2312_v17  ;;  %v1108_v63 = vpack.c.bf16 %v1092_v45, %v1092_v45  ;;  %vm2906_vm4 = vcmp.eq.f32.partialorder %v1071_v21, 8.507059e+37  ;;  %vm1083_vm15 = vweird.f32 %v2856_v18  ;;  %vm2932_vm10 = vmor %vm1067_vm13, %vm1068_vm3 }
 0x1d0   :  { %v1097_v39 = vmul.f32 %v2705_v16, %v2317_v44  ;;  %v1109_v53 = vpack.c.bf16 %v1093_v62, %v1093_v62  ;;  %v1081_v17 = vadd.f32 %v2856_v18, %v1080_v11  ;;  %v1088_v38 = vand.u32 2147483648, %v2533_v31  ;;  %vm2946_vm14 = vmor %vm1082_vm11, %vm1083_vm15 }
 0x1d1   :  { %v1098_v19 = vmul.f32 %v2737_v35, %v2334_v30  ;;  %v1110_v25 = vpack.c.bf16 %v1094_v1, %v1094_v1  ;;  %v1055_v44 = vsel %vm2917_vm9, %v2756_v50, %v1051_v43  ;;  %v1099_v16 = vmul.f32 %v970_v5, %v2343_v41 }
 0x1d2   :  { %v1111_v36 = vpack.c.bf16 %v1095_v15, %v1095_v15  ;;  %vm1124_vm0 = vcmask 125952   ;;  %v1045_v30 = vsel %vm2862_vm8, %v1044_v33, %v1040_v58  ;;  %v1070_v35 = vsel %vm2932_vm10, %v2827_v9, %v1066_v8 }
 0x1d3   :  { %v1100_v50 = vmul.f32 %v985_v12, %v2356_v32  ;;  %v1112_v41 = vpack.c.bf16 %v1096_v49, %v1096_v49  ;;  %1125 = vst.msk [vmem:[%s3034_s5] sm:$0xf] %vm1124_vm0, %v1108_v63  ;;  %v1074_v47 = vor.u32 1.1754944e-38, %v1073_v42  ;;  %v1085_v9 = vsel %vm2946_vm14, %v2856_v18, %v1081_v17 }
 0x1d4   :  { %v1101_v6 = vmul.f32 %v1000_v55, %v2368_v28  ;;  %v1113_v31 = vpack.c.bf16 %v1097_v39, %v1097_v39  ;;  %1126 = vst.msk [vmem:[%s3034_s5 + $0x4] sm:$0xf] %vm1124_vm0, %v1109_v53  ;;  %v1060_v32 = vsel %vm2873_vm6, %v1059_v24, %v1055_v44  ;;  %v1089_v14 = vor.u32 1.1754944e-38, %v1088_v38 }
 0x1d5   :  { %v1102_v5 = vmul.f32 %v1015_v48, %v2372_v20  ;;  %v1114_v51 = vpack.c.bf16 %v1098_v19, %v1098_v19  ;;  %1127 = vst.msk [vmem:[%s3034_s5 + $0x8] sm:$0xf] %vm1124_vm0, %v1110_v25  ;;  %v1075_v28 = vsel %vm2906_vm4, %v1074_v47, %v1070_v35  ;;  %vm1087_vm5 = vcmp.eq.f32.partialorder %v1086_v40, 8.507059e+37 }
 0x1d6   :  { %v1103_v33 = vmul.f32 %v1030_v52, %v2377_v37  ;;  %v1115_v56 = vpack.c.bf16 %v1099_v16, %v1099_v16  ;;  %1128 = vst.msk [vmem:[%s3034_s5 + $0xc] sm:$0xf] %vm1124_vm0, %v1111_v36  ;;  %v1090_v12 = vsel %vm1087_vm5, %v1089_v14, %v1085_v9  ;;  %v1104_v20 = vmul.f32 %v1045_v30, %v2432_v10  ;;  %v3166_v10 = vld [vmem:[#allocation2_spill] sm:$0xff] }
 0x1d7   :  { %v1116_v27 = vpack.c.bf16 %v1100_v50, %v1100_v50  ;;  %1129 = vst.msk [vmem:[%s3034_s5 + $0x10] sm:$0xf] %vm1124_vm0, %v1112_v41  ;;  %v1105_v55 = vmul.f32 %v1060_v32, %v2437_v13  ;;  %v1117_v48 = vpack.c.bf16 %v1101_v6, %v1101_v6  ;;  %v1106_v37 = vmul.f32 %v1075_v28, %v2445_v22 }
 0x1d8   :  { %1130 = vst.msk [vmem:[%s3034_s5 + $0x14] sm:$0xf] %vm1124_vm0, %v1113_v31  ;;  %v1118_v60 = vpack.c.bf16 %v1102_v5, %v1102_v5  ;;  %v1107_v2 = vmul.f32 %v1090_v12, %v3166_v10  ;;  %v1119_v18 = vpack.c.bf16 %v1103_v33, %v1103_v33  ;;  %v1120_v13 = vpack.c.bf16 %v1104_v20, %v1104_v20 }
 0x1d9   :  { %1131 = vst.msk [vmem:[%s3034_s5 + $0x18] sm:$0xf] %vm1124_vm0, %v1114_v51  ;;  %v1121_v22 = vpack.c.bf16 %v1105_v55, %v1105_v55  ;;  %v1122_v23 = vpack.c.bf16 %v1106_v37, %v1106_v37 }
 0x1da   :  { %1132 = vst.msk [vmem:[%s3034_s5 + $0x1c] sm:$0xf] %vm1124_vm0, %v1115_v56  ;;  %v1123_v4 = vpack.c.bf16 %v1107_v2, %v1107_v2 }
 0x1db   :  { %1133 = vst.msk [vmem:[%s3034_s5 + $0x20] sm:$0xf] %vm1124_vm0, %v1116_v27 }
 0x1dc   :  { %1134 = vst.msk [vmem:[%s3034_s5 + $0x24] sm:$0xf] %vm1124_vm0, %v1117_v48 }
 0x1dd   :  { %1135 = vst.msk [vmem:[%s3034_s5 + $0x28] sm:$0xf] %vm1124_vm0, %v1118_v60 }
 0x1de   :  { %1136 = vst.msk [vmem:[%s3034_s5 + $0x2c] sm:$0xf] %vm1124_vm0, %v1119_v18 }
 0x1df   :  { %1137 = vst.msk [vmem:[%s3034_s5 + $0x30] sm:$0xf] %vm1124_vm0, %v1120_v13 }
 0x1e0   :  { %1138 = vst.msk [vmem:[%s3034_s5 + $0x34] sm:$0xf] %vm1124_vm0, %v1121_v22 }
 0x1e1   :  { %1139 = vst.msk [vmem:[%s3034_s5 + $0x38] sm:$0xf] %vm1124_vm0, %v1122_v23 }
 0x1e2   :  { %1140 = vst.msk [vmem:[%s3034_s5 + $0x3c] sm:$0xf] %vm1124_vm0, %v1123_v4 }

// kernel: vqvae_forward.28
= control target key start
LH: loop header
LB: loop body
LE: loop exit
PB: predicated region body
PF: predicated region fallthrough
CT: control target
= control target key end

     0   :  { %vm185_vm0 = vcmask 130048   ;;  %s2049_s1 = inlined_call_operand.vmem [shape: bf16[144,16], index: 1, kind: input, shape index: {}]   ;;  %s2050_s0 = inlined_call_operand.vmem [shape: bf16[128,144], index: 0, kind: input, shape index: {}]   ;;  %s2051_s2 = inlined_call_operand.vmem [shape: f32[1,16], index: 2, kind: input, shape index: {}]   ;;  %s2052_s4 = inlined_call_operand.vmem [shape: f32[1,16], index: 4, kind: input, shape index: {}]   ;;  %s2053_s3 = inlined_call_operand.vmem [shape: f32[1,16], index: 3, kind: input, shape index: {}]   ;;  %s2054_s5 = inlined_call_operand.vmem [shape: bf16[128,16], index: 5, kind: output, shape index: {}]  }
   0x1   :  { %v972_v0 = vld [vmem:[%s2049_s1 + $0x38] sm:$0xff]  ;;  %v973_v1 = vld [vmem:[%s2049_s1 + $0x40] sm:$0xff]  ;;  %v829_v3 = vld [vmem:[%s2050_s0 + $0x8] sm:$0xf0] }
   0x2   :  { %v949_v2 = vld [vmem:[%s2050_s0 + $0x4] sm:$0xf]  ;;  %210 = vmatpush.bf16.msra.mxu0 %v972_v0  ;;  %266 = vmatpush.bf16.msra.mxu1 %v973_v1  ;;  %v971_v5 = vld [vmem:[%s2049_s1 + $0x30] sm:$0xff]  ;;  %v970_v6 = vld [vmem:[%s2049_s1 + $0x28] sm:$0xff] }
   0x3   :  { %v832_v4 = vor.u32 %v949_v2, %v829_v3  ;;  %974 = vmatpush.bf16.msra.mxu2 %v972_v0  ;;  %982 = vmatpush.bf16.msra.mxu3 %v973_v1  ;;  %v969_v7 = vld [vmem:[%s2049_s1 + $0x20] sm:$0xff]  ;;  %v968_v8 = vld [vmem:[%s2049_s1 + $0x18] sm:$0xff]  ;;  %v951_v9 = vld [vmem:[%s2050_s0 + $0x14] sm:$0xf] }
   0x4   :  { %v837_v10 = vld [vmem:[%s2050_s0 + $0x18] sm:$0xf0]  ;;  %v967_v12 = vld [vmem:[%s2049_s1 + $0x10] sm:$0xff]  ;;  %v966_v16 = vld [vmem:[%s2049_s1 + $0x8] sm:$0xff] }
   0x5   :  { %925 = vmatmul.msk.bf16.vlgmr.msra.gmra.mxu1 %vm185_vm0, %v832_v4  ;;  %v840_v11 = vor.u32 %v951_v9, %v837_v10  ;;  %v959_v13 = vld [vmem:[%s2050_s0 + $0x54] sm:$0xf]  ;;  %v869_v14 = vld [vmem:[%s2050_s0 + $0x58] sm:$0xf0]  ;;  %v965_v17 = vld [vmem:[%s2049_s1] sm:$0xff] }
   0x6   :  { %211 = vmatpush.bf16.msra.mxu0 %v971_v5  ;;  %v872_v15 = vor.u32 %v959_v13, %v869_v14  ;;  %v827_v18 = vld [vmem:[%s2050_s0] sm:$0xf]  ;;  %v950_v19 = vld [vmem:[%s2050_s0 + $0x4] sm:$0xf0]  ;;  %v953_v24 = vld [vmem:[%s2050_s0 + $0x24] sm:$0xf] }
   0x7   :  { %975 = vmatpush.bf16.msra.mxu2 %v971_v5  ;;  %v859_v20 = vld [vmem:[%s2050_s0 + $0x40] sm:$0xf]  ;;  %v958_v21 = vld [vmem:[%s2050_s0 + $0x44] sm:$0xf0]  ;;  %v828_v22 = vor.u32 %v950_v19, %v827_v18  ;;  %v845_v25 = vld [vmem:[%s2050_s0 + $0x28] sm:$0xf0] }
   0x8   :  { %930 = vmatmul.msk.bf16.vlgmr.msra.gmra.mxu3 %vm185_vm0, %v872_v15  ;;  %v860_v23 = vor.u32 %v958_v21, %v859_v20  ;;  %v848_v26 = vor.u32 %v953_v24, %v845_v25  ;;  %v961_v27 = vld [vmem:[%s2050_s0 + $0x64] sm:$0xf]  ;;  %v877_v28 = vld [vmem:[%s2050_s0 + $0x68] sm:$0xf0]  ;;  %v835_v30 = vld [vmem:[%s2050_s0 + $0x10] sm:$0xf] }
   0x9   :  { %v880_v29 = vor.u32 %v961_v27, %v877_v28  ;;  %v952_v31 = vld [vmem:[%s2050_s0 + $0x14] sm:$0xf0]  ;;  %v867_v32 = vld [vmem:[%s2050_s0 + $0x50] sm:$0xf]  ;;  %v955_v36 = vld [vmem:[%s2050_s0 + $0x34] sm:$0xf] }
   0xa   :  { %212 = vmatpush.bf16.msra.mxu0 %v970_v6  ;;  %v960_v33 = vld [vmem:[%s2050_s0 + $0x54] sm:$0xf0]  ;;  %v836_v34 = vor.u32 %v952_v31, %v835_v30  ;;  %v853_v37 = vld [vmem:[%s2050_s0 + $0x38] sm:$0xf0]  ;;  %v963_v39 = vld [vmem:[%s2050_s0 + $0x74] sm:$0xf] }
   0xb   :  { %976 = vmatpush.bf16.msra.mxu2 %v970_v6  ;;  %v868_v35 = vor.u32 %v960_v33, %v867_v32  ;;  %v856_v38 = vor.u32 %v955_v36, %v853_v37  ;;  %v885_v40 = vld [vmem:[%s2050_s0 + $0x78] sm:$0xf0]  ;;  %v843_v42 = vld [vmem:[%s2050_s0 + $0x20] sm:$0xf]  ;;  %v954_v43 = vld [vmem:[%s2050_s0 + $0x24] sm:$0xf0] }
   0xc   :  { %v888_v41 = vor.u32 %v963_v39, %v885_v40  ;;  %v875_v44 = vld [vmem:[%s2050_s0 + $0x60] sm:$0xf]  ;;  %v962_v45 = vld [vmem:[%s2050_s0 + $0x64] sm:$0xf0]  ;;  %v844_v46 = vor.u32 %v954_v43, %v843_v42  ;;  %v957_v48 = vld [vmem:[%s2050_s0 + $0x44] sm:$0xf] }
   0xd   :  { %v876_v47 = vor.u32 %v962_v45, %v875_v44  ;;  %v861_v49 = vld [vmem:[%s2050_s0 + $0x48] sm:$0xf0]  ;;  %v851_v51 = vld [vmem:[%s2050_s0 + $0x30] sm:$0xf]  ;;  %v956_v52 = vld [vmem:[%s2050_s0 + $0x34] sm:$0xf0] }
   0xe   :  { %213 = vmatpush.bf16.msra.mxu0 %v969_v7  ;;  %v864_v50 = vor.u32 %v957_v48, %v861_v49  ;;  %v883_v53 = vld [vmem:[%s2050_s0 + $0x70] sm:$0xf]  ;;  %v964_v54 = vld [vmem:[%s2050_s0 + $0x74] sm:$0xf0]  ;;  %v852_v55 = vor.u32 %v956_v52, %v851_v51 }
   0xf   :  { %977 = vmatpush.bf16.msra.mxu2 %v969_v7  ;;  %v884_v56 = vor.u32 %v964_v54, %v883_v53 }
  0x12   :  { %214 = vmatpush.bf16.msra.mxu0 %v968_v8 }
  0x13   :  { %978 = vmatpush.bf16.msra.mxu2 %v968_v8 }
  0x15   :  { %926 = vmatmul.msk.bf16.gmra.mxu1 %vm185_vm0, %v840_v11  ;;  %v1215_v11 = vld [vmem:[%s2051_s2] ss:$0 sm:$0xff] }
  0x16   :  { %215 = vmatpush.bf16.msra.mxu0 %v967_v12 }
  0x17   :  { %979 = vmatpush.bf16.msra.mxu2 %v967_v12 }
  0x18   :  { %931 = vmatmul.msk.bf16.gmra.mxu3 %vm185_vm0, %v880_v29 }
  0x1a   :  { %216 = vmatpush.bf16.msra.mxu0 %v966_v16 }
  0x1b   :  { %980 = vmatpush.bf16.msra.mxu2 %v966_v16 }
  0x1e   :  { %217 = vmatpush.bf16.msra.mxu0 %v965_v17 }
  0x1f   :  { %981 = vmatpush.bf16.msra.mxu2 %v965_v17 }
  0x21   :  { %218 = vmatmul.bf16.vlgmr.msra.gmra.mxu0 %v828_v22 }
  0x22   :  { %238 = vmatmul.bf16.vlgmr.msra.gmra.mxu2 %v860_v23 }
  0x25   :  { %927 = vmatmul.msk.bf16.gmra.mxu1 %vm185_vm0, %v848_v26 }
  0x28   :  { %932 = vmatmul.msk.bf16.gmra.mxu3 %vm185_vm0, %v888_v41 }
  0x31   :  { %223 = vmatmul.bf16.gmra.mxu0 %v836_v34 }
  0x32   :  { %243 = vmatmul.bf16.gmra.mxu2 %v868_v35 }
  0x35   :  { %928 = vmatmul.msk.bf16.gmra.mxu1 %vm185_vm0, %v856_v38 }
  0x41   :  { %228 = vmatmul.bf16.gmra.mxu0 %v844_v46 }
  0x42   :  { %248 = vmatmul.bf16.gmra.mxu2 %v876_v47 }
  0x45   :  { %929 = vmatmul.msk.bf16.gmra.mxu1 %vm185_vm0, %v864_v50 }
  0x51   :  { %233 = vmatmul.bf16.gmra.mxu0 %v852_v55 }
  0x52   :  { %253 = vmatmul.bf16.gmra.mxu2 %v884_v56 }
  0x82   :  { %v268_v57 = vpop.f32.mrf.mxu1 }
  0x8a   :  { %v270_v58 = vpop.f32.mrf.mxu1 }
  0x8b   :  { %v293_v4 = vpop.f32.mrf.mxu3 }
  0x92   :  { %v273_v59 = vpop.f32.mrf.mxu1 }
  0x93   :  { %v295_v8 = vpop.f32.mrf.mxu3 }
  0x9a   :  { %v275_v60 = vpop.f32.mrf.mxu1 }
  0x9b   :  { %v298_v16 = vpop.f32.mrf.mxu3 }
  0x9e   :  { %v219_v61 = vpop.f32.mrf.mxu0 }
  0x9f   :  { %v220_v17 = vadd.f32 %v1215_v11, %v219_v61 }
  0xa1   :  { %v1223_v21 = vadd.f32 %v268_v57, %v220_v17 }
  0xa2   :  { %v278_v63 = vpop.f32.mrf.mxu1 }
  0xa3   :  { %v308_v30 = vsel %vm185_vm0, %v1223_v21, 0.0  ;;  %v300_v35 = vpop.f32.mrf.mxu3 }
  0xa5   :  { %v239_v62 = vpop.f32.mrf.mxu2 }
  0xa6   :  { %v221_v0 = vpop.f32.mrf.mxu0  ;;  %v240_v46 = vadd.f32 %v1215_v11, %v239_v62 }
  0xa7   :  { %v222_v13 = vadd.f32 %v1215_v11, %v221_v0 }
  0xa9   :  { %v1220_v19 = vadd.f32 %v270_v58, %v222_v13 }
  0xaa   :  { %v280_v3 = vpop.f32.mrf.mxu1 }
  0xab   :  { %v309_v24 = vsel %vm185_vm0, %v1220_v19, 0.0  ;;  %v303_v56 = vpop.f32.mrf.mxu3 }
  0xac   :  { %v310_v34 = vadd.f32 %v309_v24, %v308_v30 }
  0xad   :  { %v241_v1 = vpop.f32.mrf.mxu2 }
  0xae   :  { %v224_v2 = vpop.f32.mrf.mxu0  ;;  %v242_v51 = vadd.f32 %v1215_v11, %v241_v1 }
  0xaf   :  { %v225_v18 = vadd.f32 %v1215_v11, %v224_v2 }
  0xb1   :  { %v1225_v22 = vadd.f32 %v273_v59, %v225_v18 }
  0xb2   :  { %v283_v7 = vpop.f32.mrf.mxu1 }
  0xb3   :  { %v311_v31 = vsel %vm185_vm0, %v1225_v22, 0.0 }
  0xb4   :  { %v312_v38 = vadd.f32 %v311_v31, %v310_v34 }
  0xb5   :  { %v244_v5 = vpop.f32.mrf.mxu2 }
  0xb6   :  { %v226_v6 = vpop.f32.mrf.mxu0  ;;  %v245_v52 = vadd.f32 %v1215_v11, %v244_v5 }
  0xb7   :  { %v227_v20 = vadd.f32 %v1215_v11, %v226_v6 }
  0xb8   :  { %v1262_v61 = vadd.f32 %v293_v4, %v245_v52 }
  0xb9   :  { %v1230_v25 = vadd.f32 %v275_v60, %v227_v20 }
  0xba   :  { %v285_v12 = vpop.f32.mrf.mxu1 }
  0xbb   :  { %v313_v36 = vsel %vm185_vm0, %v1230_v25, 0.0 }
  0xbc   :  { %v314_v41 = vadd.f32 %v313_v36, %v312_v38 }
  0xbd   :  { %v246_v9 = vpop.f32.mrf.mxu2 }
  0xbe   :  { %v229_v10 = vpop.f32.mrf.mxu0  ;;  %v247_v57 = vadd.f32 %v1215_v11, %v246_v9 }
  0xbf   :  { %v230_v23 = vadd.f32 %v1215_v11, %v229_v10 }
  0xc0   :  { %v1267_v1 = vadd.f32 %v295_v8, %v247_v57 }
  0xc1   :  { %v1237_v32 = vadd.f32 %v278_v63, %v230_v23 }
  0xc2   :  { %v288_v28 = vpop.f32.mrf.mxu1 }
  0xc3   :  { %v315_v39 = vsel %vm185_vm0, %v1237_v32, 0.0  ;;  %v1256_v53 = vadd.f32 %v288_v28, %v240_v46 }
  0xc4   :  { %v316_v43 = vadd.f32 %v315_v39, %v314_v41 }
  0xc5   :  { %v249_v14 = vpop.f32.mrf.mxu2  ;;  %v323_v62 = vsel %vm185_vm0, %v1256_v53, 0.0 }
  0xc6   :  { %v231_v15 = vpop.f32.mrf.mxu0  ;;  %v250_v63 = vadd.f32 %v1215_v11, %v249_v14 }
  0xc7   :  { %v232_v26 = vadd.f32 %v1215_v11, %v231_v15  ;;  %v305_v15 = vpop.f32.mrf.mxu3 }
  0xc8   :  { %v299_v4 = vadd.f32 %v298_v16, %v250_v63 }
  0xc9   :  { %v1242_v37 = vadd.f32 %v280_v3, %v232_v26 }
  0xca   :  { %v290_v50 = vpop.f32.mrf.mxu1  ;;  %v331_v17 = vsel %vm185_vm0, %v299_v4, 0.0 }
  0xcb   :  { %v317_v42 = vsel %vm185_vm0, %v1242_v37, 0.0  ;;  %v1259_v58 = vadd.f32 %v290_v50, %v242_v51 }
  0xcc   :  { %v318_v49 = vadd.f32 %v317_v42, %v316_v43 }
  0xcd   :  { %v251_v27 = vpop.f32.mrf.mxu2  ;;  %v325_v2 = vsel %vm185_vm0, %v1259_v58, 0.0 }
  0xce   :  { %v234_v29 = vpop.f32.mrf.mxu0  ;;  %v252_v3 = vadd.f32 %v1215_v11, %v251_v27 }
  0xcf   :  { %v235_v33 = vadd.f32 %v1215_v11, %v234_v29 }
  0xd0   :  { %v301_v13 = vadd.f32 %v300_v35, %v252_v3 }
  0xd1   :  { %v1246_v40 = vadd.f32 %v283_v7, %v235_v33  ;;  %v327_v7 = vsel %vm185_vm0, %v1262_v61, 0.0 }
  0xd2   :  { %v333_v23 = vsel %vm185_vm0, %v301_v13, 0.0 }
  0xd3   :  { %v319_v47 = vsel %vm185_vm0, %v1246_v40, 0.0 }
  0xd4   :  { %v320_v55 = vadd.f32 %v319_v47, %v318_v49 }
  0xd5   :  { %v254_v45 = vpop.f32.mrf.mxu2 }
  0xd6   :  { %v236_v44 = vpop.f32.mrf.mxu0  ;;  %v255_v9 = vadd.f32 %v1215_v11, %v254_v45 }
  0xd7   :  { %v237_v48 = vadd.f32 %v1215_v11, %v236_v44 }
  0xd8   :  { %v304_v18 = vadd.f32 %v303_v56, %v255_v9 }
  0xd9   :  { %v286_v54 = vadd.f32 %v285_v12, %v237_v48  ;;  %v329_v12 = vsel %vm185_vm0, %v1267_v1, 0.0 }
  0xda   :  { %v335_v16 = vsel %vm185_vm0, %v304_v18, 0.0 }
  0xdb   :  { %v321_v59 = vsel %vm185_vm0, %v286_v54, 0.0 }
  0xdc   :  { %v322_v60 = vadd.f32 %v321_v59, %v320_v55 }
  0xdd   :  { %v256_v6 = vpop.f32.mrf.mxu2 }
  0xde   :  { %v324_v0 = vadd.f32 %v323_v62, %v322_v60  ;;  %v257_v8 = vadd.f32 %v1215_v11, %v256_v6 }
  0xe0   :  { %v326_v5 = vadd.f32 %v325_v2, %v324_v0  ;;  %v306_v24 = vadd.f32 %v305_v15, %v257_v8 }
  0xe2   :  { %v328_v10 = vadd.f32 %v327_v7, %v326_v5  ;;  %v337_v28 = vsel %vm185_vm0, %v306_v24, 0.0 }
  0xe4   :  { %v330_v14 = vadd.f32 %v329_v12, %v328_v10 }
  0xe6   :  { %v332_v20 = vadd.f32 %v331_v17, %v330_v14 }
  0xe8   :  { %v334_v26 = vadd.f32 %v333_v23, %v332_v20 }
  0xea   :  { %v336_v27 = vadd.f32 %v335_v16, %v334_v26 }
  0xec   :  { %v338_v29 = vadd.f32 %v337_v28, %v336_v27 }
  0xee   :  { %v339_v30 = vrot.slane %v338_v29, 4 }
  0xf0   :  { %v340_v31 = vadd.f32 %v339_v30, %v338_v29 }
  0xf2   :  { %v341_v33 = vrot.slane %v340_v31, 2 }
  0xf4   :  { %v342_v11 = vadd.f32 %v341_v33, %v340_v31 }
  0xf6   :  { %v343_v34 = vrot.slane %v342_v11, 1 }
  0xf8   :  { %v344_v35 = vadd.f32 %v343_v34, %v342_v11 }
  0xfa   :  { %v345_v36 = vmul.f32 0.0078125, %v344_v35 }
  0xfc   :  { %v1283_v38 = vsub.f32 %v1223_v21, %v345_v36  ;;  %v1286_v39 = vsub.f32 %v1220_v19, %v345_v36  ;;  %v1289_v41 = vsub.f32 %v1225_v22, %v345_v36  ;;  %v1292_v42 = vsub.f32 %v1230_v25, %v345_v36 }
  0xfd   :  { %v1299_v45 = vsub.f32 %v1237_v32, %v345_v36  ;;  %v1304_v19 = vsub.f32 %v1242_v37, %v345_v36  ;;  %v1311_v48 = vsub.f32 %v1246_v40, %v345_v36  ;;  %v1316_v51 = vsub.f32 %v286_v54, %v345_v36 }
  0xfe   :  { %v362_v43 = vmul.f32 %v1283_v38, %v1283_v38  ;;  %v363_v44 = vmul.f32 %v1286_v39, %v1286_v39  ;;  %v364_v21 = vmul.f32 %v1289_v41, %v1289_v41  ;;  %v365_v22 = vmul.f32 %v1292_v42, %v1292_v42 }
  0xff   :  { %v366_v32 = vmul.f32 %v1299_v45, %v1299_v45  ;;  %v367_v37 = vmul.f32 %v1304_v19, %v1304_v19  ;;  %v1322_v56 = vsub.f32 %v1256_v53, %v345_v36  ;;  %v368_v40 = vmul.f32 %v1311_v48, %v1311_v48 }
 0x100   :  { %v378_v25 = vsel %vm185_vm0, %v362_v43, 0.0  ;;  %v379_v46 = vsel %vm185_vm0, %v363_v44, 0.0  ;;  %v381_v49 = vsel %vm185_vm0, %v364_v21, 0.0  ;;  %v383_v52 = vsel %vm185_vm0, %v365_v22, 0.0 }
 0x101   :  { %v380_v47 = vadd.f32 %v379_v46, %v378_v25  ;;  %v385_v57 = vsel %vm185_vm0, %v366_v32, 0.0  ;;  %v1328_v60 = vsub.f32 %v1259_v58, %v345_v36  ;;  %v369_v54 = vmul.f32 %v1316_v51, %v1316_v51 }
 0x102   :  { %v387_v62 = vsel %vm185_vm0, %v367_v37, 0.0  ;;  %v1334_v0 = vsub.f32 %v1262_v61, %v345_v36  ;;  %v370_v53 = vmul.f32 %v1322_v56, %v1322_v56  ;;  %v389_v2 = vsel %vm185_vm0, %v368_v40, 0.0 }
 0x103   :  { %v382_v50 = vadd.f32 %v381_v49, %v380_v47  ;;  %v1340_v5 = vsub.f32 %v1267_v1, %v345_v36  ;;  %v371_v58 = vmul.f32 %v1328_v60, %v1328_v60  ;;  %v391_v6 = vsel %vm185_vm0, %v369_v54, 0.0 }
 0x104   :  { %v1345_v9 = vsub.f32 %v299_v4, %v345_v36  ;;  %v372_v61 = vmul.f32 %v1334_v0, %v1334_v0  ;;  %v393_v10 = vsel %vm185_vm0, %v370_v53, 0.0  ;;  %v1350_v8 = vsub.f32 %v301_v13, %v345_v36 }
 0x105   :  { %v384_v55 = vadd.f32 %v383_v52, %v382_v50  ;;  %v373_v1 = vmul.f32 %v1340_v5, %v1340_v5  ;;  %v395_v14 = vsel %vm185_vm0, %v371_v58, 0.0  ;;  %v1355_v17 = vsub.f32 %v304_v18, %v345_v36 }
 0x106   :  { %v374_v4 = vmul.f32 %v1345_v9, %v1345_v9  ;;  %v397_v20 = vsel %vm185_vm0, %v372_v61, 0.0  ;;  %v1360_v26 = vsub.f32 %v306_v24, %v345_v36  ;;  %v375_v13 = vmul.f32 %v1350_v8, %v1350_v8 }
 0x107   :  { %v386_v59 = vadd.f32 %v385_v57, %v384_v55  ;;  %v399_v16 = vsel %vm185_vm0, %v373_v1, 0.0  ;;  %v376_v28 = vmul.f32 %v1355_v17, %v1355_v17  ;;  %v416_v55 = vld [vmem:[%s2053_s3] sm:$0x1] }
 0x108   :  { %v401_v18 = vsel %vm185_vm0, %v374_v4, 0.0  ;;  %v377_v30 = vmul.f32 %v1360_v26, %v1360_v26  ;;  %v403_v31 = vsel %vm185_vm0, %v375_v13, 0.0 }
 0x109   :  { %v388_v63 = vadd.f32 %v387_v62, %v386_v59  ;;  %v405_v24 = vsel %vm185_vm0, %v376_v28, 0.0 }
 0x10a   :  { %v407_v34 = vsel %vm185_vm0, %v377_v30, 0.0 }
 0x10b   :  { %v390_v3 = vadd.f32 %v389_v2, %v388_v63  ;;  %v1380_v63 = vld [vmem:[%s2052_s4] ss:$0 sm:$0xff] }
 0x10d   :  { %v392_v7 = vadd.f32 %v391_v6, %v390_v3 }
 0x10f   :  { %v394_v12 = vadd.f32 %v393_v10, %v392_v7 }
 0x111   :  { %v396_v15 = vadd.f32 %v395_v14, %v394_v12 }
 0x113   :  { %v398_v23 = vadd.f32 %v397_v20, %v396_v15 }
 0x115   :  { %v400_v27 = vadd.f32 %v399_v16, %v398_v23 }
 0x117   :  { %v402_v29 = vadd.f32 %v401_v18, %v400_v27 }
 0x119   :  { %v404_v33 = vadd.f32 %v403_v31, %v402_v29 }
 0x11b   :  { %v406_v11 = vadd.f32 %v405_v24, %v404_v33 }
 0x11d   :  { %v408_v35 = vadd.f32 %v407_v34, %v406_v11 }
 0x11f   :  { %v409_v36 = vrot.slane %v408_v35, 4 }
 0x121   :  { %v410_v43 = vadd.f32 %v409_v36, %v408_v35 }
 0x123   :  { %v411_v44 = vrot.slane %v410_v43, 2 }
 0x125   :  { %v412_v21 = vadd.f32 %v411_v44, %v410_v43 }
 0x127   :  { %v413_v22 = vrot.slane %v412_v21, 1 }
 0x129   :  { %v414_v25 = vadd.f32 %v413_v22, %v412_v21 }
 0x12b   :  { %v415_v46 = vmul.f32 0.0078125, %v414_v25 }
 0x12d   :  { %v417_v47 = vadd.f32 1e-05, %v415_v46 }
 0x12f   :  { %985 = vrsqrt.f32 %v417_v47  ;;  %vm424_vm2 = vweird.f32 %v417_v47 }
 0x135   :  { %v986_v32 = vpop.eup %985 }
 0x136   :  { %v419_v49 = vmul.f32 %v986_v32, %v417_v47  ;;  %vm425_vm1 = vweird.f32 %v986_v32 }
 0x137   :  { %vm426_vm3 = vmor %vm424_vm2, %vm425_vm1 }
 0x138   :  { %v420_v50 = vmul.f32 %v986_v32, %v419_v49 }
 0x13a   :  { %v421_v37 = vmul.f32 0.5, %v420_v50 }
 0x13c   :  { %v422_v52 = vsub.f32 1.5, %v421_v37 }
 0x13e   :  { %v423_v40 = vmul.f32 %v986_v32, %v422_v52 }
 0x140   :  { %v427_v57 = vsel %vm426_vm3, %v986_v32, %v423_v40 }
 0x141   :  { %v428_v59 = vmul.f32 %v427_v57, %v416_v55 }
 0x143   :  { %v430_v54 = vperm.slane %v428_v59, 0 }
 0x145   :  { %v432_v62 = vmul.f32 %v430_v54, %v1283_v38  ;;  %v433_v53 = vmul.f32 %v430_v54, %v1286_v39  ;;  %v434_v2 = vmul.f32 %v430_v54, %v1289_v41  ;;  %v435_v3 = vmul.f32 %v430_v54, %v1292_v42 }
 0x146   :  { %v436_v58 = vmul.f32 %v430_v54, %v1299_v45  ;;  %v437_v7 = vmul.f32 %v430_v54, %v1304_v19  ;;  %v438_v61 = vmul.f32 %v430_v54, %v1311_v48  ;;  %v439_v41 = vmul.f32 %v430_v54, %v1316_v51 }
 0x147   :  { %v1387_v6 = vadd.f32 %v1380_v63, %v432_v62  ;;  %v1391_v38 = vadd.f32 %v1380_v63, %v433_v53  ;;  %v1395_v10 = vadd.f32 %v1380_v63, %v434_v2  ;;  %v1398_v39 = vadd.f32 %v1380_v63, %v435_v3 }
 0x148   :  { %v1402_v42 = vadd.f32 %v1380_v63, %v436_v58  ;;  %v440_v19 = vmul.f32 %v430_v54, %v1322_v56  ;;  %v1407_v12 = vadd.f32 %v1380_v63, %v437_v7  ;;  %v441_v1 = vmul.f32 %v430_v54, %v1328_v60 }
 0x149   :  { %v933_v45 = vmul.f32 -1.442695, %v1387_v6  ;;  %v934_v48 = vmul.f32 -1.442695, %v1391_v38  ;;  %v1412_v14 = vadd.f32 %v1380_v63, %v438_v61  ;;  %v935_v15 = vmul.f32 -1.442695, %v1395_v10 }
 0x14a   :  { %v442_v51 = vmul.f32 %v430_v54, %v1334_v0  ;;  %v936_v4 = vmul.f32 -1.442695, %v1398_v39  ;;  %v443_v20 = vmul.f32 %v430_v54, %v1340_v5  ;;  %v1419_v56 = vadd.f32 %v1380_v63, %v439_v41 }
 0x14b   :  { %987 = vpow2.f32 %v933_v45  ;;  %v937_v23 = vmul.f32 -1.442695, %v1402_v42  ;;  %v1423_v13 = vadd.f32 %v1380_v63, %v440_v19  ;;  %v938_v60 = vmul.f32 -1.442695, %v1407_v12 }
 0x14c   :  { %989 = vpow2.f32 %v934_v48  ;;  %v1427_v16 = vadd.f32 %v1380_v63, %v441_v1  ;;  %v939_v0 = vmul.f32 -1.442695, %v1412_v14  ;;  %v1431_v5 = vadd.f32 %v1380_v63, %v442_v51 }
 0x14d   :  { %991 = vpow2.f32 %v935_v15  ;;  %v1434_v27 = vadd.f32 %v1380_v63, %v443_v20  ;;  %v940_v28 = vmul.f32 -1.442695, %v1419_v56  ;;  %v941_v18 = vmul.f32 -1.442695, %v1423_v13 }
 0x14e   :  { %993 = vpow2.f32 %v936_v4  ;;  %v942_v30 = vmul.f32 -1.442695, %v1427_v16  ;;  %v943_v33 = vmul.f32 -1.442695, %v1431_v5  ;;  %v444_v11 = vmul.f32 %v430_v54, %v1345_v9 }
 0x14f   :  { %995 = vpow2.f32 %v937_v23  ;;  %v944_v34 = vmul.f32 -1.442695, %v1434_v27  ;;  %v445_v36 = vmul.f32 %v430_v54, %v1350_v8  ;;  %v446_v21 = vmul.f32 %v430_v54, %v1355_v17 }
 0x150   :  { %997 = vpow2.f32 %v938_v60  ;;  %v447_v47 = vmul.f32 %v430_v54, %v1360_v26  ;;  %v1452_v32 = vadd.f32 %v1380_v63, %v444_v11 }
 0x151   :  { %v988_v29 = vpop.eup %987  ;;  %999 = vpow2.f32 %v939_v0  ;;  %v1457_v49 = vadd.f32 %v1380_v63, %v445_v36  ;;  %v1463_v37 = vadd.f32 %v1380_v63, %v446_v21 }
 0x152   :  { %v990_v31 = vpop.eup %989  ;;  %1001 = vpow2.f32 %v940_v28  ;;  %v1443_v43 = vadd.f32 1.0, %v988_v29  ;;  %v1472_v57 = vadd.f32 %v1380_v63, %v447_v47  ;;  %v945_v59 = vmul.f32 -1.442695, %v1452_v32 }
 0x153   :  { %v992_v24 = vpop.eup %991  ;;  %1003 = vpow2.f32 %v941_v18  ;;  %v1446_v22 = vadd.f32 1.0, %v990_v31  ;;  %2057 = vst [vmem:[#allocation2_spill] sm:$0xff] %v1463_v37  ;;  %v946_v62 = vmul.f32 -1.442695, %v1457_v49  ;;  %v947_v2 = vmul.f32 -1.442695, %v1463_v37 }
 0x154   :  { %v994_v35 = vpop.eup %993  ;;  %1005 = vpow2.f32 %v942_v30  ;;  %v1448_v46 = vadd.f32 1.0, %v992_v24  ;;  %2058 = vst [vmem:[#allocation3_spill] sm:$0xff] %v1472_v57  ;;  %v948_v58 = vmul.f32 -1.442695, %v1472_v57  ;;  %v543_v7 = vand.u32 2147483648, %v1443_v43 }
 0x155   :  { %v996_v44 = vpop.eup %995  ;;  %1007 = vpow2.f32 %v943_v33  ;;  %v1454_v8 = vadd.f32 1.0, %v994_v35  ;;  %v558_v41 = vand.u32 2147483648, %v1446_v22  ;;  %v541_v1 = vand.u32 2147483647, %v1443_v43 }
 0x156   :  { %v998_v25 = vpop.eup %997  ;;  %1009 = vpow2.f32 %v944_v34  ;;  %v1459_v17 = vadd.f32 1.0, %v996_v44  ;;  %v556_v51 = vand.u32 2147483647, %v1446_v22  ;;  %v1502_v20 = vor.u32 1.1754944e-38, %v543_v7 }
 0x157   :  { %v1000_v9 = vpop.eup %999  ;;  %1011 = vrcp.f32 %v1443_v43  ;;  %v1465_v52 = vadd.f32 1.0, %v998_v25  ;;  %v573_v60 = vand.u32 2147483648, %v1448_v46  ;;  %v1511_v18 = vor.u32 1.1754944e-38, %v558_v41 }
 0x158   :  { %v1002_v50 = vpop.eup %1001  ;;  %1013 = vrcp.f32 %v1446_v22  ;;  %v1468_v55 = vadd.f32 1.0, %v1000_v9  ;;  %v571_v29 = vand.u32 2147483647, %v1448_v46  ;;  %v588_v11 = vand.u32 2147483648, %v1454_v8 }
 0x159   :  { %v1004_v26 = vpop.eup %1003  ;;  %1015 = vrcp.f32 %v1448_v46  ;;  %v1509_v28 = vadd.f32 1.0, %v1002_v50  ;;  %v586_v21 = vand.u32 2147483647, %v1454_v8  ;;  %vm537_vm4 = vweird.f32 %v1443_v43 }
 0x15a   :  { %v1006_v40 = vpop.eup %1005  ;;  %1017 = vrcp.f32 %v1454_v8  ;;  %v1516_v33 = vadd.f32 1.0, %v1004_v26  ;;  %v1529_v26 = vor.u32 1.1754944e-38, %v573_v60  ;;  %vm552_vm5 = vweird.f32 %v1446_v22 }
 0x15b   :  { %v1008_v54 = vpop.eup %1007  ;;  %1019 = vrcp.f32 %v1459_v17  ;;  %v1518_v24 = vadd.f32 1.0, %v1006_v40  ;;  %vm567_vm6 = vweird.f32 %v1448_v46  ;;  %v1542_v41 = vor.u32 1.1754944e-38, %v588_v11 }
 0x15c   :  { %v1010_v53 = vpop.eup %1009  ;;  %1021 = vrcp.f32 %v1465_v52  ;;  %v1526_v47 = vadd.f32 1.0, %v1008_v54  ;;  %vm582_vm7 = vweird.f32 %v1454_v8  ;;  %vm1556_vm9 = vcmp.eq.f32.partialorder %v541_v1, 8.507059e+37 }
 0x15d   :  { %v1480_v3 = vpop.eup %1011  ;;  %1023 = vrcp.f32 %v1468_v55  ;;  %vm1560_vm10 = vcmp.eq.f32.partialorder %v556_v51, 8.507059e+37  ;;  %vm1570_vm13 = vcmp.eq.f32.partialorder %v571_v29, 8.507059e+37  ;;  %vm1580_vm0 = vcmp.eq.f32.partialorder %v586_v21, 8.507059e+37 }
 0x15e   :  { %v1483_v63 = vpop.eup %1013  ;;  %1025 = vpow2.f32 %v945_v59  ;;  %v533_v48 = vmul.f32 %v1480_v3, %v1443_v43  ;;  %v1533_v59 = vadd.f32 1.0, %v1010_v53  ;;  %vm538_vm12 = vweird.f32 %v1480_v3 }
 0x15f   :  { %v1487_v61 = vpop.eup %1015  ;;  %1027 = vpow2.f32 %v946_v62  ;;  %v548_v15 = vmul.f32 %v1483_v63, %v1446_v22  ;;  %vm553_vm15 = vweird.f32 %v1483_v63  ;;  %vm1597_vm3 = vmor %vm537_vm4, %vm538_vm12 }
 0x160   :  { %v1490_v45 = vpop.eup %1017  ;;  %1029 = vpow2.f32 %v947_v2  ;;  %v563_v23 = vmul.f32 %v1487_v61, %v1448_v46  ;;  %v534_v36 = vsub.f32 1.0, %v533_v48  ;;  %vm568_vm1 = vweird.f32 %v1487_v61  ;;  %vm1615_vm4 = vmor %vm552_vm5, %vm553_vm15 }
 0x161   :  { %v1492_v19 = vpop.eup %1019  ;;  %1031 = vpow2.f32 %v948_v58  ;;  %v578_v30 = vmul.f32 %v1490_v45, %v1454_v8  ;;  %v549_v44 = vsub.f32 1.0, %v548_v15  ;;  %v603_v58 = vand.u32 2147483648, %v1459_v17  ;;  %vm1633_vm5 = vmor %vm567_vm6, %vm568_vm1 }
 0x162   :  { %v1500_v4 = vpop.eup %1021  ;;  %v593_v34 = vmul.f32 %v1492_v19, %v1459_v17  ;;  %v564_v50 = vsub.f32 1.0, %v563_v23  ;;  %v601_v15 = vand.u32 2147483647, %v1459_v17  ;;  %v535_v53 = vmul.f32 %v1480_v3, %v534_v36 }
 0x163   :  { %v1507_v0 = vpop.eup %1023  ;;  %v608_v25 = vmul.f32 %v1500_v4, %v1465_v52  ;;  %v579_v2 = vsub.f32 1.0, %v578_v30  ;;  %v550_v60 = vmul.f32 %v1483_v63, %v549_v44  ;;  %1033 = vrcp.f32 %v1509_v28 }
 0x164   :  { %v1026_v31 = vpop.eup %1025  ;;  %v623_v40 = vmul.f32 %v1507_v0, %v1468_v55  ;;  %v594_v48 = vsub.f32 1.0, %v593_v34  ;;  %1035 = vrcp.f32 %v1516_v33  ;;  %v536_v51 = vadd.f32 %v1480_v3, %v535_v53 }
 0x165   :  { %v1028_v35 = vpop.eup %1027  ;;  %v1535_v62 = vadd.f32 1.0, %v1026_v31  ;;  %v609_v30 = vsub.f32 1.0, %v608_v25  ;;  %v565_v31 = vmul.f32 %v1487_v61, %v564_v50  ;;  %v580_v44 = vmul.f32 %v1490_v45, %v579_v2 }
 0x166   :  { %v1030_v9 = vpop.eup %1029  ;;  %v1539_v54 = vadd.f32 1.0, %v1028_v35  ;;  %v616_v35 = vand.u32 2147483647, %v1465_v52  ;;  %v624_v11 = vsub.f32 1.0, %v623_v40  ;;  %v1565_v25 = vor.u32 1.1754944e-38, %v603_v58 }
 0x167   :  { %v1032_v7 = vpop.eup %1031  ;;  %v1545_v23 = vadd.f32 1.0, %v1030_v9  ;;  %v618_v50 = vand.u32 2147483648, %v1465_v52  ;;  %v595_v1 = vmul.f32 %v1492_v19, %v594_v48  ;;  %v551_v2 = vadd.f32 %v1483_v63, %v550_v60 }
 0x168   :  { %v1554_v34 = vadd.f32 1.0, %v1032_v7  ;;  %v610_v29 = vmul.f32 %v1500_v4, %v609_v30  ;;  %v566_v7 = vadd.f32 %v1487_v61, %v565_v31  ;;  %vm1587_vm2 = vcmp.eq.f32.partialorder %v601_v15, 8.507059e+37 }
 0x169   :  { %v625_v53 = vmul.f32 %v1507_v0, %v624_v11  ;;  %1037 = vrcp.f32 %v1518_v24  ;;  %v581_v60 = vadd.f32 %v1490_v45, %v580_v44  ;;  %vm583_vm14 = vweird.f32 %v1490_v45  ;;  %v1609_v31 = vpop.eup %1033 }
 0x16a   :  { %vm1603_vm11 = vcmp.eq.f32.partialorder %v616_v35, 8.507059e+37  ;;  %v631_v30 = vand.u32 2147483647, %v1468_v55  ;;  %1039 = vrcp.f32 %v1526_v47  ;;  %v596_v11 = vadd.f32 %v1492_v19, %v595_v1  ;;  %v1639_v37 = vpop.eup %1035 }
 0x16b   :  { %vm598_vm12 = vweird.f32 %v1492_v19  ;;  %vm613_vm8 = vweird.f32 %v1500_v4  ;;  %v633_v35 = vand.u32 2147483648, %v1468_v55  ;;  %v540_v44 = vsel %vm1597_vm3, %v1480_v3, %v536_v51  ;;  %vm1648_vm3 = vmor %vm582_vm7, %vm583_vm14 }
 0x16c   :  { %v555_v22 = vsel %vm1615_vm4, %v1483_v63, %v551_v2  ;;  %v611_v57 = vadd.f32 %v1500_v4, %v610_v29  ;;  %vm628_vm15 = vweird.f32 %v1507_v0  ;;  %v570_v3 = vsel %vm1633_vm5, %v1487_v61, %v566_v7 }
 0x16d   :  { %v626_v63 = vadd.f32 %v1507_v0, %v625_v53  ;;  %v638_v51 = vmul.f32 %v1609_v31, %v1509_v28  ;;  %1041 = vrcp.f32 %v1533_v59  ;;  %v585_v2 = vsel %vm1648_vm3, %v1490_v45, %v581_v60 }
 0x16e   :  { %vm2079_vm6 = vweird.f32 %v1459_v17  ;;  %v619_v61 = vor.u32 1.1754944e-38, %v618_v50  ;;  %vm1667_vm7 = vcmp.eq.f32.partialorder %v631_v30, 8.507059e+37  ;;  %v653_v7 = vmul.f32 %v1639_v37, %v1516_v33 }
 0x16f   :  { %vm1663_vm1 = vmor %vm2079_vm6, %vm598_vm12  ;;  %v1673_v53 = vpop.eup %1037  ;;  %v1678_v45 = vsel %vm1556_vm9, %v1502_v20, %v540_v44  ;;  %v1683_v17 = vsel %vm1560_vm10, %v1511_v18, %v555_v22  ;;  %vm2084_vm14 = vweird.f32 %v1465_v52  ;;  %1043 = vrcp.f32 %v1535_v62 }
 0x170   :  { %v600_v50 = vsel %vm1663_vm1, %v1492_v19, %v596_v11  ;;  %vm1692_vm4 = vmor %vm2084_vm14, %vm613_vm8  ;;  %v1697_v20 = vpop.eup %1039  ;;  %v1702_v18 = vsel %vm1570_vm13, %v1529_v26, %v570_v3  ;;  %vm2087_vm8 = vweird.f32 %v1468_v55  ;;  %v634_v9 = vor.u32 1.1754944e-38, %v633_v35 }
 0x171   :  { %v615_v19 = vsel %vm1692_vm4, %v1500_v4, %v611_v57  ;;  %vm1711_vm9 = vmor %vm2087_vm8, %vm628_vm15  ;;  %v668_v36 = vmul.f32 %v1673_v53, %v1518_v24  ;;  %v1720_v26 = vsel %vm1580_vm0, %v1542_v41, %v585_v2  ;;  %v639_v4 = vsub.f32 1.0, %v638_v51 }
 0x172   :  { %v630_v57 = vsel %vm1711_vm9, %v1507_v0, %v626_v63  ;;  %v683_v55 = vmul.f32 %v1697_v20, %v1526_v47  ;;  %v1730_v40 = vsel %vm1587_vm2, %v1565_v25, %v600_v50  ;;  %v646_v60 = vand.u32 2147483647, %v1509_v28 }
 0x173   :  { %v648_v30 = vand.u32 2147483648, %v1509_v28  ;;  %v654_v58 = vsub.f32 1.0, %v653_v7  ;;  %v1734_v41 = vpop.eup %1041  ;;  %v1738_v43 = vsel %vm1603_vm11, %v619_v61, %v615_v19  ;;  %vm642_vm10 = vweird.f32 %v1509_v28 }
 0x174   :  { %v663_v0 = vand.u32 2147483648, %v1516_v33  ;;  %v669_v11 = vsub.f32 1.0, %v668_v36  ;;  %1045 = vrcp.f32 %v1539_v54  ;;  %v1745_v25 = vsel %vm1667_vm7, %v634_v9, %v630_v57 }
 0x175   :  { %v661_v48 = vand.u32 2147483647, %v1516_v33  ;;  %v684_v35 = vsub.f32 1.0, %v683_v55  ;;  %v698_v44 = vmul.f32 %v1734_v41, %v1533_v59  ;;  %v1750_v15 = vpop.eup %1043  ;;  %v640_v22 = vmul.f32 %v1609_v31, %v639_v4 }
 0x176   :  { %vm657_vm11 = vweird.f32 %v1516_v33  ;;  %v676_v1 = vand.u32 2147483647, %v1518_v24  ;;  %v678_v3 = vand.u32 2147483648, %v1518_v24  ;;  %v649_v46 = vor.u32 1.1754944e-38, %v648_v30 }
 0x177   :  { %v655_v63 = vmul.f32 %v1639_v37, %v654_v58  ;;  %v691_v51 = vand.u32 2147483647, %v1526_v47  ;;  %v699_v2 = vsub.f32 1.0, %v698_v44  ;;  %vm1758_vm13 = vcmp.eq.f32.partialorder %v646_v60, 8.507059e+37 }
 0x178   :  { %v664_v61 = vor.u32 1.1754944e-38, %v663_v0  ;;  %v670_v29 = vmul.f32 %v1673_v53, %v669_v11  ;;  %vm672_vm0 = vweird.f32 %v1518_v24  ;;  %v713_v7 = vmul.f32 %v1750_v15, %v1535_v62 }
 0x179   :  { %vm643_vm2 = vweird.f32 %v1609_v31  ;;  %vm1767_vm12 = vcmp.eq.f32.partialorder %v661_v48, 8.507059e+37  ;;  %v685_v21 = vmul.f32 %v1697_v20, %v684_v35  ;;  %vm687_vm5 = vweird.f32 %v1526_v47 }
 0x17a   :  { %v693_v19 = vand.u32 2147483648, %v1526_v47  ;;  %v1774_v52 = vpop.eup %1045  ;;  %v641_v9 = vadd.f32 %v1609_v31, %v640_v22  ;;  %vm658_vm15 = vweird.f32 %v1639_v37  ;;  %vm1778_vm3 = vcmp.eq.f32.partialorder %v676_v1, 8.507059e+37  ;;  %vm1799_vm7 = vmor %vm642_vm10, %vm643_vm2 }
 0x17b   :  { %v679_v57 = vor.u32 1.1754944e-38, %v678_v3  ;;  %1047 = vrcp.f32 %v1545_v23  ;;  %v656_v4 = vadd.f32 %v1639_v37, %v655_v63  ;;  %vm1784_vm6 = vcmp.eq.f32.partialorder %v691_v51, 8.507059e+37  ;;  %vm1813_vm8 = vmor %vm657_vm11, %vm658_vm15 }
 0x17c   :  { %v700_v60 = vmul.f32 %v1734_v41, %v699_v2  ;;  %v706_v30 = vand.u32 2147483647, %v1533_v59  ;;  %v708_v58 = vand.u32 2147483648, %v1533_v59  ;;  %v671_v0 = vadd.f32 %v1673_v53, %v670_v29 }
 0x17d   :  { %vm673_vm1 = vweird.f32 %v1673_v53  ;;  %v714_v11 = vsub.f32 1.0, %v713_v7  ;;  %v728_v48 = vmul.f32 %v1774_v52, %v1539_v54  ;;  %v686_v44 = vadd.f32 %v1697_v20, %v685_v21 }
 0x17e   :  { %vm688_vm14 = vweird.f32 %v1697_v20  ;;  %v694_v22 = vor.u32 1.1754944e-38, %v693_v19  ;;  %vm702_vm4 = vweird.f32 %v1533_v59  ;;  %v645_v1 = vsel %vm1799_vm7, %v1609_v31, %v641_v9  ;;  %vm1828_vm10 = vmor %vm672_vm0, %vm673_vm1 }
 0x17f   :  { %vm717_vm9 = vweird.f32 %v1535_v62  ;;  %v721_v3 = vand.u32 2147483647, %v1535_v62  ;;  %v723_v63 = vand.u32 2147483648, %v1535_v62  ;;  %1049 = vrcp.f32 %v1554_v34  ;;  %vm1847_vm0 = vmor %vm687_vm5, %vm688_vm14 }
 0x180   :  { %v660_v31 = vsel %vm1813_vm8, %v1639_v37, %v656_v4  ;;  %v701_v51 = vadd.f32 %v1734_v41, %v700_v60  ;;  %vm703_vm11 = vweird.f32 %v1734_v41  ;;  %vm1834_vm2 = vcmp.eq.f32.partialorder %v706_v30, 8.507059e+37 }
 0x181   :  { %v1838_v29 = vpop.eup %1047  ;;  %v675_v37 = vsel %vm1828_vm10, %v1673_v53, %v671_v0  ;;  %v709_v7 = vor.u32 1.1754944e-38, %v708_v58  ;;  %v715_v21 = vmul.f32 %v1750_v15, %v714_v11  ;;  %v729_v19 = vsub.f32 1.0, %v728_v48  ;;  %vm1864_vm5 = vmor %vm702_vm4, %vm703_vm11 }
 0x182   :  { %v650_v9 = vsel %vm1758_vm13, %v649_v46, %v645_v1  ;;  %v690_v4 = vsel %vm1847_vm0, %v1697_v20, %v686_v44  ;;  %v738_v53 = vand.u32 2147483648, %v1539_v54  ;;  %v743_v47 = vmul.f32 %v1838_v29, %v1545_v23 }
 0x183   :  { %v665_v60 = vsel %vm1767_vm12, %v664_v61, %v660_v31  ;;  %vm718_vm13 = vweird.f32 %v1750_v15  ;;  %v724_v46 = vor.u32 1.1754944e-38, %v723_v63  ;;  %vm732_vm15 = vweird.f32 %v1539_v54 }
 0x184   :  { %v736_v20 = vand.u32 2147483647, %v1539_v54  ;;  %v680_v8 = vsel %vm1778_vm3, %v679_v57, %v675_v37  ;;  %v705_v61 = vsel %vm1864_vm5, %v1734_v41, %v701_v51  ;;  %v744_v50 = vsub.f32 1.0, %v743_v47  ;;  %vm1907_vm7 = vmor %vm717_vm9, %vm718_vm13 }
 0x185   :  { %v751_v59 = vand.u32 2147483647, %v1545_v23  ;;  %v1877_v58 = vpop.eup %1049  ;;  %v695_v0 = vsel %vm1784_vm6, %v694_v22, %v690_v4  ;;  %v716_v11 = vadd.f32 %v1750_v15, %v715_v21  ;;  %v730_v48 = vmul.f32 %v1774_v52, %v729_v19 }
 0x186   :  { %vm733_vm12 = vweird.f32 %v1774_v52  ;;  %vm1884_vm1 = vcmp.eq.f32.partialorder %v721_v3, 8.507059e+37  ;;  %v739_v57 = vor.u32 1.1754944e-38, %v738_v53  ;;  %v745_v41 = vmul.f32 %v1838_v29, %v744_v50 }
 0x187   :  { %v758_v35 = vmul.f32 %v1877_v58, %v1554_v34  ;;  %v772_v55 = vmul.f32 %v1678_v45, %v1387_v6  ;;  %v710_v44 = vsel %vm1834_vm2, %v709_v7, %v705_v61  ;;  %vm1895_vm3 = vcmp.eq.f32.partialorder %v736_v20, 8.507059e+37  ;;  %vm1937_vm10 = vmor %vm732_vm15, %vm733_vm12 }
 0x188   :  { %vm747_vm6 = vweird.f32 %v1545_v23  ;;  %v753_v1 = vand.u32 2147483648, %v1545_v23  ;;  %v773_v28 = vmul.f32 %v1683_v17, %v1391_v38  ;;  %vm1911_vm14 = vcmp.eq.f32.partialorder %v751_v59, 8.507059e+37 }
 0x189   :  { %v759_v3 = vsub.f32 1.0, %v758_v35  ;;  %vm762_vm4 = vweird.f32 %v1554_v34  ;;  %v774_v63 = vmul.f32 %v1702_v18, %v1395_v10  ;;  %v720_v38 = vsel %vm1907_vm7, %v1750_v15, %v716_v11 }
 0x18a   :  { %v731_v62 = vadd.f32 %v1774_v52, %v730_v48  ;;  %vm748_vm8 = vweird.f32 %v1838_v29  ;;  %v775_v17 = vmul.f32 %v1720_v26, %v1398_v39  ;;  %v746_v31 = vadd.f32 %v1838_v29, %v745_v41 }
 0x18b   :  { %v760_v33 = vmul.f32 %v1877_v58, %v759_v3  ;;  %v776_v51 = vmul.f32 %v1730_v40, %v1402_v42  ;;  %v788_v2 = vpack.c.bf16 %v772_v55, %v772_v55  ;;  %vm763_vm9 = vweird.f32 %v1877_v58  ;;  %vm1952_vm11 = vmor %vm747_vm6, %vm748_vm8 }
 0x18c   :  { %v766_v10 = vand.u32 2147483647, %v1554_v34  ;;  %v777_v18 = vmul.f32 %v1738_v43, %v1407_v12  ;;  %v789_v15 = vpack.c.bf16 %v773_v28, %v773_v28  ;;  %v768_v42 = vand.u32 2147483648, %v1554_v34  ;;  %vm1964_vm0 = vmor %vm762_vm4, %vm763_vm9 }
 0x18d   :  { %v761_v26 = vadd.f32 %v1877_v58, %v760_v33  ;;  %v778_v40 = vmul.f32 %v1745_v25, %v1412_v14  ;;  %v790_v37 = vpack.c.bf16 %v774_v63, %v774_v63  ;;  %v735_v12 = vsel %vm1937_vm10, %v1774_v52, %v731_v62 }
 0x18e   :  { %v779_v43 = vmul.f32 %v650_v9, %v1419_v56  ;;  %v791_v24 = vpack.c.bf16 %v775_v17, %v775_v17  ;;  %vm804_vm2 = vcmask 125952   ;;  %v750_v14 = vsel %vm1952_vm11, %v1838_v29, %v746_v31 }
 0x18f   :  { %v754_v25 = vor.u32 1.1754944e-38, %v753_v1  ;;  %v780_v23 = vmul.f32 %v665_v60, %v1423_v13  ;;  %v792_v7 = vpack.c.bf16 %v776_v51, %v776_v51  ;;  %805 = vst.msk [vmem:[%s2054_s5] sm:$0xf] %vm804_vm2, %v788_v2  ;;  %v725_v56 = vsel %vm1884_vm1, %v724_v46, %v720_v38 }
 0x190   :  { %v765_v29 = vsel %vm1964_vm0, %v1877_v58, %v761_v26  ;;  %v781_v34 = vmul.f32 %v680_v8, %v1427_v16  ;;  %v793_v21 = vpack.c.bf16 %v777_v18, %v777_v18  ;;  %806 = vst.msk [vmem:[%s2054_s5 + $0x4] sm:$0xf] %vm804_vm2, %v789_v15  ;;  %v740_v13 = vsel %vm1895_vm3, %v739_v57, %v735_v12 }
 0x191   :  { %v769_v19 = vor.u32 1.1754944e-38, %v768_v42  ;;  %v782_v9 = vmul.f32 %v695_v0, %v1431_v5  ;;  %v794_v4 = vpack.c.bf16 %v778_v40, %v778_v40  ;;  %807 = vst.msk [vmem:[%s2054_s5 + $0x8] sm:$0xf] %vm804_vm2, %v790_v37  ;;  %v755_v16 = vsel %vm1911_vm14, %v754_v25, %v750_v14 }
 0x192   :  { %vm767_vm5 = vcmp.eq.f32.partialorder %v766_v10, 8.507059e+37  ;;  %v783_v53 = vmul.f32 %v710_v44, %v1434_v27  ;;  %v795_v47 = vpack.c.bf16 %v779_v43, %v779_v43  ;;  %808 = vst.msk [vmem:[%s2054_s5 + $0xc] sm:$0xf] %vm804_vm2, %v791_v24  ;;  %v784_v5 = vmul.f32 %v725_v56, %v1452_v32  ;;  %v2124_v27 = vld [vmem:[#allocation2_spill] sm:$0xff]  ;;  %v2125_v32 = vld [vmem:[#allocation3_spill] sm:$0xff] }
 0x193   :  { %v770_v60 = vsel %vm767_vm5, %v769_v19, %v765_v29  ;;  %v796_v30 = vpack.c.bf16 %v780_v23, %v780_v23  ;;  %809 = vst.msk [vmem:[%s2054_s5 + $0x10] sm:$0xf] %vm804_vm2, %v792_v7  ;;  %v785_v46 = vmul.f32 %v740_v13, %v1457_v49  ;;  %v797_v20 = vpack.c.bf16 %v781_v34, %v781_v34 }
 0x194   :  { %810 = vst.msk [vmem:[%s2054_s5 + $0x14] sm:$0xf] %vm804_vm2, %v793_v21  ;;  %v786_v8 = vmul.f32 %v755_v16, %v2124_v27  ;;  %v798_v61 = vpack.c.bf16 %v782_v9, %v782_v9  ;;  %v787_v50 = vmul.f32 %v770_v60, %v2125_v32  ;;  %v799_v59 = vpack.c.bf16 %v783_v53, %v783_v53 }
 0x195   :  { %811 = vst.msk [vmem:[%s2054_s5 + $0x18] sm:$0xf] %vm804_vm2, %v794_v4  ;;  %v800_v49 = vpack.c.bf16 %v784_v5, %v784_v5  ;;  %v801_v58 = vpack.c.bf16 %v785_v46, %v785_v46 }
 0x196   :  { %812 = vst.msk [vmem:[%s2054_s5 + $0x1c] sm:$0xf] %vm804_vm2, %v795_v47  ;;  %v802_v0 = vpack.c.bf16 %v786_v8, %v786_v8  ;;  %v803_v11 = vpack.c.bf16 %v787_v50, %v787_v50 }
 0x197   :  { %813 = vst.msk [vmem:[%s2054_s5 + $0x20] sm:$0xf] %vm804_vm2, %v796_v30 }
 0x198   :  { %814 = vst.msk [vmem:[%s2054_s5 + $0x24] sm:$0xf] %vm804_vm2, %v797_v20 }
 0x199   :  { %815 = vst.msk [vmem:[%s2054_s5 + $0x28] sm:$0xf] %vm804_vm2, %v798_v61 }
 0x19a   :  { %816 = vst.msk [vmem:[%s2054_s5 + $0x2c] sm:$0xf] %vm804_vm2, %v799_v59 }
 0x19b   :  { %817 = vst.msk [vmem:[%s2054_s5 + $0x30] sm:$0xf] %vm804_vm2, %v800_v49 }
 0x19c   :  { %818 = vst.msk [vmem:[%s2054_s5 + $0x34] sm:$0xf] %vm804_vm2, %v801_v58 }
 0x19d   :  { %819 = vst.msk [vmem:[%s2054_s5 + $0x38] sm:$0xf] %vm804_vm2, %v802_v0 }
 0x19e   :  { %820 = vst.msk [vmem:[%s2054_s5 + $0x3c] sm:$0xf] %vm804_vm2, %v803_v11 }

// kernel: vqvae_forward.29
= control target key start
LH: loop header
LB: loop body
LE: loop exit
PB: predicated region body
PF: predicated region fallthrough
CT: control target
= control target key end

     0   :  { %vm188_vm0 = vcmask 130048   ;;  %s2213_s1 = inlined_call_operand.vmem [shape: bf16[144,16], index: 1, kind: input, shape index: {}]   ;;  %s2214_s0 = inlined_call_operand.vmem [shape: bf16[128,144], index: 0, kind: input, shape index: {}]   ;;  %s2215_s2 = inlined_call_operand.vmem [shape: f32[1,16], index: 2, kind: input, shape index: {}]   ;;  %s2216_s4 = inlined_call_operand.vmem [shape: f32[1,16], index: 4, kind: input, shape index: {}]   ;;  %s2217_s3 = inlined_call_operand.vmem [shape: f32[1,16], index: 3, kind: input, shape index: {}]   ;;  %s2218_s5 = inlined_call_operand.vmem [shape: bf16[128,16], index: 5, kind: input, shape index: {}]   ;;  %s2219_s6 = inlined_call_operand.vmem [shape: bf16[128,16], index: 6, kind: output, shape index: {}]  }
   0x1   :  { %v1023_v0 = vld [vmem:[%s2213_s1 + $0x38] sm:$0xff]  ;;  %v1024_v1 = vld [vmem:[%s2213_s1 + $0x40] sm:$0xff]  ;;  %v880_v3 = vld [vmem:[%s2214_s0 + $0x8] sm:$0xf0] }
   0x2   :  { %v1000_v2 = vld [vmem:[%s2214_s0 + $0x4] sm:$0xf]  ;;  %213 = vmatpush.bf16.msra.mxu0 %v1023_v0  ;;  %269 = vmatpush.bf16.msra.mxu1 %v1024_v1  ;;  %v1022_v5 = vld [vmem:[%s2213_s1 + $0x30] sm:$0xff]  ;;  %v1021_v6 = vld [vmem:[%s2213_s1 + $0x28] sm:$0xff] }
   0x3   :  { %v883_v4 = vor.u32 %v1000_v2, %v880_v3  ;;  %1064 = vmatpush.bf16.msra.mxu2 %v1023_v0  ;;  %1072 = vmatpush.bf16.msra.mxu3 %v1024_v1  ;;  %v1020_v7 = vld [vmem:[%s2213_s1 + $0x20] sm:$0xff]  ;;  %v1019_v8 = vld [vmem:[%s2213_s1 + $0x18] sm:$0xff]  ;;  %v1002_v9 = vld [vmem:[%s2214_s0 + $0x14] sm:$0xf] }
   0x4   :  { %v888_v10 = vld [vmem:[%s2214_s0 + $0x18] sm:$0xf0]  ;;  %v1018_v12 = vld [vmem:[%s2213_s1 + $0x10] sm:$0xff]  ;;  %v1017_v16 = vld [vmem:[%s2213_s1 + $0x8] sm:$0xff] }
   0x5   :  { %976 = vmatmul.msk.bf16.vlgmr.msra.gmra.mxu1 %vm188_vm0, %v883_v4  ;;  %v891_v11 = vor.u32 %v1002_v9, %v888_v10  ;;  %v1010_v13 = vld [vmem:[%s2214_s0 + $0x54] sm:$0xf]  ;;  %v920_v14 = vld [vmem:[%s2214_s0 + $0x58] sm:$0xf0]  ;;  %v1016_v17 = vld [vmem:[%s2213_s1] sm:$0xff] }
   0x6   :  { %214 = vmatpush.bf16.msra.mxu0 %v1022_v5  ;;  %v923_v15 = vor.u32 %v1010_v13, %v920_v14  ;;  %v878_v18 = vld [vmem:[%s2214_s0] sm:$0xf]  ;;  %v1001_v19 = vld [vmem:[%s2214_s0 + $0x4] sm:$0xf0]  ;;  %v1004_v24 = vld [vmem:[%s2214_s0 + $0x24] sm:$0xf] }
   0x7   :  { %1065 = vmatpush.bf16.msra.mxu2 %v1022_v5  ;;  %v910_v20 = vld [vmem:[%s2214_s0 + $0x40] sm:$0xf]  ;;  %v1009_v21 = vld [vmem:[%s2214_s0 + $0x44] sm:$0xf0]  ;;  %v879_v22 = vor.u32 %v1001_v19, %v878_v18  ;;  %v896_v25 = vld [vmem:[%s2214_s0 + $0x28] sm:$0xf0] }
   0x8   :  { %981 = vmatmul.msk.bf16.vlgmr.msra.gmra.mxu3 %vm188_vm0, %v923_v15  ;;  %v911_v23 = vor.u32 %v1009_v21, %v910_v20  ;;  %v899_v26 = vor.u32 %v1004_v24, %v896_v25  ;;  %v1012_v27 = vld [vmem:[%s2214_s0 + $0x64] sm:$0xf]  ;;  %v928_v28 = vld [vmem:[%s2214_s0 + $0x68] sm:$0xf0]  ;;  %v886_v30 = vld [vmem:[%s2214_s0 + $0x10] sm:$0xf] }
   0x9   :  { %v931_v29 = vor.u32 %v1012_v27, %v928_v28  ;;  %v1003_v31 = vld [vmem:[%s2214_s0 + $0x14] sm:$0xf0]  ;;  %v918_v32 = vld [vmem:[%s2214_s0 + $0x50] sm:$0xf]  ;;  %v1006_v36 = vld [vmem:[%s2214_s0 + $0x34] sm:$0xf] }
   0xa   :  { %215 = vmatpush.bf16.msra.mxu0 %v1021_v6  ;;  %v1011_v33 = vld [vmem:[%s2214_s0 + $0x54] sm:$0xf0]  ;;  %v887_v34 = vor.u32 %v1003_v31, %v886_v30  ;;  %v904_v37 = vld [vmem:[%s2214_s0 + $0x38] sm:$0xf0]  ;;  %v1014_v39 = vld [vmem:[%s2214_s0 + $0x74] sm:$0xf] }
   0xb   :  { %1066 = vmatpush.bf16.msra.mxu2 %v1021_v6  ;;  %v919_v35 = vor.u32 %v1011_v33, %v918_v32  ;;  %v907_v38 = vor.u32 %v1006_v36, %v904_v37  ;;  %v936_v40 = vld [vmem:[%s2214_s0 + $0x78] sm:$0xf0]  ;;  %v894_v42 = vld [vmem:[%s2214_s0 + $0x20] sm:$0xf]  ;;  %v1005_v43 = vld [vmem:[%s2214_s0 + $0x24] sm:$0xf0] }
   0xc   :  { %v939_v41 = vor.u32 %v1014_v39, %v936_v40  ;;  %v926_v44 = vld [vmem:[%s2214_s0 + $0x60] sm:$0xf]  ;;  %v1013_v45 = vld [vmem:[%s2214_s0 + $0x64] sm:$0xf0]  ;;  %v895_v46 = vor.u32 %v1005_v43, %v894_v42  ;;  %v1008_v48 = vld [vmem:[%s2214_s0 + $0x44] sm:$0xf] }
   0xd   :  { %v927_v47 = vor.u32 %v1013_v45, %v926_v44  ;;  %v912_v49 = vld [vmem:[%s2214_s0 + $0x48] sm:$0xf0]  ;;  %v902_v51 = vld [vmem:[%s2214_s0 + $0x30] sm:$0xf]  ;;  %v1007_v52 = vld [vmem:[%s2214_s0 + $0x34] sm:$0xf0] }
   0xe   :  { %216 = vmatpush.bf16.msra.mxu0 %v1020_v7  ;;  %v915_v50 = vor.u32 %v1008_v48, %v912_v49  ;;  %v934_v53 = vld [vmem:[%s2214_s0 + $0x70] sm:$0xf]  ;;  %v1015_v54 = vld [vmem:[%s2214_s0 + $0x74] sm:$0xf0]  ;;  %v903_v55 = vor.u32 %v1007_v52, %v902_v51 }
   0xf   :  { %1067 = vmatpush.bf16.msra.mxu2 %v1020_v7  ;;  %v935_v56 = vor.u32 %v1015_v54, %v934_v53 }
  0x12   :  { %217 = vmatpush.bf16.msra.mxu0 %v1019_v8 }
  0x13   :  { %1068 = vmatpush.bf16.msra.mxu2 %v1019_v8 }
  0x15   :  { %977 = vmatmul.msk.bf16.gmra.mxu1 %vm188_vm0, %v891_v11  ;;  %v1310_v11 = vld [vmem:[%s2215_s2] ss:$0 sm:$0xff] }
  0x16   :  { %218 = vmatpush.bf16.msra.mxu0 %v1018_v12 }
  0x17   :  { %1069 = vmatpush.bf16.msra.mxu2 %v1018_v12 }
  0x18   :  { %982 = vmatmul.msk.bf16.gmra.mxu3 %vm188_vm0, %v931_v29 }
  0x1a   :  { %219 = vmatpush.bf16.msra.mxu0 %v1017_v16 }
  0x1b   :  { %1070 = vmatpush.bf16.msra.mxu2 %v1017_v16 }
  0x1e   :  { %220 = vmatpush.bf16.msra.mxu0 %v1016_v17 }
  0x1f   :  { %1071 = vmatpush.bf16.msra.mxu2 %v1016_v17 }
  0x21   :  { %221 = vmatmul.bf16.vlgmr.msra.gmra.mxu0 %v879_v22 }
  0x22   :  { %241 = vmatmul.bf16.vlgmr.msra.gmra.mxu2 %v911_v23 }
  0x25   :  { %978 = vmatmul.msk.bf16.gmra.mxu1 %vm188_vm0, %v899_v26 }
  0x28   :  { %983 = vmatmul.msk.bf16.gmra.mxu3 %vm188_vm0, %v939_v41 }
  0x31   :  { %226 = vmatmul.bf16.gmra.mxu0 %v887_v34 }
  0x32   :  { %246 = vmatmul.bf16.gmra.mxu2 %v919_v35 }
  0x35   :  { %979 = vmatmul.msk.bf16.gmra.mxu1 %vm188_vm0, %v907_v38 }
  0x41   :  { %231 = vmatmul.bf16.gmra.mxu0 %v895_v46 }
  0x42   :  { %251 = vmatmul.bf16.gmra.mxu2 %v927_v47 }
  0x45   :  { %980 = vmatmul.msk.bf16.gmra.mxu1 %vm188_vm0, %v915_v50 }
  0x51   :  { %236 = vmatmul.bf16.gmra.mxu0 %v903_v55 }
  0x52   :  { %256 = vmatmul.bf16.gmra.mxu2 %v935_v56 }
  0x82   :  { %v271_v57 = vpop.f32.mrf.mxu1 }
  0x8a   :  { %v273_v58 = vpop.f32.mrf.mxu1 }
  0x8b   :  { %v296_v4 = vpop.f32.mrf.mxu3 }
  0x92   :  { %v276_v59 = vpop.f32.mrf.mxu1 }
  0x93   :  { %v298_v8 = vpop.f32.mrf.mxu3 }
  0x9a   :  { %v278_v60 = vpop.f32.mrf.mxu1 }
  0x9b   :  { %v301_v16 = vpop.f32.mrf.mxu3 }
  0x9e   :  { %v222_v61 = vpop.f32.mrf.mxu0 }
  0x9f   :  { %v223_v17 = vadd.f32 %v1310_v11, %v222_v61 }
  0xa1   :  { %v1318_v21 = vadd.f32 %v271_v57, %v223_v17 }
  0xa2   :  { %v281_v63 = vpop.f32.mrf.mxu1 }
  0xa3   :  { %v311_v30 = vsel %vm188_vm0, %v1318_v21, 0.0  ;;  %v303_v35 = vpop.f32.mrf.mxu3 }
  0xa5   :  { %v242_v62 = vpop.f32.mrf.mxu2 }
  0xa6   :  { %v224_v0 = vpop.f32.mrf.mxu0  ;;  %v243_v46 = vadd.f32 %v1310_v11, %v242_v62 }
  0xa7   :  { %v225_v13 = vadd.f32 %v1310_v11, %v224_v0 }
  0xa9   :  { %v1315_v19 = vadd.f32 %v273_v58, %v225_v13 }
  0xaa   :  { %v283_v3 = vpop.f32.mrf.mxu1 }
  0xab   :  { %v312_v24 = vsel %vm188_vm0, %v1315_v19, 0.0  ;;  %v306_v56 = vpop.f32.mrf.mxu3 }
  0xac   :  { %v313_v34 = vadd.f32 %v312_v24, %v311_v30 }
  0xad   :  { %v244_v1 = vpop.f32.mrf.mxu2 }
  0xae   :  { %v227_v2 = vpop.f32.mrf.mxu0  ;;  %v245_v51 = vadd.f32 %v1310_v11, %v244_v1 }
  0xaf   :  { %v228_v18 = vadd.f32 %v1310_v11, %v227_v2 }
  0xb1   :  { %v1320_v22 = vadd.f32 %v276_v59, %v228_v18 }
  0xb2   :  { %v286_v7 = vpop.f32.mrf.mxu1 }
  0xb3   :  { %v314_v31 = vsel %vm188_vm0, %v1320_v22, 0.0 }
  0xb4   :  { %v315_v38 = vadd.f32 %v314_v31, %v313_v34 }
  0xb5   :  { %v247_v5 = vpop.f32.mrf.mxu2 }
  0xb6   :  { %v229_v6 = vpop.f32.mrf.mxu0  ;;  %v248_v52 = vadd.f32 %v1310_v11, %v247_v5 }
  0xb7   :  { %v230_v20 = vadd.f32 %v1310_v11, %v229_v6 }
  0xb8   :  { %v1357_v61 = vadd.f32 %v296_v4, %v248_v52 }
  0xb9   :  { %v1325_v25 = vadd.f32 %v278_v60, %v230_v20 }
  0xba   :  { %v288_v12 = vpop.f32.mrf.mxu1 }
  0xbb   :  { %v316_v36 = vsel %vm188_vm0, %v1325_v25, 0.0 }
  0xbc   :  { %v317_v41 = vadd.f32 %v316_v36, %v315_v38 }
  0xbd   :  { %v249_v9 = vpop.f32.mrf.mxu2 }
  0xbe   :  { %v232_v10 = vpop.f32.mrf.mxu0  ;;  %v250_v57 = vadd.f32 %v1310_v11, %v249_v9 }
  0xbf   :  { %v233_v23 = vadd.f32 %v1310_v11, %v232_v10 }
  0xc0   :  { %v1362_v1 = vadd.f32 %v298_v8, %v250_v57 }
  0xc1   :  { %v1332_v32 = vadd.f32 %v281_v63, %v233_v23 }
  0xc2   :  { %v291_v28 = vpop.f32.mrf.mxu1 }
  0xc3   :  { %v318_v39 = vsel %vm188_vm0, %v1332_v32, 0.0  ;;  %v1351_v53 = vadd.f32 %v291_v28, %v243_v46 }
  0xc4   :  { %v319_v43 = vadd.f32 %v318_v39, %v317_v41 }
  0xc5   :  { %v252_v14 = vpop.f32.mrf.mxu2  ;;  %v326_v62 = vsel %vm188_vm0, %v1351_v53, 0.0 }
  0xc6   :  { %v234_v15 = vpop.f32.mrf.mxu0  ;;  %v253_v63 = vadd.f32 %v1310_v11, %v252_v14 }
  0xc7   :  { %v235_v26 = vadd.f32 %v1310_v11, %v234_v15  ;;  %v308_v15 = vpop.f32.mrf.mxu3 }
  0xc8   :  { %v302_v4 = vadd.f32 %v301_v16, %v253_v63 }
  0xc9   :  { %v1337_v37 = vadd.f32 %v283_v3, %v235_v26 }
  0xca   :  { %v293_v50 = vpop.f32.mrf.mxu1  ;;  %v334_v17 = vsel %vm188_vm0, %v302_v4, 0.0 }
  0xcb   :  { %v320_v42 = vsel %vm188_vm0, %v1337_v37, 0.0  ;;  %v1354_v58 = vadd.f32 %v293_v50, %v245_v51 }
  0xcc   :  { %v321_v49 = vadd.f32 %v320_v42, %v319_v43 }
  0xcd   :  { %v254_v27 = vpop.f32.mrf.mxu2  ;;  %v328_v2 = vsel %vm188_vm0, %v1354_v58, 0.0 }
  0xce   :  { %v237_v29 = vpop.f32.mrf.mxu0  ;;  %v255_v3 = vadd.f32 %v1310_v11, %v254_v27 }
  0xcf   :  { %v238_v33 = vadd.f32 %v1310_v11, %v237_v29 }
  0xd0   :  { %v304_v13 = vadd.f32 %v303_v35, %v255_v3 }
  0xd1   :  { %v1341_v40 = vadd.f32 %v286_v7, %v238_v33  ;;  %v330_v7 = vsel %vm188_vm0, %v1357_v61, 0.0 }
  0xd2   :  { %v336_v23 = vsel %vm188_vm0, %v304_v13, 0.0 }
  0xd3   :  { %v322_v47 = vsel %vm188_vm0, %v1341_v40, 0.0 }
  0xd4   :  { %v323_v55 = vadd.f32 %v322_v47, %v321_v49 }
  0xd5   :  { %v257_v45 = vpop.f32.mrf.mxu2 }
  0xd6   :  { %v239_v44 = vpop.f32.mrf.mxu0  ;;  %v258_v9 = vadd.f32 %v1310_v11, %v257_v45 }
  0xd7   :  { %v240_v48 = vadd.f32 %v1310_v11, %v239_v44 }
  0xd8   :  { %v307_v18 = vadd.f32 %v306_v56, %v258_v9 }
  0xd9   :  { %v289_v54 = vadd.f32 %v288_v12, %v240_v48  ;;  %v332_v12 = vsel %vm188_vm0, %v1362_v1, 0.0 }
  0xda   :  { %v338_v16 = vsel %vm188_vm0, %v307_v18, 0.0 }
  0xdb   :  { %v324_v59 = vsel %vm188_vm0, %v289_v54, 0.0 }
  0xdc   :  { %v325_v60 = vadd.f32 %v324_v59, %v323_v55 }
  0xdd   :  { %v259_v6 = vpop.f32.mrf.mxu2 }
  0xde   :  { %v327_v0 = vadd.f32 %v326_v62, %v325_v60  ;;  %v260_v8 = vadd.f32 %v1310_v11, %v259_v6 }
  0xe0   :  { %v329_v5 = vadd.f32 %v328_v2, %v327_v0  ;;  %v309_v24 = vadd.f32 %v308_v15, %v260_v8 }
  0xe2   :  { %v331_v10 = vadd.f32 %v330_v7, %v329_v5  ;;  %v340_v28 = vsel %vm188_vm0, %v309_v24, 0.0 }
  0xe4   :  { %v333_v14 = vadd.f32 %v332_v12, %v331_v10 }
  0xe6   :  { %v335_v20 = vadd.f32 %v334_v17, %v333_v14 }
  0xe8   :  { %v337_v26 = vadd.f32 %v336_v23, %v335_v20 }
  0xea   :  { %v339_v27 = vadd.f32 %v338_v16, %v337_v26 }
  0xec   :  { %v341_v29 = vadd.f32 %v340_v28, %v339_v27 }
  0xee   :  { %v342_v30 = vrot.slane %v341_v29, 4 }
  0xf0   :  { %v343_v31 = vadd.f32 %v342_v30, %v341_v29 }
  0xf2   :  { %v344_v33 = vrot.slane %v343_v31, 2 }
  0xf4   :  { %v345_v11 = vadd.f32 %v344_v33, %v343_v31 }
  0xf6   :  { %v346_v34 = vrot.slane %v345_v11, 1 }
  0xf8   :  { %v347_v35 = vadd.f32 %v346_v34, %v345_v11 }
  0xfa   :  { %v348_v36 = vmul.f32 0.0078125, %v347_v35 }
  0xfc   :  { %v1378_v38 = vsub.f32 %v1318_v21, %v348_v36  ;;  %v1381_v39 = vsub.f32 %v1315_v19, %v348_v36  ;;  %v1384_v41 = vsub.f32 %v1320_v22, %v348_v36  ;;  %v1387_v42 = vsub.f32 %v1325_v25, %v348_v36 }
  0xfd   :  { %v1394_v45 = vsub.f32 %v1332_v32, %v348_v36  ;;  %v1399_v19 = vsub.f32 %v1337_v37, %v348_v36  ;;  %v1406_v48 = vsub.f32 %v1341_v40, %v348_v36  ;;  %v1411_v51 = vsub.f32 %v289_v54, %v348_v36 }
  0xfe   :  { %v365_v43 = vmul.f32 %v1378_v38, %v1378_v38  ;;  %v366_v44 = vmul.f32 %v1381_v39, %v1381_v39  ;;  %v367_v21 = vmul.f32 %v1384_v41, %v1384_v41  ;;  %v368_v22 = vmul.f32 %v1387_v42, %v1387_v42 }
  0xff   :  { %v369_v32 = vmul.f32 %v1394_v45, %v1394_v45  ;;  %v370_v37 = vmul.f32 %v1399_v19, %v1399_v19  ;;  %v1417_v56 = vsub.f32 %v1351_v53, %v348_v36  ;;  %v371_v40 = vmul.f32 %v1406_v48, %v1406_v48 }
 0x100   :  { %v381_v25 = vsel %vm188_vm0, %v365_v43, 0.0  ;;  %v382_v46 = vsel %vm188_vm0, %v366_v44, 0.0  ;;  %v384_v49 = vsel %vm188_vm0, %v367_v21, 0.0  ;;  %v386_v52 = vsel %vm188_vm0, %v368_v22, 0.0 }
 0x101   :  { %v383_v47 = vadd.f32 %v382_v46, %v381_v25  ;;  %v388_v57 = vsel %vm188_vm0, %v369_v32, 0.0  ;;  %v1423_v60 = vsub.f32 %v1354_v58, %v348_v36  ;;  %v372_v54 = vmul.f32 %v1411_v51, %v1411_v51 }
 0x102   :  { %v390_v62 = vsel %vm188_vm0, %v370_v37, 0.0  ;;  %v1429_v0 = vsub.f32 %v1357_v61, %v348_v36  ;;  %v373_v53 = vmul.f32 %v1417_v56, %v1417_v56  ;;  %v392_v2 = vsel %vm188_vm0, %v371_v40, 0.0 }
 0x103   :  { %v385_v50 = vadd.f32 %v384_v49, %v383_v47  ;;  %v1435_v5 = vsub.f32 %v1362_v1, %v348_v36  ;;  %v374_v58 = vmul.f32 %v1423_v60, %v1423_v60  ;;  %v394_v6 = vsel %vm188_vm0, %v372_v54, 0.0 }
 0x104   :  { %v1440_v9 = vsub.f32 %v302_v4, %v348_v36  ;;  %v375_v61 = vmul.f32 %v1429_v0, %v1429_v0  ;;  %v396_v10 = vsel %vm188_vm0, %v373_v53, 0.0  ;;  %v1445_v8 = vsub.f32 %v304_v13, %v348_v36 }
 0x105   :  { %v387_v55 = vadd.f32 %v386_v52, %v385_v50  ;;  %v376_v1 = vmul.f32 %v1435_v5, %v1435_v5  ;;  %v398_v14 = vsel %vm188_vm0, %v374_v58, 0.0  ;;  %v1450_v17 = vsub.f32 %v307_v18, %v348_v36 }
 0x106   :  { %v377_v4 = vmul.f32 %v1440_v9, %v1440_v9  ;;  %v400_v20 = vsel %vm188_vm0, %v375_v61, 0.0  ;;  %v1455_v26 = vsub.f32 %v309_v24, %v348_v36  ;;  %v378_v13 = vmul.f32 %v1445_v8, %v1445_v8 }
 0x107   :  { %v389_v59 = vadd.f32 %v388_v57, %v387_v55  ;;  %v402_v16 = vsel %vm188_vm0, %v376_v1, 0.0  ;;  %v379_v28 = vmul.f32 %v1450_v17, %v1450_v17  ;;  %v419_v55 = vld [vmem:[%s2217_s3] sm:$0x1] }
 0x108   :  { %v404_v18 = vsel %vm188_vm0, %v377_v4, 0.0  ;;  %v380_v30 = vmul.f32 %v1455_v26, %v1455_v26  ;;  %v406_v31 = vsel %vm188_vm0, %v378_v13, 0.0 }
 0x109   :  { %v391_v63 = vadd.f32 %v390_v62, %v389_v59  ;;  %v408_v24 = vsel %vm188_vm0, %v379_v28, 0.0 }
 0x10a   :  { %v410_v34 = vsel %vm188_vm0, %v380_v30, 0.0 }
 0x10b   :  { %v393_v3 = vadd.f32 %v392_v2, %v391_v63  ;;  %v1475_v63 = vld [vmem:[%s2216_s4] ss:$0 sm:$0xff] }
 0x10d   :  { %v395_v7 = vadd.f32 %v394_v6, %v393_v3 }
 0x10f   :  { %v397_v12 = vadd.f32 %v396_v10, %v395_v7 }
 0x111   :  { %v399_v15 = vadd.f32 %v398_v14, %v397_v12 }
 0x113   :  { %v401_v23 = vadd.f32 %v400_v20, %v399_v15 }
 0x115   :  { %v403_v27 = vadd.f32 %v402_v16, %v401_v23 }
 0x117   :  { %v405_v29 = vadd.f32 %v404_v18, %v403_v27 }
 0x119   :  { %v407_v33 = vadd.f32 %v406_v31, %v405_v29 }
 0x11b   :  { %v409_v11 = vadd.f32 %v408_v24, %v407_v33 }
 0x11d   :  { %v411_v35 = vadd.f32 %v410_v34, %v409_v11 }
 0x11f   :  { %v412_v36 = vrot.slane %v411_v35, 4 }
 0x121   :  { %v413_v43 = vadd.f32 %v412_v36, %v411_v35 }
 0x123   :  { %v414_v44 = vrot.slane %v413_v43, 2 }
 0x125   :  { %v415_v21 = vadd.f32 %v414_v44, %v413_v43 }
 0x127   :  { %v416_v22 = vrot.slane %v415_v21, 1 }
 0x129   :  { %v417_v25 = vadd.f32 %v416_v22, %v415_v21 }
 0x12b   :  { %v418_v46 = vmul.f32 0.0078125, %v417_v25 }
 0x12d   :  { %v420_v47 = vadd.f32 1e-05, %v418_v46 }
 0x12f   :  { %1075 = vrsqrt.f32 %v420_v47  ;;  %vm427_vm2 = vweird.f32 %v420_v47 }
 0x135   :  { %v1076_v32 = vpop.eup %1075 }
 0x136   :  { %v422_v49 = vmul.f32 %v1076_v32, %v420_v47  ;;  %vm428_vm1 = vweird.f32 %v1076_v32 }
 0x137   :  { %vm429_vm3 = vmor %vm427_vm2, %vm428_vm1 }
 0x138   :  { %v423_v50 = vmul.f32 %v1076_v32, %v422_v49 }
 0x13a   :  { %v424_v37 = vmul.f32 0.5, %v423_v50 }
 0x13c   :  { %v425_v52 = vsub.f32 1.5, %v424_v37 }
 0x13e   :  { %v426_v40 = vmul.f32 %v1076_v32, %v425_v52  ;;  %v1566_v52 = vld [vmem:[%s2218_s5 + $0x8] sm:$0xff]  }
 0x140   :  { %v430_v57 = vsel %vm429_vm3, %v1076_v32, %v426_v40 }
 0x141   :  { %v431_v59 = vmul.f32 %v430_v57, %v419_v55 }
 0x143   :  { %v433_v54 = vperm.slane %v431_v59, 0  ;;  %v1577_v59 = vld [vmem:[%s2218_s5 + $0x10] sm:$0xff]  }
 0x145   :  { %v435_v62 = vmul.f32 %v433_v54, %v1378_v38  ;;  %v436_v53 = vmul.f32 %v433_v54, %v1381_v39  ;;  %v437_v2 = vmul.f32 %v433_v54, %v1384_v41  ;;  %v438_v3 = vmul.f32 %v433_v54, %v1387_v42 }
 0x146   :  { %v439_v58 = vmul.f32 %v433_v54, %v1394_v45  ;;  %v440_v7 = vmul.f32 %v433_v54, %v1399_v19  ;;  %v441_v61 = vmul.f32 %v433_v54, %v1406_v48  ;;  %v442_v39 = vmul.f32 %v433_v54, %v1411_v51 }
 0x147   :  { %v1482_v6 = vadd.f32 %v1475_v63, %v435_v62  ;;  %v1486_v38 = vadd.f32 %v1475_v63, %v436_v53  ;;  %v1490_v10 = vadd.f32 %v1475_v63, %v437_v2  ;;  %v1494_v41 = vadd.f32 %v1475_v63, %v438_v3  ;;  %v1586_v2 = vld [vmem:[%s2218_s5 + $0x18] sm:$0xff]  }
 0x148   :  { %v443_v42 = vmul.f32 %v433_v54, %v1417_v56  ;;  %v1498_v45 = vadd.f32 %v1475_v63, %v439_v58  ;;  %v444_v12 = vmul.f32 %v433_v54, %v1423_v60  ;;  %v1503_v1 = vadd.f32 %v1475_v63, %v440_v7  ;;  %2236 = vst [vmem:[#allocation6_spill] sm:$0xff] %v1586_v2 }
 0x149   :  { %v984_v19 = vmul.f32 -1.442695, %v1482_v6  ;;  %v985_v48 = vmul.f32 -1.442695, %v1486_v38  ;;  %v445_v14 = vmul.f32 %v433_v54, %v1429_v0  ;;  %v1508_v51 = vadd.f32 %v1475_v63, %v441_v61  ;;  %v1596_v61 = vld [vmem:[%s2218_s5 + $0x20] sm:$0xff]  }
 0x14a   :  { %v986_v15 = vmul.f32 -1.442695, %v1490_v10  ;;  %v446_v56 = vmul.f32 %v433_v54, %v1435_v5  ;;  %v1513_v4 = vadd.f32 %v1475_v63, %v442_v39  ;;  %v987_v20 = vmul.f32 -1.442695, %v1494_v41  ;;  %2237 = vst [vmem:[#allocation7_spill] sm:$0xff] %v1596_v61 }
 0x14b   :  { %v447_v60 = vmul.f32 %v433_v54, %v1440_v9  ;;  %v1518_v23 = vadd.f32 %v1475_v63, %v443_v42  ;;  %1077 = vpow2.f32 %v984_v19  ;;  %v988_v0 = vmul.f32 -1.442695, %v1498_v45 }
 0x14c   :  { %v1522_v13 = vadd.f32 %v1475_v63, %v444_v12  ;;  %1079 = vpow2.f32 %v985_v48  ;;  %v989_v16 = vmul.f32 -1.442695, %v1503_v1  ;;  %v1526_v5 = vadd.f32 %v1475_v63, %v445_v14  ;;  %v1605_v48 = vld [vmem:[%s2218_s5 + $0x28] sm:$0xff]  }
 0x14d   :  { %1081 = vpow2.f32 %v986_v15  ;;  %v990_v27 = vmul.f32 -1.442695, %v1508_v51  ;;  %v1530_v9 = vadd.f32 %v1475_v63, %v446_v56  ;;  %v991_v28 = vmul.f32 -1.442695, %v1513_v4  ;;  %2238 = vst [vmem:[#allocation8_spill] sm:$0xff] %v1605_v48 }
 0x14e   :  { %1083 = vpow2.f32 %v987_v20  ;;  %v1534_v18 = vadd.f32 %v1475_v63, %v447_v60  ;;  %v992_v29 = vmul.f32 -1.442695, %v1518_v23  ;;  %v993_v30 = vmul.f32 -1.442695, %v1522_v13 }
 0x14f   :  { %1085 = vpow2.f32 %v988_v0  ;;  %v994_v33 = vmul.f32 -1.442695, %v1526_v5  ;;  %v995_v11 = vmul.f32 -1.442695, %v1530_v9  ;;  %v448_v35 = vmul.f32 %v433_v54, %v1445_v8 }
 0x150   :  { %2232 = vst [vmem:[#allocation2_spill] sm:$0xff] %v1534_v18  ;;  %1087 = vpow2.f32 %v989_v16  ;;  %v996_v36 = vmul.f32 -1.442695, %v1534_v18  ;;  %v449_v44 = vmul.f32 %v433_v54, %v1450_v17  ;;  %v450_v25 = vmul.f32 %v433_v54, %v1455_v26  ;;  %v1556_v17 = vld [vmem:[%s2218_s5] sm:$0xff]  }
 0x151   :  { %v1078_v31 = vpop.eup %1077  ;;  %1089 = vpow2.f32 %v990_v27  ;;  %v1551_v49 = vadd.f32 %v1475_v63, %v448_v35 }
 0x152   :  { %v1080_v24 = vpop.eup %1079  ;;  %1091 = vpow2.f32 %v991_v28  ;;  %v1543_v21 = vadd.f32 1.0, %v1078_v31  ;;  %v1561_v37 = vadd.f32 %v1475_v63, %v449_v44  ;;  %v1572_v57 = vadd.f32 %v1475_v63, %v450_v25  ;;  %v1620_v28 = vld [vmem:[%s2218_s5 + $0x30] sm:$0xff]  }
 0x153   :  { %v1082_v34 = vpop.eup %1081  ;;  %1093 = vpow2.f32 %v992_v29  ;;  %v1546_v46 = vadd.f32 1.0, %v1080_v24  ;;  %2233 = vst [vmem:[#allocation3_spill] sm:$0xff] %v1551_v49  ;;  %v997_v39 = vmul.f32 -1.442695, %v1551_v49 }
 0x154   :  { %v1084_v43 = vpop.eup %1083  ;;  %1095 = vpow2.f32 %v993_v30  ;;  %v1548_v32 = vadd.f32 1.0, %v1082_v34  ;;  %2234 = vst [vmem:[#allocation4_spill] sm:$0xff] %v1561_v37  ;;  %v998_v14 = vmul.f32 -1.442695, %v1561_v37  ;;  %v999_v60 = vmul.f32 -1.442695, %v1572_v57 }
 0x155   :  { %v1086_v22 = vpop.eup %1085  ;;  %1097 = vpow2.f32 %v994_v33  ;;  %v1558_v50 = vadd.f32 1.0, %v1084_v43  ;;  %2235 = vst [vmem:[#allocation5_spill] sm:$0xff] %v1572_v57  ;;  %v578_v29 = vand.u32 2147483648, %v1543_v21  ;;  %v593_v24 = vand.u32 2147483648, %v1546_v46 }
 0x156   :  { %v1088_v47 = vpop.eup %1087  ;;  %1099 = vpow2.f32 %v995_v11  ;;  %v1568_v55 = vadd.f32 1.0, %v1086_v22  ;;  %2239 = vst [vmem:[#allocation9_spill] sm:$0xff] %v1620_v28  ;;  %v576_v22 = vand.u32 2147483647, %v1543_v21  ;;  %v608_v34 = vand.u32 2147483648, %v1548_v32 }
 0x157   :  { %v1090_v8 = vpop.eup %1089  ;;  %1101 = vpow2.f32 %v996_v36  ;;  %v1579_v54 = vadd.f32 1.0, %v1088_v47  ;;  %v1652_v31 = vor.u32 1.1754944e-38, %v593_v24  ;;  %v623_v56 = vand.u32 2147483648, %v1558_v50 }
 0x158   :  { %v1092_v26 = vpop.eup %1091  ;;  %1103 = vrcp.f32 %v1543_v21  ;;  %v1588_v3 = vadd.f32 1.0, %v1090_v8  ;;  %vm572_vm4 = vweird.f32 %v1543_v21  ;;  %vm587_vm5 = vweird.f32 %v1546_v46 }
 0x159   :  { %v1094_v40 = vpop.eup %1093  ;;  %1105 = vrcp.f32 %v1546_v46  ;;  %v1644_v8 = vadd.f32 1.0, %v1092_v26  ;;  %vm602_vm6 = vweird.f32 %v1548_v32  ;;  %vm617_vm7 = vweird.f32 %v1558_v50 }
 0x15a   :  { %v1096_v62 = vpop.eup %1095  ;;  %1107 = vrcp.f32 %v1548_v32  ;;  %v636_v61 = vand.u32 2147483647, %v1568_v55  ;;  %vm632_vm8 = vweird.f32 %v1568_v55  ;;  %vm1702_vm11 = vcmp.eq.f32.partialorder %v576_v22, 8.507059e+37 }
 0x15b   :  { %v1098_v63 = vpop.eup %1097  ;;  %1109 = vrcp.f32 %v1558_v50  ;;  %v1664_v19 = vadd.f32 1.0, %v1096_v62  ;;  %v638_v62 = vand.u32 2147483648, %v1568_v55 }
 0x15c   :  { %v1100_v42 = vpop.eup %1099  ;;  %1111 = vrcp.f32 %v1568_v55  ;;  %v1671_v57 = vadd.f32 1.0, %v1098_v63  ;;  %vm1726_vm1 = vcmp.eq.f32.partialorder %v636_v61, 8.507059e+37  ;;  %v653_v61 = vand.u32 2147483648, %v1579_v54 }
 0x15d   :  { %v1102_v15 = vpop.eup %1101  ;;  %1113 = vrcp.f32 %v1579_v54  ;;  %v1678_v48 = vadd.f32 1.0, %v1100_v42 }
 0x15e   :  { %v1613_v0 = vpop.eup %1103  ;;  %1115 = vrcp.f32 %v1588_v3 }
 0x15f   :  { %v1624_v30 = vpop.eup %1105  ;;  %1117 = vpow2.f32 %v997_v39  ;;  %v568_v35 = vmul.f32 %v1613_v0, %v1543_v21  ;;  %v1646_v39 = vor.u32 1.1754944e-38, %v578_v29  ;;  %v1661_v29 = vadd.f32 1.0, %v1094_v40 }
 0x160   :  { %v1629_v11 = vpop.eup %1107  ;;  %1119 = vpow2.f32 %v998_v14  ;;  %v583_v36 = vmul.f32 %v1624_v30, %v1546_v46  ;;  %v591_v14 = vand.u32 2147483647, %v1546_v46  ;;  %v1674_v40 = vor.u32 1.1754944e-38, %v608_v34 }
 0x161   :  { %v1636_v43 = vpop.eup %1109  ;;  %1121 = vpow2.f32 %v999_v60  ;;  %v598_v25 = vmul.f32 %v1629_v11, %v1548_v32  ;;  %v606_v60 = vand.u32 2147483647, %v1548_v32  ;;  %v569_v16 = vsub.f32 1.0, %v568_v35 }
 0x162   :  { %v1642_v47 = vpop.eup %1111  ;;  %v613_v44 = vmul.f32 %v1636_v43, %v1558_v50  ;;  %v584_v20 = vsub.f32 1.0, %v583_v36  ;;  %v621_v35 = vand.u32 2147483647, %v1558_v50  ;;  %v1686_v34 = vor.u32 1.1754944e-38, %v623_v56 }
 0x163   :  { %v1650_v33 = vpop.eup %1113  ;;  %v628_v27 = vmul.f32 %v1642_v47, %v1568_v55  ;;  %v599_v24 = vsub.f32 1.0, %v598_v25  ;;  %v1680_v25 = vadd.f32 1.0, %v1102_v15  ;;  %v570_v63 = vmul.f32 %v1613_v0, %v569_v16 }
 0x164   :  { %v1659_v26 = vpop.eup %1115  ;;  %v643_v7 = vmul.f32 %v1650_v33, %v1579_v54  ;;  %v614_v37 = vsub.f32 1.0, %v613_v44  ;;  %v585_v28 = vmul.f32 %v1624_v30, %v584_v20  ;;  %v1697_v16 = vor.u32 1.1754944e-38, %v638_v62 }
 0x165   :  { %v1118_v12 = vpop.eup %1117  ;;  %v658_v58 = vmul.f32 %v1659_v26, %v1588_v3  ;;  %v629_v49 = vsub.f32 1.0, %v628_v27  ;;  %v600_v42 = vmul.f32 %v1629_v11, %v599_v24  ;;  %v651_v56 = vand.u32 2147483647, %v1579_v54 }
 0x166   :  { %v1120_v53 = vpop.eup %1119  ;;  %v1689_v18 = vadd.f32 1.0, %v1118_v12  ;;  %v644_v15 = vsub.f32 1.0, %v643_v7  ;;  %vm573_vm10 = vweird.f32 %v1613_v0  ;;  %vm1706_vm12 = vcmp.eq.f32.partialorder %v591_v14, 8.507059e+37 }
 0x167   :  { %v1122_v36 = vpop.eup %1121  ;;  %v659_v2 = vsub.f32 1.0, %v658_v58  ;;  %v1693_v44 = vadd.f32 1.0, %v1120_v53  ;;  %vm1710_vm13 = vcmp.eq.f32.partialorder %v606_v60, 8.507059e+37  ;;  %v615_v58 = vmul.f32 %v1636_v43, %v614_v37  ;;  %vm1737_vm2 = vmor %vm572_vm4, %vm573_vm10 }
 0x168   :  { %v1695_v27 = vadd.f32 1.0, %v1122_v36  ;;  %v630_v7 = vmul.f32 %v1642_v47, %v629_v49  ;;  %1123 = vrcp.f32 %v1644_v8  ;;  %v571_v24 = vadd.f32 %v1613_v0, %v570_v63 }
 0x169   :  { %v586_v22 = vadd.f32 %v1624_v30, %v585_v28  ;;  %vm588_vm14 = vweird.f32 %v1624_v30  ;;  %vm603_vm15 = vweird.f32 %v1629_v11  ;;  %v601_v14 = vadd.f32 %v1629_v11, %v600_v42 }
 0x16a   :  { %vm1722_vm0 = vcmp.eq.f32.partialorder %v621_v35, 8.507059e+37  ;;  %v645_v49 = vmul.f32 %v1650_v33, %v644_v15  ;;  %v660_v62 = vmul.f32 %v1659_v26, %v659_v2  ;;  %1125 = vrcp.f32 %v1661_v29  ;;  %vm1747_vm9 = vmor %vm587_vm5, %vm588_vm14 }
 0x16b   :  { %vm618_vm3 = vweird.f32 %v1636_v43  ;;  %v666_v35 = vand.u32 2147483647, %v1588_v3  ;;  %v668_v36 = vand.u32 2147483648, %v1588_v3  ;;  %v616_v21 = vadd.f32 %v1636_v43, %v615_v58  ;;  %vm1762_vm5 = vmor %vm602_vm6, %vm603_vm15 }
 0x16c   :  { %v631_v63 = vadd.f32 %v1642_v47, %v630_v7  ;;  %vm633_vm4 = vweird.f32 %v1642_v47  ;;  %1127 = vrcp.f32 %v1664_v19  ;;  %v575_v42 = vsel %vm1737_vm2, %v1613_v0, %v571_v24  ;;  %vm1781_vm6 = vmor %vm617_vm7, %vm618_vm3 }
 0x16d   :  { %vm648_vm10 = vweird.f32 %v1650_v33  ;;  %vm663_vm14 = vweird.f32 %v1659_v26  ;;  %1129 = vrcp.f32 %v1671_v57  ;;  %v590_v0 = vsel %vm1747_vm9, %v1624_v30, %v586_v22  ;;  %vm1789_vm15 = vmor %vm632_vm8, %vm633_vm4 }
 0x16e   :  { %v1769_v15 = vpop.eup %1123  ;;  %v605_v32 = vsel %vm1762_vm5, %v1629_v11, %v601_v14  ;;  %v646_v7 = vadd.f32 %v1650_v33, %v645_v49  ;;  %v661_v24 = vadd.f32 %v1659_v26, %v660_v62  ;;  %vm1793_vm9 = vcmp.eq.f32.partialorder %v651_v56, 8.507059e+37 }
 0x16f   :  { %v654_v22 = vor.u32 1.1754944e-38, %v653_v61  ;;  %vm662_vm7 = vweird.f32 %v1588_v3  ;;  %v673_v50 = vmul.f32 %v1769_v15, %v1644_v8  ;;  %v620_v55 = vsel %vm1781_vm6, %v1636_v43, %v616_v21 }
 0x170   :  { %v1800_v14 = vpop.eup %1125  ;;  %v635_v49 = vsel %vm1789_vm15, %v1642_v47, %v631_v63  ;;  %vm2262_vm8 = vweird.f32 %v1579_v54  ;;  %vm1816_vm3 = vcmp.eq.f32.partialorder %v666_v35, 8.507059e+37  ;;  %1131 = vrcp.f32 %v1678_v48  ;;  %vm1838_vm4 = vmor %vm662_vm7, %vm663_vm14 }
 0x171   :  { %vm1812_vm2 = vmor %vm2262_vm8, %vm648_vm10  ;;  %v1824_v43 = vsel %vm1702_vm11, %v1646_v39, %v575_v42  ;;  %v1829_v47 = vsel %vm1706_vm12, %v1652_v31, %v590_v0  ;;  %v1834_v54 = vsel %vm1710_vm13, %v1674_v40, %v605_v32  ;;  %v688_v39 = vmul.f32 %v1800_v14, %v1661_v29 }
 0x172   :  { %v1844_v12 = vpop.eup %1127  ;;  %v650_v31 = vsel %vm1812_vm2, %v1650_v33, %v646_v7  ;;  %v665_v40 = vsel %vm1838_vm4, %v1659_v26, %v661_v24  ;;  %v669_v20 = vor.u32 1.1754944e-38, %v668_v36  ;;  %1133 = vrcp.f32 %v1680_v25 }
 0x173   :  { %v1853_v53 = vpop.eup %1129  ;;  %v1858_v28 = vsel %vm1722_vm0, %v1686_v34, %v620_v55  ;;  %v1863_v61 = vsel %vm1726_vm1, %v1697_v16, %v635_v49  ;;  %v674_v33 = vsub.f32 1.0, %v673_v50  ;;  %v703_v35 = vmul.f32 %v1844_v12, %v1664_v19 }
 0x174   :  { %v681_v26 = vand.u32 2147483647, %v1644_v8  ;;  %v683_v36 = vand.u32 2147483648, %v1644_v8  ;;  %v698_v2 = vand.u32 2147483648, %v1661_v29  ;;  %v718_v60 = vmul.f32 %v1853_v53, %v1671_v57 }
 0x175   :  { %v1874_v34 = vsel %vm1793_vm9, %v654_v22, %v650_v31  ;;  %v1878_v16 = vsel %vm1816_vm3, %v669_v20, %v665_v40  ;;  %vm677_vm11 = vweird.f32 %v1644_v8  ;;  %v689_v37 = vsub.f32 1.0, %v688_v39 }
 0x176   :  { %v704_v21 = vsub.f32 1.0, %v703_v35  ;;  %v1881_v63 = vpop.eup %1131  ;;  %vm692_vm12 = vweird.f32 %v1661_v29  ;;  %v696_v42 = vand.u32 2147483647, %v1661_v29  ;;  %v713_v46 = vand.u32 2147483648, %v1664_v19 }
 0x177   :  { %v728_v0 = vand.u32 2147483648, %v1671_v57  ;;  %1135 = vrcp.f32 %v1689_v18  ;;  %v675_v32 = vmul.f32 %v1769_v15, %v674_v33  ;;  %v711_v58 = vand.u32 2147483647, %v1664_v19 }
 0x178   :  { %v719_v7 = vsub.f32 1.0, %v718_v60  ;;  %v733_v24 = vmul.f32 %v1881_v63, %v1678_v48  ;;  %v1892_v30 = vpop.eup %1133  ;;  %v684_v11 = vor.u32 1.1754944e-38, %v683_v36  ;;  %v699_v22 = vor.u32 1.1754944e-38, %v698_v2 }
 0x179   :  { %vm707_vm13 = vweird.f32 %v1664_v19  ;;  %v726_v50 = vand.u32 2147483647, %v1671_v57  ;;  %vm1896_vm0 = vcmp.eq.f32.partialorder %v681_v26, 8.507059e+37  ;;  %v690_v49 = vmul.f32 %v1800_v14, %v689_v37 }
 0x17a   :  { %v705_v56 = vmul.f32 %v1844_v12, %v704_v21  ;;  %v734_v3 = vsub.f32 1.0, %v733_v24  ;;  %v748_v62 = vmul.f32 %v1892_v30, %v1680_v25  ;;  %vm678_vm1 = vweird.f32 %v1769_v15 }
 0x17b   :  { %v714_v39 = vor.u32 1.1754944e-38, %v713_v46  ;;  %vm722_vm5 = vweird.f32 %v1671_v57  ;;  %v729_v31 = vor.u32 1.1754944e-38, %v728_v0  ;;  %v676_v40 = vadd.f32 %v1769_v15, %v675_v32  ;;  %vm1936_vm8 = vmor %vm677_vm11, %vm678_vm1 }
 0x17c   :  { %vm693_vm10 = vweird.f32 %v1800_v14  ;;  %vm1908_vm14 = vcmp.eq.f32.partialorder %v696_v42, 8.507059e+37  ;;  %vm1912_vm6 = vcmp.eq.f32.partialorder %v711_v58, 8.507059e+37  ;;  %v720_v35 = vmul.f32 %v1853_v53, %v719_v7 }
 0x17d   :  { %vm737_vm15 = vweird.f32 %v1678_v48  ;;  %v1918_v26 = vpop.eup %1135  ;;  %vm708_vm9 = vweird.f32 %v1844_v12  ;;  %v741_v36 = vand.u32 2147483647, %v1678_v48  ;;  %v749_v2 = vsub.f32 1.0, %v748_v62  ;;  %vm1951_vm4 = vmor %vm692_vm12, %vm693_vm10 }
 0x17e   :  { %1137 = vrcp.f32 %v1693_v44  ;;  %v691_v60 = vadd.f32 %v1800_v14, %v690_v49  ;;  %v706_v37 = vadd.f32 %v1844_v12, %v705_v56  ;;  %vm1925_vm7 = vcmp.eq.f32.partialorder %v726_v50, 8.507059e+37  ;;  %vm1961_vm11 = vmor %vm707_vm13, %vm708_vm9 }
 0x17f   :  { %v735_v42 = vmul.f32 %v1881_v63, %v734_v3  ;;  %v763_v46 = vmul.f32 %v1918_v26, %v1689_v18  ;;  %vm723_vm2 = vweird.f32 %v1853_v53  ;;  %v743_v32 = vand.u32 2147483648, %v1678_v48 }
 0x180   :  { %vm752_vm3 = vweird.f32 %v1680_v25  ;;  %v756_v58 = vand.u32 2147483647, %v1680_v25  ;;  %v680_v7 = vsel %vm1936_vm8, %v1769_v15, %v676_v40  ;;  %v721_v24 = vadd.f32 %v1853_v53, %v720_v35  ;;  %vm1988_vm12 = vmor %vm722_vm5, %vm723_vm2 }
 0x181   :  { %v758_v50 = vand.u32 2147483648, %v1680_v25  ;;  %v764_v49 = vsub.f32 1.0, %v763_v46  ;;  %vm738_vm1 = vweird.f32 %v1881_v63  ;;  %vm1966_vm8 = vcmp.eq.f32.partialorder %v741_v36, 8.507059e+37 }
 0x182   :  { %v750_v15 = vmul.f32 %v1892_v30, %v749_v2  ;;  %1139 = vrcp.f32 %v1695_v27  ;;  %v695_v3 = vsel %vm1951_vm4, %v1800_v14, %v691_v60  ;;  %v710_v19 = vsel %vm1961_vm11, %v1844_v12, %v706_v37 }
 0x183   :  { %v736_v62 = vadd.f32 %v1881_v63, %v735_v42  ;;  %v771_v40 = vand.u32 2147483647, %v1689_v18  ;;  %v685_v36 = vsel %vm1896_vm0, %v684_v11, %v680_v7  ;;  %v744_v14 = vor.u32 1.1754944e-38, %v743_v32  ;;  %vm2012_vm0 = vmor %vm737_vm15, %vm738_vm1 }
 0x184   :  { %v1980_v35 = vpop.eup %1137  ;;  %vm767_vm13 = vweird.f32 %v1689_v18  ;;  %v773_v12 = vand.u32 2147483648, %v1689_v18  ;;  %v725_v60 = vsel %vm1988_vm12, %v1853_v53, %v721_v24  ;;  %vm1997_vm10 = vcmp.eq.f32.partialorder %v756_v58, 8.507059e+37 }
 0x185   :  { %v759_v11 = vor.u32 1.1754944e-38, %v758_v50  ;;  %v765_v57 = vmul.f32 %v1918_v26, %v764_v49  ;;  %v778_v37 = vmul.f32 %v1980_v35, %v1693_v44  ;;  %v700_v42 = vsel %vm1908_vm14, %v699_v22, %v695_v3  ;;  %v2311_v22 = vld [vmem:[#allocation6_spill] sm:$0xff] }
 0x186   :  { %v715_v46 = vsel %vm1912_vm6, %v714_v39, %v710_v19  ;;  %v751_v0 = vadd.f32 %v1892_v30, %v750_v15  ;;  %vm753_vm5 = vweird.f32 %v1892_v30  ;;  %v740_v20 = vsel %vm2012_vm0, %v1881_v63, %v736_v62 }
 0x187   :  { %vm2021_vm14 = vcmp.eq.f32.partialorder %v771_v40, 8.507059e+37  ;;  %v779_v39 = vsub.f32 1.0, %v778_v37  ;;  %v786_v33 = vand.u32 2147483647, %v1693_v44  ;;  %v788_v48 = vand.u32 2147483648, %v1693_v44  ;;  %vm2033_vm9 = vmor %vm752_vm3, %vm753_vm5 }
 0x188   :  { %v1140_v32 = vpop.eup %1139  ;;  %v730_v58 = vsel %vm1925_vm7, %v729_v31, %v725_v60  ;;  %vm768_vm6 = vweird.f32 %v1918_v26  ;;  %v774_v7 = vor.u32 1.1754944e-38, %v773_v12  ;;  %vm782_vm15 = vweird.f32 %v1693_v44 }
 0x189   :  { %v766_v8 = vadd.f32 %v1918_v26, %v765_v57  ;;  %v780_v24 = vmul.f32 %v1980_v35, %v779_v39  ;;  %v793_v50 = vmul.f32 %v1140_v32, %v1695_v27  ;;  %v807_v31 = vmul.f32 %v1824_v43, %v1482_v6  ;;  %vm2061_vm3 = vmor %vm767_vm13, %vm768_vm6 }
 0x18a   :  { %v745_v21 = vsel %vm1966_vm8, %v744_v14, %v740_v20  ;;  %v755_v25 = vsel %vm2033_vm9, %v1892_v30, %v751_v0  ;;  %vm797_vm7 = vweird.f32 %v1695_v27  ;;  %v808_v49 = vmul.f32 %v1829_v47, %v1486_v38 }
 0x18b   :  { %vm2050_vm2 = vcmp.eq.f32.partialorder %v786_v33, 8.507059e+37  ;;  %v789_v15 = vor.u32 1.1754944e-38, %v788_v48  ;;  %v794_v3 = vsub.f32 1.0, %v793_v50  ;;  %v801_v6 = vand.u32 2147483647, %v1695_v27  ;;  %v1063_v33 = vld [vmem:[%s2218_s5 + $0x38] sm:$0xff]  }
 0x18c   :  { %v809_v43 = vmul.f32 %v1834_v54, %v1490_v10  ;;  %vm783_vm4 = vweird.f32 %v1980_v35  ;;  %v803_v38 = vand.u32 2147483648, %v1695_v27  ;;  %v810_v47 = vmul.f32 %v1858_v28, %v1494_v41 }
 0x18d   :  { %v811_v29 = vmul.f32 %v1863_v61, %v1498_v45  ;;  %v770_v10 = vsel %vm2061_vm3, %v1918_v26, %v766_v8  ;;  %v781_v18 = vadd.f32 %v1980_v35, %v780_v24  ;;  %v795_v54 = vmul.f32 %v1140_v32, %v794_v3  ;;  %vm2097_vm8 = vmor %vm782_vm15, %vm783_vm4  ;;  %v2317_v24 = vld [vmem:[#allocation9_spill] sm:$0xff]  ;;  %v2320_v3 = vld [vmem:[#allocation4_spill] sm:$0xff] }
 0x18e   :  { %v2299_v19 = vunpack.c.l.bf16 %v1556_v17  ;;  %v760_v40 = vsel %vm1997_vm10, %v759_v11, %v755_v25  ;;  %vm798_vm11 = vweird.f32 %v1140_v32  ;;  %v812_v41 = vmul.f32 %v1874_v34, %v1503_v1 }
 0x18f   :  { %v2300_v28 = vunpack.c.h.bf16 %v1556_v17  ;;  %v796_v61 = vadd.f32 %v1140_v32, %v795_v54  ;;  %vm2083_vm1 = vcmp.eq.f32.partialorder %v801_v6, 8.507059e+37  ;;  %v813_v26 = vmul.f32 %v1878_v16, %v1508_v51  ;;  %vm2109_vm12 = vmor %vm797_vm7, %vm798_vm11 }
 0x190   :  { %v823_v62 = vadd.f32 %v2299_v19, %v807_v31  ;;  %v2303_v14 = vunpack.c.l.bf16 %v1566_v52  ;;  %v775_v60 = vsel %vm2021_vm14, %v774_v7, %v770_v10  ;;  %v804_v17 = vor.u32 1.1754944e-38, %v803_v38  ;;  %v2318_v31 = vld [vmem:[#allocation3_spill] sm:$0xff]  ;;  %v2323_v10 = vld [vmem:[#allocation5_spill] sm:$0xff] }
 0x191   :  { %v824_v45 = vadd.f32 %v2300_v28, %v808_v49  ;;  %v814_v34 = vmul.f32 %v685_v36, %v1513_v4  ;;  %v2306_v55 = vunpack.c.h.bf16 %v1566_v52  ;;  %v785_v16 = vsel %vm2097_vm8, %v1980_v35, %v781_v18 }
 0x192   :  { %v825_v12 = vadd.f32 %v2303_v14, %v809_v43  ;;  %v815_v44 = vmul.f32 %v700_v42, %v1518_v23  ;;  %v2309_v57 = vunpack.c.l.bf16 %v1577_v59  ;;  %v839_v53 = vpack.c.bf16 %v823_v62, %v823_v62  ;;  %v2321_v43 = vld [vmem:[#allocation8_spill] sm:$0xff] }
 0x193   :  { %v826_v51 = vadd.f32 %v2306_v55, %v810_v47  ;;  %v800_v4 = vsel %vm2109_vm12, %v1140_v32, %v796_v61  ;;  %v816_v52 = vmul.f32 %v715_v46, %v1522_v13  ;;  %v2310_v36 = vunpack.c.h.bf16 %v1577_v59 }
 0x194   :  { %v827_v37 = vadd.f32 %v2309_v57, %v811_v29  ;;  %v840_v0 = vpack.c.bf16 %v824_v45, %v824_v45  ;;  %v817_v27 = vmul.f32 %v730_v58, %v1526_v5  ;;  %v818_v20 = vmul.f32 %v745_v21, %v1530_v9  ;;  %v2314_v9 = vld [vmem:[#allocation2_spill] sm:$0xff]  ;;  %v2315_v58 = vld [vmem:[#allocation7_spill] sm:$0xff] }
 0x195   :  { %v828_v35 = vadd.f32 %v2310_v36, %v812_v41  ;;  %v2312_v39 = vunpack.c.l.bf16 %v2311_v22  ;;  %v841_v42 = vpack.c.bf16 %v825_v12, %v825_v12  ;;  %v790_v48 = vsel %vm2050_vm2, %v789_v15, %v785_v16 }
 0x196   :  { %v2313_v13 = vunpack.c.h.bf16 %v2311_v22  ;;  %v842_v46 = vpack.c.bf16 %v826_v51, %v826_v51  ;;  %vm855_vm13 = vcmask 125952   ;;  %v805_v5 = vsel %vm2083_vm1, %v804_v17, %v800_v4 }
 0x197   :  { %v829_v23 = vadd.f32 %v2312_v39, %v813_v26  ;;  %v819_v32 = vmul.f32 %v760_v40, %v2314_v9  ;;  %v2316_v7 = vunpack.c.l.bf16 %v2315_v58  ;;  %v843_v8 = vpack.c.bf16 %v827_v37, %v827_v37  ;;  %856 = vst.msk [vmem:[%s2219_s6] sm:$0xf] %vm855_vm13, %v839_v53 }
 0x198   :  { %v830_v59 = vadd.f32 %v2313_v13, %v814_v34  ;;  %v1052_v50 = vunpack.c.h.bf16 %v2317_v24  ;;  %v820_v21 = vmul.f32 %v775_v60, %v2318_v31  ;;  %v2319_v25 = vunpack.c.h.bf16 %v2315_v58  ;;  %857 = vst.msk [vmem:[%s2219_s6 + $0x4] sm:$0xf] %vm855_vm13, %v840_v0 }
 0x199   :  { %v831_v63 = vadd.f32 %v2316_v7, %v815_v44  ;;  %v844_v56 = vpack.c.bf16 %v828_v35, %v828_v35  ;;  %v1055_v15 = vunpack.c.l.bf16 %v1063_v33  ;;  %v821_v6 = vmul.f32 %v790_v48, %v2320_v3  ;;  %858 = vst.msk [vmem:[%s2219_s6 + $0x8] sm:$0xf] %vm855_vm13, %v841_v42 }
 0x19a   :  { %v832_v49 = vadd.f32 %v2319_v25, %v816_v52  ;;  %v2322_v30 = vunpack.c.l.bf16 %v2321_v43  ;;  %v845_v47 = vpack.c.bf16 %v829_v23, %v829_v23  ;;  %v1056_v29 = vunpack.c.h.bf16 %v1063_v33  ;;  %859 = vst.msk [vmem:[%s2219_s6 + $0xc] sm:$0xf] %vm855_vm13, %v842_v46 }
 0x19b   :  { %v822_v18 = vmul.f32 %v805_v5, %v2323_v10  ;;  %v2324_v54 = vunpack.c.h.bf16 %v2321_v43  ;;  %v846_v62 = vpack.c.bf16 %v830_v59, %v830_v59  ;;  %v2325_v40 = vunpack.c.l.bf16 %v2317_v24  ;;  %860 = vst.msk [vmem:[%s2219_s6 + $0x10] sm:$0xf] %vm855_vm13, %v843_v8 }
 0x19c   :  { %v833_v38 = vadd.f32 %v2322_v30, %v817_v27  ;;  %v847_v28 = vpack.c.bf16 %v831_v63, %v831_v63  ;;  %v836_v45 = vadd.f32 %v1052_v50, %v820_v21  ;;  %v848_v61 = vpack.c.bf16 %v832_v49, %v832_v49  ;;  %861 = vst.msk [vmem:[%s2219_s6 + $0x14] sm:$0xf] %vm855_vm13, %v844_v56 }
 0x19d   :  { %v834_v19 = vadd.f32 %v2324_v54, %v818_v20  ;;  %v835_v41 = vadd.f32 %v2325_v40, %v819_v32  ;;  %v837_v2 = vadd.f32 %v1055_v15, %v821_v6  ;;  %862 = vst.msk [vmem:[%s2219_s6 + $0x18] sm:$0xf] %vm855_vm13, %v845_v47  ;;  %v838_v14 = vadd.f32 %v1056_v29, %v822_v18 }
 0x19e   :  { %v849_v26 = vpack.c.bf16 %v833_v38, %v833_v38  ;;  %863 = vst.msk [vmem:[%s2219_s6 + $0x1c] sm:$0xf] %vm855_vm13, %v846_v62  ;;  %v852_v1 = vpack.c.bf16 %v836_v45, %v836_v45 }
 0x19f   :  { %v850_v12 = vpack.c.bf16 %v834_v19, %v834_v19  ;;  %v851_v60 = vpack.c.bf16 %v835_v41, %v835_v41  ;;  %864 = vst.msk [vmem:[%s2219_s6 + $0x20] sm:$0xf] %vm855_vm13, %v847_v28  ;;  %v853_v17 = vpack.c.bf16 %v837_v2, %v837_v2  ;;  %v854_v34 = vpack.c.bf16 %v838_v14, %v838_v14 }
 0x1a0   :  { %865 = vst.msk [vmem:[%s2219_s6 + $0x24] sm:$0xf] %vm855_vm13, %v848_v61 }
 0x1a1   :  { %866 = vst.msk [vmem:[%s2219_s6 + $0x28] sm:$0xf] %vm855_vm13, %v849_v26 }
 0x1a2   :  { %867 = vst.msk [vmem:[%s2219_s6 + $0x2c] sm:$0xf] %vm855_vm13, %v850_v12 }
 0x1a3   :  { %868 = vst.msk [vmem:[%s2219_s6 + $0x30] sm:$0xf] %vm855_vm13, %v851_v60 }
 0x1a4   :  { %869 = vst.msk [vmem:[%s2219_s6 + $0x34] sm:$0xf] %vm855_vm13, %v852_v1 }
 0x1a5   :  { %870 = vst.msk [vmem:[%s2219_s6 + $0x38] sm:$0xf] %vm855_vm13, %v853_v17 }
 0x1a6   :  { %871 = vst.msk [vmem:[%s2219_s6 + $0x3c] sm:$0xf] %vm855_vm13, %v854_v34 }

// kernel: vqvae_forward.30
= control target key start
LH: loop header
LB: loop body
LE: loop exit
PB: predicated region body
PF: predicated region fallthrough
CT: control target
= control target key end

     0   :  { %vm119_vm0 = vcmask 130048   ;;  %s572_s1 = inlined_call_operand.vmem [shape: bf16[144,16], index: 1, kind: input, shape index: {}]   ;;  %s573_s0 = inlined_call_operand.vmem [shape: bf16[32,144], index: 0, kind: input, shape index: {}]   ;;  %s574_s2 = inlined_call_operand.vmem [shape: f32[1,16], index: 2, kind: input, shape index: {}]   ;;  %s575_s4 = inlined_call_operand.vmem [shape: f32[1,16], index: 4, kind: input, shape index: {}]   ;;  %s576_s3 = inlined_call_operand.vmem [shape: f32[1,16], index: 3, kind: input, shape index: {}]   ;;  %s577_s5 = inlined_call_operand.vmem [shape: bf16[32,16], index: 5, kind: output, shape index: {}]  }
   0x1   :  { %v390_v0 = vld [vmem:[%s572_s1 + $0x38] sm:$0xff]  ;;  %v391_v1 = vld [vmem:[%s572_s1 + $0x40] sm:$0xff]  ;;  %v389_v3 = vld [vmem:[%s572_s1 + $0x30] sm:$0xff] }
   0x2   :  { %v379_v2 = vld [vmem:[%s573_s0 + $0x4] sm:$0xf]  ;;  %126 = vmatpush.bf16.msra.mxu0 %v390_v0  ;;  %392 = vmatpush.bf16.msra.mxu2 %v390_v0  ;;  %v325_v4 = vld [vmem:[%s573_s0 + $0x8] sm:$0xf0]  ;;  %v386_v8 = vld [vmem:[%s572_s1 + $0x18] sm:$0xff] }
   0x3   :  { %152 = vmatpush.bf16.msra.mxu1 %v391_v1  ;;  %v328_v5 = vor.u32 %v379_v2, %v325_v4  ;;  %v388_v6 = vld [vmem:[%s572_s1 + $0x28] sm:$0xff]  ;;  %v387_v7 = vld [vmem:[%s572_s1 + $0x20] sm:$0xff]  ;;  %v381_v9 = vld [vmem:[%s573_s0 + $0x14] sm:$0xf] }
   0x4   :  { %v333_v10 = vld [vmem:[%s573_s0 + $0x18] sm:$0xf0]  ;;  %v385_v11 = vld [vmem:[%s572_s1 + $0x10] sm:$0xff]  ;;  %v384_v13 = vld [vmem:[%s572_s1 + $0x8] sm:$0xff] }
   0x5   :  { %v336_v12 = vor.u32 %v381_v9, %v333_v10  ;;  %v383_v14 = vld [vmem:[%s572_s1] sm:$0xff]  ;;  %v380_v16 = vld [vmem:[%s573_s0 + $0x4] sm:$0xf0]  ;;  %v331_v17 = vld [vmem:[%s573_s0 + $0x10] sm:$0xf] }
   0x6   :  { %127 = vmatpush.bf16.msra.mxu0 %v389_v3  ;;  %393 = vmatpush.bf16.msra.mxu2 %v389_v3  ;;  %v323_v15 = vld [vmem:[%s573_s0] sm:$0xf]  ;;  %v382_v18 = vld [vmem:[%s573_s0 + $0x14] sm:$0xf0] }
   0x7   :  { %373 = vmatmul.msk.bf16.vlgmr.msra.gmra.mxu1 %vm119_vm0, %v328_v5  ;;  %v324_v19 = vor.u32 %v380_v16, %v323_v15  ;;  %v332_v20 = vor.u32 %v382_v18, %v331_v17  ;;  %v400_v24 = vld [vmem:[%s574_s2] ss:$0 sm:$0xff] }
   0x8   :  { %v200_v16 = vld [vmem:[%s576_s3] sm:$0x1] }
   0xa   :  { %128 = vmatpush.bf16.msra.mxu0 %v388_v6  ;;  %394 = vmatpush.bf16.msra.mxu2 %v388_v6 }
   0xe   :  { %129 = vmatpush.bf16.msra.mxu0 %v387_v7  ;;  %395 = vmatpush.bf16.msra.mxu2 %v387_v7 }
  0x12   :  { %130 = vmatpush.bf16.msra.mxu0 %v386_v8  ;;  %396 = vmatpush.bf16.msra.mxu2 %v386_v8 }
  0x16   :  { %131 = vmatpush.bf16.msra.mxu0 %v385_v11  ;;  %397 = vmatpush.bf16.msra.mxu2 %v385_v11 }
  0x17   :  { %374 = vmatmul.msk.bf16.gmra.mxu1 %vm119_vm0, %v336_v12 }
  0x1a   :  { %132 = vmatpush.bf16.msra.mxu0 %v384_v13  ;;  %398 = vmatpush.bf16.msra.mxu2 %v384_v13 }
  0x1e   :  { %133 = vmatpush.bf16.msra.mxu0 %v383_v14  ;;  %399 = vmatpush.bf16.msra.mxu2 %v383_v14 }
  0x21   :  { %134 = vmatmul.bf16.vlgmr.msra.gmra.mxu0 %v324_v19  ;;  %139 = vmatmul.bf16.vlgmr.msra.gmra.mxu2 %v332_v20 }
  0x84   :  { %v154_v21 = vpop.f32.mrf.mxu1 }
  0x8c   :  { %v156_v22 = vpop.f32.mrf.mxu1 }
  0x94   :  { %v159_v26 = vpop.f32.mrf.mxu1 }
  0x9c   :  { %v161_v39 = vpop.f32.mrf.mxu1 }
  0x9e   :  { %v135_v23 = vpop.f32.mrf.mxu0 }
  0x9f   :  { %v136_v25 = vadd.f32 %v400_v24, %v135_v23 }
  0xa1   :  { %v155_v29 = vadd.f32 %v154_v21, %v136_v25  ;;  %v401_v21 = vld [vmem:[%s575_s4] ss:$0 sm:$0xff] }
  0xa3   :  { %v164_v33 = vsel %vm119_vm0, %v155_v29, 0.0 }
  0xa4   :  { %v140_v27 = vpop.f32.mrf.mxu2 }
  0xa5   :  { %v141_v30 = vadd.f32 %v400_v24, %v140_v27 }
  0xa6   :  { %v137_v28 = vpop.f32.mrf.mxu0 }
  0xa7   :  { %v138_v31 = vadd.f32 %v400_v24, %v137_v28  ;;  %v160_v34 = vadd.f32 %v159_v26, %v141_v30 }
  0xa9   :  { %v157_v32 = vadd.f32 %v156_v22, %v138_v31  ;;  %v167_v40 = vsel %vm119_vm0, %v160_v34, 0.0 }
  0xab   :  { %v165_v35 = vsel %vm119_vm0, %v157_v32, 0.0 }
  0xac   :  { %v166_v36 = vadd.f32 %v165_v35, %v164_v33  ;;  %v142_v37 = vpop.f32.mrf.mxu2 }
  0xad   :  { %v143_v38 = vadd.f32 %v400_v24, %v142_v37 }
  0xae   :  { %v168_v42 = vadd.f32 %v167_v40, %v166_v36 }
  0xaf   :  { %v162_v41 = vadd.f32 %v161_v39, %v143_v38 }
  0xb1   :  { %v169_v43 = vsel %vm119_vm0, %v162_v41, 0.0 }
  0xb2   :  { %v170_v44 = vadd.f32 %v169_v43, %v168_v42 }
  0xb4   :  { %v171_v45 = vrot.slane %v170_v44, 4 }
  0xb6   :  { %v172_v46 = vadd.f32 %v171_v45, %v170_v44 }
  0xb8   :  { %v173_v47 = vrot.slane %v172_v46, 2 }
  0xba   :  { %v174_v48 = vadd.f32 %v173_v47, %v172_v46 }
  0xbc   :  { %v175_v49 = vrot.slane %v174_v48, 1 }
  0xbe   :  { %v176_v50 = vadd.f32 %v175_v49, %v174_v48 }
  0xc0   :  { %v177_v51 = vmul.f32 0.03125, %v176_v50 }
  0xc2   :  { %v178_v52 = vsub.f32 %v155_v29, %v177_v51  ;;  %v179_v53 = vsub.f32 %v157_v32, %v177_v51  ;;  %v180_v54 = vsub.f32 %v160_v34, %v177_v51  ;;  %v181_v55 = vsub.f32 %v162_v41, %v177_v51 }
  0xc4   :  { %v182_v56 = vmul.f32 %v178_v52, %v178_v52  ;;  %v183_v57 = vmul.f32 %v179_v53, %v179_v53  ;;  %v184_v58 = vmul.f32 %v180_v54, %v180_v54  ;;  %v185_v59 = vmul.f32 %v181_v55, %v181_v55 }
  0xc6   :  { %v186_v60 = vsel %vm119_vm0, %v182_v56, 0.0  ;;  %v187_v61 = vsel %vm119_vm0, %v183_v57, 0.0  ;;  %v189_v63 = vsel %vm119_vm0, %v184_v58, 0.0  ;;  %v191_v1 = vsel %vm119_vm0, %v185_v59, 0.0 }
  0xc7   :  { %v188_v62 = vadd.f32 %v187_v61, %v186_v60 }
  0xc9   :  { %v190_v0 = vadd.f32 %v189_v63, %v188_v62 }
  0xcb   :  { %v192_v2 = vadd.f32 %v191_v1, %v190_v0 }
  0xcd   :  { %v193_v3 = vrot.slane %v192_v2, 4 }
  0xcf   :  { %v194_v4 = vadd.f32 %v193_v3, %v192_v2 }
  0xd1   :  { %v195_v5 = vrot.slane %v194_v4, 2 }
  0xd3   :  { %v196_v6 = vadd.f32 %v195_v5, %v194_v4 }
  0xd5   :  { %v197_v7 = vrot.slane %v196_v6, 1 }
  0xd7   :  { %v198_v8 = vadd.f32 %v197_v7, %v196_v6 }
  0xd9   :  { %v199_v9 = vmul.f32 0.03125, %v198_v8 }
  0xdb   :  { %v201_v10 = vadd.f32 1e-05, %v199_v9 }
  0xdd   :  { %402 = vrsqrt.f32 %v201_v10  ;;  %vm208_vm2 = vweird.f32 %v201_v10 }
  0xe3   :  { %v403_v11 = vpop.eup %402 }
  0xe4   :  { %v203_v12 = vmul.f32 %v403_v11, %v201_v10  ;;  %vm209_vm1 = vweird.f32 %v403_v11 }
  0xe5   :  { %vm210_vm3 = vmor %vm208_vm2, %vm209_vm1 }
  0xe6   :  { %v204_v13 = vmul.f32 %v403_v11, %v203_v12 }
  0xe8   :  { %v205_v14 = vmul.f32 0.5, %v204_v13 }
  0xea   :  { %v206_v15 = vsub.f32 1.5, %v205_v14 }
  0xec   :  { %v207_v17 = vmul.f32 %v403_v11, %v206_v15 }
  0xee   :  { %v211_v18 = vsel %vm210_vm3, %v403_v11, %v207_v17  ;;  %vm312_vm3 = vcmask 125952  }
  0xef   :  { %v212_v19 = vmul.f32 %v211_v18, %v200_v16 }
  0xf1   :  { %v214_v20 = vperm.slane %v212_v19, 0 }
  0xf3   :  { %v216_v22 = vmul.f32 %v214_v20, %v178_v52  ;;  %v217_v23 = vmul.f32 %v214_v20, %v179_v53  ;;  %v218_v24 = vmul.f32 %v214_v20, %v180_v54  ;;  %v219_v25 = vmul.f32 %v214_v20, %v181_v55 }
  0xf5   :  { %v520_v26 = vadd.f32 %v401_v21, %v216_v22  ;;  %v522_v27 = vadd.f32 %v401_v21, %v217_v23  ;;  %v524_v28 = vadd.f32 %v401_v21, %v218_v24  ;;  %v526_v29 = vadd.f32 %v401_v21, %v219_v25 }
  0xf7   :  { %v375_v30 = vmul.f32 -1.442695, %v520_v26  ;;  %v376_v31 = vmul.f32 -1.442695, %v522_v27  ;;  %v377_v32 = vmul.f32 -1.442695, %v524_v28 }
  0xf8   :  { %v378_v33 = vmul.f32 -1.442695, %v526_v29 }
  0xf9   :  { %404 = vpow2.f32 %v375_v30 }
  0xfa   :  { %406 = vpow2.f32 %v376_v31 }
  0xfb   :  { %408 = vpow2.f32 %v377_v32 }
  0xfc   :  { %410 = vpow2.f32 %v378_v33 }
  0xff   :  { %v405_v34 = vpop.eup %404 }
 0x100   :  { %v407_v35 = vpop.eup %406  ;;  %v240_v36 = vadd.f32 1.0, %v405_v34 }
 0x101   :  { %v409_v37 = vpop.eup %408  ;;  %v241_v38 = vadd.f32 1.0, %v407_v35 }
 0x102   :  { %v411_v39 = vpop.eup %410  ;;  %v242_v40 = vadd.f32 1.0, %v409_v37  ;;  %412 = vrcp.f32 %v240_v36  ;;  %v253_v42 = vand.u32 2147483647, %v240_v36  ;;  %v255_v43 = vand.u32 2147483648, %v240_v36 }
 0x103   :  { %v532_v41 = vadd.f32 1.0, %v411_v39  ;;  %414 = vrcp.f32 %v241_v38  ;;  %vm249_vm4 = vweird.f32 %v240_v36  ;;  %vm264_vm5 = vweird.f32 %v241_v38 }
 0x104   :  { %416 = vrcp.f32 %v242_v40  ;;  %v268_v49 = vand.u32 2147483647, %v241_v38  ;;  %v270_v50 = vand.u32 2147483648, %v241_v38  ;;  %vm535_vm6 = vcmp.eq.f32.partialorder %v253_v42, 8.507059e+37 }
 0x105   :  { %418 = vrcp.f32 %v532_v41  ;;  %v256_v53 = vor.u32 1.1754944e-38, %v255_v43  ;;  %vm279_vm7 = vweird.f32 %v242_v40  ;;  %v283_v57 = vand.u32 2147483647, %v242_v40 }
 0x106   :  { %v285_v58 = vand.u32 2147483648, %v242_v40  ;;  %vm540_vm10 = vcmp.eq.f32.partialorder %v268_v49, 8.507059e+37  ;;  %v271_v0 = vor.u32 1.1754944e-38, %v270_v50  ;;  %vm294_vm13 = vweird.f32 %v532_v41 }
 0x107   :  { %v298_v5 = vand.u32 2147483647, %v532_v41  ;;  %v300_v6 = vand.u32 2147483648, %v532_v41  ;;  %vm284_vm1 = vcmp.eq.f32.partialorder %v283_v57, 8.507059e+37 }
 0x108   :  { %v413_v44 = vpop.eup %412  ;;  %v286_v12 = vor.u32 1.1754944e-38, %v285_v58 }
 0x109   :  { %v415_v45 = vpop.eup %414  ;;  %v245_v46 = vmul.f32 %v413_v44, %v240_v36  ;;  %vm250_vm8 = vweird.f32 %v413_v44  ;;  %v301_v18 = vor.u32 1.1754944e-38, %v300_v6 }
 0x10a   :  { %v417_v47 = vpop.eup %416  ;;  %v260_v48 = vmul.f32 %v415_v45, %v241_v38  ;;  %vm265_vm9 = vweird.f32 %v415_v45  ;;  %vm251_vm12 = vmor %vm249_vm4, %vm250_vm8  ;;  %vm299_vm4 = vcmp.eq.f32.partialorder %v298_v5, 8.507059e+37 }
 0x10b   :  { %v246_v51 = vsub.f32 1.0, %v245_v46  ;;  %v275_v54 = vmul.f32 %v417_v47, %v242_v40  ;;  %v419_v55 = vpop.eup %418  ;;  %vm280_vm11 = vweird.f32 %v417_v47  ;;  %vm266_vm14 = vmor %vm264_vm5, %vm265_vm9 }
 0x10c   :  { %v261_v56 = vsub.f32 1.0, %v260_v48  ;;  %v290_v61 = vmul.f32 %v419_v55, %v532_v41  ;;  %vm295_vm15 = vweird.f32 %v419_v55  ;;  %vm281_vm0 = vmor %vm279_vm7, %vm280_vm11 }
 0x10d   :  { %v247_v59 = vmul.f32 %v413_v44, %v246_v51  ;;  %v276_v60 = vsub.f32 1.0, %v275_v54  ;;  %vm296_vm2 = vmor %vm294_vm13, %vm295_vm15 }
 0x10e   :  { %v262_v62 = vmul.f32 %v415_v45, %v261_v56  ;;  %v291_v3 = vsub.f32 1.0, %v290_v61 }
 0x10f   :  { %v248_v1 = vadd.f32 %v413_v44, %v247_v59  ;;  %v277_v2 = vmul.f32 %v417_v47, %v276_v60 }
 0x110   :  { %v263_v4 = vadd.f32 %v415_v45, %v262_v62  ;;  %v292_v9 = vmul.f32 %v419_v55, %v291_v3 }
 0x111   :  { %v252_v7 = vsel %vm251_vm12, %v413_v44, %v248_v1  ;;  %v278_v8 = vadd.f32 %v417_v47, %v277_v2 }
 0x112   :  { %v257_v10 = vsel %vm535_vm6, %v256_v53, %v252_v7  ;;  %v267_v11 = vsel %vm266_vm14, %v415_v45, %v263_v4  ;;  %v293_v15 = vadd.f32 %v419_v55, %v292_v9 }
 0x113   :  { %v272_v13 = vsel %vm540_vm10, %v271_v0, %v267_v11  ;;  %v282_v14 = vsel %vm281_vm0, %v417_v47, %v278_v8  ;;  %v304_v16 = vmul.f32 %v257_v10, %v520_v26 }
 0x114   :  { %v287_v17 = vsel %vm284_vm1, %v286_v12, %v282_v14  ;;  %v305_v19 = vmul.f32 %v272_v13, %v522_v27  ;;  %v297_v20 = vsel %vm296_vm2, %v419_v55, %v293_v15 }
 0x115   :  { %v306_v21 = vmul.f32 %v287_v17, %v524_v28  ;;  %v308_v22 = vpack.c.bf16 %v304_v16, %v304_v16  ;;  %v302_v23 = vsel %vm299_vm4, %v301_v18, %v297_v20 }
 0x116   :  { %v309_v24 = vpack.c.bf16 %v305_v19, %v305_v19  ;;  %v307_v25 = vmul.f32 %v302_v23, %v526_v29 }
 0x117   :  { %v310_v30 = vpack.c.bf16 %v306_v21, %v306_v21  ;;  %313 = vst.msk [vmem:[%s577_s5] sm:$0xf] %vm312_vm3, %v308_v22 }
 0x118   :  { %314 = vst.msk [vmem:[%s577_s5 + $0x4] sm:$0xf] %vm312_vm3, %v309_v24  ;;  %v311_v26 = vpack.c.bf16 %v307_v25, %v307_v25 }
 0x119   :  { %315 = vst.msk [vmem:[%s577_s5 + $0x8] sm:$0xf] %vm312_vm3, %v310_v30 }
 0x11a   :  { %316 = vst.msk [vmem:[%s577_s5 + $0xc] sm:$0xf] %vm312_vm3, %v311_v26 }

// kernel: vqvae_forward.31
= control target key start
LH: loop header
LB: loop body
LE: loop exit
PB: predicated region body
PF: predicated region fallthrough
CT: control target
= control target key end

     0   :  { %vm122_vm0 = vcmask 130048   ;;  %s615_s1 = inlined_call_operand.vmem [shape: bf16[144,16], index: 1, kind: input, shape index: {}]   ;;  %s616_s0 = inlined_call_operand.vmem [shape: bf16[32,144], index: 0, kind: input, shape index: {}]   ;;  %s617_s2 = inlined_call_operand.vmem [shape: f32[1,16], index: 2, kind: input, shape index: {}]   ;;  %s618_s4 = inlined_call_operand.vmem [shape: f32[1,16], index: 4, kind: input, shape index: {}]   ;;  %s619_s3 = inlined_call_operand.vmem [shape: f32[1,16], index: 3, kind: input, shape index: {}]   ;;  %s620_s5 = inlined_call_operand.vmem [shape: bf16[32,16], index: 5, kind: input, shape index: {}]   ;;  %s621_s6 = inlined_call_operand.vmem [shape: bf16[32,16], index: 6, kind: output, shape index: {}]  }
   0x1   :  { %v405_v0 = vld [vmem:[%s615_s1 + $0x38] sm:$0xff]  ;;  %v406_v1 = vld [vmem:[%s615_s1 + $0x40] sm:$0xff]  ;;  %v404_v3 = vld [vmem:[%s615_s1 + $0x30] sm:$0xff] }
   0x2   :  { %v394_v2 = vld [vmem:[%s616_s0 + $0x4] sm:$0xf]  ;;  %129 = vmatpush.bf16.msra.mxu0 %v405_v0  ;;  %416 = vmatpush.bf16.msra.mxu2 %v405_v0  ;;  %v340_v4 = vld [vmem:[%s616_s0 + $0x8] sm:$0xf0]  ;;  %v401_v8 = vld [vmem:[%s615_s1 + $0x18] sm:$0xff] }
   0x3   :  { %155 = vmatpush.bf16.msra.mxu1 %v406_v1  ;;  %v343_v5 = vor.u32 %v394_v2, %v340_v4  ;;  %v403_v6 = vld [vmem:[%s615_s1 + $0x28] sm:$0xff]  ;;  %v402_v7 = vld [vmem:[%s615_s1 + $0x20] sm:$0xff]  ;;  %v396_v9 = vld [vmem:[%s616_s0 + $0x14] sm:$0xf] }
   0x4   :  { %v348_v10 = vld [vmem:[%s616_s0 + $0x18] sm:$0xf0]  ;;  %v400_v11 = vld [vmem:[%s615_s1 + $0x10] sm:$0xff]  ;;  %v399_v13 = vld [vmem:[%s615_s1 + $0x8] sm:$0xff] }
   0x5   :  { %v351_v12 = vor.u32 %v396_v9, %v348_v10  ;;  %v398_v14 = vld [vmem:[%s615_s1] sm:$0xff]  ;;  %v395_v16 = vld [vmem:[%s616_s0 + $0x4] sm:$0xf0]  ;;  %v346_v17 = vld [vmem:[%s616_s0 + $0x10] sm:$0xf] }
   0x6   :  { %130 = vmatpush.bf16.msra.mxu0 %v404_v3  ;;  %417 = vmatpush.bf16.msra.mxu2 %v404_v3  ;;  %v338_v15 = vld [vmem:[%s616_s0] sm:$0xf]  ;;  %v397_v18 = vld [vmem:[%s616_s0 + $0x14] sm:$0xf0] }
   0x7   :  { %388 = vmatmul.msk.bf16.vlgmr.msra.gmra.mxu1 %vm122_vm0, %v343_v5  ;;  %v339_v19 = vor.u32 %v395_v16, %v338_v15  ;;  %v347_v20 = vor.u32 %v397_v18, %v346_v17  ;;  %v424_v24 = vld [vmem:[%s617_s2] ss:$0 sm:$0xff] }
   0x8   :  { %v203_v16 = vld [vmem:[%s619_s3] sm:$0x1] }
   0xa   :  { %131 = vmatpush.bf16.msra.mxu0 %v403_v6  ;;  %418 = vmatpush.bf16.msra.mxu2 %v403_v6 }
   0xe   :  { %132 = vmatpush.bf16.msra.mxu0 %v402_v7  ;;  %419 = vmatpush.bf16.msra.mxu2 %v402_v7 }
  0x12   :  { %133 = vmatpush.bf16.msra.mxu0 %v401_v8  ;;  %420 = vmatpush.bf16.msra.mxu2 %v401_v8 }
  0x16   :  { %134 = vmatpush.bf16.msra.mxu0 %v400_v11  ;;  %421 = vmatpush.bf16.msra.mxu2 %v400_v11 }
  0x17   :  { %389 = vmatmul.msk.bf16.gmra.mxu1 %vm122_vm0, %v351_v12 }
  0x1a   :  { %135 = vmatpush.bf16.msra.mxu0 %v399_v13  ;;  %422 = vmatpush.bf16.msra.mxu2 %v399_v13 }
  0x1e   :  { %136 = vmatpush.bf16.msra.mxu0 %v398_v14  ;;  %423 = vmatpush.bf16.msra.mxu2 %v398_v14 }
  0x21   :  { %137 = vmatmul.bf16.vlgmr.msra.gmra.mxu0 %v339_v19  ;;  %142 = vmatmul.bf16.vlgmr.msra.gmra.mxu2 %v347_v20 }
  0x84   :  { %v157_v21 = vpop.f32.mrf.mxu1 }
  0x8c   :  { %v159_v22 = vpop.f32.mrf.mxu1 }
  0x94   :  { %v162_v26 = vpop.f32.mrf.mxu1 }
  0x9c   :  { %v164_v39 = vpop.f32.mrf.mxu1 }
  0x9e   :  { %v138_v23 = vpop.f32.mrf.mxu0 }
  0x9f   :  { %v139_v25 = vadd.f32 %v424_v24, %v138_v23 }
  0xa1   :  { %v158_v29 = vadd.f32 %v157_v21, %v139_v25  ;;  %v425_v21 = vld [vmem:[%s618_s4] ss:$0 sm:$0xff] }
  0xa3   :  { %v167_v33 = vsel %vm122_vm0, %v158_v29, 0.0 }
  0xa4   :  { %v143_v27 = vpop.f32.mrf.mxu2 }
  0xa5   :  { %v144_v30 = vadd.f32 %v424_v24, %v143_v27 }
  0xa6   :  { %v140_v28 = vpop.f32.mrf.mxu0 }
  0xa7   :  { %v141_v31 = vadd.f32 %v424_v24, %v140_v28  ;;  %v163_v34 = vadd.f32 %v162_v26, %v144_v30 }
  0xa9   :  { %v160_v32 = vadd.f32 %v159_v22, %v141_v31  ;;  %v170_v40 = vsel %vm122_vm0, %v163_v34, 0.0 }
  0xab   :  { %v168_v35 = vsel %vm122_vm0, %v160_v32, 0.0 }
  0xac   :  { %v169_v36 = vadd.f32 %v168_v35, %v167_v33  ;;  %v145_v37 = vpop.f32.mrf.mxu2 }
  0xad   :  { %v146_v38 = vadd.f32 %v424_v24, %v145_v37 }
  0xae   :  { %v171_v42 = vadd.f32 %v170_v40, %v169_v36 }
  0xaf   :  { %v165_v41 = vadd.f32 %v164_v39, %v146_v38 }
  0xb1   :  { %v172_v43 = vsel %vm122_vm0, %v165_v41, 0.0 }
  0xb2   :  { %v173_v44 = vadd.f32 %v172_v43, %v171_v42  ;;  %v566_v42 = vld [vmem:[%s620_s5] sm:$0xff]   ;;  %v571_v43 = vld [vmem:[%s620_s5 + $0x8] sm:$0xff]  }
  0xb4   :  { %v174_v45 = vrot.slane %v173_v44, 4 }
  0xb6   :  { %v175_v46 = vadd.f32 %v174_v45, %v173_v44 }
  0xb8   :  { %v176_v47 = vrot.slane %v175_v46, 2 }
  0xba   :  { %v177_v48 = vadd.f32 %v176_v47, %v175_v46  ;;  %v409_v47 = vunpack.c.l.bf16 %v566_v42 }
  0xbc   :  { %v178_v49 = vrot.slane %v177_v48, 1 }
  0xbe   :  { %v179_v50 = vadd.f32 %v178_v49, %v177_v48  ;;  %v410_v49 = vunpack.c.h.bf16 %v566_v42 }
  0xc0   :  { %v180_v51 = vmul.f32 0.03125, %v179_v50  ;;  %v413_v50 = vunpack.c.l.bf16 %v571_v43 }
  0xc2   :  { %v181_v52 = vsub.f32 %v158_v29, %v180_v51  ;;  %v182_v53 = vsub.f32 %v160_v32, %v180_v51  ;;  %v183_v54 = vsub.f32 %v163_v34, %v180_v51  ;;  %v184_v55 = vsub.f32 %v165_v41, %v180_v51 }
  0xc4   :  { %v185_v56 = vmul.f32 %v181_v52, %v181_v52  ;;  %v186_v57 = vmul.f32 %v182_v53, %v182_v53  ;;  %v187_v58 = vmul.f32 %v183_v54, %v183_v54  ;;  %v188_v59 = vmul.f32 %v184_v55, %v184_v55 }
  0xc6   :  { %v189_v60 = vsel %vm122_vm0, %v185_v56, 0.0  ;;  %v190_v61 = vsel %vm122_vm0, %v186_v57, 0.0  ;;  %v192_v63 = vsel %vm122_vm0, %v187_v58, 0.0  ;;  %v194_v1 = vsel %vm122_vm0, %v188_v59, 0.0 }
  0xc7   :  { %v191_v62 = vadd.f32 %v190_v61, %v189_v60 }
  0xc9   :  { %v193_v0 = vadd.f32 %v192_v63, %v191_v62 }
  0xcb   :  { %v195_v2 = vadd.f32 %v194_v1, %v193_v0 }
  0xcd   :  { %v196_v3 = vrot.slane %v195_v2, 4 }
  0xcf   :  { %v197_v4 = vadd.f32 %v196_v3, %v195_v2 }
  0xd1   :  { %v198_v5 = vrot.slane %v197_v4, 2 }
  0xd3   :  { %v199_v6 = vadd.f32 %v198_v5, %v197_v4 }
  0xd5   :  { %v200_v7 = vrot.slane %v199_v6, 1 }
  0xd7   :  { %v201_v8 = vadd.f32 %v200_v7, %v199_v6 }
  0xd9   :  { %v202_v9 = vmul.f32 0.03125, %v201_v8 }
  0xdb   :  { %v204_v10 = vadd.f32 1e-05, %v202_v9 }
  0xdd   :  { %426 = vrsqrt.f32 %v204_v10  ;;  %vm211_vm2 = vweird.f32 %v204_v10 }
  0xe3   :  { %v427_v11 = vpop.eup %426 }
  0xe4   :  { %v206_v12 = vmul.f32 %v427_v11, %v204_v10  ;;  %vm212_vm1 = vweird.f32 %v427_v11 }
  0xe5   :  { %vm213_vm3 = vmor %vm211_vm2, %vm212_vm1 }
  0xe6   :  { %v207_v13 = vmul.f32 %v427_v11, %v206_v12 }
  0xe8   :  { %v208_v14 = vmul.f32 0.5, %v207_v13 }
  0xea   :  { %v209_v15 = vsub.f32 1.5, %v208_v14 }
  0xec   :  { %v210_v17 = vmul.f32 %v427_v11, %v209_v15 }
  0xee   :  { %v214_v18 = vsel %vm213_vm3, %v427_v11, %v210_v17 }
  0xef   :  { %v215_v19 = vmul.f32 %v214_v18, %v203_v16 }
  0xf1   :  { %v217_v20 = vperm.slane %v215_v19, 0 }
  0xf3   :  { %v219_v22 = vmul.f32 %v217_v20, %v181_v52  ;;  %v220_v23 = vmul.f32 %v217_v20, %v182_v53  ;;  %v221_v24 = vmul.f32 %v217_v20, %v183_v54  ;;  %v222_v25 = vmul.f32 %v217_v20, %v184_v55 }
  0xf5   :  { %v549_v26 = vadd.f32 %v425_v21, %v219_v22  ;;  %v551_v27 = vadd.f32 %v425_v21, %v220_v23  ;;  %v553_v28 = vadd.f32 %v425_v21, %v221_v24  ;;  %v555_v29 = vadd.f32 %v425_v21, %v222_v25 }
  0xf6   :  { %v414_v22 = vunpack.c.h.bf16 %v571_v43 }
  0xf7   :  { %v390_v30 = vmul.f32 -1.442695, %v549_v26  ;;  %v391_v31 = vmul.f32 -1.442695, %v551_v27  ;;  %v392_v32 = vmul.f32 -1.442695, %v553_v28 }
  0xf8   :  { %v393_v33 = vmul.f32 -1.442695, %v555_v29 }
  0xf9   :  { %428 = vpow2.f32 %v390_v30 }
  0xfa   :  { %430 = vpow2.f32 %v391_v31 }
  0xfb   :  { %432 = vpow2.f32 %v392_v32 }
  0xfc   :  { %434 = vpow2.f32 %v393_v33 }
  0xff   :  { %v429_v34 = vpop.eup %428 }
 0x100   :  { %v431_v35 = vpop.eup %430  ;;  %v251_v36 = vadd.f32 1.0, %v429_v34 }
 0x101   :  { %v433_v37 = vpop.eup %432  ;;  %v252_v38 = vadd.f32 1.0, %v431_v35 }
 0x102   :  { %v435_v39 = vpop.eup %434  ;;  %v253_v40 = vadd.f32 1.0, %v433_v37  ;;  %436 = vrcp.f32 %v251_v36  ;;  %v264_v44 = vand.u32 2147483647, %v251_v36  ;;  %v266_v45 = vand.u32 2147483648, %v251_v36 }
 0x103   :  { %v561_v41 = vadd.f32 1.0, %v435_v39  ;;  %438 = vrcp.f32 %v252_v38  ;;  %vm260_vm4 = vweird.f32 %v251_v36  ;;  %vm275_vm5 = vweird.f32 %v252_v38 }
 0x104   :  { %440 = vrcp.f32 %v253_v40  ;;  %v279_v54 = vand.u32 2147483647, %v252_v38  ;;  %v281_v55 = vand.u32 2147483648, %v252_v38  ;;  %vm577_vm6 = vcmp.eq.f32.partialorder %v264_v44, 8.507059e+37 }
 0x105   :  { %442 = vrcp.f32 %v561_v41  ;;  %v267_v58 = vor.u32 1.1754944e-38, %v266_v45  ;;  %vm290_vm7 = vweird.f32 %v253_v40  ;;  %v294_v62 = vand.u32 2147483647, %v253_v40 }
 0x106   :  { %v296_v63 = vand.u32 2147483648, %v253_v40  ;;  %vm582_vm10 = vcmp.eq.f32.partialorder %v279_v54, 8.507059e+37  ;;  %v282_v5 = vor.u32 1.1754944e-38, %v281_v55  ;;  %vm305_vm13 = vweird.f32 %v561_v41 }
 0x107   :  { %v309_v10 = vand.u32 2147483647, %v561_v41  ;;  %v311_v11 = vand.u32 2147483648, %v561_v41  ;;  %vm295_vm1 = vcmp.eq.f32.partialorder %v294_v62, 8.507059e+37 }
 0x108   :  { %v437_v46 = vpop.eup %436  ;;  %v297_v17 = vor.u32 1.1754944e-38, %v296_v63 }
 0x109   :  { %v439_v48 = vpop.eup %438  ;;  %v256_v51 = vmul.f32 %v437_v46, %v251_v36  ;;  %vm261_vm8 = vweird.f32 %v437_v46  ;;  %v312_v24 = vor.u32 1.1754944e-38, %v311_v11  ;;  %vm310_vm3 = vcmp.eq.f32.partialorder %v309_v10, 8.507059e+37 }
 0x10a   :  { %v441_v52 = vpop.eup %440  ;;  %v271_v53 = vmul.f32 %v439_v48, %v252_v38  ;;  %vm276_vm9 = vweird.f32 %v439_v48  ;;  %vm262_vm12 = vmor %vm260_vm4, %vm261_vm8  ;;  %vm327_vm4 = vcmask 125952  }
 0x10b   :  { %v257_v56 = vsub.f32 1.0, %v256_v51  ;;  %v286_v59 = vmul.f32 %v441_v52, %v253_v40  ;;  %v443_v60 = vpop.eup %442  ;;  %vm291_vm11 = vweird.f32 %v441_v52  ;;  %vm277_vm14 = vmor %vm275_vm5, %vm276_vm9 }
 0x10c   :  { %v272_v61 = vsub.f32 1.0, %v271_v53  ;;  %v301_v2 = vmul.f32 %v443_v60, %v561_v41  ;;  %vm306_vm15 = vweird.f32 %v443_v60  ;;  %vm292_vm0 = vmor %vm290_vm7, %vm291_vm11 }
 0x10d   :  { %v258_v0 = vmul.f32 %v437_v46, %v257_v56  ;;  %v287_v1 = vsub.f32 1.0, %v286_v59  ;;  %vm307_vm2 = vmor %vm305_vm13, %vm306_vm15 }
 0x10e   :  { %v273_v3 = vmul.f32 %v439_v48, %v272_v61  ;;  %v302_v8 = vsub.f32 1.0, %v301_v2 }
 0x10f   :  { %v259_v6 = vadd.f32 %v437_v46, %v258_v0  ;;  %v288_v7 = vmul.f32 %v441_v52, %v287_v1 }
 0x110   :  { %v274_v9 = vadd.f32 %v439_v48, %v273_v3  ;;  %v303_v14 = vmul.f32 %v443_v60, %v302_v8 }
 0x111   :  { %v263_v12 = vsel %vm262_vm12, %v437_v46, %v259_v6  ;;  %v289_v13 = vadd.f32 %v441_v52, %v288_v7 }
 0x112   :  { %v268_v15 = vsel %vm577_vm6, %v267_v58, %v263_v12  ;;  %v278_v16 = vsel %vm277_vm14, %v439_v48, %v274_v9  ;;  %v304_v20 = vadd.f32 %v443_v60, %v303_v14 }
 0x113   :  { %v283_v18 = vsel %vm582_vm10, %v282_v5, %v278_v16  ;;  %v293_v19 = vsel %vm292_vm0, %v441_v52, %v289_v13  ;;  %v315_v21 = vmul.f32 %v268_v15, %v549_v26 }
 0x114   :  { %v298_v23 = vsel %vm295_vm1, %v297_v17, %v293_v19  ;;  %v316_v25 = vmul.f32 %v283_v18, %v551_v27  ;;  %v308_v30 = vsel %vm307_vm2, %v443_v60, %v304_v20 }
 0x115   :  { %v317_v31 = vmul.f32 %v298_v23, %v553_v28  ;;  %v319_v32 = vadd.f32 %v409_v47, %v315_v21  ;;  %v313_v33 = vsel %vm310_vm3, %v312_v24, %v308_v30 }
 0x116   :  { %v320_v34 = vadd.f32 %v410_v49, %v316_v25  ;;  %v318_v35 = vmul.f32 %v313_v33, %v555_v29 }
 0x117   :  { %v321_v26 = vadd.f32 %v413_v50, %v317_v31  ;;  %v323_v36 = vpack.c.bf16 %v319_v32, %v319_v32 }
 0x118   :  { %v324_v37 = vpack.c.bf16 %v320_v34, %v320_v34  ;;  %v322_v38 = vadd.f32 %v414_v22, %v318_v35 }
 0x119   :  { %v325_v39 = vpack.c.bf16 %v321_v26, %v321_v26  ;;  %328 = vst.msk [vmem:[%s621_s6] sm:$0xf] %vm327_vm4, %v323_v36 }
 0x11a   :  { %329 = vst.msk [vmem:[%s621_s6 + $0x4] sm:$0xf] %vm327_vm4, %v324_v37  ;;  %v326_v27 = vpack.c.bf16 %v322_v38, %v322_v38 }
 0x11b   :  { %330 = vst.msk [vmem:[%s621_s6 + $0x8] sm:$0xf] %vm327_vm4, %v325_v39 }
 0x11c   :  { %331 = vst.msk [vmem:[%s621_s6 + $0xc] sm:$0xf] %vm327_vm4, %v326_v27 }

// kernel: vqvae_forward.33
= control target key start
LH: loop header
LB: loop body
LE: loop exit
PB: predicated region body
PF: predicated region fallthrough
CT: control target
= control target key end

     0   :  { %vm119_vm0 = vcmask 130048   ;;  %s696_s1 = inlined_call_operand.vmem [shape: bf16[144,16], index: 1, kind: input, shape index: {}]   ;;  %s697_s0 = inlined_call_operand.vmem [shape: bf16[32,144], index: 0, kind: input, shape index: {}]   ;;  %s698_s2 = inlined_call_operand.vmem [shape: f32[1,16], index: 2, kind: input, shape index: {}]   ;;  %s699_s4 = inlined_call_operand.vmem [shape: f32[1,16], index: 4, kind: input, shape index: {}]   ;;  %s700_s3 = inlined_call_operand.vmem [shape: f32[1,16], index: 3, kind: input, shape index: {}]   ;;  %s701_s5 = inlined_call_operand.vmem [shape: bf16[32,16], index: 5, kind: output, shape index: {}]  }
   0x1   :  { %v474_v0 = vld [vmem:[%s696_s1 + $0x38] sm:$0xff]  ;;  %v475_v1 = vld [vmem:[%s696_s1 + $0x40] sm:$0xff]  ;;  %v473_v3 = vld [vmem:[%s696_s1 + $0x30] sm:$0xff] }
   0x2   :  { %v463_v2 = vld [vmem:[%s697_s0 + $0x4] sm:$0xf]  ;;  %126 = vmatpush.bf16.msra.mxu0 %v474_v0  ;;  %476 = vmatpush.bf16.msra.mxu2 %v474_v0  ;;  %v405_v4 = vld [vmem:[%s697_s0 + $0x8] sm:$0xf0]  ;;  %v470_v8 = vld [vmem:[%s696_s1 + $0x18] sm:$0xff] }
   0x3   :  { %152 = vmatpush.bf16.msra.mxu1 %v475_v1  ;;  %v408_v5 = vor.u32 %v463_v2, %v405_v4  ;;  %v472_v6 = vld [vmem:[%s696_s1 + $0x28] sm:$0xff]  ;;  %v471_v7 = vld [vmem:[%s696_s1 + $0x20] sm:$0xff]  ;;  %v465_v9 = vld [vmem:[%s697_s0 + $0x14] sm:$0xf] }
   0x4   :  { %v413_v10 = vld [vmem:[%s697_s0 + $0x18] sm:$0xf0]  ;;  %v469_v11 = vld [vmem:[%s696_s1 + $0x10] sm:$0xff]  ;;  %v468_v13 = vld [vmem:[%s696_s1 + $0x8] sm:$0xff] }
   0x5   :  { %v416_v12 = vor.u32 %v465_v9, %v413_v10  ;;  %v467_v14 = vld [vmem:[%s696_s1] sm:$0xff]  ;;  %v464_v16 = vld [vmem:[%s697_s0 + $0x4] sm:$0xf0]  ;;  %v411_v17 = vld [vmem:[%s697_s0 + $0x10] sm:$0xf] }
   0x6   :  { %127 = vmatpush.bf16.msra.mxu0 %v473_v3  ;;  %477 = vmatpush.bf16.msra.mxu2 %v473_v3  ;;  %v403_v15 = vld [vmem:[%s697_s0] sm:$0xf]  ;;  %v466_v18 = vld [vmem:[%s697_s0 + $0x14] sm:$0xf0] }
   0x7   :  { %453 = vmatmul.msk.bf16.vlgmr.msra.gmra.mxu1 %vm119_vm0, %v408_v5  ;;  %v404_v19 = vor.u32 %v464_v16, %v403_v15  ;;  %v412_v20 = vor.u32 %v466_v18, %v411_v17  ;;  %v484_v24 = vld [vmem:[%s698_s2] ss:$0 sm:$0xff] }
   0x8   :  { %v200_v16 = vld [vmem:[%s700_s3] sm:$0x1] }
   0xa   :  { %128 = vmatpush.bf16.msra.mxu0 %v472_v6  ;;  %478 = vmatpush.bf16.msra.mxu2 %v472_v6 }
   0xe   :  { %129 = vmatpush.bf16.msra.mxu0 %v471_v7  ;;  %479 = vmatpush.bf16.msra.mxu2 %v471_v7 }
  0x12   :  { %130 = vmatpush.bf16.msra.mxu0 %v470_v8  ;;  %480 = vmatpush.bf16.msra.mxu2 %v470_v8 }
  0x16   :  { %131 = vmatpush.bf16.msra.mxu0 %v469_v11  ;;  %481 = vmatpush.bf16.msra.mxu2 %v469_v11 }
  0x17   :  { %454 = vmatmul.msk.bf16.gmra.mxu1 %vm119_vm0, %v416_v12 }
  0x1a   :  { %132 = vmatpush.bf16.msra.mxu0 %v468_v13  ;;  %482 = vmatpush.bf16.msra.mxu2 %v468_v13 }
  0x1e   :  { %133 = vmatpush.bf16.msra.mxu0 %v467_v14  ;;  %483 = vmatpush.bf16.msra.mxu2 %v467_v14 }
  0x21   :  { %134 = vmatmul.bf16.vlgmr.msra.gmra.mxu0 %v404_v19  ;;  %139 = vmatmul.bf16.vlgmr.msra.gmra.mxu2 %v412_v20 }
  0x84   :  { %v154_v21 = vpop.f32.mrf.mxu1 }
  0x8c   :  { %v156_v22 = vpop.f32.mrf.mxu1 }
  0x94   :  { %v159_v26 = vpop.f32.mrf.mxu1 }
  0x9c   :  { %v161_v39 = vpop.f32.mrf.mxu1 }
  0x9e   :  { %v135_v23 = vpop.f32.mrf.mxu0 }
  0x9f   :  { %v136_v25 = vadd.f32 %v484_v24, %v135_v23 }
  0xa1   :  { %v155_v29 = vadd.f32 %v154_v21, %v136_v25  ;;  %v485_v21 = vld [vmem:[%s699_s4] ss:$0 sm:$0xff] }
  0xa3   :  { %v164_v33 = vsel %vm119_vm0, %v155_v29, 0.0 }
  0xa4   :  { %v140_v27 = vpop.f32.mrf.mxu2 }
  0xa5   :  { %v141_v30 = vadd.f32 %v484_v24, %v140_v27 }
  0xa6   :  { %v137_v28 = vpop.f32.mrf.mxu0 }
  0xa7   :  { %v138_v31 = vadd.f32 %v484_v24, %v137_v28  ;;  %v160_v34 = vadd.f32 %v159_v26, %v141_v30 }
  0xa9   :  { %v157_v32 = vadd.f32 %v156_v22, %v138_v31  ;;  %v167_v40 = vsel %vm119_vm0, %v160_v34, 0.0 }
  0xab   :  { %v165_v35 = vsel %vm119_vm0, %v157_v32, 0.0 }
  0xac   :  { %v166_v36 = vadd.f32 %v165_v35, %v164_v33  ;;  %v142_v37 = vpop.f32.mrf.mxu2 }
  0xad   :  { %v143_v38 = vadd.f32 %v484_v24, %v142_v37 }
  0xae   :  { %v168_v42 = vadd.f32 %v167_v40, %v166_v36 }
  0xaf   :  { %v162_v41 = vadd.f32 %v161_v39, %v143_v38 }
  0xb1   :  { %v169_v43 = vsel %vm119_vm0, %v162_v41, 0.0 }
  0xb2   :  { %v170_v44 = vadd.f32 %v169_v43, %v168_v42 }
  0xb4   :  { %v171_v45 = vrot.slane %v170_v44, 4 }
  0xb6   :  { %v172_v46 = vadd.f32 %v171_v45, %v170_v44 }
  0xb8   :  { %v173_v47 = vrot.slane %v172_v46, 2 }
  0xba   :  { %v174_v48 = vadd.f32 %v173_v47, %v172_v46 }
  0xbc   :  { %v175_v49 = vrot.slane %v174_v48, 1 }
  0xbe   :  { %v176_v50 = vadd.f32 %v175_v49, %v174_v48 }
  0xc0   :  { %v177_v51 = vmul.f32 0.03125, %v176_v50 }
  0xc2   :  { %v178_v52 = vsub.f32 %v155_v29, %v177_v51  ;;  %v179_v53 = vsub.f32 %v157_v32, %v177_v51  ;;  %v180_v54 = vsub.f32 %v160_v34, %v177_v51  ;;  %v181_v55 = vsub.f32 %v162_v41, %v177_v51 }
  0xc4   :  { %v182_v56 = vmul.f32 %v178_v52, %v178_v52  ;;  %v183_v57 = vmul.f32 %v179_v53, %v179_v53  ;;  %v184_v58 = vmul.f32 %v180_v54, %v180_v54  ;;  %v185_v59 = vmul.f32 %v181_v55, %v181_v55 }
  0xc6   :  { %v186_v60 = vsel %vm119_vm0, %v182_v56, 0.0  ;;  %v187_v61 = vsel %vm119_vm0, %v183_v57, 0.0  ;;  %v189_v63 = vsel %vm119_vm0, %v184_v58, 0.0  ;;  %v191_v1 = vsel %vm119_vm0, %v185_v59, 0.0 }
  0xc7   :  { %v188_v62 = vadd.f32 %v187_v61, %v186_v60 }
  0xc9   :  { %v190_v0 = vadd.f32 %v189_v63, %v188_v62 }
  0xcb   :  { %v192_v2 = vadd.f32 %v191_v1, %v190_v0 }
  0xcd   :  { %v193_v3 = vrot.slane %v192_v2, 4 }
  0xcf   :  { %v194_v4 = vadd.f32 %v193_v3, %v192_v2 }
  0xd1   :  { %v195_v5 = vrot.slane %v194_v4, 2 }
  0xd3   :  { %v196_v6 = vadd.f32 %v195_v5, %v194_v4 }
  0xd5   :  { %v197_v7 = vrot.slane %v196_v6, 1 }
  0xd7   :  { %v198_v8 = vadd.f32 %v197_v7, %v196_v6 }
  0xd9   :  { %v199_v9 = vmul.f32 0.03125, %v198_v8 }
  0xdb   :  { %v201_v10 = vadd.f32 1e-05, %v199_v9 }
  0xdd   :  { %486 = vrsqrt.f32 %v201_v10  ;;  %vm208_vm2 = vweird.f32 %v201_v10 }
  0xe3   :  { %v487_v11 = vpop.eup %486 }
  0xe4   :  { %v203_v12 = vmul.f32 %v487_v11, %v201_v10  ;;  %vm209_vm1 = vweird.f32 %v487_v11 }
  0xe5   :  { %vm210_vm3 = vmor %vm208_vm2, %vm209_vm1 }
  0xe6   :  { %v204_v13 = vmul.f32 %v487_v11, %v203_v12 }
  0xe8   :  { %v205_v14 = vmul.f32 0.5, %v204_v13 }
  0xea   :  { %v206_v15 = vsub.f32 1.5, %v205_v14 }
  0xec   :  { %v207_v17 = vmul.f32 %v487_v11, %v206_v15 }
  0xee   :  { %v211_v18 = vsel %vm210_vm3, %v487_v11, %v207_v17 }
  0xef   :  { %v212_v19 = vmul.f32 %v211_v18, %v200_v16 }
  0xf1   :  { %v214_v20 = vperm.slane %v212_v19, 0 }
  0xf3   :  { %v216_v22 = vmul.f32 %v214_v20, %v178_v52  ;;  %v217_v23 = vmul.f32 %v214_v20, %v179_v53  ;;  %v218_v24 = vmul.f32 %v214_v20, %v180_v54  ;;  %v219_v25 = vmul.f32 %v214_v20, %v181_v55 }
  0xf5   :  { %v620_v26 = vadd.f32 %v485_v21, %v216_v22  ;;  %v622_v27 = vadd.f32 %v485_v21, %v217_v23  ;;  %v624_v28 = vadd.f32 %v485_v21, %v218_v24  ;;  %v626_v29 = vadd.f32 %v485_v21, %v219_v25 }
  0xf7   :  { %v455_v30 = vmul.f32 -1.442695, %v620_v26  ;;  %v456_v31 = vmul.f32 -1.442695, %v622_v27  ;;  %v457_v32 = vmul.f32 -1.442695, %v624_v28 }
  0xf8   :  { %v458_v33 = vmul.f32 -1.442695, %v626_v29 }
  0xf9   :  { %488 = vpow2.f32 %v455_v30 }
  0xfa   :  { %490 = vpow2.f32 %v456_v31 }
  0xfb   :  { %492 = vpow2.f32 %v457_v32 }
  0xfc   :  { %494 = vpow2.f32 %v458_v33 }
  0xff   :  { %v489_v34 = vpop.eup %488 }
 0x100   :  { %v491_v35 = vpop.eup %490  ;;  %v240_v36 = vadd.f32 1.0, %v489_v34 }
 0x101   :  { %v493_v37 = vpop.eup %492  ;;  %v241_v38 = vadd.f32 1.0, %v491_v35 }
 0x102   :  { %v495_v39 = vpop.eup %494  ;;  %v242_v40 = vadd.f32 1.0, %v493_v37  ;;  %496 = vrcp.f32 %v240_v36  ;;  %v253_v42 = vand.u32 2147483647, %v240_v36  ;;  %v255_v43 = vand.u32 2147483648, %v240_v36 }
 0x103   :  { %v243_v41 = vadd.f32 1.0, %v495_v39  ;;  %498 = vrcp.f32 %v241_v38  ;;  %vm249_vm4 = vweird.f32 %v240_v36  ;;  %vm264_vm5 = vweird.f32 %v241_v38 }
 0x104   :  { %500 = vrcp.f32 %v242_v40  ;;  %v268_v49 = vand.u32 2147483647, %v241_v38  ;;  %v270_v50 = vand.u32 2147483648, %v241_v38  ;;  %vm632_vm6 = vcmp.eq.f32.partialorder %v253_v42, 8.507059e+37 }
 0x105   :  { %502 = vrcp.f32 %v243_v41  ;;  %v256_v53 = vor.u32 1.1754944e-38, %v255_v43  ;;  %vm279_vm7 = vweird.f32 %v242_v40  ;;  %v283_v57 = vand.u32 2147483647, %v242_v40 }
 0x106   :  { %v285_v58 = vand.u32 2147483648, %v242_v40  ;;  %vm636_vm10 = vcmp.eq.f32.partialorder %v268_v49, 8.507059e+37  ;;  %v271_v0 = vor.u32 1.1754944e-38, %v270_v50  ;;  %vm294_vm13 = vweird.f32 %v243_v41 }
 0x107   :  { %v298_v5 = vand.u32 2147483647, %v243_v41  ;;  %v300_v6 = vand.u32 2147483648, %v243_v41  ;;  %vm284_vm1 = vcmp.eq.f32.partialorder %v283_v57, 8.507059e+37 }
 0x108   :  { %v497_v44 = vpop.eup %496  ;;  %v286_v12 = vor.u32 1.1754944e-38, %v285_v58 }
 0x109   :  { %v499_v45 = vpop.eup %498  ;;  %v245_v46 = vmul.f32 %v497_v44, %v240_v36  ;;  %vm250_vm8 = vweird.f32 %v497_v44  ;;  %v301_v18 = vor.u32 1.1754944e-38, %v300_v6  ;;  %vm299_vm3 = vcmp.eq.f32.partialorder %v298_v5, 8.507059e+37 }
 0x10a   :  { %v501_v47 = vpop.eup %500  ;;  %v260_v48 = vmul.f32 %v499_v45, %v241_v38  ;;  %vm265_vm9 = vweird.f32 %v499_v45  ;;  %vm251_vm12 = vmor %vm249_vm4, %vm250_vm8 }
 0x10b   :  { %v246_v51 = vsub.f32 1.0, %v245_v46  ;;  %v275_v54 = vmul.f32 %v501_v47, %v242_v40  ;;  %v503_v55 = vpop.eup %502  ;;  %vm280_vm11 = vweird.f32 %v501_v47  ;;  %vm266_vm14 = vmor %vm264_vm5, %vm265_vm9 }
 0x10c   :  { %v261_v56 = vsub.f32 1.0, %v260_v48  ;;  %v290_v61 = vmul.f32 %v503_v55, %v243_v41  ;;  %vm295_vm15 = vweird.f32 %v503_v55  ;;  %vm281_vm0 = vmor %vm279_vm7, %vm280_vm11 }
 0x10d   :  { %v247_v59 = vmul.f32 %v497_v44, %v246_v51  ;;  %v276_v60 = vsub.f32 1.0, %v275_v54  ;;  %vm296_vm2 = vmor %vm294_vm13, %vm295_vm15 }
 0x10e   :  { %v262_v62 = vmul.f32 %v499_v45, %v261_v56  ;;  %v291_v3 = vsub.f32 1.0, %v290_v61 }
 0x10f   :  { %v248_v1 = vadd.f32 %v497_v44, %v247_v59  ;;  %v277_v2 = vmul.f32 %v501_v47, %v276_v60 }
 0x110   :  { %v263_v4 = vadd.f32 %v499_v45, %v262_v62  ;;  %v292_v9 = vmul.f32 %v503_v55, %v291_v3 }
 0x111   :  { %v252_v7 = vsel %vm251_vm12, %v497_v44, %v248_v1  ;;  %v278_v8 = vadd.f32 %v501_v47, %v277_v2 }
 0x112   :  { %v257_v10 = vsel %vm632_vm6, %v256_v53, %v252_v7  ;;  %v267_v11 = vsel %vm266_vm14, %v499_v45, %v263_v4  ;;  %v293_v15 = vadd.f32 %v503_v55, %v292_v9 }
 0x113   :  { %v272_v13 = vsel %vm636_vm10, %v271_v0, %v267_v11  ;;  %v282_v14 = vsel %vm281_vm0, %v501_v47, %v278_v8  ;;  %v648_v16 = vmul.f32 %v257_v10, %v620_v26 }
 0x114   :  { %v287_v17 = vsel %vm284_vm1, %v286_v12, %v282_v14  ;;  %v652_v19 = vmul.f32 %v272_v13, %v622_v27  ;;  %v297_v20 = vsel %vm296_vm2, %v503_v55, %v293_v15 }
 0x115   :  { %v655_v21 = vmul.f32 %v287_v17, %v624_v28  ;;  %v459_v22 = vmul.f32 -1.442695, %v648_v16  ;;  %v302_v23 = vsel %vm299_vm3, %v301_v18, %v297_v20  ;;  %vm392_vm3 = vcmask 125952  }
 0x116   :  { %v460_v24 = vmul.f32 -1.442695, %v652_v19  ;;  %v660_v25 = vmul.f32 %v302_v23, %v626_v29 }
 0x117   :  { %504 = vpow2.f32 %v459_v22  ;;  %v461_v26 = vmul.f32 -1.442695, %v655_v21 }
 0x118   :  { %506 = vpow2.f32 %v460_v24  ;;  %v462_v27 = vmul.f32 -1.442695, %v660_v25 }
 0x119   :  { %508 = vpow2.f32 %v461_v26 }
 0x11a   :  { %510 = vpow2.f32 %v462_v27 }
 0x11d   :  { %v505_v30 = vpop.eup %504 }
 0x11e   :  { %v507_v31 = vpop.eup %506  ;;  %v320_v28 = vadd.f32 1.0, %v505_v30 }
 0x11f   :  { %v509_v32 = vpop.eup %508  ;;  %v321_v33 = vadd.f32 1.0, %v507_v31 }
 0x120   :  { %v322_v34 = vadd.f32 1.0, %v509_v32  ;;  %512 = vrcp.f32 %v320_v28  ;;  %v511_v35 = vpop.eup %510  ;;  %v333_v29 = vand.u32 2147483647, %v320_v28  ;;  %v335_v37 = vand.u32 2147483648, %v320_v28 }
 0x121   :  { %514 = vrcp.f32 %v321_v33  ;;  %v323_v36 = vadd.f32 1.0, %v511_v35  ;;  %v348_v39 = vand.u32 2147483647, %v321_v33  ;;  %vm329_vm4 = vweird.f32 %v320_v28 }
 0x122   :  { %516 = vrcp.f32 %v322_v34  ;;  %vm344_vm5 = vweird.f32 %v321_v33  ;;  %v350_v44 = vand.u32 2147483648, %v321_v33  ;;  %vm664_vm6 = vcmp.eq.f32.partialorder %v333_v29, 8.507059e+37 }
 0x123   :  { %518 = vrcp.f32 %v323_v36  ;;  %v336_v47 = vor.u32 1.1754944e-38, %v335_v37  ;;  %vm668_vm7 = vcmp.eq.f32.partialorder %v348_v39, 8.507059e+37  ;;  %vm359_vm8 = vweird.f32 %v322_v34 }
 0x124   :  { %v363_v52 = vand.u32 2147483647, %v322_v34  ;;  %v351_v57 = vor.u32 1.1754944e-38, %v350_v44  ;;  %v365_v58 = vand.u32 2147483648, %v322_v34  ;;  %vm374_vm13 = vweird.f32 %v323_v36 }
 0x125   :  { %v378_v63 = vand.u32 2147483647, %v323_v36  ;;  %v380_v0 = vand.u32 2147483648, %v323_v36 }
 0x126   :  { %v513_v38 = vpop.eup %512  ;;  %vm364_vm1 = vcmp.eq.f32.partialorder %v363_v52, 8.507059e+37  ;;  %v366_v6 = vor.u32 1.1754944e-38, %v365_v58 }
 0x127   :  { %v515_v40 = vpop.eup %514  ;;  %v325_v41 = vmul.f32 %v513_v38, %v320_v28  ;;  %vm330_vm9 = vweird.f32 %v513_v38  ;;  %v381_v12 = vor.u32 1.1754944e-38, %v380_v0 }
 0x128   :  { %v517_v42 = vpop.eup %516  ;;  %v340_v43 = vmul.f32 %v515_v40, %v321_v33  ;;  %vm345_vm10 = vweird.f32 %v515_v40  ;;  %vm331_vm12 = vmor %vm329_vm4, %vm330_vm9  ;;  %vm379_vm4 = vcmp.eq.f32.partialorder %v378_v63, 8.507059e+37 }
 0x129   :  { %v326_v45 = vsub.f32 1.0, %v325_v41  ;;  %v355_v48 = vmul.f32 %v517_v42, %v322_v34  ;;  %v519_v49 = vpop.eup %518  ;;  %vm360_vm11 = vweird.f32 %v517_v42  ;;  %vm346_vm14 = vmor %vm344_vm5, %vm345_vm10 }
 0x12a   :  { %v341_v50 = vsub.f32 1.0, %v340_v43  ;;  %v370_v55 = vmul.f32 %v519_v49, %v323_v36  ;;  %vm375_vm15 = vweird.f32 %v519_v49  ;;  %vm361_vm0 = vmor %vm359_vm8, %vm360_vm11 }
 0x12b   :  { %v327_v53 = vmul.f32 %v513_v38, %v326_v45  ;;  %v356_v54 = vsub.f32 1.0, %v355_v48  ;;  %vm376_vm2 = vmor %vm374_vm13, %vm375_vm15 }
 0x12c   :  { %v342_v56 = vmul.f32 %v515_v40, %v341_v50  ;;  %v371_v61 = vsub.f32 1.0, %v370_v55 }
 0x12d   :  { %v328_v59 = vadd.f32 %v513_v38, %v327_v53  ;;  %v357_v60 = vmul.f32 %v517_v42, %v356_v54 }
 0x12e   :  { %v343_v62 = vadd.f32 %v515_v40, %v342_v56  ;;  %v372_v3 = vmul.f32 %v519_v49, %v371_v61 }
 0x12f   :  { %v332_v1 = vsel %vm331_vm12, %v513_v38, %v328_v59  ;;  %v358_v2 = vadd.f32 %v517_v42, %v357_v60 }
 0x130   :  { %v337_v4 = vsel %vm664_vm6, %v336_v47, %v332_v1  ;;  %v347_v5 = vsel %vm346_vm14, %v515_v40, %v343_v62  ;;  %v373_v9 = vadd.f32 %v519_v49, %v372_v3 }
 0x131   :  { %v352_v7 = vsel %vm668_vm7, %v351_v57, %v347_v5  ;;  %v362_v8 = vsel %vm361_vm0, %v517_v42, %v358_v2  ;;  %v384_v10 = vmul.f32 %v337_v4, %v648_v16 }
 0x132   :  { %v367_v11 = vsel %vm364_vm1, %v366_v6, %v362_v8  ;;  %v385_v13 = vmul.f32 %v352_v7, %v652_v19  ;;  %v377_v14 = vsel %vm376_vm2, %v519_v49, %v373_v9 }
 0x133   :  { %v386_v15 = vmul.f32 %v367_v11, %v655_v21  ;;  %v388_v17 = vpack.c.bf16 %v384_v10, %v384_v10  ;;  %v382_v18 = vsel %vm379_vm4, %v381_v12, %v377_v14 }
 0x134   :  { %v389_v20 = vpack.c.bf16 %v385_v13, %v385_v13  ;;  %v387_v22 = vmul.f32 %v382_v18, %v660_v25 }
 0x135   :  { %v390_v23 = vpack.c.bf16 %v386_v15, %v386_v15  ;;  %393 = vst.msk [vmem:[%s701_s5] sm:$0xf] %vm392_vm3, %v388_v17 }
 0x136   :  { %394 = vst.msk [vmem:[%s701_s5 + $0x4] sm:$0xf] %vm392_vm3, %v389_v20  ;;  %v391_v16 = vpack.c.bf16 %v387_v22, %v387_v22 }
 0x137   :  { %395 = vst.msk [vmem:[%s701_s5 + $0x8] sm:$0xf] %vm392_vm3, %v390_v23 }
 0x138   :  { %396 = vst.msk [vmem:[%s701_s5 + $0xc] sm:$0xf] %vm392_vm3, %v391_v16 }

// kernel: vqvae_forward.36
= control target key start
LH: loop header
LB: loop body
LE: loop exit
PB: predicated region body
PF: predicated region fallthrough
CT: control target
= control target key end

     0   :  { %vm104_vm0 = vcmask 130048   ;;  %vm195_vm8 = vcmask 125952   ;;  %s331_s1 = inlined_call_operand.vmem [shape: bf16[144,16], index: 1, kind: input, shape index: {}]   ;;  %s332_s0 = inlined_call_operand.vmem [shape: bf16[8,144], index: 0, kind: input, shape index: {}]   ;;  %s333_s2 = inlined_call_operand.vmem [shape: f32[1,16], index: 2, kind: input, shape index: {}]   ;;  %s334_s4 = inlined_call_operand.vmem [shape: f32[1,16], index: 4, kind: input, shape index: {}]   ;;  %s335_s3 = inlined_call_operand.vmem [shape: f32[1,16], index: 3, kind: input, shape index: {}]   ;;  %s336_s5 = inlined_call_operand.vmem [shape: bf16[8,16], index: 5, kind: output, shape index: {}]  }
   0x1   :  { %v246_v0 = vld [vmem:[%s331_s1 + $0x38] sm:$0xff]  ;;  %v245_v1 = vld [vmem:[%s331_s1 + $0x30] sm:$0xff]  ;;  %v247_v2 = vld [vmem:[%s331_s1 + $0x40] sm:$0xff] }
   0x2   :  { %108 = vmatpush.bf16.msra.mxu0 %v246_v0  ;;  %v21_v3 = vld [vmem:[%s332_s0] sm:$0xff]  ;;  %128 = vmatpush.bf16.msra.mxu1 %v247_v2  ;;  %v244_v6 = vld [vmem:[%s331_s1 + $0x28] sm:$0xff]  ;;  %v242_v8 = vld [vmem:[%s331_s1 + $0x18] sm:$0xff] }
   0x3   :  { %v46_v4 = vunpack.c.h.b16 %v21_v3  ;;  %v243_v7 = vld [vmem:[%s331_s1 + $0x20] sm:$0xff]  ;;  %v241_v9 = vld [vmem:[%s331_s1 + $0x10] sm:$0xff]  ;;  %v240_v10 = vld [vmem:[%s331_s1 + $0x8] sm:$0xff]  ;;  %v45_v11 = vunpack.c.l.b16 %v21_v3 }
   0x4   :  { %v239_v12 = vld [vmem:[%s331_s1] sm:$0xff] }
   0x5   :  { %v48_v5 = vpack.c.b16 %v46_v4, %v46_v4  ;;  %v47_v13 = vpack.c.b16 %v45_v11, %v45_v11  ;;  %v248_v16 = vld [vmem:[%s333_s2] ss:$0 sm:$0xff] }
   0x6   :  { %109 = vmatpush.bf16.msra.mxu0 %v245_v1  ;;  %v152_v45 = vld [vmem:[%s335_s3] sm:$0x1] }
   0x7   :  { %237 = vmatmul.msk.bf16.vlgmr.msra.gmra.mxu1 %vm104_vm0, %v48_v5  ;;  %v249_v50 = vld [vmem:[%s334_s4] ss:$0 sm:$0xff] }
   0xa   :  { %110 = vmatpush.bf16.msra.mxu0 %v244_v6 }
   0xe   :  { %111 = vmatpush.bf16.msra.mxu0 %v243_v7 }
  0x12   :  { %112 = vmatpush.bf16.msra.mxu0 %v242_v8 }
  0x16   :  { %113 = vmatpush.bf16.msra.mxu0 %v241_v9 }
  0x1a   :  { %114 = vmatpush.bf16.msra.mxu0 %v240_v10 }
  0x1e   :  { %115 = vmatpush.bf16.msra.mxu0 %v239_v12 }
  0x21   :  { %116 = vmatmul.bf16.vlgmr.msra.gmra.mxu0 %v47_v13 }
  0x84   :  { %v130_v14 = vpop.f32.mrf.mxu1 }
  0x8c   :  { %v132_v15 = vpop.f32.mrf.mxu1 }
  0x9e   :  { %v117_v17 = vpop.f32.mrf.mxu0 }
  0x9f   :  { %v118_v18 = vadd.f32 %v248_v16, %v117_v17 }
  0xa1   :  { %v131_v19 = vadd.f32 %v130_v14, %v118_v18 }
  0xa3   :  { %v134_v20 = vsel %vm104_vm0, %v131_v19, 0.0 }
  0xa4   :  { %v135_v21 = vrot.slane %v134_v20, 4 }
  0xa6   :  { %v136_v22 = vadd.f32 %v135_v21, %v134_v20  ;;  %v119_v23 = vpop.f32.mrf.mxu0 }
  0xa8   :  { %v137_v24 = vrot.slane %v136_v22, 2 }
  0xaa   :  { %v138_v25 = vadd.f32 %v137_v24, %v136_v22 }
  0xac   :  { %v139_v26 = vrot.slane %v138_v25, 1 }
  0xae   :  { %v140_v27 = vadd.f32 %v139_v26, %v138_v25 }
  0xb0   :  { %v141_v28 = vmul.f32 0.125, %v140_v27 }
  0xb2   :  { %v142_v29 = vsub.f32 %v131_v19, %v141_v28 }
  0xb4   :  { %v143_v30 = vmul.f32 %v142_v29, %v142_v29 }
  0xb6   :  { %v144_v31 = vsel %vm104_vm0, %v143_v30, 0.0 }
  0xb7   :  { %v145_v32 = vrot.slane %v144_v31, 4 }
  0xb9   :  { %v146_v33 = vadd.f32 %v145_v32, %v144_v31 }
  0xbb   :  { %v147_v34 = vrot.slane %v146_v33, 2 }
  0xbd   :  { %v148_v35 = vadd.f32 %v147_v34, %v146_v33 }
  0xbf   :  { %v149_v36 = vrot.slane %v148_v35, 1 }
  0xc1   :  { %v150_v37 = vadd.f32 %v149_v36, %v148_v35 }
  0xc3   :  { %v151_v38 = vmul.f32 0.125, %v150_v37 }
  0xc5   :  { %v153_v39 = vadd.f32 1e-05, %v151_v38 }
  0xc7   :  { %250 = vrsqrt.f32 %v153_v39  ;;  %vm160_vm2 = vweird.f32 %v153_v39 }
  0xcd   :  { %v251_v40 = vpop.eup %250 }
  0xce   :  { %v155_v41 = vmul.f32 %v251_v40, %v153_v39  ;;  %vm161_vm1 = vweird.f32 %v251_v40 }
  0xcf   :  { %vm162_vm3 = vmor %vm160_vm2, %vm161_vm1 }
  0xd0   :  { %v156_v42 = vmul.f32 %v251_v40, %v155_v41 }
  0xd2   :  { %v157_v43 = vmul.f32 0.5, %v156_v42 }
  0xd4   :  { %v158_v44 = vsub.f32 1.5, %v157_v43 }
  0xd6   :  { %v159_v46 = vmul.f32 %v251_v40, %v158_v44 }
  0xd8   :  { %v163_v47 = vsel %vm162_vm3, %v251_v40, %v159_v46 }
  0xd9   :  { %v164_v48 = vmul.f32 %v163_v47, %v152_v45 }
  0xdb   :  { %v166_v49 = vperm.slane %v164_v48, 0 }
  0xdd   :  { %v168_v51 = vmul.f32 %v166_v49, %v142_v29 }
  0xdf   :  { %v173_v52 = vadd.f32 %v249_v50, %v168_v51 }
  0xe1   :  { %v238_v53 = vmul.f32 -1.442695, %v173_v52 }
  0xe3   :  { %252 = vpow2.f32 %v238_v53 }
  0xe9   :  { %v253_v54 = vpop.eup %252 }
  0xea   :  { %v177_v55 = vadd.f32 1.0, %v253_v54 }
  0xec   :  { %254 = vrcp.f32 %v177_v55  ;;  %v189_v59 = vand.u32 2147483648, %v177_v55  ;;  %v187_v61 = vand.u32 2147483647, %v177_v55  ;;  %vm183_vm5 = vweird.f32 %v177_v55 }
  0xee   :  { %v190_v63 = vor.u32 1.1754944e-38, %v189_v59  ;;  %vm188_vm7 = vcmp.eq.f32.partialorder %v187_v61, 8.507059e+37 }
  0xf2   :  { %v255_v56 = vpop.eup %254 }
  0xf3   :  { %v179_v57 = vmul.f32 %v255_v56, %v177_v55  ;;  %vm184_vm4 = vweird.f32 %v255_v56 }
  0xf4   :  { %vm185_vm6 = vmor %vm183_vm5, %vm184_vm4 }
  0xf5   :  { %v180_v58 = vsub.f32 1.0, %v179_v57 }
  0xf7   :  { %v181_v60 = vmul.f32 %v255_v56, %v180_v58 }
  0xf9   :  { %v182_v62 = vadd.f32 %v255_v56, %v181_v60 }
  0xfb   :  { %v186_v0 = vsel %vm185_vm6, %v255_v56, %v182_v62 }
  0xfc   :  { %v191_v1 = vsel %vm188_vm7, %v190_v63, %v186_v0 }
  0xfd   :  { %v193_v2 = vmul.f32 %v191_v1, %v173_v52 }
  0xff   :  { %v194_v3 = vpack.c.bf16 %v193_v2, %v193_v2 }
 0x101   :  { %196 = vst.msk [vmem:[%s336_s5] sm:$0xf] %vm195_vm8, %v194_v3 }

// kernel: vqvae_forward.37
= control target key start
LH: loop header
LB: loop body
LE: loop exit
PB: predicated region body
PF: predicated region fallthrough
CT: control target
= control target key end

     0   :  { %vm107_vm0 = vcmask 130048   ;;  %vm201_vm8 = vcmask 125952   ;;  %s345_s1 = inlined_call_operand.vmem [shape: bf16[144,16], index: 1, kind: input, shape index: {}]   ;;  %s346_s0 = inlined_call_operand.vmem [shape: bf16[8,144], index: 0, kind: input, shape index: {}]   ;;  %s347_s2 = inlined_call_operand.vmem [shape: f32[1,16], index: 2, kind: input, shape index: {}]   ;;  %s348_s4 = inlined_call_operand.vmem [shape: f32[1,16], index: 4, kind: input, shape index: {}]   ;;  %s349_s3 = inlined_call_operand.vmem [shape: f32[1,16], index: 3, kind: input, shape index: {}]   ;;  %s350_s5 = inlined_call_operand.vmem [shape: bf16[8,16], index: 5, kind: input, shape index: {}]   ;;  %s351_s6 = inlined_call_operand.vmem [shape: bf16[8,16], index: 6, kind: output, shape index: {}]  }
   0x1   :  { %v252_v0 = vld [vmem:[%s345_s1 + $0x38] sm:$0xff]  ;;  %v251_v1 = vld [vmem:[%s345_s1 + $0x30] sm:$0xff]  ;;  %v253_v2 = vld [vmem:[%s345_s1 + $0x40] sm:$0xff] }
   0x2   :  { %111 = vmatpush.bf16.msra.mxu0 %v252_v0  ;;  %v24_v3 = vld [vmem:[%s346_s0] sm:$0xff]  ;;  %131 = vmatpush.bf16.msra.mxu1 %v253_v2  ;;  %v250_v6 = vld [vmem:[%s345_s1 + $0x28] sm:$0xff]  ;;  %v248_v8 = vld [vmem:[%s345_s1 + $0x18] sm:$0xff] }
   0x3   :  { %v49_v4 = vunpack.c.h.b16 %v24_v3  ;;  %v249_v7 = vld [vmem:[%s345_s1 + $0x20] sm:$0xff]  ;;  %v247_v9 = vld [vmem:[%s345_s1 + $0x10] sm:$0xff]  ;;  %v246_v10 = vld [vmem:[%s345_s1 + $0x8] sm:$0xff]  ;;  %v48_v11 = vunpack.c.l.b16 %v24_v3 }
   0x4   :  { %v245_v12 = vld [vmem:[%s345_s1] sm:$0xff] }
   0x5   :  { %v51_v5 = vpack.c.b16 %v49_v4, %v49_v4  ;;  %v50_v13 = vpack.c.b16 %v48_v11, %v48_v11  ;;  %v254_v16 = vld [vmem:[%s347_s2] ss:$0 sm:$0xff] }
   0x6   :  { %112 = vmatpush.bf16.msra.mxu0 %v251_v1  ;;  %v155_v45 = vld [vmem:[%s349_s3] sm:$0x1] }
   0x7   :  { %243 = vmatmul.msk.bf16.vlgmr.msra.gmra.mxu1 %vm107_vm0, %v51_v5  ;;  %v255_v50 = vld [vmem:[%s348_s4] ss:$0 sm:$0xff] }
   0x8   :  { %v177_v62 = vld [vmem:[%s350_s5] sm:$0xf] }
   0x9   :  { %v178_v1 = vunpack.c.l.bf16 %v177_v62 }
   0xa   :  { %113 = vmatpush.bf16.msra.mxu0 %v250_v6 }
   0xe   :  { %114 = vmatpush.bf16.msra.mxu0 %v249_v7 }
  0x12   :  { %115 = vmatpush.bf16.msra.mxu0 %v248_v8 }
  0x16   :  { %116 = vmatpush.bf16.msra.mxu0 %v247_v9 }
  0x1a   :  { %117 = vmatpush.bf16.msra.mxu0 %v246_v10 }
  0x1e   :  { %118 = vmatpush.bf16.msra.mxu0 %v245_v12 }
  0x21   :  { %119 = vmatmul.bf16.vlgmr.msra.gmra.mxu0 %v50_v13 }
  0x84   :  { %v133_v14 = vpop.f32.mrf.mxu1 }
  0x8c   :  { %v135_v15 = vpop.f32.mrf.mxu1 }
  0x9e   :  { %v120_v17 = vpop.f32.mrf.mxu0 }
  0x9f   :  { %v121_v18 = vadd.f32 %v254_v16, %v120_v17 }
  0xa1   :  { %v134_v19 = vadd.f32 %v133_v14, %v121_v18 }
  0xa3   :  { %v137_v20 = vsel %vm107_vm0, %v134_v19, 0.0 }
  0xa4   :  { %v138_v21 = vrot.slane %v137_v20, 4 }
  0xa6   :  { %v139_v22 = vadd.f32 %v138_v21, %v137_v20  ;;  %v122_v23 = vpop.f32.mrf.mxu0 }
  0xa8   :  { %v140_v24 = vrot.slane %v139_v22, 2 }
  0xaa   :  { %v141_v25 = vadd.f32 %v140_v24, %v139_v22 }
  0xac   :  { %v142_v26 = vrot.slane %v141_v25, 1 }
  0xae   :  { %v143_v27 = vadd.f32 %v142_v26, %v141_v25 }
  0xb0   :  { %v144_v28 = vmul.f32 0.125, %v143_v27 }
  0xb2   :  { %v145_v29 = vsub.f32 %v134_v19, %v144_v28 }
  0xb4   :  { %v146_v30 = vmul.f32 %v145_v29, %v145_v29 }
  0xb6   :  { %v147_v31 = vsel %vm107_vm0, %v146_v30, 0.0 }
  0xb7   :  { %v148_v32 = vrot.slane %v147_v31, 4 }
  0xb9   :  { %v149_v33 = vadd.f32 %v148_v32, %v147_v31 }
  0xbb   :  { %v150_v34 = vrot.slane %v149_v33, 2 }
  0xbd   :  { %v151_v35 = vadd.f32 %v150_v34, %v149_v33 }
  0xbf   :  { %v152_v36 = vrot.slane %v151_v35, 1 }
  0xc1   :  { %v153_v37 = vadd.f32 %v152_v36, %v151_v35 }
  0xc3   :  { %v154_v38 = vmul.f32 0.125, %v153_v37 }
  0xc5   :  { %v156_v39 = vadd.f32 1e-05, %v154_v38 }
  0xc7   :  { %256 = vrsqrt.f32 %v156_v39  ;;  %vm163_vm2 = vweird.f32 %v156_v39 }
  0xcd   :  { %v257_v40 = vpop.eup %256 }
  0xce   :  { %v158_v41 = vmul.f32 %v257_v40, %v156_v39  ;;  %vm164_vm1 = vweird.f32 %v257_v40 }
  0xcf   :  { %vm165_vm3 = vmor %vm163_vm2, %vm164_vm1 }
  0xd0   :  { %v159_v42 = vmul.f32 %v257_v40, %v158_v41 }
  0xd2   :  { %v160_v43 = vmul.f32 0.5, %v159_v42 }
  0xd4   :  { %v161_v44 = vsub.f32 1.5, %v160_v43 }
  0xd6   :  { %v162_v46 = vmul.f32 %v257_v40, %v161_v44 }
  0xd8   :  { %v166_v47 = vsel %vm165_vm3, %v257_v40, %v162_v46 }
  0xd9   :  { %v167_v48 = vmul.f32 %v166_v47, %v155_v45 }
  0xdb   :  { %v169_v49 = vperm.slane %v167_v48, 0 }
  0xdd   :  { %v171_v51 = vmul.f32 %v169_v49, %v145_v29 }
  0xdf   :  { %v176_v52 = vadd.f32 %v255_v50, %v171_v51 }
  0xe1   :  { %v244_v53 = vmul.f32 -1.442695, %v176_v52 }
  0xe3   :  { %258 = vpow2.f32 %v244_v53 }
  0xe9   :  { %v259_v54 = vpop.eup %258 }
  0xea   :  { %v182_v55 = vadd.f32 1.0, %v259_v54 }
  0xec   :  { %260 = vrcp.f32 %v182_v55  ;;  %v194_v59 = vand.u32 2147483648, %v182_v55  ;;  %v192_v61 = vand.u32 2147483647, %v182_v55  ;;  %vm188_vm5 = vweird.f32 %v182_v55 }
  0xee   :  { %v195_v0 = vor.u32 1.1754944e-38, %v194_v59  ;;  %vm193_vm7 = vcmp.eq.f32.partialorder %v192_v61, 8.507059e+37 }
  0xf2   :  { %v261_v56 = vpop.eup %260 }
  0xf3   :  { %v184_v57 = vmul.f32 %v261_v56, %v182_v55  ;;  %vm189_vm4 = vweird.f32 %v261_v56 }
  0xf4   :  { %vm190_vm6 = vmor %vm188_vm5, %vm189_vm4 }
  0xf5   :  { %v185_v58 = vsub.f32 1.0, %v184_v57 }
  0xf7   :  { %v186_v60 = vmul.f32 %v261_v56, %v185_v58 }
  0xf9   :  { %v187_v63 = vadd.f32 %v261_v56, %v186_v60 }
  0xfb   :  { %v191_v2 = vsel %vm190_vm6, %v261_v56, %v187_v63 }
  0xfc   :  { %v196_v3 = vsel %vm193_vm7, %v195_v0, %v191_v2 }
  0xfd   :  { %v198_v4 = vmul.f32 %v196_v3, %v176_v52 }
  0xff   :  { %v199_v5 = vadd.f32 %v198_v4, %v178_v1 }
 0x101   :  { %v200_v6 = vpack.c.bf16 %v199_v5, %v199_v5 }
 0x103   :  { %202 = vst.msk [vmem:[%s351_s6] sm:$0xf] %vm201_vm8, %v200_v6 }

// kernel: vqvae_forward.38
= control target key start
LH: loop header
LB: loop body
LE: loop exit
PB: predicated region body
PF: predicated region fallthrough
CT: control target
= control target key end

     0   :  { %vm36_vm0 = vcmask 130048   ;;  %vm63_vm1 = vcmask 1043456   ;;  %vm55_vm2 = vcmask 64512   ;;  %vm87_vm3 = vcmask 261120   ;;  %s230_s1 = inlined_call_operand.vmem [shape: bf16[16,8], index: 1, kind: input, shape index: {}]   ;;  %s231_s0 = inlined_call_operand.vmem [shape: bf16[8,16], index: 0, kind: input, shape index: {}]   ;;  %s232_s2 = inlined_call_operand.vmem [shape: f32[1,8], index: 2, kind: input, shape index: {}]   ;;  %s233_s3 = inlined_call_operand.vmem [shape: bf16[8,32], index: 3, kind: input, shape index: {}]   ;;  %s234_s4 = inlined_call_operand.vmem [shape: f32[1,32], index: 4, kind: input, shape index: {}]   ;;  %s235_s5 = inlined_call_operand.vmem [shape: bf16[8,8], index: 5, kind: output, shape index: {0}]   ;;  %s236_s6 = inlined_call_operand.vmem [shape: f32[1,1,8], index: 6, kind: output, shape index: {1}]  }
   0x1   :  { %v162_v0 = vld [vmem:[%s230_s1] sm:$0xff]  ;;  %v91_v19 = vlaneseq  ;;  %v166_v36 = vmov 0.0   ;;  %vm144_vm7 = vcmask 60416   ;;  %vm141_vm8 = vcmask 57344  }
   0x2   :  { %47 = vmatpush.bf16.msra.mxu0 %v162_v0  ;;  %v23_v1 = vld [vmem:[%s231_s0] sm:$0xf] }
   0x3   :  { %v53_v2 = vld [vmem:[%s233_s3] sm:$0xf]  ;;  %v92_v20 = vand.u32 127, %v91_v19 }
   0x4   :  { %v65_v3 = vsel %vm63_vm1, %v53_v2, 0  ;;  %v164_v4 = vld [vmem:[%s232_s2] ss:$0 sm:$0xff]  ;;  %v117_v30 = vsel %vm87_vm3, %v53_v2, 0 }
   0x5   :  { %158 = vmatmul.msk.bf16.vlgmr.msra.gmra.mxu0 %vm36_vm0, %v23_v1  ;;  %74 = vmatpush.bf16.msra.mxu1 %v65_v3  ;;  %v165_v13 = vld [vmem:[%s234_s4] ss:$0 sm:$0xff] }
   0x6   :  { %126 = vmatpush.bf16.xpose.msra.mxu2 %v117_v30 }
  0x82   :  { %v49_v5 = vpop.f32.mrf.mxu0 }
  0x83   :  { %v50_v6 = vadd.f32 %v164_v4, %v49_v5 }
  0x85   :  { %v59_v7 = vpack.c.bf16 %v50_v6, %v50_v6  ;;  %v54_v8 = vmul.f32 %v50_v6, %v50_v6 }
  0x87   :  { %159 = vmatmul.msk.bf16.vlgmr.msra.gmra.mxu1 %vm55_vm2, %v59_v7  ;;  %v56_v9 = vsel %vm55_vm2, %v54_v8, 0.0 }
  0x88   :  { %57 = vadd.xlane.f32.xlu0 %v56_v9 }
  0x8a   :  { %v51_v10 = vpop.f32.mrf.mxu0 }
  0xfb   :  { %v58_v14 = vpop.xlane.xlu0 %57 }
 0x104   :  { %v76_v11 = vpop.f32.mrf.mxu1 }
 0x105   :  { %v80_v12 = vmul.f32 2.0, %v76_v11 }
 0x107   :  { %v81_v15 = vsub.f32 %v58_v14, %v80_v12 }
 0x109   :  { %v86_v16 = vadd.f32 %v165_v13, %v81_v15 }
 0x10b   :  { %v88_v17 = vsel %vm87_vm3, %v86_v16, inf }
 0x10c   :  { %v78_v18 = vpop.f32.mrf.mxu1  ;;  %89 = vmin.xlane.f32.xlu0 %v88_v17 }
 0x17f   :  { %v90_v21 = vpop.xlane.xlu0 %89 }
 0x180   :  { %vm93_vm4 = vcmp.eq.f32.partialorder %v86_v16, %v90_v21 }
 0x181   :  { %v94_v22 = vsel %vm93_vm4, %v92_v20, 32 }
 0x182   :  { %v95_v23 = vsel %vm87_vm3, %v94_v22, 2147483647 }
 0x183   :  { %v97_v24 = vshra.s32 %v95_v23, 16  ;;  %v96_v26 = vand.u32 65535, %v95_v23 }
 0x185   :  { %v99_v25 = vcvt.s32.f32 %v97_v24  ;;  %v98_v28 = vcvt.s32.f32 %v96_v26 }
 0x187   :  { %100 = vmin.xlane.f32.xlu1 %v99_v25 }
 0x1fa   :  { %v101_v27 = vpop.xlane.xlu1 %100 }
 0x1fb   :  { %vm102_vm5 = vcmp.eq.f32.partialorder %v99_v25, %v101_v27  ;;  %v107_v31 = vcvt.f32.s32 %v101_v27 }
 0x1fc   :  { %v103_v29 = vsel %vm102_vm5, %v98_v28, inf }
 0x1fd   :  { %104 = vmin.xlane.f32.xlu1 %v103_v29  ;;  %v108_v33 = vshll.u32 %v107_v31, 16 }
 0x270   :  { %v105_v32 = vpop.xlane.xlu1 %104 }
 0x271   :  { %v106_v34 = vcvt.f32.s32 %v105_v32 }
 0x273   :  { %v109_v35 = vadd.s32 %v108_v33, %v106_v34 }
 0x275   :  { %vm110_vm6 = vcmp.eq.s32.totalorder %v92_v20, %v109_v35 }
 0x276   :  { %v160_v37 = vsel %vm110_vm6, 1.0, %v166_v36 }
 0x277   :  { %v113_v38 = vpack.c.bf16 %v160_v37, %v160_v37 }
 0x279   :  { %161 = vmatmul.msk.bf16.vlgmr.msra.gmra.mxu2 %vm87_vm3, %v113_v38 }
 0x2fc   :  { %v128_v39 = vpop.f32.mrf.mxu2 }
 0x2fd   :  { %v132_v40 = vsub.f32 %v128_v39, %v50_v6  ;;  %v143_v41 = vpack.c.bf16 %v128_v39, %v128_v39 }
 0x2ff   :  { %v133_v42 = vmul.f32 %v132_v40, %v132_v40  ;;  %145 = vst.msk [vmem:[%s235_s5] sm:$0xf] %vm144_vm7, %v143_v41 }
 0x301   :  { %v134_v43 = vsel %vm55_vm2, %v133_v42, 0.0 }
 0x302   :  { %v135_v44 = vrot.slane %v134_v43, 4 }
 0x304   :  { %v136_v45 = vadd.f32 %v135_v44, %v134_v43  ;;  %v130_v46 = vpop.f32.mrf.mxu2 }
 0x306   :  { %v137_v47 = vrot.slane %v136_v45, 2 }
 0x308   :  { %v138_v48 = vadd.f32 %v137_v47, %v136_v45 }
 0x30a   :  { %v139_v49 = vrot.slane %v138_v48, 1 }
 0x30c   :  { %v140_v50 = vadd.f32 %v139_v49, %v138_v48 }
 0x30e   :  { %142 = vst.msk [vmem:[%s236_s6] sm:$0x1] %vm141_vm8, %v140_v50 }

// kernel: vqvae_forward.39
= control target key start
LH: loop header
LB: loop body
LE: loop exit
PB: predicated region body
PF: predicated region fallthrough
CT: control target
= control target key end

     0   :  { %vm66_vm0 = vcmask 1043456   ;;  %vm62_vm1 = vcmask 588800   ;;  %vm83_vm2 = vcmask 64512   ;;  %vm145_vm10 = vcmask 60416   ;;  %s241_s1 = inlined_call_operand.vmem [shape: bf16[72,8], index: 1, kind: input, shape index: {}]   ;;  %s242_s2 = inlined_call_operand.vmem [shape: f32[1,8], index: 2, kind: input, shape index: {}]   ;;  %s243_s4 = inlined_call_operand.vmem [shape: f32[1,8], index: 4, kind: input, shape index: {}]   ;;  %s244_s0 = inlined_call_operand.vmem [shape: bf16[8,72], index: 0, kind: input, shape index: {}]   ;;  %s245_s3 = inlined_call_operand.vmem [shape: f32[1,8], index: 3, kind: input, shape index: {}]   ;;  %s246_s5 = inlined_call_operand.vmem [shape: bf16[8,8], index: 5, kind: output, shape index: {}]  }
   0x1   :  { %v30_v0 = vld [vmem:[%s241_s1 + $0x20] sm:$0xf]  ;;  %v172_v4 = vld [vmem:[%s241_s1 + $0x18] sm:$0xff]  ;;  %v171_v5 = vld [vmem:[%s241_s1 + $0x10] sm:$0xff] }
   0x2   :  { %v52_v1 = vunpack.c.l.b16 %v30_v0  ;;  %v170_v6 = vld [vmem:[%s241_s1 + $0x8] sm:$0xff]  ;;  %v169_v7 = vld [vmem:[%s241_s1] sm:$0xff] }
   0x3   :  { %v21_v8 = vld [vmem:[%s244_s0] sm:$0xf] }
   0x4   :  { %v57_v2 = vpack.c.b16 %v52_v1, %v52_v1  ;;  %v173_v9 = vld [vmem:[%s242_s2] ss:$0 sm:$0xff] }
   0x5   :  { %v102_v37 = vld [vmem:[%s245_s3] sm:$0x1] }
   0x6   :  { %v68_v3 = vsel %vm66_vm0, %v57_v2, 0  ;;  %v174_v42 = vld [vmem:[%s243_s4] ss:$0 sm:$0xff] }
   0x7   :  { %73 = vmatpush.bf16.msra.mxu0 %v68_v3 }
   0xb   :  { %74 = vmatpush.bf16.msra.mxu0 %v172_v4 }
   0xf   :  { %75 = vmatpush.bf16.msra.mxu0 %v171_v5 }
  0x13   :  { %76 = vmatpush.bf16.msra.mxu0 %v170_v6 }
  0x17   :  { %77 = vmatpush.bf16.msra.mxu0 %v169_v7 }
  0x1a   :  { %167 = vmatmul.msk.bf16.vlgmr.msra.gmra.mxu0 %vm62_vm1, %v21_v8 }
  0x97   :  { %v79_v10 = vpop.f32.mrf.mxu0 }
  0x98   :  { %v80_v11 = vadd.f32 %v173_v9, %v79_v10 }
  0x9a   :  { %v84_v12 = vsel %vm83_vm2, %v80_v11, 0.0 }
  0x9b   :  { %v85_v13 = vrot.slane %v84_v12, 4 }
  0x9d   :  { %v86_v14 = vadd.f32 %v85_v13, %v84_v12 }
  0x9f   :  { %v87_v15 = vrot.slane %v86_v14, 2  ;;  %v81_v16 = vpop.f32.mrf.mxu0 }
  0xa1   :  { %v88_v17 = vadd.f32 %v87_v15, %v86_v14 }
  0xa3   :  { %v89_v18 = vrot.slane %v88_v17, 1 }
  0xa5   :  { %v90_v19 = vadd.f32 %v89_v18, %v88_v17 }
  0xa7   :  { %v91_v20 = vmul.f32 0.125, %v90_v19 }
  0xa9   :  { %v92_v21 = vsub.f32 %v80_v11, %v91_v20 }
  0xab   :  { %v93_v22 = vmul.f32 %v92_v21, %v92_v21 }
  0xad   :  { %v94_v23 = vsel %vm83_vm2, %v93_v22, 0.0 }
  0xae   :  { %v95_v24 = vrot.slane %v94_v23, 4 }
  0xb0   :  { %v96_v25 = vadd.f32 %v95_v24, %v94_v23 }
  0xb2   :  { %v97_v26 = vrot.slane %v96_v25, 2 }
  0xb4   :  { %v98_v27 = vadd.f32 %v97_v26, %v96_v25 }
  0xb6   :  { %v99_v28 = vrot.slane %v98_v27, 1 }
  0xb8   :  { %v100_v29 = vadd.f32 %v99_v28, %v98_v27 }
  0xba   :  { %v101_v30 = vmul.f32 0.125, %v100_v29 }
  0xbc   :  { %v103_v31 = vadd.f32 1e-05, %v101_v30 }
  0xbe   :  { %175 = vrsqrt.f32 %v103_v31  ;;  %vm110_vm4 = vweird.f32 %v103_v31 }
  0xc4   :  { %v176_v32 = vpop.eup %175 }
  0xc5   :  { %v105_v33 = vmul.f32 %v176_v32, %v103_v31  ;;  %vm111_vm3 = vweird.f32 %v176_v32 }
  0xc6   :  { %vm112_vm5 = vmor %vm110_vm4, %vm111_vm3 }
  0xc7   :  { %v106_v34 = vmul.f32 %v176_v32, %v105_v33 }
  0xc9   :  { %v107_v35 = vmul.f32 0.5, %v106_v34 }
  0xcb   :  { %v108_v36 = vsub.f32 1.5, %v107_v35 }
  0xcd   :  { %v109_v38 = vmul.f32 %v176_v32, %v108_v36 }
  0xcf   :  { %v113_v39 = vsel %vm112_vm5, %v176_v32, %v109_v38 }
  0xd0   :  { %v114_v40 = vmul.f32 %v113_v39, %v102_v37 }
  0xd2   :  { %v116_v41 = vperm.slane %v114_v40, 0 }
  0xd4   :  { %v118_v43 = vmul.f32 %v116_v41, %v92_v21 }
  0xd6   :  { %v123_v44 = vadd.f32 %v174_v42, %v118_v43 }
  0xd8   :  { %v168_v45 = vmul.f32 -1.442695, %v123_v44 }
  0xda   :  { %177 = vpow2.f32 %v168_v45 }
  0xe0   :  { %v178_v46 = vpop.eup %177 }
  0xe1   :  { %v127_v47 = vadd.f32 1.0, %v178_v46 }
  0xe3   :  { %179 = vrcp.f32 %v127_v47  ;;  %v139_v51 = vand.u32 2147483648, %v127_v47  ;;  %v137_v53 = vand.u32 2147483647, %v127_v47  ;;  %vm133_vm7 = vweird.f32 %v127_v47 }
  0xe5   :  { %v140_v55 = vor.u32 1.1754944e-38, %v139_v51  ;;  %vm138_vm9 = vcmp.eq.f32.partialorder %v137_v53, 8.507059e+37 }
  0xe9   :  { %v180_v48 = vpop.eup %179 }
  0xea   :  { %v129_v49 = vmul.f32 %v180_v48, %v127_v47  ;;  %vm134_vm6 = vweird.f32 %v180_v48 }
  0xeb   :  { %vm135_vm8 = vmor %vm133_vm7, %vm134_vm6 }
  0xec   :  { %v130_v50 = vsub.f32 1.0, %v129_v49 }
  0xee   :  { %v131_v52 = vmul.f32 %v180_v48, %v130_v50 }
  0xf0   :  { %v132_v54 = vadd.f32 %v180_v48, %v131_v52 }
  0xf2   :  { %v136_v56 = vsel %vm135_vm8, %v180_v48, %v132_v54 }
  0xf3   :  { %v141_v57 = vsel %vm138_vm9, %v140_v55, %v136_v56 }
  0xf4   :  { %v143_v58 = vmul.f32 %v141_v57, %v123_v44 }
  0xf6   :  { %v144_v59 = vpack.c.bf16 %v143_v58, %v143_v58 }
  0xf8   :  { %146 = vst.msk [vmem:[%s246_s5] sm:$0xf] %vm145_vm10, %v144_v59 }

// kernel: vqvae_forward.45
= control target key start
LH: loop header
LB: loop body
LE: loop exit
PB: predicated region body
PF: predicated region fallthrough
CT: control target
= control target key end

     0   :  { %vm60_vm0 = vcmask 1043456   ;;  %vm56_vm1 = vcmask 588800   ;;  %vm78_vm2 = vcmask 257024   ;;  %s150_s1 = inlined_call_operand.vmem [shape: bf16[72,32], index: 1, kind: input, shape index: {}]   ;;  %s151_s2 = inlined_call_operand.vmem [shape: f32[1,32], index: 2, kind: input, shape index: {}]   ;;  %s152_s0 = inlined_call_operand.vmem [shape: bf16[8,72], index: 0, kind: input, shape index: {}]   ;;  %s153_s3 = inlined_call_operand.vmem [shape: bf16[8,32], index: 3, kind: output, shape index: {}]  }
   0x1   :  { %v24_v0 = vld [vmem:[%s150_s1 + $0x20] sm:$0xf]  ;;  %v104_v4 = vld [vmem:[%s150_s1 + $0x18] sm:$0xff]  ;;  %v103_v5 = vld [vmem:[%s150_s1 + $0x10] sm:$0xff] }
   0x2   :  { %v46_v1 = vunpack.c.l.b16 %v24_v0  ;;  %v102_v6 = vld [vmem:[%s150_s1 + $0x8] sm:$0xff]  ;;  %v101_v7 = vld [vmem:[%s150_s1] sm:$0xff] }
   0x3   :  { %v15_v8 = vld [vmem:[%s152_s0] sm:$0xf] }
   0x4   :  { %v51_v2 = vpack.c.b16 %v46_v1, %v46_v1  ;;  %v105_v9 = vld [vmem:[%s151_s2] ss:$0 sm:$0xff] }
   0x6   :  { %v62_v3 = vsel %vm60_vm0, %v51_v2, 0 }
   0x7   :  { %67 = vmatpush.bf16.msra.mxu0 %v62_v3 }
   0xb   :  { %68 = vmatpush.bf16.msra.mxu0 %v104_v4 }
   0xf   :  { %69 = vmatpush.bf16.msra.mxu0 %v103_v5 }
  0x13   :  { %70 = vmatpush.bf16.msra.mxu0 %v102_v6 }
  0x17   :  { %71 = vmatpush.bf16.msra.mxu0 %v101_v7 }
  0x1a   :  { %100 = vmatmul.msk.bf16.vlgmr.msra.gmra.mxu0 %vm56_vm1, %v15_v8 }
  0x97   :  { %v73_v10 = vpop.f32.mrf.mxu0 }
  0x98   :  { %v74_v11 = vadd.f32 %v105_v9, %v73_v10 }
  0x9a   :  { %v77_v12 = vpack.c.bf16 %v74_v11, %v74_v11 }
  0x9c   :  { %79 = vst.msk [vmem:[%s153_s3] sm:$0xf] %vm78_vm2, %v77_v12 }
  0x9f   :  { %v75_v13 = vpop.f32.mrf.mxu0 }

// kernel: vqvae_forward.40
= control target key start
LH: loop header
LB: loop body
LE: loop exit
PB: predicated region body
PF: predicated region fallthrough
CT: control target
= control target key end

     0   :  { %vm69_vm0 = vcmask 1043456   ;;  %vm65_vm1 = vcmask 588800   ;;  %vm86_vm2 = vcmask 64512   ;;  %vm151_vm10 = vcmask 60416   ;;  %s255_s1 = inlined_call_operand.vmem [shape: bf16[72,8], index: 1, kind: input, shape index: {}]   ;;  %s256_s2 = inlined_call_operand.vmem [shape: f32[1,8], index: 2, kind: input, shape index: {}]   ;;  %s257_s4 = inlined_call_operand.vmem [shape: f32[1,8], index: 4, kind: input, shape index: {}]   ;;  %s258_s0 = inlined_call_operand.vmem [shape: bf16[8,72], index: 0, kind: input, shape index: {}]   ;;  %s259_s3 = inlined_call_operand.vmem [shape: f32[1,8], index: 3, kind: input, shape index: {}]   ;;  %s260_s5 = inlined_call_operand.vmem [shape: bf16[8,8], index: 5, kind: input, shape index: {}]   ;;  %s261_s6 = inlined_call_operand.vmem [shape: bf16[8,8], index: 6, kind: output, shape index: {}]  }
   0x1   :  { %v33_v0 = vld [vmem:[%s255_s1 + $0x20] sm:$0xf]  ;;  %v178_v4 = vld [vmem:[%s255_s1 + $0x18] sm:$0xff]  ;;  %v177_v5 = vld [vmem:[%s255_s1 + $0x10] sm:$0xff] }
   0x2   :  { %v55_v1 = vunpack.c.l.b16 %v33_v0  ;;  %v176_v6 = vld [vmem:[%s255_s1 + $0x8] sm:$0xff]  ;;  %v175_v7 = vld [vmem:[%s255_s1] sm:$0xff] }
   0x3   :  { %v24_v8 = vld [vmem:[%s258_s0] sm:$0xf] }
   0x4   :  { %v60_v2 = vpack.c.b16 %v55_v1, %v55_v1  ;;  %v179_v9 = vld [vmem:[%s256_s2] ss:$0 sm:$0xff] }
   0x5   :  { %v105_v37 = vld [vmem:[%s259_s3] sm:$0x1] }
   0x6   :  { %v71_v3 = vsel %vm69_vm0, %v60_v2, 0  ;;  %v180_v42 = vld [vmem:[%s257_s4] ss:$0 sm:$0xff] }
   0x7   :  { %76 = vmatpush.bf16.msra.mxu0 %v71_v3  ;;  %v127_v54 = vld [vmem:[%s260_s5] sm:$0xf] }
   0x8   :  { %v128_v57 = vunpack.c.l.bf16 %v127_v54 }
   0xb   :  { %77 = vmatpush.bf16.msra.mxu0 %v178_v4 }
   0xf   :  { %78 = vmatpush.bf16.msra.mxu0 %v177_v5 }
  0x13   :  { %79 = vmatpush.bf16.msra.mxu0 %v176_v6 }
  0x17   :  { %80 = vmatpush.bf16.msra.mxu0 %v175_v7 }
  0x1a   :  { %173 = vmatmul.msk.bf16.vlgmr.msra.gmra.mxu0 %vm65_vm1, %v24_v8 }
  0x97   :  { %v82_v10 = vpop.f32.mrf.mxu0 }
  0x98   :  { %v83_v11 = vadd.f32 %v179_v9, %v82_v10 }
  0x9a   :  { %v87_v12 = vsel %vm86_vm2, %v83_v11, 0.0 }
  0x9b   :  { %v88_v13 = vrot.slane %v87_v12, 4 }
  0x9d   :  { %v89_v14 = vadd.f32 %v88_v13, %v87_v12 }
  0x9f   :  { %v90_v15 = vrot.slane %v89_v14, 2  ;;  %v84_v16 = vpop.f32.mrf.mxu0 }
  0xa1   :  { %v91_v17 = vadd.f32 %v90_v15, %v89_v14 }
  0xa3   :  { %v92_v18 = vrot.slane %v91_v17, 1 }
  0xa5   :  { %v93_v19 = vadd.f32 %v92_v18, %v91_v17 }
  0xa7   :  { %v94_v20 = vmul.f32 0.125, %v93_v19 }
  0xa9   :  { %v95_v21 = vsub.f32 %v83_v11, %v94_v20 }
  0xab   :  { %v96_v22 = vmul.f32 %v95_v21, %v95_v21 }
  0xad   :  { %v97_v23 = vsel %vm86_vm2, %v96_v22, 0.0 }
  0xae   :  { %v98_v24 = vrot.slane %v97_v23, 4 }
  0xb0   :  { %v99_v25 = vadd.f32 %v98_v24, %v97_v23 }
  0xb2   :  { %v100_v26 = vrot.slane %v99_v25, 2 }
  0xb4   :  { %v101_v27 = vadd.f32 %v100_v26, %v99_v25 }
  0xb6   :  { %v102_v28 = vrot.slane %v101_v27, 1 }
  0xb8   :  { %v103_v29 = vadd.f32 %v102_v28, %v101_v27 }
  0xba   :  { %v104_v30 = vmul.f32 0.125, %v103_v29 }
  0xbc   :  { %v106_v31 = vadd.f32 1e-05, %v104_v30 }
  0xbe   :  { %181 = vrsqrt.f32 %v106_v31  ;;  %vm113_vm4 = vweird.f32 %v106_v31 }
  0xc4   :  { %v182_v32 = vpop.eup %181 }
  0xc5   :  { %v108_v33 = vmul.f32 %v182_v32, %v106_v31  ;;  %vm114_vm3 = vweird.f32 %v182_v32 }
  0xc6   :  { %vm115_vm5 = vmor %vm113_vm4, %vm114_vm3 }
  0xc7   :  { %v109_v34 = vmul.f32 %v182_v32, %v108_v33 }
  0xc9   :  { %v110_v35 = vmul.f32 0.5, %v109_v34 }
  0xcb   :  { %v111_v36 = vsub.f32 1.5, %v110_v35 }
  0xcd   :  { %v112_v38 = vmul.f32 %v182_v32, %v111_v36 }
  0xcf   :  { %v116_v39 = vsel %vm115_vm5, %v182_v32, %v112_v38 }
  0xd0   :  { %v117_v40 = vmul.f32 %v116_v39, %v105_v37 }
  0xd2   :  { %v119_v41 = vperm.slane %v117_v40, 0 }
  0xd4   :  { %v121_v43 = vmul.f32 %v119_v41, %v95_v21 }
  0xd6   :  { %v126_v44 = vadd.f32 %v180_v42, %v121_v43 }
  0xd8   :  { %v174_v45 = vmul.f32 -1.442695, %v126_v44 }
  0xda   :  { %183 = vpow2.f32 %v174_v45 }
  0xe0   :  { %v184_v46 = vpop.eup %183 }
  0xe1   :  { %v132_v47 = vadd.f32 1.0, %v184_v46 }
  0xe3   :  { %185 = vrcp.f32 %v132_v47  ;;  %v144_v51 = vand.u32 2147483648, %v132_v47  ;;  %v142_v53 = vand.u32 2147483647, %v132_v47  ;;  %vm138_vm7 = vweird.f32 %v132_v47 }
  0xe5   :  { %v145_v56 = vor.u32 1.1754944e-38, %v144_v51  ;;  %vm143_vm9 = vcmp.eq.f32.partialorder %v142_v53, 8.507059e+37 }
  0xe9   :  { %v186_v48 = vpop.eup %185 }
  0xea   :  { %v134_v49 = vmul.f32 %v186_v48, %v132_v47  ;;  %vm139_vm6 = vweird.f32 %v186_v48 }
  0xeb   :  { %vm140_vm8 = vmor %vm138_vm7, %vm139_vm6 }
  0xec   :  { %v135_v50 = vsub.f32 1.0, %v134_v49 }
  0xee   :  { %v136_v52 = vmul.f32 %v186_v48, %v135_v50 }
  0xf0   :  { %v137_v55 = vadd.f32 %v186_v48, %v136_v52 }
  0xf2   :  { %v141_v58 = vsel %vm140_vm8, %v186_v48, %v137_v55 }
  0xf3   :  { %v146_v59 = vsel %vm143_vm9, %v145_v56, %v141_v58 }
  0xf4   :  { %v148_v60 = vmul.f32 %v146_v59, %v126_v44 }
  0xf6   :  { %v149_v61 = vadd.f32 %v148_v60, %v128_v57 }
  0xf8   :  { %v150_v62 = vpack.c.bf16 %v149_v61, %v149_v61 }
  0xfa   :  { %152 = vst.msk [vmem:[%s261_s6] sm:$0xf] %vm151_vm10, %v150_v62 }

// kernel: vqvae_forward.44
= control target key start
LH: loop header
LB: loop body
LE: loop exit
PB: predicated region body
PF: predicated region fallthrough
CT: control target
= control target key end

     0   :  { %vm60_vm0 = vcmask 1043456   ;;  %vm53_vm1 = vcmask 195584   ;;  %vm88_vm2 = vcmask 64512   ;;  %vm147_vm3 = vcmask 261120   ;;  %s478_s1 = inlined_call_operand.vmem [shape: bf16[24,8], index: 1, kind: input, shape index: {}]   ;;  %s479_s2 = inlined_call_operand.vmem [shape: f32[1,8], index: 2, kind: input, shape index: {}]   ;;  %s480_s0 = inlined_call_operand.vmem [shape: bf16[32,24], index: 0, kind: input, shape index: {}]   ;;  %s481_s3 = inlined_call_operand.vmem [shape: bf16[8,32], index: 3, kind: input, shape index: {}]   ;;  %s482_s4 = inlined_call_operand.vmem [shape: f32[1,32], index: 4, kind: input, shape index: {}]   ;;  %s483_s5 = inlined_call_operand.vmem [shape: bf16[32,8], index: 5, kind: output, shape index: {0}]   ;;  %s484_s6 = inlined_call_operand.vmem [shape: f32[1,1,8], index: 6, kind: output, shape index: {1}]  }
   0x1   :  { %v29_v0 = vld [vmem:[%s478_s1 + $0x8] sm:$0xf]  ;;  %v335_v4 = vld [vmem:[%s478_s1] sm:$0xff]  ;;  %v160_v53 = vlaneseq }
   0x2   :  { %v49_v1 = vunpack.c.l.b16 %v29_v0  ;;  %v333_v5 = vld [vmem:[%s480_s0] sm:$0xff]  ;;  %v334_v6 = vld [vmem:[%s480_s0 + $0x8] sm:$0xff] }
   0x3   :  { %v393_v7 = vld [vmem:[%s481_s3] sm:$0xf]  ;;  %v433_v54 = vand.u32 127, %v160_v53 }
   0x4   :  { %v51_v2 = vpack.c.b16 %v49_v1, %v49_v1  ;;  %v110_v8 = vsel %vm60_vm0, %v393_v7, 0  ;;  %v339_v9 = vld [vmem:[%s479_s2] ss:$0 sm:$0xff] }
   0x5   :  { %119 = vmatpush.bf16.msra.mxu1 %v110_v8  ;;  %v340_v31 = vld [vmem:[%s482_s4] ss:$0 sm:$0xff] }
   0x6   :  { %v62_v3 = vsel %vm60_vm0, %v51_v2, 0  ;;  %vm298_vm0 = vcmask 60416  }
   0x7   :  { %70 = vmatpush.bf16.msra.mxu0 %v62_v3  ;;  %336 = vmatpush.bf16.msra.mxu3 %v62_v3 }
   0xb   :  { %71 = vmatpush.bf16.msra.mxu0 %v335_v4  ;;  %337 = vmatpush.bf16.msra.mxu3 %v335_v4 }
   0xe   :  { %323 = vmatmul.msk.bf16.vlgmr.msra.gmra.mxu0 %vm53_vm1, %v333_v5  ;;  %324 = vmatmul.msk.bf16.vlgmr.msra.gmra.mxu3 %vm53_vm1, %v334_v6  ;;  %vm292_vm1 = vcmask 57344  }
  0x8b   :  { %v73_v10 = vpop.f32.mrf.mxu0 }
  0x8c   :  { %v400_v11 = vadd.f32 %v339_v9, %v73_v10 }
  0x8e   :  { %v84_v12 = vmul.f32 %v400_v11, %v400_v11 }
  0x90   :  { %v89_v13 = vsel %vm88_vm2, %v84_v12, 0.0 }
  0x91   :  { %90 = vadd.xlane.f32.xlu0 %v89_v13  ;;  %v78_v14 = vpop.f32.mrf.mxu3 }
  0x92   :  { %v405_v15 = vadd.f32 %v339_v9, %v78_v14 }
  0x93   :  { %v75_v16 = vpop.f32.mrf.mxu0 }
  0x94   :  { %v407_v17 = vadd.f32 %v339_v9, %v75_v16  ;;  %v86_v18 = vmul.f32 %v405_v15, %v405_v15 }
  0x96   :  { %v101_v19 = vpack.c.bf16 %v407_v17, %v400_v11  ;;  %v95_v20 = vsel %vm88_vm2, %v86_v18, 0.0  ;;  %v85_v21 = vmul.f32 %v407_v17, %v407_v17 }
  0x97   :  { %96 = vadd.xlane.f32.xlu1 %v95_v20 }
  0x98   :  { %325 = vmatmul.msk.bf16.vlgmr.msra.gmra.mxu1 %vm88_vm2, %v101_v19  ;;  %v92_v22 = vsel %vm88_vm2, %v85_v21, 0.0 }
  0x99   :  { %93 = vadd.xlane.f32.xlu0 %v92_v22  ;;  %v80_v23 = vpop.f32.mrf.mxu3 }
  0x9a   :  { %v418_v24 = vadd.f32 %v339_v9, %v80_v23 }
  0x9c   :  { %v87_v25 = vmul.f32 %v418_v24, %v418_v24  ;;  %v102_v27 = vpack.c.bf16 %v418_v24, %v405_v15 }
  0x9e   :  { %v98_v26 = vsel %vm88_vm2, %v87_v25, 0.0 }
  0x9f   :  { %99 = vadd.xlane.f32.xlu1 %v98_v26 }
  0xa8   :  { %326 = vmatmul.msk.bf16.gmra.mxu1 %vm88_vm2, %v102_v27 }
 0x104   :  { %v91_v28 = vpop.xlane.xlu0 %90 }
 0x10a   :  { %v97_v41 = vpop.xlane.xlu1 %96 }
 0x10c   :  { %v94_v37 = vpop.xlane.xlu0 %93 }
 0x112   :  { %v100_v49 = vpop.xlane.xlu1 %99 }
 0x115   :  { %v121_v29 = vpop.f32.mrf.mxu1 }
 0x116   :  { %v131_v30 = vmul.f32 2.0, %v121_v29 }
 0x118   :  { %v135_v32 = vsub.f32 %v91_v28, %v131_v30 }
 0x11a   :  { %v143_v33 = vadd.f32 %v340_v31, %v135_v32  ;;  %v250_v32 = vsel %vm147_vm3, %v393_v7, 0 }
 0x11b   :  { %259 = vmatpush.bf16.xpose.msra.mxu2 %v250_v32 }
 0x11c   :  { %v148_v34 = vsel %vm147_vm3, %v143_v33, inf }
 0x11d   :  { %v123_v35 = vpop.f32.mrf.mxu1  ;;  %149 = vmin.xlane.f32.xlu2 %v148_v34 }
 0x11e   :  { %v132_v36 = vmul.f32 2.0, %v123_v35 }
 0x120   :  { %v136_v38 = vsub.f32 %v94_v37, %v132_v36 }
 0x122   :  { %v144_v39 = vadd.f32 %v340_v31, %v136_v38 }
 0x124   :  { %v151_v40 = vsel %vm147_vm3, %v144_v39, inf }
 0x125   :  { %v126_v42 = vpop.f32.mrf.mxu1  ;;  %152 = vmin.xlane.f32.xlu2 %v151_v40 }
 0x126   :  { %v133_v43 = vmul.f32 2.0, %v126_v42 }
 0x128   :  { %v137_v44 = vsub.f32 %v97_v41, %v133_v43  ;;  %v341_v43 = vmov 0.0  }
 0x12a   :  { %v145_v45 = vadd.f32 %v340_v31, %v137_v44 }
 0x12c   :  { %v154_v46 = vsel %vm147_vm3, %v145_v45, inf }
 0x12d   :  { %v128_v47 = vpop.f32.mrf.mxu1  ;;  %155 = vmin.xlane.f32.xlu0 %v154_v46 }
 0x12e   :  { %v134_v48 = vmul.f32 2.0, %v128_v47 }
 0x130   :  { %v138_v50 = vsub.f32 %v100_v49, %v134_v48 }
 0x132   :  { %v146_v51 = vadd.f32 %v340_v31, %v138_v50 }
 0x134   :  { %v157_v52 = vsel %vm147_vm3, %v146_v51, inf }
 0x135   :  { %158 = vmin.xlane.f32.xlu1 %v157_v52 }
 0x190   :  { %v150_v55 = vpop.xlane.xlu2 %149 }
 0x191   :  { %vm162_vm4 = vcmp.eq.f32.partialorder %v143_v33, %v150_v55 }
 0x192   :  { %v166_v56 = vsel %vm162_vm4, %v433_v54, 32 }
 0x193   :  { %v170_v57 = vsel %vm147_vm3, %v166_v56, 2147483647 }
 0x194   :  { %v172_v58 = vshra.s32 %v170_v57, 16  ;;  %v171_v13 = vand.u32 65535, %v170_v57 }
 0x196   :  { %v174_v59 = vcvt.s32.f32 %v172_v58  ;;  %v173_v16 = vcvt.s32.f32 %v171_v13 }
 0x198   :  { %175 = vmin.xlane.f32.xlu2 %v174_v59  ;;  %v153_v60 = vpop.xlane.xlu2 %152 }
 0x199   :  { %vm163_vm5 = vcmp.eq.f32.partialorder %v144_v39, %v153_v60 }
 0x19a   :  { %v167_v61 = vsel %vm163_vm5, %v433_v54, 32 }
 0x19b   :  { %v185_v62 = vsel %vm147_vm3, %v167_v61, 2147483647 }
 0x19c   :  { %v187_v63 = vshra.s32 %v185_v62, 16  ;;  %v186_v19 = vand.u32 65535, %v185_v62 }
 0x19e   :  { %v189_v0 = vcvt.s32.f32 %v187_v63  ;;  %v188_v21 = vcvt.s32.f32 %v186_v19 }
 0x1a0   :  { %190 = vmin.xlane.f32.xlu0 %v189_v0  ;;  %v156_v1 = vpop.xlane.xlu0 %155 }
 0x1a1   :  { %vm164_vm6 = vcmp.eq.f32.partialorder %v145_v45, %v156_v1 }
 0x1a2   :  { %v168_v2 = vsel %vm164_vm6, %v433_v54, 32 }
 0x1a3   :  { %v200_v3 = vsel %vm147_vm3, %v168_v2, 2147483647 }
 0x1a4   :  { %v202_v4 = vshra.s32 %v200_v3, 16  ;;  %v201_v23 = vand.u32 65535, %v200_v3 }
 0x1a6   :  { %v204_v5 = vcvt.s32.f32 %v202_v4  ;;  %v203_v26 = vcvt.s32.f32 %v201_v23 }
 0x1a8   :  { %v159_v6 = vpop.xlane.xlu1 %158  ;;  %205 = vmin.xlane.f32.xlu1 %v204_v5 }
 0x1a9   :  { %vm165_vm7 = vcmp.eq.f32.partialorder %v146_v51, %v159_v6 }
 0x1aa   :  { %v169_v8 = vsel %vm165_vm7, %v433_v54, 32 }
 0x1ab   :  { %v215_v9 = vsel %vm147_vm3, %v169_v8, 2147483647 }
 0x1ac   :  { %v217_v10 = vshra.s32 %v215_v9, 16  ;;  %v216_v28 = vand.u32 65535, %v215_v9 }
 0x1ae   :  { %v219_v12 = vcvt.s32.f32 %v217_v10  ;;  %v218_v30 = vcvt.s32.f32 %v216_v28 }
 0x1b0   :  { %220 = vmin.xlane.f32.xlu2 %v219_v12 }
 0x20b   :  { %v176_v14 = vpop.xlane.xlu2 %175 }
 0x20c   :  { %vm177_vm8 = vcmp.eq.f32.partialorder %v174_v59, %v176_v14  ;;  %v182_v34 = vcvt.f32.s32 %v176_v14 }
 0x20d   :  { %v178_v18 = vsel %vm177_vm8, %v173_v16, inf }
 0x20e   :  { %179 = vmin.xlane.f32.xlu0 %v178_v18  ;;  %v183_v36 = vshll.u32 %v182_v34, 16 }
 0x213   :  { %v191_v20 = vpop.xlane.xlu0 %190 }
 0x214   :  { %vm192_vm9 = vcmp.eq.f32.partialorder %v189_v0, %v191_v20  ;;  %v197_v37 = vcvt.f32.s32 %v191_v20 }
 0x215   :  { %v193_v22 = vsel %vm192_vm9, %v188_v21, inf }
 0x216   :  { %194 = vmin.xlane.f32.xlu1 %v193_v22  ;;  %v198_v40 = vshll.u32 %v197_v37, 16 }
 0x21b   :  { %v206_v25 = vpop.xlane.xlu1 %205 }
 0x21c   :  { %vm207_vm10 = vcmp.eq.f32.partialorder %v204_v5, %v206_v25  ;;  %v212_v47 = vcvt.f32.s32 %v206_v25 }
 0x21d   :  { %v208_v27 = vsel %vm207_vm10, %v203_v26, inf }
 0x21e   :  { %209 = vmin.xlane.f32.xlu2 %v208_v27  ;;  %v213_v49 = vshll.u32 %v212_v47, 16 }
 0x223   :  { %v221_v29 = vpop.xlane.xlu2 %220 }
 0x224   :  { %vm222_vm11 = vcmp.eq.f32.partialorder %v219_v12, %v221_v29  ;;  %v227_v50 = vcvt.f32.s32 %v221_v29 }
 0x225   :  { %v223_v31 = vsel %vm222_vm11, %v218_v30, inf }
 0x226   :  { %224 = vmin.xlane.f32.xlu0 %v223_v31  ;;  %v228_v53 = vshll.u32 %v227_v50, 16 }
 0x281   :  { %v180_v33 = vpop.xlane.xlu0 %179 }
 0x282   :  { %v181_v35 = vcvt.f32.s32 %v180_v33 }
 0x284   :  { %v184_v38 = vadd.s32 %v183_v36, %v181_v35 }
 0x286   :  { %vm230_vm12 = vcmp.eq.s32.totalorder %v433_v54, %v184_v38 }
 0x287   :  { %v327_v45 = vsel %vm230_vm12, 1.0, %v341_v43 }
 0x289   :  { %v195_v39 = vpop.xlane.xlu1 %194 }
 0x28a   :  { %v196_v41 = vcvt.f32.s32 %v195_v39 }
 0x28c   :  { %v199_v42 = vadd.s32 %v198_v40, %v196_v41 }
 0x28e   :  { %vm231_vm13 = vcmp.eq.s32.totalorder %v433_v54, %v199_v42 }
 0x28f   :  { %v328_v44 = vsel %vm231_vm13, 1.0, %v341_v43 }
 0x290   :  { %v242_v46 = vpack.c.bf16 %v328_v44, %v327_v45 }
 0x291   :  { %v210_v7 = vpop.xlane.xlu2 %209 }
 0x292   :  { %331 = vmatmul.msk.bf16.vlgmr.msra.gmra.mxu2 %vm147_vm3, %v242_v46  ;;  %v211_v48 = vcvt.f32.s32 %v210_v7 }
 0x294   :  { %v214_v51 = vadd.s32 %v213_v49, %v211_v48 }
 0x296   :  { %vm232_vm14 = vcmp.eq.s32.totalorder %v433_v54, %v214_v51 }
 0x297   :  { %v329_v57 = vsel %vm232_vm14, 1.0, %v341_v43 }
 0x299   :  { %v225_v52 = vpop.xlane.xlu0 %224 }
 0x29a   :  { %v226_v55 = vcvt.f32.s32 %v225_v52 }
 0x29c   :  { %v229_v56 = vadd.s32 %v228_v53, %v226_v55 }
 0x29e   :  { %vm233_vm15 = vcmp.eq.s32.totalorder %v433_v54, %v229_v56 }
 0x29f   :  { %v330_v58 = vsel %vm233_vm15, 1.0, %v341_v43 }
 0x2a0   :  { %v243_v59 = vpack.c.bf16 %v330_v58, %v329_v57 }
 0x2a2   :  { %332 = vmatmul.msk.bf16.gmra.mxu2 %vm147_vm3, %v243_v59 }
 0x315   :  { %v261_v60 = vpop.f32.mrf.mxu2 }
 0x316   :  { %v294_v61 = vpack.c.bf16 %v261_v60, %v261_v60  ;;  %v271_v1 = vsub.f32 %v261_v60, %v400_v11 }
 0x318   :  { %299 = vst.msk [vmem:[%s483_s5] sm:$0xf] %vm298_vm0, %v294_v61  ;;  %v275_v5 = vmul.f32 %v271_v1, %v271_v1 }
 0x31a   :  { %v279_v10 = vsel %vm88_vm2, %v275_v5, 0.0 }
 0x31d   :  { %v263_v62 = vpop.f32.mrf.mxu2 }
 0x31e   :  { %v295_v63 = vpack.c.bf16 %v263_v62, %v263_v62  ;;  %v272_v54 = vsub.f32 %v263_v62, %v407_v17 }
 0x320   :  { %300 = vst.msk [vmem:[%s483_s5 + $0x4] sm:$0xf] %vm298_vm0, %v295_v63  ;;  %v276_v4 = vmul.f32 %v272_v54, %v272_v54 }
 0x322   :  { %v280_v8 = vsel %vm88_vm2, %v276_v4, 0.0 }
 0x325   :  { %v266_v0 = vpop.f32.mrf.mxu2 }
 0x326   :  { %v273_v2 = vsub.f32 %v266_v0, %v405_v15  ;;  %v296_v3 = vpack.c.bf16 %v266_v0, %v266_v0  ;;  %v281_v15 = vadd.f32 %v280_v8, %v279_v10 }
 0x328   :  { %301 = vst.msk [vmem:[%s483_s5 + $0x8] sm:$0xf] %vm298_vm0, %v296_v3  ;;  %v277_v6 = vmul.f32 %v273_v2, %v273_v2 }
 0x32a   :  { %v282_v17 = vsel %vm88_vm2, %v277_v6, 0.0 }
 0x32b   :  { %v283_v14 = vadd.f32 %v282_v17, %v281_v15 }
 0x32d   :  { %v268_v9 = vpop.f32.mrf.mxu2 }
 0x32e   :  { %v274_v11 = vsub.f32 %v268_v9, %v418_v24  ;;  %v297_v12 = vpack.c.bf16 %v268_v9, %v268_v9 }
 0x330   :  { %v278_v13 = vmul.f32 %v274_v11, %v274_v11  ;;  %302 = vst.msk [vmem:[%s483_s5 + $0xc] sm:$0xf] %vm298_vm0, %v297_v12 }
 0x332   :  { %v284_v16 = vsel %vm88_vm2, %v278_v13, 0.0 }
 0x333   :  { %v285_v18 = vadd.f32 %v284_v16, %v283_v14 }
 0x335   :  { %v286_v19 = vrot.slane %v285_v18, 4 }
 0x337   :  { %v287_v20 = vadd.f32 %v286_v19, %v285_v18 }
 0x339   :  { %v288_v21 = vrot.slane %v287_v20, 2 }
 0x33b   :  { %v289_v22 = vadd.f32 %v288_v21, %v287_v20 }
 0x33d   :  { %v290_v23 = vrot.slane %v289_v22, 1 }
 0x33f   :  { %v291_v25 = vadd.f32 %v290_v23, %v289_v22 }
 0x341   :  { %293 = vst.msk [vmem:[%s484_s6] sm:$0x1] %vm292_vm1, %v291_v25 }

// kernel: vqvae_forward.48
= control target key start
LH: loop header
LB: loop body
LE: loop exit
PB: predicated region body
PF: predicated region fallthrough
CT: control target
= control target key end

     0   :  { %vm113_vm0 = vcmask 130048   ;;  %vm162_vm1 = vcmask 519168   ;;  %s339_s1 = inlined_call_operand.vmem [shape: bf16[144,64], index: 1, kind: input, shape index: {}]   ;;  %s340_s0 = inlined_call_operand.vmem [shape: bf16[32,144], index: 0, kind: input, shape index: {}]   ;;  %s341_s2 = inlined_call_operand.vmem [shape: f32[1,64], index: 2, kind: input, shape index: {}]   ;;  %s342_s3 = inlined_call_operand.vmem [shape: bf16[32,64], index: 3, kind: output, shape index: {}]  }
   0x1   :  { %v236_v0 = vld [vmem:[%s339_s1 + $0x38] sm:$0xff]  ;;  %v237_v1 = vld [vmem:[%s339_s1 + $0x40] sm:$0xff]  ;;  %v235_v3 = vld [vmem:[%s339_s1 + $0x30] sm:$0xff] }
   0x2   :  { %v225_v2 = vld [vmem:[%s340_s0 + $0x4] sm:$0xf]  ;;  %120 = vmatpush.bf16.msra.mxu0 %v236_v0  ;;  %238 = vmatpush.bf16.msra.mxu2 %v236_v0  ;;  %v175_v4 = vld [vmem:[%s340_s0 + $0x8] sm:$0xf0]  ;;  %v232_v8 = vld [vmem:[%s339_s1 + $0x18] sm:$0xff] }
   0x3   :  { %146 = vmatpush.bf16.msra.mxu1 %v237_v1  ;;  %v178_v5 = vor.u32 %v225_v2, %v175_v4  ;;  %v234_v6 = vld [vmem:[%s339_s1 + $0x28] sm:$0xff]  ;;  %v233_v7 = vld [vmem:[%s339_s1 + $0x20] sm:$0xff]  ;;  %v227_v9 = vld [vmem:[%s340_s0 + $0x14] sm:$0xf] }
   0x4   :  { %v183_v10 = vld [vmem:[%s340_s0 + $0x18] sm:$0xf0]  ;;  %v231_v11 = vld [vmem:[%s339_s1 + $0x10] sm:$0xff]  ;;  %v230_v13 = vld [vmem:[%s339_s1 + $0x8] sm:$0xff] }
   0x5   :  { %v186_v12 = vor.u32 %v227_v9, %v183_v10  ;;  %v229_v14 = vld [vmem:[%s339_s1] sm:$0xff]  ;;  %v226_v16 = vld [vmem:[%s340_s0 + $0x4] sm:$0xf0]  ;;  %v181_v17 = vld [vmem:[%s340_s0 + $0x10] sm:$0xf] }
   0x6   :  { %121 = vmatpush.bf16.msra.mxu0 %v235_v3  ;;  %239 = vmatpush.bf16.msra.mxu2 %v235_v3  ;;  %v173_v15 = vld [vmem:[%s340_s0] sm:$0xf]  ;;  %v228_v18 = vld [vmem:[%s340_s0 + $0x14] sm:$0xf0] }
   0x7   :  { %223 = vmatmul.msk.bf16.vlgmr.msra.gmra.mxu1 %vm113_vm0, %v178_v5  ;;  %v174_v19 = vor.u32 %v226_v16, %v173_v15  ;;  %v182_v20 = vor.u32 %v228_v18, %v181_v17  ;;  %v246_v23 = vld [vmem:[%s341_s2] ss:$0 sm:$0xff] }
   0xa   :  { %122 = vmatpush.bf16.msra.mxu0 %v234_v6  ;;  %240 = vmatpush.bf16.msra.mxu2 %v234_v6 }
   0xe   :  { %123 = vmatpush.bf16.msra.mxu0 %v233_v7  ;;  %241 = vmatpush.bf16.msra.mxu2 %v233_v7 }
  0x12   :  { %124 = vmatpush.bf16.msra.mxu0 %v232_v8  ;;  %242 = vmatpush.bf16.msra.mxu2 %v232_v8 }
  0x16   :  { %125 = vmatpush.bf16.msra.mxu0 %v231_v11  ;;  %243 = vmatpush.bf16.msra.mxu2 %v231_v11 }
  0x17   :  { %224 = vmatmul.msk.bf16.gmra.mxu1 %vm113_vm0, %v186_v12 }
  0x1a   :  { %126 = vmatpush.bf16.msra.mxu0 %v230_v13  ;;  %244 = vmatpush.bf16.msra.mxu2 %v230_v13 }
  0x1e   :  { %127 = vmatpush.bf16.msra.mxu0 %v229_v14  ;;  %245 = vmatpush.bf16.msra.mxu2 %v229_v14 }
  0x21   :  { %128 = vmatmul.bf16.vlgmr.msra.gmra.mxu0 %v174_v19  ;;  %133 = vmatmul.bf16.vlgmr.msra.gmra.mxu2 %v182_v20 }
  0x84   :  { %v148_v21 = vpop.f32.mrf.mxu1 }
  0x8c   :  { %v150_v22 = vpop.f32.mrf.mxu1 }
  0x94   :  { %v153_v28 = vpop.f32.mrf.mxu1 }
  0x9c   :  { %v155_v39 = vpop.f32.mrf.mxu1 }
  0x9e   :  { %v129_v24 = vpop.f32.mrf.mxu0 }
  0x9f   :  { %v130_v25 = vadd.f32 %v246_v23, %v129_v24 }
  0xa1   :  { %v149_v26 = vadd.f32 %v148_v21, %v130_v25 }
  0xa3   :  { %v158_v27 = vpack.c.bf16 %v149_v26, %v149_v26 }
  0xa4   :  { %v134_v29 = vpop.f32.mrf.mxu2 }
  0xa5   :  { %163 = vst.msk [vmem:[%s342_s3] sm:$0xf] %vm162_vm1, %v158_v27  ;;  %v135_v30 = vadd.f32 %v246_v23, %v134_v29 }
  0xa6   :  { %v131_v31 = vpop.f32.mrf.mxu0 }
  0xa7   :  { %v154_v32 = vadd.f32 %v153_v28, %v135_v30  ;;  %v132_v33 = vadd.f32 %v246_v23, %v131_v31 }
  0xa9   :  { %v160_v34 = vpack.c.bf16 %v154_v32, %v154_v32  ;;  %v151_v35 = vadd.f32 %v150_v22, %v132_v33 }
  0xab   :  { %165 = vst.msk [vmem:[%s342_s3 + $0x8] sm:$0xf] %vm162_vm1, %v160_v34  ;;  %v159_v36 = vpack.c.bf16 %v151_v35, %v151_v35 }
  0xac   :  { %v136_v37 = vpop.f32.mrf.mxu2 }
  0xad   :  { %164 = vst.msk [vmem:[%s342_s3 + $0x4] sm:$0xf] %vm162_vm1, %v159_v36  ;;  %v137_v38 = vadd.f32 %v246_v23, %v136_v37 }
  0xaf   :  { %v156_v40 = vadd.f32 %v155_v39, %v137_v38 }
  0xb1   :  { %v161_v41 = vpack.c.bf16 %v156_v40, %v156_v40 }
  0xb3   :  { %166 = vst.msk [vmem:[%s342_s3 + $0xc] sm:$0xf] %vm162_vm1, %v161_v41 }

// kernel: vqvae_forward.51
= control target key start
LH: loop header
LB: loop body
LE: loop exit
PB: predicated region body
PF: predicated region fallthrough
CT: control target
= control target key end

     0   :  { %vm179_vm0 = vcmask 130048   ;;  %vm318_vm1 = vcmask 93184   ;;  %s718_s1 = inlined_call_operand.vmem [shape: bf16[144,12], index: 1, kind: input, shape index: {}]   ;;  %s719_s0 = inlined_call_operand.vmem [shape: bf16[128,144], index: 0, kind: input, shape index: {}]   ;;  %s720_s2 = inlined_call_operand.vmem [shape: f32[1,12], index: 2, kind: input, shape index: {}]   ;;  %s721_s3 = inlined_call_operand.vmem [shape: bf16[128,12], index: 3, kind: output, shape index: {}]  }
   0x1   :  { %v470_v0 = vld [vmem:[%s718_s1 + $0x38] sm:$0xff]  ;;  %v471_v1 = vld [vmem:[%s718_s1 + $0x40] sm:$0xff]  ;;  %v343_v3 = vld [vmem:[%s719_s0 + $0x8] sm:$0xf0] }
   0x2   :  { %v447_v2 = vld [vmem:[%s719_s0 + $0x4] sm:$0xf]  ;;  %204 = vmatpush.bf16.msra.mxu0 %v470_v0  ;;  %472 = vmatpush.bf16.msra.mxu2 %v470_v0  ;;  %v469_v5 = vld [vmem:[%s718_s1 + $0x30] sm:$0xff]  ;;  %v468_v6 = vld [vmem:[%s718_s1 + $0x28] sm:$0xff] }
   0x3   :  { %v346_v4 = vor.u32 %v447_v2, %v343_v3  ;;  %260 = vmatpush.bf16.msra.mxu1 %v471_v1  ;;  %480 = vmatpush.bf16.msra.mxu3 %v471_v1  ;;  %v457_v7 = vld [vmem:[%s719_s0 + $0x54] sm:$0xf]  ;;  %v383_v8 = vld [vmem:[%s719_s0 + $0x58] sm:$0xf0]  ;;  %v467_v10 = vld [vmem:[%s718_s1 + $0x20] sm:$0xff] }
   0x4   :  { %v386_v9 = vor.u32 %v457_v7, %v383_v8  ;;  %v466_v11 = vld [vmem:[%s718_s1 + $0x18] sm:$0xff]  ;;  %v449_v12 = vld [vmem:[%s719_s0 + $0x14] sm:$0xf]  ;;  %v464_v16 = vld [vmem:[%s718_s1 + $0x8] sm:$0xff] }
   0x5   :  { %v351_v13 = vld [vmem:[%s719_s0 + $0x18] sm:$0xf0]  ;;  %v465_v15 = vld [vmem:[%s718_s1 + $0x10] sm:$0xff]  ;;  %v459_v17 = vld [vmem:[%s719_s0 + $0x64] sm:$0xf] }
   0x6   :  { %439 = vmatmul.msk.bf16.vlgmr.msra.gmra.mxu1 %vm179_vm0, %v346_v4  ;;  %205 = vmatpush.bf16.msra.mxu0 %v469_v5  ;;  %v354_v14 = vor.u32 %v449_v12, %v351_v13  ;;  %v391_v18 = vld [vmem:[%s719_s0 + $0x68] sm:$0xf0]  ;;  %v463_v20 = vld [vmem:[%s718_s1] sm:$0xff]  ;;  %v448_v22 = vld [vmem:[%s719_s0 + $0x4] sm:$0xf0] }
   0x7   :  { %473 = vmatpush.bf16.msra.mxu2 %v469_v5  ;;  %444 = vmatmul.msk.bf16.vlgmr.msra.gmra.mxu3 %vm179_vm0, %v386_v9  ;;  %v394_v19 = vor.u32 %v459_v17, %v391_v18  ;;  %v341_v21 = vld [vmem:[%s719_s0] sm:$0xf]  ;;  %v456_v24 = vld [vmem:[%s719_s0 + $0x44] sm:$0xf0]  ;;  %v451_v27 = vld [vmem:[%s719_s0 + $0x24] sm:$0xf] }
   0x8   :  { %v373_v23 = vld [vmem:[%s719_s0 + $0x40] sm:$0xf]  ;;  %v342_v25 = vor.u32 %v448_v22, %v341_v21  ;;  %v359_v28 = vld [vmem:[%s719_s0 + $0x28] sm:$0xf0]  ;;  %v461_v30 = vld [vmem:[%s719_s0 + $0x74] sm:$0xf] }
   0x9   :  { %v374_v26 = vor.u32 %v456_v24, %v373_v23  ;;  %v362_v29 = vor.u32 %v451_v27, %v359_v28  ;;  %v399_v31 = vld [vmem:[%s719_s0 + $0x78] sm:$0xf0]  ;;  %v349_v33 = vld [vmem:[%s719_s0 + $0x10] sm:$0xf]  ;;  %v450_v34 = vld [vmem:[%s719_s0 + $0x14] sm:$0xf0] }
   0xa   :  { %206 = vmatpush.bf16.msra.mxu0 %v468_v6  ;;  %v402_v32 = vor.u32 %v461_v30, %v399_v31  ;;  %v381_v35 = vld [vmem:[%s719_s0 + $0x50] sm:$0xf]  ;;  %v458_v36 = vld [vmem:[%s719_s0 + $0x54] sm:$0xf0]  ;;  %v350_v37 = vor.u32 %v450_v34, %v349_v33  ;;  %v453_v39 = vld [vmem:[%s719_s0 + $0x34] sm:$0xf] }
   0xb   :  { %474 = vmatpush.bf16.msra.mxu2 %v468_v6  ;;  %v382_v38 = vor.u32 %v458_v36, %v381_v35  ;;  %v367_v40 = vld [vmem:[%s719_s0 + $0x38] sm:$0xf0]  ;;  %v357_v42 = vld [vmem:[%s719_s0 + $0x20] sm:$0xf]  ;;  %v452_v43 = vld [vmem:[%s719_s0 + $0x24] sm:$0xf0] }
   0xc   :  { %v370_v41 = vor.u32 %v453_v39, %v367_v40  ;;  %v389_v44 = vld [vmem:[%s719_s0 + $0x60] sm:$0xf]  ;;  %v460_v45 = vld [vmem:[%s719_s0 + $0x64] sm:$0xf0]  ;;  %v358_v46 = vor.u32 %v452_v43, %v357_v42  ;;  %v455_v48 = vld [vmem:[%s719_s0 + $0x44] sm:$0xf] }
   0xd   :  { %v390_v47 = vor.u32 %v460_v45, %v389_v44  ;;  %v375_v49 = vld [vmem:[%s719_s0 + $0x48] sm:$0xf0]  ;;  %v365_v51 = vld [vmem:[%s719_s0 + $0x30] sm:$0xf]  ;;  %v454_v52 = vld [vmem:[%s719_s0 + $0x34] sm:$0xf0] }
   0xe   :  { %207 = vmatpush.bf16.msra.mxu0 %v467_v10  ;;  %v378_v50 = vor.u32 %v455_v48, %v375_v49  ;;  %v397_v53 = vld [vmem:[%s719_s0 + $0x70] sm:$0xf]  ;;  %v462_v54 = vld [vmem:[%s719_s0 + $0x74] sm:$0xf0]  ;;  %v366_v55 = vor.u32 %v454_v52, %v365_v51  ;;  %v636_v61 = vld [vmem:[%s720_s2] ss:$0 sm:$0xff] }
   0xf   :  { %475 = vmatpush.bf16.msra.mxu2 %v467_v10  ;;  %v398_v56 = vor.u32 %v462_v54, %v397_v53 }
  0x12   :  { %208 = vmatpush.bf16.msra.mxu0 %v466_v11 }
  0x13   :  { %476 = vmatpush.bf16.msra.mxu2 %v466_v11 }
  0x16   :  { %440 = vmatmul.msk.bf16.gmra.mxu1 %vm179_vm0, %v354_v14  ;;  %209 = vmatpush.bf16.msra.mxu0 %v465_v15 }
  0x17   :  { %477 = vmatpush.bf16.msra.mxu2 %v465_v15  ;;  %445 = vmatmul.msk.bf16.gmra.mxu3 %vm179_vm0, %v394_v19 }
  0x1a   :  { %210 = vmatpush.bf16.msra.mxu0 %v464_v16 }
  0x1b   :  { %478 = vmatpush.bf16.msra.mxu2 %v464_v16 }
  0x1e   :  { %211 = vmatpush.bf16.msra.mxu0 %v463_v20 }
  0x1f   :  { %479 = vmatpush.bf16.msra.mxu2 %v463_v20 }
  0x21   :  { %212 = vmatmul.bf16.vlgmr.msra.gmra.mxu0 %v342_v25 }
  0x22   :  { %232 = vmatmul.bf16.vlgmr.msra.gmra.mxu2 %v374_v26 }
  0x26   :  { %441 = vmatmul.msk.bf16.gmra.mxu1 %vm179_vm0, %v362_v29 }
  0x27   :  { %446 = vmatmul.msk.bf16.gmra.mxu3 %vm179_vm0, %v402_v32 }
  0x31   :  { %217 = vmatmul.bf16.gmra.mxu0 %v350_v37 }
  0x32   :  { %237 = vmatmul.bf16.gmra.mxu2 %v382_v38 }
  0x36   :  { %442 = vmatmul.msk.bf16.gmra.mxu1 %vm179_vm0, %v370_v41 }
  0x41   :  { %222 = vmatmul.bf16.gmra.mxu0 %v358_v46 }
  0x42   :  { %242 = vmatmul.bf16.gmra.mxu2 %v390_v47 }
  0x46   :  { %443 = vmatmul.msk.bf16.gmra.mxu1 %vm179_vm0, %v378_v50 }
  0x51   :  { %227 = vmatmul.bf16.gmra.mxu0 %v366_v55 }
  0x52   :  { %247 = vmatmul.bf16.gmra.mxu2 %v398_v56 }
  0x83   :  { %v262_v57 = vpop.f32.mrf.mxu1 }
  0x8a   :  { %v287_v10 = vpop.f32.mrf.mxu3 }
  0x8b   :  { %v264_v58 = vpop.f32.mrf.mxu1 }
  0x92   :  { %v289_v20 = vpop.f32.mrf.mxu3 }
  0x93   :  { %v267_v59 = vpop.f32.mrf.mxu1 }
  0x9a   :  { %v292_v32 = vpop.f32.mrf.mxu3 }
  0x9b   :  { %v269_v60 = vpop.f32.mrf.mxu1 }
  0x9e   :  { %v213_v62 = vpop.f32.mrf.mxu0 }
  0x9f   :  { %v214_v63 = vadd.f32 %v636_v61, %v213_v62 }
  0xa1   :  { %v263_v0 = vadd.f32 %v262_v57, %v214_v63 }
  0xa2   :  { %v294_v48 = vpop.f32.mrf.mxu3 }
  0xa3   :  { %v302_v1 = vpack.c.bf16 %v263_v0, %v263_v0  ;;  %v272_v2 = vpop.f32.mrf.mxu1 }
  0xa5   :  { %319 = vst.msk [vmem:[%s721_s3] sm:$0xf] %vm318_vm1, %v302_v1  ;;  %v233_v3 = vpop.f32.mrf.mxu2 }
  0xa6   :  { %v215_v4 = vpop.f32.mrf.mxu0  ;;  %v234_v33 = vadd.f32 %v636_v61, %v233_v3 }
  0xa7   :  { %v216_v5 = vadd.f32 %v636_v61, %v215_v4 }
  0xa9   :  { %v265_v6 = vadd.f32 %v264_v58, %v216_v5 }
  0xab   :  { %v303_v7 = vpack.c.bf16 %v265_v6, %v265_v6  ;;  %v274_v8 = vpop.f32.mrf.mxu1 }
  0xad   :  { %320 = vst.msk [vmem:[%s721_s3 + $0x4] sm:$0xf] %vm318_vm1, %v303_v7  ;;  %v235_v9 = vpop.f32.mrf.mxu2 }
  0xae   :  { %v218_v11 = vpop.f32.mrf.mxu0  ;;  %v236_v45 = vadd.f32 %v636_v61, %v235_v9 }
  0xaf   :  { %v219_v12 = vadd.f32 %v636_v61, %v218_v11 }
  0xb1   :  { %v268_v13 = vadd.f32 %v267_v59, %v219_v12 }
  0xb3   :  { %v304_v14 = vpack.c.bf16 %v268_v13, %v268_v13  ;;  %v277_v15 = vpop.f32.mrf.mxu1 }
  0xb5   :  { %321 = vst.msk [vmem:[%s721_s3 + $0x8] sm:$0xf] %vm318_vm1, %v304_v14  ;;  %v238_v16 = vpop.f32.mrf.mxu2 }
  0xb6   :  { %v239_v17 = vadd.f32 %v636_v61, %v238_v16  ;;  %v220_v18 = vpop.f32.mrf.mxu0 }
  0xb7   :  { %v221_v19 = vadd.f32 %v636_v61, %v220_v18 }
  0xb8   :  { %v288_v21 = vadd.f32 %v287_v10, %v239_v17 }
  0xb9   :  { %v270_v22 = vadd.f32 %v269_v60, %v221_v19  ;;  %v297_v60 = vpop.f32.mrf.mxu3 }
  0xba   :  { %v312_v23 = vpack.c.bf16 %v288_v21, %v288_v21 }
  0xbb   :  { %v305_v24 = vpack.c.bf16 %v270_v22, %v270_v22  ;;  %v279_v25 = vpop.f32.mrf.mxu1 }
  0xbc   :  { %329 = vst.msk [vmem:[%s721_s3 + $0x28] sm:$0xf] %vm318_vm1, %v312_v23 }
  0xbd   :  { %322 = vst.msk [vmem:[%s721_s3 + $0xc] sm:$0xf] %vm318_vm1, %v305_v24  ;;  %v240_v26 = vpop.f32.mrf.mxu2 }
  0xbe   :  { %v241_v27 = vadd.f32 %v636_v61, %v240_v26  ;;  %v223_v28 = vpop.f32.mrf.mxu0 }
  0xbf   :  { %v224_v29 = vadd.f32 %v636_v61, %v223_v28 }
  0xc0   :  { %v290_v30 = vadd.f32 %v289_v20, %v241_v27 }
  0xc1   :  { %v273_v31 = vadd.f32 %v272_v2, %v224_v29 }
  0xc2   :  { %v313_v34 = vpack.c.bf16 %v290_v30, %v290_v30 }
  0xc3   :  { %v306_v35 = vpack.c.bf16 %v273_v31, %v273_v31  ;;  %v282_v36 = vpop.f32.mrf.mxu1 }
  0xc4   :  { %330 = vst.msk [vmem:[%s721_s3 + $0x2c] sm:$0xf] %vm318_vm1, %v313_v34  ;;  %v283_v37 = vadd.f32 %v282_v36, %v234_v33 }
  0xc5   :  { %323 = vst.msk [vmem:[%s721_s3 + $0x10] sm:$0xf] %vm318_vm1, %v306_v35  ;;  %v243_v38 = vpop.f32.mrf.mxu2 }
  0xc6   :  { %v310_v39 = vpack.c.bf16 %v283_v37, %v283_v37  ;;  %v244_v40 = vadd.f32 %v636_v61, %v243_v38  ;;  %v225_v41 = vpop.f32.mrf.mxu0 }
  0xc7   :  { %v226_v42 = vadd.f32 %v636_v61, %v225_v41 }
  0xc8   :  { %327 = vst.msk [vmem:[%s721_s3 + $0x20] sm:$0xf] %vm318_vm1, %v310_v39  ;;  %v293_v43 = vadd.f32 %v292_v32, %v244_v40 }
  0xc9   :  { %v275_v44 = vadd.f32 %v274_v8, %v226_v42  ;;  %v299_v8 = vpop.f32.mrf.mxu3 }
  0xca   :  { %v314_v46 = vpack.c.bf16 %v293_v43, %v293_v43 }
  0xcb   :  { %v307_v47 = vpack.c.bf16 %v275_v44, %v275_v44  ;;  %v284_v49 = vpop.f32.mrf.mxu1 }
  0xcc   :  { %331 = vst.msk [vmem:[%s721_s3 + $0x30] sm:$0xf] %vm318_vm1, %v314_v46  ;;  %v285_v50 = vadd.f32 %v284_v49, %v236_v45 }
  0xcd   :  { %324 = vst.msk [vmem:[%s721_s3 + $0x14] sm:$0xf] %vm318_vm1, %v307_v47  ;;  %v245_v51 = vpop.f32.mrf.mxu2 }
  0xce   :  { %v311_v52 = vpack.c.bf16 %v285_v50, %v285_v50  ;;  %v246_v53 = vadd.f32 %v636_v61, %v245_v51  ;;  %v228_v54 = vpop.f32.mrf.mxu0 }
  0xcf   :  { %v229_v55 = vadd.f32 %v636_v61, %v228_v54 }
  0xd0   :  { %328 = vst.msk [vmem:[%s721_s3 + $0x24] sm:$0xf] %vm318_vm1, %v311_v52  ;;  %v295_v56 = vadd.f32 %v294_v48, %v246_v53 }
  0xd1   :  { %v278_v57 = vadd.f32 %v277_v15, %v229_v55 }
  0xd2   :  { %v315_v58 = vpack.c.bf16 %v295_v56, %v295_v56 }
  0xd3   :  { %v308_v59 = vpack.c.bf16 %v278_v57, %v278_v57 }
  0xd4   :  { %332 = vst.msk [vmem:[%s721_s3 + $0x34] sm:$0xf] %vm318_vm1, %v315_v58 }
  0xd5   :  { %325 = vst.msk [vmem:[%s721_s3 + $0x18] sm:$0xf] %vm318_vm1, %v308_v59  ;;  %v248_v62 = vpop.f32.mrf.mxu2 }
  0xd6   :  { %v249_v63 = vadd.f32 %v636_v61, %v248_v62  ;;  %v230_v0 = vpop.f32.mrf.mxu0 }
  0xd7   :  { %v231_v1 = vadd.f32 %v636_v61, %v230_v0 }
  0xd8   :  { %v298_v2 = vadd.f32 %v297_v60, %v249_v63 }
  0xd9   :  { %v280_v3 = vadd.f32 %v279_v25, %v231_v1 }
  0xda   :  { %v316_v4 = vpack.c.bf16 %v298_v2, %v298_v2 }
  0xdb   :  { %v309_v5 = vpack.c.bf16 %v280_v3, %v280_v3 }
  0xdc   :  { %333 = vst.msk [vmem:[%s721_s3 + $0x38] sm:$0xf] %vm318_vm1, %v316_v4 }
  0xdd   :  { %326 = vst.msk [vmem:[%s721_s3 + $0x1c] sm:$0xf] %vm318_vm1, %v309_v5  ;;  %v250_v6 = vpop.f32.mrf.mxu2 }
  0xde   :  { %v251_v7 = vadd.f32 %v636_v61, %v250_v6 }
  0xe0   :  { %v300_v9 = vadd.f32 %v299_v8, %v251_v7 }
  0xe2   :  { %v317_v10 = vpack.c.bf16 %v300_v9, %v300_v9 }
  0xe4   :  { %334 = vst.msk [vmem:[%s721_s3 + $0x3c] sm:$0xf] %vm318_vm1, %v317_v10 }

</bundles_post_ra>
